<compile_context>
chip_gen: v5e
topology: v5e:2x2
jax: 0.10.0
libtpu: 0.0.40
codegen_flags: <defaults>
</compile_context>

<pallas_src>
import math

import jax
import jax.numpy as jnp
from jax.experimental import pallas as pl
from jax.experimental.pallas import tpu as pltpu

LANE = 128


def _round_up(n, m):
    return ((n + m - 1) // m) * m


def _pad_to(x, axis, target):
    pad = target - x.shape[axis]
    if pad == 0:
        return x
    widths = [(0, 0)] * x.ndim
    widths[axis] = (0, pad)
    return jnp.pad(x, widths)


# ----------------------------------------------------------------------------
# Kernel: one grid step = one batch tile, full depth loop inside.
# ----------------------------------------------------------------------------
def _make_kernel(depth, d_real):
    inv_d = 1.0 / float(d_real)   # LayerNorm stats over the REAL dim_input

    def mlp_kernel(noised_ref, times_ref, cond_ref,
                   sinw2_ref, phase_ref, tw_x_ref, tw_sincos_ref, tb_ref,
                   adaln_w_ref, gamma_w_ref, w1_ref, b1_ref, w2_ref, b2_ref,
                   out_ref):
        f32, bf16 = jnp.float32, jnp.bfloat16

        # ---- prologue (once per batch tile): time embedding + SiLU(cond) ---
        times = times_ref[...]                                     # (Bt, 1)
        # LearnedSinusoidalPosEmb: [sin(f), cos(f)] via one EUP sin
        # (cos(x) = sin(x + pi/2)); padded lanes stay exactly zero.
        freqs = times * sinw2_ref[...] * (2.0 * math.pi) + phase_ref[...]
        fourier = jnp.sin(freqs)                                   # (Bt, Fp)
        time_emb = (times * tw_x_ref[...]
                    + jnp.dot(fourier, tw_sincos_ref[...],
                              preferred_element_type=f32)
                    + tb_ref[...])                                 # (Bt, Cp)
        c = time_emb + cond_ref[...]
        cond = c * jax.nn.sigmoid(c)                               # SiLU, f32

        denoised = noised_ref[...]                                 # (Bt, Dp)

        # ---- depth residual blocks; all weights VMEM-resident.  Static
        # Python unroll keeps every weight access a zero-cost static slice.
        for k in range(depth):
            residual = denoised

            # LayerNorm (no affine), single-pass stats: var = E[x^2] - E[x]^2.
            # Padded lanes are zero, so sums over the padded row are exact.
            s1 = jnp.sum(denoised, axis=-1, keepdims=True)
            s2 = jnp.sum(denoised * denoised, axis=-1, keepdims=True)
            mean = s1 * inv_d
            var = s2 * inv_d - mean * mean
            normed = (denoised - mean) * jax.lax.rsqrt(var + 1e-5)

            # AdaptiveLayerNorm gamma (tiny matmul, kept f32)
            g_ada = jnp.dot(cond, adaln_w_ref[k], preferred_element_type=f32)
            x = normed * (g_ada + 1.0)

            # block: Linear -> SiLU -> Dropout(p=0, identity) -> Linear (bf16 MXU)
            h = jnp.dot(x.astype(bf16), w1_ref[k],
                        preferred_element_type=f32) + b1_ref[k]
            h = h * jax.nn.sigmoid(h)
            block_out = jnp.dot(h.astype(bf16), w2_ref[k],
                                preferred_element_type=f32) + b2_ref[k]

            # block_out_gamma (tiny matmul, f32)
            g_out = jnp.dot(cond, gamma_w_ref[k], preferred_element_type=f32)
            denoised = block_out * (g_out + 1.0) + residual

        out_ref[...] = denoised

    return mlp_kernel


# ----------------------------------------------------------------------------
# Wrapper
# ----------------------------------------------------------------------------
def mlp_forward(noised, times, cond, params, *, batch_tile=128, dropout=0.0):
    """noised: (B, dim_input) f32, times: (B,) f32, cond: (B, dim_cond) f32."""
    # TODO(synk): Dropout(p>0) would require in-kernel RNG; the module default
    # (and inference behaviour) is p=0.0 == identity.
    assert dropout == 0.0, "only Dropout(p=0.0) is supported by this kernel"

    f32, bf16 = jnp.float32, jnp.bfloat16
    B, D = noised.shape
    C = cond.shape[-1]
    half = params["sin_w"].shape[-1]
    Fdim = 2 * half
    depth, _, W = params["w1"].shape

    # Lane-dense padding of every feature dim (documented biggest lever).
    Dp, Wp, Cp, Fp = (_round_up(v, LANE) for v in (D, W, C, Fdim))

    Bt = min(batch_tile, B)
    assert B % Bt == 0 and Bt % 8 == 0, "batch must tile into multiples of 8"
    nb = B // Bt   # keep nb >= 2 so both v7x TensorCores get work

    times_col = times.reshape(B, 1).astype(f32)
    noised_p = _pad_to(noised.astype(f32), 1, Dp)
    cond_p = _pad_to(cond.astype(f32), 1, Cp)

    # --- fused / zero-padded parameters (constant-size; folds under jit) ---
    sinw2 = _pad_to(jnp.concatenate([params["sin_w"], params["sin_w"]], -1), 1, Fp)
    phase = _pad_to(jnp.concatenate(
        [jnp.zeros((1, half), f32), jnp.full((1, half), 0.5 * math.pi, f32)], -1), 1, Fp)
    tw_x = _pad_to(params["tw_x"], 1, Cp)
    tw_sincos = _pad_to(_pad_to(
        jnp.concatenate([params["tw_sin"], params["tw_cos"]], 0), 0, Fp), 1, Cp)
    tb = _pad_to(params["tb"], 1, Cp)
    adaln_w = _pad_to(_pad_to(params["adaln_w"], 1, Cp), 2, Dp)
    gamma_w = _pad_to(_pad_to(params["gamma_w"], 1, Cp), 2, Dp)
    w1 = _pad_to(_pad_to(params["w1"], 1, Dp), 2, Wp).astype(bf16)
    b1 = _pad_to(params["b1"], 2, Wp)
    w2 = _pad_to(_pad_to(params["w2"], 1, Wp), 2, Dp).astype(bf16)
    b2 = _pad_to(params["b2"], 2, Dp)

    inputs = (noised_p, times_col, cond_p,
              sinw2, phase, tw_x, tw_sincos, tb,
              adaln_w, gamma_w, w1, b1, w2, b2)

    # Batch-tiled activations; everything else constant-index (loaded once,
    # VMEM-resident -- padded weight footprint here is ~1 MiB, far under the
    # v7x 64 MiB budget).  At real model sizes, consider pipeline_mode =
    # pl.Buffered(1) on the constant-index specs to drop their second buffer.
    in_specs = [
        pl.BlockSpec((Bt, Dp), lambda b: (b, 0)),              # noised
        pl.BlockSpec((Bt, 1), lambda b: (b, 0)),               # times
        pl.BlockSpec((Bt, Cp), lambda b: (b, 0)),              # cond
        pl.BlockSpec((1, Fp), lambda b: (0, 0)),               # sinw2
        pl.BlockSpec((1, Fp), lambda b: (0, 0)),               # phase
        pl.BlockSpec((1, Cp), lambda b: (0, 0)),               # tw_x
        pl.BlockSpec((Fp, Cp), lambda b: (0, 0)),              # tw_sincos
        pl.BlockSpec((1, Cp), lambda b: (0, 0)),               # tb
        pl.BlockSpec((depth, Cp, Dp), lambda b: (0, 0, 0)),    # adaln_w (resident)
        pl.BlockSpec((depth, Cp, Dp), lambda b: (0, 0, 0)),    # gamma_w (resident)
        pl.BlockSpec((depth, Dp, Wp), lambda b: (0, 0, 0)),    # w1 (resident)
        pl.BlockSpec((depth, 1, Wp), lambda b: (0, 0, 0)),     # b1
        pl.BlockSpec((depth, Wp, Dp), lambda b: (0, 0, 0)),    # w2 (resident)
        pl.BlockSpec((depth, 1, Dp), lambda b: (0, 0, 0)),     # b2
    ]
    out_spec = pl.BlockSpec((Bt, Dp), lambda b: (b, 0))

    # advisory cost hint (weights counted once: they are resident, not
    # re-streamed per batch tile)
    flops = 2 * B * (Fp * Cp + depth * (2 * Cp * Dp + Dp * Wp + Wp * Dp))
    transcendentals = B * (Fp + Cp + depth * Wp)
    bytes_accessed = (sum(int(a.size) * a.dtype.itemsize for a in inputs)
                      + B * Dp * 4)

    out = pl.pallas_call(
        _make_kernel(depth, D),
        out_shape=jax.ShapeDtypeStruct((B, Dp), f32),
        grid=(nb,),
        in_specs=in_specs,
        out_specs=out_spec,
        compiler_params=pltpu.CompilerParams(
            dimension_semantics=("parallel",)),
        cost_estimate=pl.CostEstimate(flops=int(flops),
                                      transcendentals=int(transcendentals),
                                      bytes_accessed=int(bytes_accessed)),
    )(*inputs)
    return out[:, :D]


# ----------------------------------------------------------------------------
# Deterministic parameter construction (shapes follow MLP.__init__).
# NOTE: to_gamma / block_out_gamma are zero-init in the original module; here
# they get small random values so the gamma paths are actually exercised.
# ----------------------------------------------------------------------------
def make_params(key, dim_cond, dim_input, depth, width):
    ks = jax.random.split(key, 16)
    half = dim_cond // 2
    scale = 0.05

    sin_w = jax.random.normal(ks[0], (1, half), jnp.float32)
    # Linear(dim_cond+1 -> dim_cond): weight rows split for [x | sin | cos]
    tw_full = scale * jax.random.normal(ks[1], (dim_cond + 1, dim_cond), jnp.float32)
    tw_x = tw_full[0:1]                    # (1, C)
    tw_sin = tw_full[1:1 + half]           # (half, C)
    tw_cos = tw_full[1 + half:]            # (half, C)
    tb = scale * jax.random.normal(ks[2], (1, dim_cond), jnp.float32)

    adaln_w = scale * jax.random.normal(ks[3], (depth, dim_cond, dim_input), jnp.float32)
    w1 = scale * jax.random.normal(ks[4], (depth, dim_input, width), jnp.float32)
    b1 = scale * jax.random.normal(ks[5], (depth, 1, width), jnp.float32)
    w2 = scale * jax.random.normal(ks[6], (depth, width, dim_input), jnp.float32)
    b2 = scale * jax.random.normal(ks[7], (depth, 1, dim_input), jnp.float32)
    gamma_w = scale * jax.random.normal(ks[8], (depth, dim_cond, dim_input), jnp.float32)

    return dict(sin_w=sin_w, tw_x=tw_x, tw_sin=tw_sin, tw_cos=tw_cos, tb=tb,
                adaln_w=adaln_w, w1=w1, b1=b1, w2=w2, b2=b2, gamma_w=gamma_w)


# Pure-JAX f32 reference (mirrors the PyTorch forward) for correctness check.
def mlp_reference(noised, times, cond, p):
    B = noised.shape[0]
    t = times.reshape(B, 1)
    freqs = t * p["sin_w"] * (2.0 * math.pi)
    fourier = jnp.concatenate([t, jnp.sin(freqs), jnp.cos(freqs)], axis=-1)
    tw_full = jnp.concatenate([p["tw_x"], p["tw_sin"], p["tw_cos"]], axis=0)
    time_emb = fourier @ tw_full + p["tb"]
    c = time_emb + cond
    cond = c * jax.nn.sigmoid(c)
    den = noised
    depth = p["adaln_w"].shape[0]
    for k in range(depth):
        res = den
        mean = jnp.mean(den, axis=-1, keepdims=True)
        var = jnp.mean((den - mean) ** 2, axis=-1, keepdims=True)
        normed = (den - mean) / jnp.sqrt(var + 1e-5)
        x = normed * (cond @ p["adaln_w"][k] + 1.0)
        h = x @ p["w1"][k] + p["b1"][k]
        h = h * jax.nn.sigmoid(h)
        bo = h @ p["w2"][k] + p["b2"][k]
        den = bo * (cond @ p["gamma_w"][k] + 1.0) + res
    return den


if __name__ == "__main__":
    # B=256 with batch_tile=128 -> nb=2 (both v7x TensorCores get a tile);
    # feature dims stay small and are lane-padded inside the wrapper.
    B, dim_cond, dim_input, depth, width = 256, 32, 16, 3, 64

    key = jax.random.PRNGKey(0)
    k_noise, k_time, k_cond, k_param = jax.random.split(key, 4)
    noised = jax.random.normal(k_noise, (B, dim_input), jnp.float32)
    times = jax.random.uniform(k_time, (B,), jnp.float32)
    cond = jax.random.normal(k_cond, (B, dim_cond), jnp.float32)
    params = make_params(k_param, dim_cond, dim_input, depth, width)

    out = mlp_forward(noised, times, cond, params, batch_tile=128)
    out = jax.block_until_ready(out)

    ref = mlp_reference(noised, times, cond, params)
    assert out.shape == (B, dim_input)
    # bf16 operands in the large matmuls (f32 accumulation) -> loose tolerance
    assert jnp.allclose(out, ref, atol=2e-2, rtol=2e-2), "mismatch vs reference"

    print("KERNEL_OK")
</pallas_src>

<mosaic_0001>
module attributes {stable_mosaic.version = 11 : i64} {
  func.func @mlp_kernel(%arg0: i32, %arg1: memref<128x128xf32, #tpu.memory_space<vmem>>, %arg2: memref<128x1xf32, #tpu.memory_space<vmem>>, %arg3: memref<128x128xf32, #tpu.memory_space<vmem>>, %arg4: memref<1x128xf32, #tpu.memory_space<vmem>>, %arg5: memref<1x128xf32, #tpu.memory_space<vmem>>, %arg6: memref<1x128xf32, #tpu.memory_space<vmem>>, %arg7: memref<128x128xf32, #tpu.memory_space<vmem>>, %arg8: memref<1x128xf32, #tpu.memory_space<vmem>>, %arg9: memref<3x128x128xf32, #tpu.memory_space<vmem>>, %arg10: memref<3x128x128xf32, #tpu.memory_space<vmem>>, %arg11: memref<3x128x128xbf16, #tpu.memory_space<vmem>>, %arg12: memref<3x1x128xf32, #tpu.memory_space<vmem>>, %arg13: memref<3x128x128xbf16, #tpu.memory_space<vmem>>, %arg14: memref<3x1x128xf32, #tpu.memory_space<vmem>>, %arg15: memref<128x128xf32, #tpu.memory_space<vmem>>) attributes {dimension_semantics = [#tpu.dimension_semantics<parallel>], iteration_bounds = array<i64: 2>, scalar_prefetch = 0 : i64, scratch_operands = 0 : i64, tpu.core_type = #tpu.core_type<tc>, window_params = [{transform_indices = @transform_0, window_bounds = array<i64: 128, 128>}, {transform_indices = @transform_1, window_bounds = array<i64: 128, 1>}, {transform_indices = @transform_2, window_bounds = array<i64: 128, 128>}, {pipeline_mode = #tpu.pipeline_mode<synchronous>, transform_indices = @transform_3, window_bounds = array<i64: 1, 128>}, {pipeline_mode = #tpu.pipeline_mode<synchronous>, transform_indices = @transform_4, window_bounds = array<i64: 1, 128>}, {pipeline_mode = #tpu.pipeline_mode<synchronous>, transform_indices = @transform_5, window_bounds = array<i64: 1, 128>}, {pipeline_mode = #tpu.pipeline_mode<synchronous>, transform_indices = @transform_6, window_bounds = array<i64: 128, 128>}, {pipeline_mode = #tpu.pipeline_mode<synchronous>, transform_indices = @transform_7, window_bounds = array<i64: 1, 128>}, {pipeline_mode = #tpu.pipeline_mode<synchronous>, transform_indices = @transform_8, window_bounds = array<i64: 3, 128, 128>}, {pipeline_mode = #tpu.pipeline_mode<synchronous>, transform_indices = @transform_9, window_bounds = array<i64: 3, 128, 128>}, {pipeline_mode = #tpu.pipeline_mode<synchronous>, transform_indices = @transform_10, window_bounds = array<i64: 3, 128, 128>}, {pipeline_mode = #tpu.pipeline_mode<synchronous>, transform_indices = @transform_11, window_bounds = array<i64: 3, 1, 128>}, {pipeline_mode = #tpu.pipeline_mode<synchronous>, transform_indices = @transform_12, window_bounds = array<i64: 3, 128, 128>}, {pipeline_mode = #tpu.pipeline_mode<synchronous>, transform_indices = @transform_13, window_bounds = array<i64: 3, 1, 128>}, {transform_indices = @transform_14, window_bounds = array<i64: 128, 128>}]} {
    %c0 = arith.constant 0 : index
    %c0_0 = arith.constant 0 : index
    %0 = vector.load %arg2[%c0, %c0_0] : memref<128x1xf32, #tpu.memory_space<vmem>>, vector<128x1xf32>
    %c0_1 = arith.constant 0 : index
    %c0_2 = arith.constant 0 : index
    %1 = vector.load %arg4[%c0_1, %c0_2] : memref<1x128xf32, #tpu.memory_space<vmem>>, vector<1x128xf32>
    %2 = vector.broadcast %0 : vector<128x1xf32> to vector<128x128xf32>
    %3 = vector.broadcast %1 : vector<1x128xf32> to vector<128x128xf32>
    %4 = arith.mulf %2, %3 : vector<128x128xf32>
    %cst = arith.constant 6.28318548 : f32
    %5 = vector.broadcast %cst : f32 to vector<128x128xf32>
    %6 = arith.mulf %4, %5 : vector<128x128xf32>
    %c0_3 = arith.constant 0 : index
    %c0_4 = arith.constant 0 : index
    %7 = vector.load %arg5[%c0_3, %c0_4] : memref<1x128xf32, #tpu.memory_space<vmem>>, vector<1x128xf32>
    %8 = vector.broadcast %7 : vector<1x128xf32> to vector<128x128xf32>
    %9 = arith.addf %6, %8 : vector<128x128xf32>
    %10 = math.sin %9 : vector<128x128xf32>
    %c0_5 = arith.constant 0 : index
    %c0_6 = arith.constant 0 : index
    %11 = vector.load %arg6[%c0_5, %c0_6] : memref<1x128xf32, #tpu.memory_space<vmem>>, vector<1x128xf32>
    %12 = vector.broadcast %0 : vector<128x1xf32> to vector<128x128xf32>
    %13 = vector.broadcast %11 : vector<1x128xf32> to vector<128x128xf32>
    %14 = arith.mulf %12, %13 : vector<128x128xf32>
    %c0_7 = arith.constant 0 : index
    %c0_8 = arith.constant 0 : index
    %15 = vector.load %arg7[%c0_7, %c0_8] : memref<128x128xf32, #tpu.memory_space<vmem>>, vector<128x128xf32>
    %cst_9 = arith.constant dense<0.000000e+00> : vector<128x128xf32>
    %16 = tpu.matmul %10, %15, %cst_9 {dimension_numbers = #tpu.dot_dimension_numbers<[1], [0], [0], [1], [0, 0, 1, 1], [], []>} : vector<128x128xf32>, vector<128x128xf32>, vector<128x128xf32> -> vector<128x128xf32>
    %17 = arith.addf %14, %16 : vector<128x128xf32>
    %c0_10 = arith.constant 0 : index
    %c0_11 = arith.constant 0 : index
    %18 = vector.load %arg8[%c0_10, %c0_11] : memref<1x128xf32, #tpu.memory_space<vmem>>, vector<1x128xf32>
    %19 = vector.broadcast %18 : vector<1x128xf32> to vector<128x128xf32>
    %20 = arith.addf %17, %19 : vector<128x128xf32>
    %c0_12 = arith.constant 0 : index
    %c0_13 = arith.constant 0 : index
    %21 = vector.load %arg3[%c0_12, %c0_13] : memref<128x128xf32, #tpu.memory_space<vmem>>, vector<128x128xf32>
    %22 = arith.addf %20, %21 : vector<128x128xf32>
    %23 = arith.negf %22 : vector<128x128xf32>
    %24 = math.exp %23 : vector<128x128xf32>
    %cst_14 = arith.constant 1.000000e+00 : f32
    %25 = vector.broadcast %cst_14 : f32 to vector<128x128xf32>
    %26 = arith.addf %25, %24 : vector<128x128xf32>
    %27 = arith.divf %25, %26 : vector<128x128xf32>
    %28 = arith.mulf %22, %27 : vector<128x128xf32>
    %c0_15 = arith.constant 0 : index
    %c0_16 = arith.constant 0 : index
    %29 = vector.load %arg1[%c0_15, %c0_16] : memref<128x128xf32, #tpu.memory_space<vmem>>, vector<128x128xf32>
    %cst_17 = arith.constant dense<0.000000e+00> : vector<128xf32>
    %30 = vector.multi_reduction <add>, %29, %cst_17 [1] : vector<128x128xf32> to vector<128xf32>
    %31 = vector.shape_cast %30 : vector<128xf32> to vector<128x1xf32>
    %32 = arith.mulf %29, %29 : vector<128x128xf32>
    %cst_18 = arith.constant dense<0.000000e+00> : vector<128xf32>
    %33 = vector.multi_reduction <add>, %32, %cst_18 [1] : vector<128x128xf32> to vector<128xf32>
    %34 = vector.shape_cast %33 : vector<128xf32> to vector<128x1xf32>
    %cst_19 = arith.constant 6.250000e-02 : f32
    %35 = vector.broadcast %cst_19 : f32 to vector<128x1xf32>
    %36 = arith.mulf %31, %35 : vector<128x1xf32>
    %cst_20 = arith.constant 6.250000e-02 : f32
    %37 = vector.broadcast %cst_20 : f32 to vector<128x1xf32>
    %38 = arith.mulf %34, %37 : vector<128x1xf32>
    %39 = arith.mulf %36, %36 : vector<128x1xf32>
    %40 = arith.subf %38, %39 : vector<128x1xf32>
    %41 = vector.broadcast %36 : vector<128x1xf32> to vector<128x128xf32>
    %42 = arith.subf %29, %41 : vector<128x128xf32>
    %cst_21 = arith.constant 9.99999974E-6 : f32
    %43 = vector.broadcast %cst_21 : f32 to vector<128x1xf32>
    %44 = arith.addf %40, %43 : vector<128x1xf32>
    %45 = math.rsqrt %44 : vector<128x1xf32>
    %46 = vector.broadcast %45 : vector<128x1xf32> to vector<128x128xf32>
    %47 = arith.mulf %42, %46 : vector<128x128xf32>
    %c0_22 = arith.constant 0 : index
    %c0_23 = arith.constant 0 : index
    %c0_24 = arith.constant 0 : index
    %48 = vector.load %arg9[%c0_22, %c0_23, %c0_24] : memref<3x128x128xf32, #tpu.memory_space<vmem>>, vector<1x128x128xf32>
    %49 = vector.shape_cast %48 : vector<1x128x128xf32> to vector<128x128xf32>
    %cst_25 = arith.constant dense<0.000000e+00> : vector<128x128xf32>
    %50 = tpu.matmul %28, %49, %cst_25 {dimension_numbers = #tpu.dot_dimension_numbers<[1], [0], [0], [1], [0, 0, 1, 1], [], []>} : vector<128x128xf32>, vector<128x128xf32>, vector<128x128xf32> -> vector<128x128xf32>
    %cst_26 = arith.constant 1.000000e+00 : f32
    %51 = vector.broadcast %cst_26 : f32 to vector<128x128xf32>
    %52 = arith.addf %50, %51 : vector<128x128xf32>
    %53 = arith.mulf %47, %52 : vector<128x128xf32>
    %54 = arith.truncf %53 : vector<128x128xf32> to vector<128x128xbf16>
    %c0_27 = arith.constant 0 : index
    %c0_28 = arith.constant 0 : index
    %c0_29 = arith.constant 0 : index
    %55 = vector.load %arg11[%c0_27, %c0_28, %c0_29] : memref<3x128x128xbf16, #tpu.memory_space<vmem>>, vector<1x128x128xbf16>
    %56 = vector.shape_cast %55 : vector<1x128x128xbf16> to vector<128x128xbf16>
    %cst_30 = arith.constant dense<0.000000e+00> : vector<128x128xf32>
    %57 = tpu.matmul %54, %56, %cst_30 {dimension_numbers = #tpu.dot_dimension_numbers<[1], [0], [0], [1], [0, 0, 1, 1], [], []>} : vector<128x128xbf16>, vector<128x128xbf16>, vector<128x128xf32> -> vector<128x128xf32>
    %c0_31 = arith.constant 0 : index
    %c0_32 = arith.constant 0 : index
    %c0_33 = arith.constant 0 : index
    %58 = vector.load %arg12[%c0_31, %c0_32, %c0_33] : memref<3x1x128xf32, #tpu.memory_space<vmem>>, vector<1x1x128xf32>
    %59 = vector.shape_cast %58 : vector<1x1x128xf32> to vector<1x128xf32>
    %60 = vector.broadcast %59 : vector<1x128xf32> to vector<128x128xf32>
    %61 = arith.addf %57, %60 : vector<128x128xf32>
    %62 = arith.negf %61 : vector<128x128xf32>
    %63 = math.exp %62 : vector<128x128xf32>
    %cst_34 = arith.constant 1.000000e+00 : f32
    %64 = vector.broadcast %cst_34 : f32 to vector<128x128xf32>
    %65 = arith.addf %64, %63 : vector<128x128xf32>
    %66 = arith.divf %64, %65 : vector<128x128xf32>
    %67 = arith.mulf %61, %66 : vector<128x128xf32>
    %68 = arith.truncf %67 : vector<128x128xf32> to vector<128x128xbf16>
    %c0_35 = arith.constant 0 : index
    %c0_36 = arith.constant 0 : index
    %c0_37 = arith.constant 0 : index
    %69 = vector.load %arg13[%c0_35, %c0_36, %c0_37] : memref<3x128x128xbf16, #tpu.memory_space<vmem>>, vector<1x128x128xbf16>
    %70 = vector.shape_cast %69 : vector<1x128x128xbf16> to vector<128x128xbf16>
    %cst_38 = arith.constant dense<0.000000e+00> : vector<128x128xf32>
    %71 = tpu.matmul %68, %70, %cst_38 {dimension_numbers = #tpu.dot_dimension_numbers<[1], [0], [0], [1], [0, 0, 1, 1], [], []>} : vector<128x128xbf16>, vector<128x128xbf16>, vector<128x128xf32> -> vector<128x128xf32>
    %c0_39 = arith.constant 0 : index
    %c0_40 = arith.constant 0 : index
    %c0_41 = arith.constant 0 : index
    %72 = vector.load %arg14[%c0_39, %c0_40, %c0_41] : memref<3x1x128xf32, #tpu.memory_space<vmem>>, vector<1x1x128xf32>
    %73 = vector.shape_cast %72 : vector<1x1x128xf32> to vector<1x128xf32>
    %74 = vector.broadcast %73 : vector<1x128xf32> to vector<128x128xf32>
    %75 = arith.addf %71, %74 : vector<128x128xf32>
    %c0_42 = arith.constant 0 : index
    %c0_43 = arith.constant 0 : index
    %c0_44 = arith.constant 0 : index
    %76 = vector.load %arg10[%c0_42, %c0_43, %c0_44] : memref<3x128x128xf32, #tpu.memory_space<vmem>>, vector<1x128x128xf32>
    %77 = vector.shape_cast %76 : vector<1x128x128xf32> to vector<128x128xf32>
    %cst_45 = arith.constant dense<0.000000e+00> : vector<128x128xf32>
    %78 = tpu.matmul %28, %77, %cst_45 {dimension_numbers = #tpu.dot_dimension_numbers<[1], [0], [0], [1], [0, 0, 1, 1], [], []>} : vector<128x128xf32>, vector<128x128xf32>, vector<128x128xf32> -> vector<128x128xf32>
    %cst_46 = arith.constant 1.000000e+00 : f32
    %79 = vector.broadcast %cst_46 : f32 to vector<128x128xf32>
    %80 = arith.addf %78, %79 : vector<128x128xf32>
    %81 = arith.mulf %75, %80 : vector<128x128xf32>
    %82 = arith.addf %81, %29 : vector<128x128xf32>
    %cst_47 = arith.constant dense<0.000000e+00> : vector<128xf32>
    %83 = vector.multi_reduction <add>, %82, %cst_47 [1] : vector<128x128xf32> to vector<128xf32>
    %84 = vector.shape_cast %83 : vector<128xf32> to vector<128x1xf32>
    %85 = arith.mulf %82, %82 : vector<128x128xf32>
    %cst_48 = arith.constant dense<0.000000e+00> : vector<128xf32>
    %86 = vector.multi_reduction <add>, %85, %cst_48 [1] : vector<128x128xf32> to vector<128xf32>
    %87 = vector.shape_cast %86 : vector<128xf32> to vector<128x1xf32>
    %cst_49 = arith.constant 6.250000e-02 : f32
    %88 = vector.broadcast %cst_49 : f32 to vector<128x1xf32>
    %89 = arith.mulf %84, %88 : vector<128x1xf32>
    %cst_50 = arith.constant 6.250000e-02 : f32
    %90 = vector.broadcast %cst_50 : f32 to vector<128x1xf32>
    %91 = arith.mulf %87, %90 : vector<128x1xf32>
    %92 = arith.mulf %89, %89 : vector<128x1xf32>
    %93 = arith.subf %91, %92 : vector<128x1xf32>
    %94 = vector.broadcast %89 : vector<128x1xf32> to vector<128x128xf32>
    %95 = arith.subf %82, %94 : vector<128x128xf32>
    %cst_51 = arith.constant 9.99999974E-6 : f32
    %96 = vector.broadcast %cst_51 : f32 to vector<128x1xf32>
    %97 = arith.addf %93, %96 : vector<128x1xf32>
    %98 = math.rsqrt %97 : vector<128x1xf32>
    %99 = vector.broadcast %98 : vector<128x1xf32> to vector<128x128xf32>
    %100 = arith.mulf %95, %99 : vector<128x128xf32>
    %c1 = arith.constant 1 : index
    %c0_52 = arith.constant 0 : index
    %c0_53 = arith.constant 0 : index
    %101 = vector.load %arg9[%c1, %c0_52, %c0_53] : memref<3x128x128xf32, #tpu.memory_space<vmem>>, vector<1x128x128xf32>
    %102 = vector.shape_cast %101 : vector<1x128x128xf32> to vector<128x128xf32>
    %cst_54 = arith.constant dense<0.000000e+00> : vector<128x128xf32>
    %103 = tpu.matmul %28, %102, %cst_54 {dimension_numbers = #tpu.dot_dimension_numbers<[1], [0], [0], [1], [0, 0, 1, 1], [], []>} : vector<128x128xf32>, vector<128x128xf32>, vector<128x128xf32> -> vector<128x128xf32>
    %cst_55 = arith.constant 1.000000e+00 : f32
    %104 = vector.broadcast %cst_55 : f32 to vector<128x128xf32>
    %105 = arith.addf %103, %104 : vector<128x128xf32>
    %106 = arith.mulf %100, %105 : vector<128x128xf32>
    %107 = arith.truncf %106 : vector<128x128xf32> to vector<128x128xbf16>
    %c1_56 = arith.constant 1 : index
    %c0_57 = arith.constant 0 : index
    %c0_58 = arith.constant 0 : index
    %108 = vector.load %arg11[%c1_56, %c0_57, %c0_58] : memref<3x128x128xbf16, #tpu.memory_space<vmem>>, vector<1x128x128xbf16>
    %109 = vector.shape_cast %108 : vector<1x128x128xbf16> to vector<128x128xbf16>
    %cst_59 = arith.constant dense<0.000000e+00> : vector<128x128xf32>
    %110 = tpu.matmul %107, %109, %cst_59 {dimension_numbers = #tpu.dot_dimension_numbers<[1], [0], [0], [1], [0, 0, 1, 1], [], []>} : vector<128x128xbf16>, vector<128x128xbf16>, vector<128x128xf32> -> vector<128x128xf32>
    %c1_60 = arith.constant 1 : index
    %c0_61 = arith.constant 0 : index
    %c0_62 = arith.constant 0 : index
    %111 = vector.load %arg12[%c1_60, %c0_61, %c0_62] : memref<3x1x128xf32, #tpu.memory_space<vmem>>, vector<1x1x128xf32>
    %112 = vector.shape_cast %111 : vector<1x1x128xf32> to vector<1x128xf32>
    %113 = vector.broadcast %112 : vector<1x128xf32> to vector<128x128xf32>
    %114 = arith.addf %110, %113 : vector<128x128xf32>
    %115 = arith.negf %114 : vector<128x128xf32>
    %116 = math.exp %115 : vector<128x128xf32>
    %cst_63 = arith.constant 1.000000e+00 : f32
    %117 = vector.broadcast %cst_63 : f32 to vector<128x128xf32>
    %118 = arith.addf %117, %116 : vector<128x128xf32>
    %119 = arith.divf %117, %118 : vector<128x128xf32>
    %120 = arith.mulf %114, %119 : vector<128x128xf32>
    %121 = arith.truncf %120 : vector<128x128xf32> to vector<128x128xbf16>
    %c1_64 = arith.constant 1 : index
    %c0_65 = arith.constant 0 : index
    %c0_66 = arith.constant 0 : index
    %122 = vector.load %arg13[%c1_64, %c0_65, %c0_66] : memref<3x128x128xbf16, #tpu.memory_space<vmem>>, vector<1x128x128xbf16>
    %123 = vector.shape_cast %122 : vector<1x128x128xbf16> to vector<128x128xbf16>
    %cst_67 = arith.constant dense<0.000000e+00> : vector<128x128xf32>
    %124 = tpu.matmul %121, %123, %cst_67 {dimension_numbers = #tpu.dot_dimension_numbers<[1], [0], [0], [1], [0, 0, 1, 1], [], []>} : vector<128x128xbf16>, vector<128x128xbf16>, vector<128x128xf32> -> vector<128x128xf32>
    %c1_68 = arith.constant 1 : index
    %c0_69 = arith.constant 0 : index
    %c0_70 = arith.constant 0 : index
    %125 = vector.load %arg14[%c1_68, %c0_69, %c0_70] : memref<3x1x128xf32, #tpu.memory_space<vmem>>, vector<1x1x128xf32>
    %126 = vector.shape_cast %125 : vector<1x1x128xf32> to vector<1x128xf32>
    %127 = vector.broadcast %126 : vector<1x128xf32> to vector<128x128xf32>
    %128 = arith.addf %124, %127 : vector<128x128xf32>
    %c1_71 = arith.constant 1 : index
    %c0_72 = arith.constant 0 : index
    %c0_73 = arith.constant 0 : index
    %129 = vector.load %arg10[%c1_71, %c0_72, %c0_73] : memref<3x128x128xf32, #tpu.memory_space<vmem>>, vector<1x128x128xf32>
    %130 = vector.shape_cast %129 : vector<1x128x128xf32> to vector<128x128xf32>
    %cst_74 = arith.constant dense<0.000000e+00> : vector<128x128xf32>
    %131 = tpu.matmul %28, %130, %cst_74 {dimension_numbers = #tpu.dot_dimension_numbers<[1], [0], [0], [1], [0, 0, 1, 1], [], []>} : vector<128x128xf32>, vector<128x128xf32>, vector<128x128xf32> -> vector<128x128xf32>
    %cst_75 = arith.constant 1.000000e+00 : f32
    %132 = vector.broadcast %cst_75 : f32 to vector<128x128xf32>
    %133 = arith.addf %131, %132 : vector<128x128xf32>
    %134 = arith.mulf %128, %133 : vector<128x128xf32>
    %135 = arith.addf %134, %82 : vector<128x128xf32>
    %cst_76 = arith.constant dense<0.000000e+00> : vector<128xf32>
    %136 = vector.multi_reduction <add>, %135, %cst_76 [1] : vector<128x128xf32> to vector<128xf32>
    %137 = vector.shape_cast %136 : vector<128xf32> to vector<128x1xf32>
    %138 = arith.mulf %135, %135 : vector<128x128xf32>
    %cst_77 = arith.constant dense<0.000000e+00> : vector<128xf32>
    %139 = vector.multi_reduction <add>, %138, %cst_77 [1] : vector<128x128xf32> to vector<128xf32>
    %140 = vector.shape_cast %139 : vector<128xf32> to vector<128x1xf32>
    %cst_78 = arith.constant 6.250000e-02 : f32
    %141 = vector.broadcast %cst_78 : f32 to vector<128x1xf32>
    %142 = arith.mulf %137, %141 : vector<128x1xf32>
    %cst_79 = arith.constant 6.250000e-02 : f32
    %143 = vector.broadcast %cst_79 : f32 to vector<128x1xf32>
    %144 = arith.mulf %140, %143 : vector<128x1xf32>
    %145 = arith.mulf %142, %142 : vector<128x1xf32>
    %146 = arith.subf %144, %145 : vector<128x1xf32>
    %147 = vector.broadcast %142 : vector<128x1xf32> to vector<128x128xf32>
    %148 = arith.subf %135, %147 : vector<128x128xf32>
    %cst_80 = arith.constant 9.99999974E-6 : f32
    %149 = vector.broadcast %cst_80 : f32 to vector<128x1xf32>
    %150 = arith.addf %146, %149 : vector<128x1xf32>
    %151 = math.rsqrt %150 : vector<128x1xf32>
    %152 = vector.broadcast %151 : vector<128x1xf32> to vector<128x128xf32>
    %153 = arith.mulf %148, %152 : vector<128x128xf32>
    %c2 = arith.constant 2 : index
    %c0_81 = arith.constant 0 : index
    %c0_82 = arith.constant 0 : index
    %154 = vector.load %arg9[%c2, %c0_81, %c0_82] : memref<3x128x128xf32, #tpu.memory_space<vmem>>, vector<1x128x128xf32>
    %155 = vector.shape_cast %154 : vector<1x128x128xf32> to vector<128x128xf32>
    %cst_83 = arith.constant dense<0.000000e+00> : vector<128x128xf32>
    %156 = tpu.matmul %28, %155, %cst_83 {dimension_numbers = #tpu.dot_dimension_numbers<[1], [0], [0], [1], [0, 0, 1, 1], [], []>} : vector<128x128xf32>, vector<128x128xf32>, vector<128x128xf32> -> vector<128x128xf32>
    %cst_84 = arith.constant 1.000000e+00 : f32
    %157 = vector.broadcast %cst_84 : f32 to vector<128x128xf32>
    %158 = arith.addf %156, %157 : vector<128x128xf32>
    %159 = arith.mulf %153, %158 : vector<128x128xf32>
    %160 = arith.truncf %159 : vector<128x128xf32> to vector<128x128xbf16>
    %c2_85 = arith.constant 2 : index
    %c0_86 = arith.constant 0 : index
    %c0_87 = arith.constant 0 : index
    %161 = vector.load %arg11[%c2_85, %c0_86, %c0_87] : memref<3x128x128xbf16, #tpu.memory_space<vmem>>, vector<1x128x128xbf16>
    %162 = vector.shape_cast %161 : vector<1x128x128xbf16> to vector<128x128xbf16>
    %cst_88 = arith.constant dense<0.000000e+00> : vector<128x128xf32>
    %163 = tpu.matmul %160, %162, %cst_88 {dimension_numbers = #tpu.dot_dimension_numbers<[1], [0], [0], [1], [0, 0, 1, 1], [], []>} : vector<128x128xbf16>, vector<128x128xbf16>, vector<128x128xf32> -> vector<128x128xf32>
    %c2_89 = arith.constant 2 : index
    %c0_90 = arith.constant 0 : index
    %c0_91 = arith.constant 0 : index
    %164 = vector.load %arg12[%c2_89, %c0_90, %c0_91] : memref<3x1x128xf32, #tpu.memory_space<vmem>>, vector<1x1x128xf32>
    %165 = vector.shape_cast %164 : vector<1x1x128xf32> to vector<1x128xf32>
    %166 = vector.broadcast %165 : vector<1x128xf32> to vector<128x128xf32>
    %167 = arith.addf %163, %166 : vector<128x128xf32>
    %168 = arith.negf %167 : vector<128x128xf32>
    %169 = math.exp %168 : vector<128x128xf32>
    %cst_92 = arith.constant 1.000000e+00 : f32
    %170 = vector.broadcast %cst_92 : f32 to vector<128x128xf32>
    %171 = arith.addf %170, %169 : vector<128x128xf32>
    %172 = arith.divf %170, %171 : vector<128x128xf32>
    %173 = arith.mulf %167, %172 : vector<128x128xf32>
    %174 = arith.truncf %173 : vector<128x128xf32> to vector<128x128xbf16>
    %c2_93 = arith.constant 2 : index
    %c0_94 = arith.constant 0 : index
    %c0_95 = arith.constant 0 : index
    %175 = vector.load %arg13[%c2_93, %c0_94, %c0_95] : memref<3x128x128xbf16, #tpu.memory_space<vmem>>, vector<1x128x128xbf16>
    %176 = vector.shape_cast %175 : vector<1x128x128xbf16> to vector<128x128xbf16>
    %cst_96 = arith.constant dense<0.000000e+00> : vector<128x128xf32>
    %177 = tpu.matmul %174, %176, %cst_96 {dimension_numbers = #tpu.dot_dimension_numbers<[1], [0], [0], [1], [0, 0, 1, 1], [], []>} : vector<128x128xbf16>, vector<128x128xbf16>, vector<128x128xf32> -> vector<128x128xf32>
    %c2_97 = arith.constant 2 : index
    %c0_98 = arith.constant 0 : index
    %c0_99 = arith.constant 0 : index
    %178 = vector.load %arg14[%c2_97, %c0_98, %c0_99] : memref<3x1x128xf32, #tpu.memory_space<vmem>>, vector<1x1x128xf32>
    %179 = vector.shape_cast %178 : vector<1x1x128xf32> to vector<1x128xf32>
    %180 = vector.broadcast %179 : vector<1x128xf32> to vector<128x128xf32>
    %181 = arith.addf %177, %180 : vector<128x128xf32>
    %c2_100 = arith.constant 2 : index
    %c0_101 = arith.constant 0 : index
    %c0_102 = arith.constant 0 : index
    %182 = vector.load %arg10[%c2_100, %c0_101, %c0_102] : memref<3x128x128xf32, #tpu.memory_space<vmem>>, vector<1x128x128xf32>
    %183 = vector.shape_cast %182 : vector<1x128x128xf32> to vector<128x128xf32>
    %cst_103 = arith.constant dense<0.000000e+00> : vector<128x128xf32>
    %184 = tpu.matmul %28, %183, %cst_103 {dimension_numbers = #tpu.dot_dimension_numbers<[1], [0], [0], [1], [0, 0, 1, 1], [], []>} : vector<128x128xf32>, vector<128x128xf32>, vector<128x128xf32> -> vector<128x128xf32>
    %cst_104 = arith.constant 1.000000e+00 : f32
    %185 = vector.broadcast %cst_104 : f32 to vector<128x128xf32>
    %186 = arith.addf %184, %185 : vector<128x128xf32>
    %187 = arith.mulf %181, %186 : vector<128x128xf32>
    %188 = arith.addf %187, %135 : vector<128x128xf32>
    %c0_105 = arith.constant 0 : index
    %c0_106 = arith.constant 0 : index
    %189 = vector.load %arg15[%c0_105, %c0_106] : memref<128x128xf32, #tpu.memory_space<vmem>>, vector<128x128xf32>
    tpu.vector_store %arg15[%c0_105, %c0_106], %188 {strides = array<i32>} : memref<128x128xf32, #tpu.memory_space<vmem>>, vector<128x128xf32>,
    return
  }
  func.func @transform_0(%arg0: i32) -> (i32, i32) {
    %c0_i32 = arith.constant 0 : i32
    %c0_i32_0 = arith.constant 0 : i32
    return %arg0, %c0_i32 : i32, i32
  }
  func.func @transform_1(%arg0: i32) -> (i32, i32) {
    %c0_i32 = arith.constant 0 : i32
    %c0_i32_0 = arith.constant 0 : i32
    return %arg0, %c0_i32 : i32, i32
  }
  func.func @transform_2(%arg0: i32) -> (i32, i32) {
    %c0_i32 = arith.constant 0 : i32
    %c0_i32_0 = arith.constant 0 : i32
    return %arg0, %c0_i32 : i32, i32
  }
  func.func @transform_3(%arg0: i32) -> (i32, i32) {
    %c0_i32 = arith.constant 0 : i32
    %c0_i32_0 = arith.constant 0 : i32
    %c0_i32_1 = arith.constant 0 : i32
    return %c0_i32, %c0_i32_0 : i32, i32
  }
  func.func @transform_4(%arg0: i32) -> (i32, i32) {
    %c0_i32 = arith.constant 0 : i32
    %c0_i32_0 = arith.constant 0 : i32
    %c0_i32_1 = arith.constant 0 : i32
    return %c0_i32, %c0_i32_0 : i32, i32
  }
  func.func @transform_5(%arg0: i32) -> (i32, i32) {
    %c0_i32 = arith.constant 0 : i32
    %c0_i32_0 = arith.constant 0 : i32
    %c0_i32_1 = arith.constant 0 : i32
    return %c0_i32, %c0_i32_0 : i32, i32
  }
  func.func @transform_6(%arg0: i32) -> (i32, i32) {
    %c0_i32 = arith.constant 0 : i32
    %c0_i32_0 = arith.constant 0 : i32
    %c0_i32_1 = arith.constant 0 : i32
    return %c0_i32, %c0_i32_0 : i32, i32
  }
  func.func @transform_7(%arg0: i32) -> (i32, i32) {
    %c0_i32 = arith.constant 0 : i32
    %c0_i32_0 = arith.constant 0 : i32
    %c0_i32_1 = arith.constant 0 : i32
    return %c0_i32, %c0_i32_0 : i32, i32
  }
  func.func @transform_8(%arg0: i32) -> (i32, i32, i32) {
    %c0_i32 = arith.constant 0 : i32
    %c0_i32_0 = arith.constant 0 : i32
    %c0_i32_1 = arith.constant 0 : i32
    %c0_i32_2 = arith.constant 0 : i32
    return %c0_i32, %c0_i32_0, %c0_i32_1 : i32, i32, i32
  }
  func.func @transform_9(%arg0: i32) -> (i32, i32, i32) {
    %c0_i32 = arith.constant 0 : i32
    %c0_i32_0 = arith.constant 0 : i32
    %c0_i32_1 = arith.constant 0 : i32
    %c0_i32_2 = arith.constant 0 : i32
    return %c0_i32, %c0_i32_0, %c0_i32_1 : i32, i32, i32
  }
  func.func @transform_10(%arg0: i32) -> (i32, i32, i32) {
    %c0_i32 = arith.constant 0 : i32
    %c0_i32_0 = arith.constant 0 : i32
    %c0_i32_1 = arith.constant 0 : i32
    %c0_i32_2 = arith.constant 0 : i32
    return %c0_i32, %c0_i32_0, %c0_i32_1 : i32, i32, i32
  }
  func.func @transform_11(%arg0: i32) -> (i32, i32, i32) {
    %c0_i32 = arith.constant 0 : i32
    %c0_i32_0 = arith.constant 0 : i32
    %c0_i32_1 = arith.constant 0 : i32
    %c0_i32_2 = arith.constant 0 : i32
    return %c0_i32, %c0_i32_0, %c0_i32_1 : i32, i32, i32
  }
  func.func @transform_12(%arg0: i32) -> (i32, i32, i32) {
    %c0_i32 = arith.constant 0 : i32
    %c0_i32_0 = arith.constant 0 : i32
    %c0_i32_1 = arith.constant 0 : i32
    %c0_i32_2 = arith.constant 0 : i32
    return %c0_i32, %c0_i32_0, %c0_i32_1 : i32, i32, i32
  }
  func.func @transform_13(%arg0: i32) -> (i32, i32, i32) {
    %c0_i32 = arith.constant 0 : i32
    %c0_i32_0 = arith.constant 0 : i32
    %c0_i32_1 = arith.constant 0 : i32
    %c0_i32_2 = arith.constant 0 : i32
    return %c0_i32, %c0_i32_0, %c0_i32_1 : i32, i32, i32
  }
  func.func @transform_14(%arg0: i32) -> (i32, i32) {
    %c0_i32 = arith.constant 0 : i32
    %c0_i32_0 = arith.constant 0 : i32
    return %arg0, %c0_i32 : i32, i32
  }
}

</mosaic_0001>

<bundles_post_ra>
// kernel: tpu_custom_call.1
= control target key start
LH: loop header
LB: loop body
LE: loop exit
PB: predicated region body
PF: predicated region fallthrough
CT: control target
= control target key end

     0   :  { %s13580_s0 = inlined_call_operand.vmem [shape: f32[256,128], index: 0, kind: input, shape index: {}]   ;;  %s13581_s1 = inlined_call_operand.vmem [shape: f32[256,1], index: 1, kind: input, shape index: {}]   ;;  %s13582_s2 = inlined_call_operand.hbm [shape: f32[256,128], index: 2, kind: input, shape index: {}]   ;;  %s13583_s3 = inlined_call_operand.vmem [shape: f32[1,128], index: 3, kind: input, shape index: {}]   ;;  %s13584_s4 = inlined_call_operand.hbm [shape: f32[1,128], index: 4, kind: input, shape index: {}]   ;;  %s13585_s5 = inlined_call_operand.hbm [shape: f32[1,128], index: 5, kind: input, shape index: {}]   ;;  %s13586_s6 = inlined_call_operand.hbm [shape: f32[128,128], index: 6, kind: input, shape index: {}]   ;;  %s13587_s7 = inlined_call_operand.hbm [shape: f32[1,128], index: 7, kind: input, shape index: {}]   ;;  %s13588_s8 = inlined_call_operand.hbm [shape: f32[3,128,128], index: 8, kind: input, shape index: {}]   ;;  %s13589_s9 = inlined_call_operand.hbm [shape: f32[3,128,128], index: 9, kind: input, shape index: {}]   ;;  %s13590_s10 = inlined_call_operand.hbm [shape: bf16[3,128,128], index: 10, kind: input, shape index: {}]   ;;  %s13591_s11 = inlined_call_operand.vmem [shape: f32[3,1,128], index: 11, kind: input, shape index: {}]   ;;  %s13592_s12 = inlined_call_operand.hbm [shape: bf16[3,128,128], index: 12, kind: input, shape index: {}]   ;;  %s13593_s13 = inlined_call_operand.vmem [shape: f32[3,1,128], index: 13, kind: input, shape index: {}]   ;;  %s13594_s14 = inlined_call_operand.hbm [shape: f32[256,128], index: 14, kind: output, shape index: {}]  }
   0x1   :  { %13660 = sst [smem:[#allocation59_spill]] %s13584_s4 }
   0x2   :  { %13661 = sst [smem:[#allocation60_spill]] %s13585_s5 }
   0x3   :  { %13662 = sst [smem:[#allocation61_spill]] %s13586_s6 }
   0x4   :  { %13663 = sst [smem:[#allocation62_spill]] %s13587_s7 }
   0x5   :  { %13664 = sst [smem:[#allocation63_spill]] %s13588_s8 }
   0x6   :  { %13665 = sst [smem:[#allocation64_spill]] %s13589_s9 }
   0x7   :  { %13666 = sst [smem:[#allocation65_spill]] %s13590_s10 }
   0x8   :  { %13667 = sst [smem:[#allocation66_spill]] %s13592_s12 }
   0x9   :  { %13668 = sst [smem:[#allocation67_spill]] %s13593_s13 }
   0xa   :  { %13669 = sst [smem:[#allocation68_spill]] %s13594_s14 }
   0xb   :  { %19 = vsyncpa [#allocation3], 0 }
   0xc   :  { %21 = vsyncpa [#allocation3 + $0x1], 0 }
   0xd   :  { %22 = vsyncpa [#allocation6], 0 }
   0xe   :  { %23 = vsyncpa [#allocation9], 0 }
   0xf   :  { %24 = vsyncpa [#allocation12], 0 }
  0x10   :  { %25 = vsyncpa [#allocation15], 0 }
  0x11   :  { %26 = vsyncpa [#allocation4], 0 }
  0x12   :  { %28 = vsyncpa [#allocation4 + $0x1], 0  ;;  %s8837_s29 = smov 0   ;;  %s8839_s30 = smov 0  }
  0x13   :  { %s8841_s15 = smov 0   ;;  %s8843_s16 = smov 0  }
  0x14 LB: > { %s13670_s4 = sld [smem:[#allocation59_spill]]  ;;  %s8861_s20 = sadd.s32 4294967295, %s8739_s16   ;;  %s8739_s16 = sphi %s8843_s16, %s13892_s16   ;;  %s8735_s15 = sphi %s8841_s15, %s13891_s15   ;;  %s8731_s30 = sphi %s8839_s30, %s13890_s30   ;;  %s8727_s29 = sphi %s8837_s29, %s13889_s29  }
  0x15   : > { %p7411_p0 = scmp.ge.s32.totalorder %s8739_s16, 1  ;;  %p107_p1 = scmp.eq.s32.totalorder %s8861_s20, 0 }
  0x16   : > { %p374_p2 = scmp.lt.s32.totalorder %s8739_s16, 3  ;;  %s8741_s22 = smov [#allocation5]  }
  0x17   : > { %s391_s23 = sshll.u32 %s8741_s22, 4  ;;  %s13672_s6 = sld [smem:[#allocation61_spill]]  ;;  %s392_s23 = int_to_ptr.vmem [resolvable:$true] %s391_s23 }
  0x18   : > { %p8866_p3 = pnand %p7411_p0, %p374_p2  ;;  %s8742_s28 = smov [#allocation8]  }
  0x19   : > { %s414_s17 = sshll.u32 %s8742_s28, 4  ;;  %s13597_s18 = smov 128   ;;  %s415_s17 = int_to_ptr.vmem [resolvable:$true] %s414_s17 }
  0x1a   : > { %s389_s19 = sshll.u32 %s13670_s4, 4  ;;  %p7886_p5 = pneg %p8866_p3  ;;  %s390_s19 = int_to_ptr.hbm [resolvable:$true] %s389_s19 }
  0x1b   : > { %s13599_s22 = smov 8   ;;  %s13674_s8 = sld [smem:[#allocation63_spill]] }
  0x1c   : > { %p8878_p6 = pnand %p7886_p5, %p107_p1  ;;  %s13675_s10 = sld [smem:[#allocation65_spill]] }
  0x1d   : > { %s412_s26 = sshll.u32 %s13672_s6, 4  ;;  %s8745_s6 = smov [#allocation11]   ;;  %s413_s26 = int_to_ptr.hbm [resolvable:$true] %s412_s26 }
  0x1e   : > { %7889 = dma.hbm_to_vmem [thread:$0]  (!%p8878_p6), %s390_s19, 16, %s392_s23, [#allocation6]  }
  0x1f   : > { %7895 = dma.hbm_to_vmem [thread:$0]  (!%p8878_p6), %s413_s26, 2048, %s415_s17, [#allocation9], %s13597_s18, %s13597_s18, %s13599_s22  }
  0x20   : > { %s440_s14 = sshll.u32 %s8745_s6, 4  ;;  %s8746_s23 = smov [#allocation14]   ;;  %s441_s14 = int_to_ptr.vmem [resolvable:$true] %s440_s14 }
  0x21   : > { %s438_s4 = sshll.u32 %s13674_s8, 4  ;;  %s468_s26 = sshll.u32 %s8746_s23, 4  ;;  %s439_s4 = int_to_ptr.hbm [resolvable:$true] %s438_s4  ;;  %s469_s26 = int_to_ptr.vmem [resolvable:$true] %s468_s26 }
  0x22   : > { %s466_s19 = sshll.u32 %s13675_s10, 4  ;;  %s8747_s17 = smov 64   ;;  %s467_s19 = int_to_ptr.hbm [resolvable:$true] %s466_s19 }
  0x23   : > { %7901 = dma.hbm_to_vmem [thread:$0]  (!%p8878_p6), %s439_s4, 6144, %s441_s14, [#allocation12], %s13597_s18, %s13597_s18, %s13599_s22  }
  0x24   : > { %s8748_s24 = smov 4   ;;  %s13676_s5 = sld [smem:[#allocation60_spill]] }
  0x25   : > { %7907 = dma.hbm_to_vmem [thread:$0]  (!%p8878_p6), %s467_s19, 3072, %s469_s26, [#allocation15], %s8747_s17, %s8747_s17, %s8748_s24  }
  0x26   : > { %s8749_s28 = smov [#allocation7]   ;;  %s13677_s7 = sld [smem:[#allocation62_spill]] }
  0x27   : > { %s403_s8 = sshll.u32 %s8749_s28, 4  ;;  %s8750_s23 = smov [#allocation10]   ;;  %s404_s8 = int_to_ptr.vmem [resolvable:$true] %s403_s8 }
  0x28   : > { %s429_s19 = sshll.u32 %s8750_s23, 4  ;;  %s13678_s9 = sld [smem:[#allocation64_spill]]  ;;  %s430_s19 = int_to_ptr.vmem [resolvable:$true] %s429_s19 }
  0x29   : > { %s13679_s12 = sld [smem:[#allocation66_spill]]  ;;  %s13680_s18 = smov 128  }
  0x2a   : > { %s401_s13 = sshll.u32 %s13676_s5, 4  ;;  %s8752_s4 = smov [#allocation16]   ;;  %s402_s13 = int_to_ptr.hbm [resolvable:$true] %s401_s13 }
  0x2b   : > { %7892 = dma.hbm_to_vmem [thread:$0]  (!%p8878_p6), %s402_s13, 16, %s404_s8, [#allocation6]  }
  0x2c   : > { %s427_s14 = sshll.u32 %s13677_s7, 4  ;;  %s8751_s13 = smov [#allocation13]   ;;  %s428_s14 = int_to_ptr.hbm [resolvable:$true] %s427_s14 }
  0x2d   : > { %7898 = dma.hbm_to_vmem [thread:$0]  (!%p8878_p6), %s428_s14, 16, %s430_s19, [#allocation9]  }
  0x2e   : > { %s452_s6 = sshll.u32 %s13678_s9, 4  ;;  %s454_s28 = sshll.u32 %s8751_s13, 4  ;;  %s453_s6 = int_to_ptr.hbm [resolvable:$true] %s452_s6  ;;  %s455_s28 = int_to_ptr.vmem [resolvable:$true] %s454_s28 }
  0x2f   : > { %s483_s8 = sshll.u32 %s13679_s12, 4  ;;  %s485_s14 = sshll.u32 %s8752_s4, 4  ;;  %s484_s8 = int_to_ptr.hbm [resolvable:$true] %s483_s8  ;;  %s486_s14 = int_to_ptr.vmem [resolvable:$true] %s485_s14 }
  0x30   : > { %7904 = dma.hbm_to_vmem [thread:$0]  (!%p8878_p6), %s453_s6, 6144, %s455_s28, [#allocation12], %s13680_s18, %s13680_s18, %s13599_s22  }
  0x31   : > { %7910 = dma.hbm_to_vmem [thread:$0]  (!%p8878_p6), %s484_s8, 3072, %s486_s14, [#allocation15], %s8747_s17, %s8747_s17, %s8748_s24  }
  0x32   : > { %s7410_s23 = sadd.s32 4294967294, %s8739_s16   ;;  %s8927_s19 = sadd.s32 1, %s8739_s16  }
  0x33   : > { %s90_s26 = ssub.s32 %s8739_s16, %s8927_s19  ;;  %s93_s10 = sadd.s32 1, %s8735_s15 }
  0x34   : > { %p91_p7 = scmp.eq.s32.totalorder %s90_s26, 0  ;;  %p100_p8 = scmp.ne.s32.totalorder %s8735_s15, %s8731_s30 }
  0x35   : > { %p101_p9 = scmp.eq.s32.totalorder %s8739_s16, 0  ;;  %p106_p10 = scmp.ne.s32.totalorder %s8731_s30, %s8727_s29 }
  0x36   : > { %s8938_s6 = scalar_select %p91_p7, %s8735_s15, %s93_s10  }
  0x37   : > { %p8940_p11 = por %p101_p9, %p100_p8  ;;  %p8946_p12 = por %p107_p1, %p106_p10 }
  0x38   : > { %p361_p13 = scmp.eq.s32.totalorder %s8861_s20, 1  ;;  %p367_p0 = scmp.eq.s32.totalorder %s7410_s23, 1 }
  0x39   : > { %p7927_p2 = scmp.lt.s32.totalorder %s8739_s16, 2  ;;  %s520_s17 = sand.u32 1, %s8735_s15  }
  0x3a   : > { %p8953_p5 = por %p361_p13, %p100_p8  ;;  %p8957_p6 = por %p367_p0, %p106_p10 }
  0x3b   : > { %s7421_s13 = sshll.u32 %s520_s17, 7  ;;  %s7752_s28 = sshll.u32 %s8739_s16, 7 }
  0x3c   : > { %s529_s26 = scalar_lea.hbm %s13582_s2, %s7752_s28  ;;  %s524_s10 = scalar_lea.vmem [#allocation2], %s7421_s13 }
  0x3d   : > { %s532_s22 = sshll.u32 %s524_s10, 4  ;;  %s530_s5 = sshll.u32 %s529_s26, 4  ;;  %s533_s22 = int_to_ptr.vmem [resolvable:$true] %s532_s22  ;;  %s531_s5 = int_to_ptr.hbm [resolvable:$true] %s530_s5 }
  0x3e   : > { %p8967_p7 = pnand %p7927_p2, %p8940_p11  ;;  %s521_s7 = scalar_lea.sflag [#allocation3], %s520_s17 }
  0x3f   : > { %s8627_s9 = sshra.s32 %s531_s5, 4  ;;  %s8634_s4 = scalar_lea.hbm %s13582_s2, 256  ;;  %s8628_s9 = int_to_ptr.hbm [resolvable:$true] %s8627_s9 }
  0x40   : > { %s8629_s12 = scalar_lea.hbm %s8628_s9, 128  ;;  %p8631_p9 = pneg %p8967_p7 }
  0x41   : > { %p8630_p8 = scmp.ne.s32.totalorder %s8628_s9, %s8629_s12  ;;  %p8635_p11 = scmp.lt.s32.totalorder %s8628_s9, %s13582_s2 }
  0x42   : > { %p8636_p0 = scmp.lt.s32.totalorder %s8634_s4, %s8629_s12 }
  0x43   : > { %p8632_p10 = pnand %p8631_p9, %p8630_p8 }
  0x44   : > { %p8637_p2 = por %p8636_p0, %p8635_p11 }
  0x45   : > { %p8633_p13 = pneg %p8632_p10 }
  0x47   : > { %p8638_p4 = pnand %p8637_p2, %p8633_p13 }
  0x49   : > { %8641 = shalt.err (!%p8638_p4)
}
  0x4a   : > { %s13686_s17 = smov 8   ;;  %544 = sbr.rel (%p8866_p3) target bundleno = 2447 (0x98f), region = 76 }
  0x4b   : > { %7914 = dma.hbm_to_vmem [thread:$0]  (!%p8967_p7), %s531_s5, 2048, %s533_s22, %s521_s7, %s13680_s18, %s13680_s18, %s13686_s17  }
  0x4f   : > { %s8987_s26 = sand.u32 1, %s8731_s30  }
  0x50   : > { %s7425_s9 = sshll.u32 %s8987_s26, 7  ;;  %s547_s12 = scalar_lea.sflag [#allocation3], %s8987_s26 }
  0x51   : > { %s8993_s10 = scalar_lea.vmem [#allocation2], %s7425_s9 }
  0x52   : > { %8702 = dma.done.wait (%p8946_p12), %s547_s12, 2048  }
  0x53   : > { %8704 = vsyncadd (%p8946_p12), %s547_s12, 4294965248 }
  0x54   : > { %8706 = dma.done.wait (%p107_p1), [#allocation6], 32  }
  0x55   : > { %8708 = vsyncadd (%p107_p1), [#allocation6], 4294967264 }
  0x56   : > { %8710 = dma.done.wait (%p107_p1), [#allocation9], 2064  }
  0x57   : > { %8712 = vsyncadd (%p107_p1), [#allocation9], 4294965232 }
  0x58   : > { %8714 = dma.done.wait (%p107_p1), [#allocation12], 12288  }
  0x59   : > { %8716 = vsyncadd (%p107_p1), [#allocation12], 4294955008 }
  0x5a   : > { %8718 = dma.done.wait (%p107_p1), [#allocation15], 6144  }
  0x5b   : > { %8720 = vsyncadd (%p107_p1), [#allocation15], 4294961152  ;;  %s7435_s5 = sshll.u32 %s8861_s20, 4  ;;  %v13613_v0 = vmov 0   ;;  %v9050_v18 = vld [vmem:[%s13583_s3] ss:$0 sm:$0xff] }
  0x5c   : > { %7992 = vset.pattern.permute.xlu2 %v13613_v0  ;;  %7991 = vset.pattern.permute.xlu1 %v13613_v0  ;;  %p647_p3 = scmp.lt.s32.totalorder %s7435_s5, 31  ;;  %v9056_v21 = vld [vmem:[#allocation5] ss:$0 sm:$0xff]  ;;  %s13498_s14 = scalar_lea.vmem [#allocation17], %s7425_s9 }
  0x5d   : > { %7990 = vset.pattern.permute.xlu0 %v13613_v0  ;;  %v3327_v62 = vld [vmem:[#allocation8 + $0x78] sm:$0xff]  ;;  %s7801_s9 = sshll.u32 %s8861_s20, 7  ;;  %s13887_s12 = sld [smem:[#allocation68_spill]] }
  0x5e   : > { %s13894_s5 = smov (!%p647_p3, %s7435_s5), 31  ;;  %7802 = vmatpush.msra.mxu1 %v3327_v62  ;;  %7803 = vmatpush.msra.mxu2 %v3327_v62  ;;  %s7222_s20 = scalar_lea.sflag [#allocation4], %s8987_s26 }
  0x5f   : > { %s7436_s7 = sshll.u32 %s13894_s5, 3  ;;  %3328 = vmatpush.msra.mxu0 %v3327_v62  ;;  %7804 = vmatpush.msra.mxu3 %v3327_v62  ;;  %s7234_s5 = sshll.u32 %s13498_s14, 4  ;;  %s7235_s5 = int_to_ptr.vmem [resolvable:$true] %s7234_s5 }
  0x60   : > { %s9027_s18 = scalar_lea.vmem %s13581_s1, %s7436_s7  ;;  %s11455_s25 = scalar_lea.vmem %s13580_s0, %s7436_s7 }
  0x61   : > { %v664_v1 = vld [vmem:[%s9027_s18 + $0x20] sm:$0xff]  ;;  %v662_v2 = vld [vmem:[%s9027_s18 + $0x10] sm:$0xff]  ;;  %v665_v4 = vld [vmem:[%s9027_s18 + $0x28] sm:$0xff]  ;;  %s13852_s7 = sld [smem:[#allocation67_spill]] }
  0x62   : > { %v660_v3 = vld [vmem:[%s9027_s18] sm:$0xff]  ;;  %699 = vperm.xlu2 %7992, %v664_v1   ;;  %689 = vperm.xlu1 %7991, %v662_v2   ;;  %v663_v5 = vld [vmem:[%s9027_s18 + $0x18] sm:$0xff]  ;;  %v661_v6 = vld [vmem:[%s9027_s18 + $0x8] sm:$0xff] }
  0x63   : > { %679 = vperm.xlu0 %7990, %v660_v3   ;;  %v668_v7 = vld [vmem:[%s9027_s18 + $0x40] sm:$0xff]  ;;  %v667_v8 = vld [vmem:[%s9027_s18 + $0x38] sm:$0xff]  ;;  %v666_v9 = vld [vmem:[%s9027_s18 + $0x30] sm:$0xff]  ;;  %s8677_s13 = scalar_lea.hbm %s13887_s12, 256 }
  0x64   : > { %v671_v10 = vld [vmem:[%s9027_s18 + $0x58] sm:$0xff]  ;;  %v670_v11 = vld [vmem:[%s9027_s18 + $0x50] sm:$0xff]  ;;  %v669_v12 = vld [vmem:[%s9027_s18 + $0x48] sm:$0xff] }
  0x65   : > { %v674_v13 = vld [vmem:[%s9027_s18 + $0x70] sm:$0xff]  ;;  %v673_v14 = vld [vmem:[%s9027_s18 + $0x68] sm:$0xff]  ;;  %v672_v15 = vld [vmem:[%s9027_s18 + $0x60] sm:$0xff] }
  0x66   : > { %v675_v16 = vld [vmem:[%s9027_s18 + $0x78] sm:$0xff] }
  0x6a   : > { %704 = vperm.xlu2 %7992, %v665_v4   ;;  %694 = vperm.xlu1 %7991, %v663_v5   ;;  %v3326_v5 = vld [vmem:[#allocation8 + $0x70] sm:$0xff] }
  0x6b   : > { %684 = vperm.xlu0 %7990, %v661_v6   ;;  %7805 = vmatpush.msra.mxu1 %v3326_v5 }
  0x6c   : > { %7806 = vmatpush.msra.mxu2 %v3326_v5  ;;  %3329 = vmatpush.msra.mxu0 %v3326_v5 }
  0x6d   : > { %7807 = vmatpush.msra.mxu3 %v3326_v5 }
  0x72   : > { %719 = vperm.xlu2 %7992, %v668_v7   ;;  %714 = vperm.xlu1 %7991, %v667_v8   ;;  %v13611_v7 = vmov 683565275  }
  0x73   : > { %709 = vperm.xlu0 %7990, %v666_v9   ;;  %v13609_v9 = vmov 2475754826  }
  0x7a   : > { %734 = vperm.xlu2 %7992, %v671_v10   ;;  %729 = vperm.xlu1 %7991, %v670_v11   ;;  %v13607_v11 = vmov 2131351028  }
  0x7b   : > { %724 = vperm.xlu0 %7990, %v669_v12  }
  0x82   : > { %749 = vperm.xlu2 %7992, %v674_v13   ;;  %744 = vperm.xlu1 %7991, %v673_v14  }
  0x83   : > { %739 = vperm.xlu0 %7990, %v672_v15   ;;  %v13605_v15 = vmov 2102212464  }
  0x8b   : > { %754 = vperm.xlu0 %7990, %v675_v16  }
  0xbc   : > { %v9045_v17 = vpop.permute.xlu2 %699 }
  0xbd   : > { %13687 = vst [vmem:[#allocation24_spill] sm:$0xff] %v9045_v17  ;;  %v764_v19 = vmul.f32 %v9050_v18, %v9045_v17 }
  0xbf   : > { %v780_v22 = vmul.f32 6.2831855, %v764_v19  ;;  %v13603_v19 = vmov 920167782  }
  0xc1   : > { %v9059_v23 = vadd.f32 %v9056_v21, %v780_v22 }
  0xc3   : > { %v1435_v24 = vand.u32 2139095040, %v9059_v23  ;;  %v13600_v57 = vand.u32 2147483647, %v9059_v23 }
  0xc4   : > { %v9054_v20 = vpop.permute.xlu2 %704 }
  0xc5   : > { %13688 = vst [vmem:[#allocation25_spill] sm:$0xff] %v9054_v20  ;;  %v765_v26 = vmul.f32 %v9050_v18, %v9054_v20  ;;  %v1436_v27 = vshrl.u32 %v1435_v24, 23  ;;  %v9113_v6 = vand.u32 8388607, %v13600_v57 }
  0xc7   : > { %v781_v28 = vmul.f32 6.2831855, %v765_v26  ;;  %v7451_v30 = vadd.s32 4294967169, %v1436_v27  ;;  %v3325_v27 = vld [vmem:[#allocation8 + $0x68] sm:$0xff] }
  0xc8   : > { %7808 = vmatpush.msra.mxu1 %v3325_v27  ;;  %7809 = vmatpush.msra.mxu2 %v3325_v27 }
  0xc9   : > { %v9071_v32 = vadd.f32 %v9056_v21, %v781_v28  ;;  %v1442_v35 = vadd.s32 1, %v7451_v30  ;;  %3330 = vmatpush.msra.mxu0 %v3325_v27  ;;  %7810 = vmatpush.msra.mxu3 %v3325_v27 }
  0xcb   : > { %v1590_v37 = vand.u32 2139095040, %v9071_v32  ;;  %vm1443_vm0 = vcmp.gt.s32.totalorder %v1442_v35, 0 }
  0xcc   : > { %v9062_v25 = vpop.permute.xlu2 %719  ;;  %v1444_v45 = vsel %vm1443_vm0, %v1442_v35, 0 }
  0xcd   : > { %13689 = vst [vmem:[#allocation26_spill] sm:$0xff] %v9062_v25  ;;  %v768_v29 = vmul.f32 %v9050_v18, %v9062_v25  ;;  %v1591_v42 = vshrl.u32 %v1590_v37, 23  ;;  %v1446_v50 = vand.u32 31, %v1444_v45  ;;  %v9120_v13 = vshrl.u32 %v1444_v45, 5  ;;  %v3324_v37 = vld [vmem:[#allocation8 + $0x60] sm:$0xff] }
  0xce   : > { %7811 = vmatpush.msra.mxu1 %v3324_v37  ;;  %7812 = vmatpush.msra.mxu2 %v3324_v37 }
  0xcf   : > { %v784_v33 = vmul.f32 6.2831855, %v768_v29  ;;  %v7454_v51 = vadd.s32 4294967169, %v1591_v42  ;;  %v1447_v59 = vsub.s32 32, %v1446_v50  ;;  %v1449_v8 = vshll.u32 %v13611_v7, %v1446_v50  ;;  %3331 = vmatpush.msra.mxu0 %v3324_v37  ;;  %7813 = vmatpush.msra.mxu3 %v3324_v37 }
  0xd0   : > { %v9117_v10 = vshll.u32 %v13609_v9, %v1446_v50  ;;  %v1455_v12 = vshll.u32 %v13607_v11, %v1446_v50  ;;  %v9126_v16 = vshll.u32 %v13605_v15, %v1446_v50  ;;  %v9129_v22 = vshll.u32 %v13603_v19, %v1446_v50 }
  0xd1   : > { %v9081_v39 = vadd.f32 %v9056_v21, %v784_v33  ;;  %v1597_v60 = vadd.s32 1, %v7454_v51  ;;  %v1456_v28 = vshrl.u32 %v13605_v15, %v1447_v59  ;;  %v1453_v42 = vshrl.u32 %v13607_v11, %v1447_v59  ;;  %v3313_v15 = vld [vmem:[#allocation8 + $0x8] sm:$0xff] }
  0xd2   : > { %vm1467_vm2 = vcmp.lt.s32.totalorder %v9120_v13, 4  ;;  %vm1464_vm4 = vcmp.lt.s32.totalorder %v9120_v13, 1  ;;  %vm1466_vm5 = vcmp.lt.s32.totalorder %v9120_v13, 3  ;;  %vm1465_vm6 = vcmp.lt.s32.totalorder %v9120_v13, 2 }
  0xd3   : > { %v2055_v46 = vand.u32 2139095040, %v9081_v39  ;;  %vm1598_vm1 = vcmp.gt.s32.totalorder %v1597_v60, 0 }
  0xd4   : > { %v9068_v31 = vpop.permute.xlu1 %689  ;;  %v9073_v34 = vpop.permute.xlu2 %734 }
  0xd5   : > { %13690 = vst [vmem:[#allocation27_spill] sm:$0xff] %v9068_v31  ;;  %v9075_v36 = vpop.permute.xlu0 %679  ;;  %v771_v38 = vmul.f32 %v9050_v18, %v9073_v34  ;;  %v762_v40 = vmul.f32 %v9050_v18, %v9068_v31  ;;  %v2056_v53 = vshrl.u32 %v2055_v46, 23  ;;  %v3323_v46 = vld [vmem:[#allocation8 + $0x58] sm:$0xff] }
  0xd6   : > { %13691 = vst [vmem:[#allocation28_spill] sm:$0xff] %v9073_v34  ;;  %v760_v41 = vmul.f32 %v9050_v18, %v9075_v36  ;;  %7814 = vmatpush.msra.mxu1 %v3323_v46  ;;  %7815 = vmatpush.msra.mxu2 %v3323_v46 }
  0xd7   : > { %13692 = vst [vmem:[#allocation29_spill] sm:$0xff] %v9075_v36  ;;  %v787_v43 = vmul.f32 6.2831855, %v771_v38  ;;  %v778_v47 = vmul.f32 6.2831855, %v762_v40  ;;  %v7463_v63 = vadd.s32 4294967169, %v2056_v53  ;;  %v1448_v40 = vshrl.u32 %v13611_v7, %v1447_v59  ;;  %3332 = vmatpush.msra.mxu0 %v3323_v46  ;;  %7816 = vmatpush.msra.mxu3 %v3323_v46 }
  0xd8   : > { %v776_v48 = vmul.f32 6.2831855, %v760_v41  ;;  %v1440_v38 = vor.u32 8388608, %v9113_v6  ;;  %v1450_v41 = vshrl.u32 %v13609_v9, %v1447_v59  ;;  %v3322_v53 = vld [vmem:[#allocation8 + $0x50] sm:$0xff] }
  0xd9   : > { %v9093_v52 = vadd.f32 %v9056_v21, %v787_v43  ;;  %v9096_v54 = vadd.f32 %v9056_v21, %v778_v47  ;;  %v2062_v29 = vadd.s32 1, %v7463_v63  ;;  %v1599_v43 = vsel %vm1598_vm1, %v1597_v60, 0  ;;  %7817 = vmatpush.msra.mxu1 %v3322_v53  ;;  %7818 = vmatpush.msra.mxu2 %v3322_v53 }
  0xda   : > { %v9099_v55 = vadd.f32 %v9056_v21, %v776_v48  ;;  %v1459_v47 = vshrl.u32 %v13603_v19, %v1447_v59  ;;  %v13601_v48 = vmov 1326507024   ;;  %v9148_v63 = vand.u32 31, %v1599_v43  ;;  %3333 = vmatpush.msra.mxu0 %v3322_v53  ;;  %7819 = vmatpush.msra.mxu3 %v3322_v53 }
  0xdb   : > { %13694 = vst [vmem:[#allocation31_spill] sm:$0xff] %v9093_v52  ;;  %v2520_v61 = vand.u32 2139095040, %v9093_v52  ;;  %v1125_v1 = vand.u32 2139095040, %v9096_v54  ;;  %vm2063_vm3 = vcmp.gt.s32.totalorder %v2062_v29, 0 }
  0xdc   : > { %v9087_v44 = vpop.permute.xlu1 %694  ;;  %13695 = vst [vmem:[#allocation32_spill] sm:$0xff] %v9096_v54  ;;  %v815_v2 = vand.u32 2139095040, %v9099_v55  ;;  %v9107_v3 = vpop.permute.xlu2 %749  ;;  %v9171_v37 = vsub.s32 32, %v9148_v63 }
  0xdd   : > { %13693 = vst [vmem:[#allocation30_spill] sm:$0xff] %v9087_v44  ;;  %v763_v49 = vmul.f32 %v9050_v18, %v9087_v44  ;;  %v9101_v56 = vpop.permute.xlu0 %684  ;;  %v2521_v24 = vshrl.u32 %v2520_v61, 23  ;;  %v774_v26 = vmul.f32 %v9050_v18, %v9107_v3  ;;  %v1126_v30 = vshrl.u32 %v1125_v1, 23 }
  0xde   : > { %13696 = vst [vmem:[#allocation33_spill] sm:$0xff] %v9101_v56  ;;  %v761_v4 = vmul.f32 %v9050_v18, %v9101_v56  ;;  %v816_v33 = vshrl.u32 %v815_v2, 23  ;;  %v1451_v1 = vor.u32 %v1450_v41, %v1449_v8  ;;  %v2064_v8 = vsel %vm2063_vm3, %v2062_v29, 0 }
  0xdf   : > { %v779_v58 = vmul.f32 6.2831855, %v763_v49  ;;  %13697 = vst [vmem:[#allocation34_spill] sm:$0xff] %v9107_v3  ;;  %v1462_v49 = vshrl.u32 %v13601_v48, %v1447_v59  ;;  %v7472_v50 = vadd.s32 4294967169, %v2521_v24  ;;  %v790_v51 = vmul.f32 6.2831855, %v774_v26 }
  0xe0   : > { %v777_v35 = vmul.f32 6.2831855, %v761_v4  ;;  %v7445_v60 = vadd.s32 4294967169, %v1126_v30  ;;  %v7439_v61 = vadd.s32 4294967169, %v816_v33  ;;  %v3321_v59 = vld [vmem:[#allocation8 + $0x48] sm:$0xff]  ;;  %v1468_v30 = vsel %vm1464_vm4, %v1448_v40, %v1451_v1 }
  0xe1   : > { %v9123_v14 = vadd.f32 %v9056_v21, %v779_v58  ;;  %v9142_v58 = vor.u32 %v1456_v28, %v1455_v12  ;;  %v1454_v12 = vor.u32 %v1453_v42, %v9117_v10  ;;  %v1463_v24 = vor.u32 %v1462_v49, %v9129_v22  ;;  %v3320_v28 = vld [vmem:[#allocation8 + $0x40] sm:$0xff]  ;;  %7820 = vmatpush.msra.mxu1 %v3321_v59  ;;  %v3319_v42 = vld [vmem:[#allocation8 + $0x38] sm:$0xff] }
  0xe2   : > { %v9146_v62 = vadd.f32 %v9056_v21, %v777_v35  ;;  %v2527_v26 = vadd.s32 1, %v7472_v50  ;;  %v9161_v27 = vadd.f32 %v9056_v21, %v790_v51  ;;  %v1132_v33 = vadd.s32 1, %v7445_v60  ;;  %7821 = vmatpush.msra.mxu2 %v3321_v59  ;;  %3334 = vmatpush.msra.mxu0 %v3321_v59  ;;  %v3318_v51 = vld [vmem:[#allocation8 + $0x30] sm:$0xff] }
  0xe3   : > { %13698 = vst [vmem:[#allocation35_spill] sm:$0xff] %v9123_v14  ;;  %v1280_v45 = vand.u32 2139095040, %v9123_v14  ;;  %v1469_v2 = vsel %vm1467_vm2, %v9142_v58, 2102212464  ;;  %v822_v35 = vadd.s32 1, %v7439_v61  ;;  %v9168_v29 = vshrl.u32 %v1599_v43, 5  ;;  %7822 = vmatpush.msra.mxu3 %v3321_v59  ;;  %7823 = vmatpush.msra.mxu1 %v3320_v28 }
  0xe4   : > { %v9154_v5 = vpop.permute.xlu1 %714  ;;  %13700 = vst [vmem:[#allocation37_spill] sm:$0xff] %v9161_v27  ;;  %v970_v10 = vand.u32 2139095040, %v9146_v62  ;;  %v1470_v22 = vsel %vm1466_vm5, %v1454_v12, %v1469_v2  ;;  %v9178_v46 = vand.u32 31, %v2064_v8  ;;  %7824 = vmatpush.msra.mxu2 %v3320_v28  ;;  %v1477_v43 = vsel %vm1467_vm2, %v1463_v24, 1326507024  ;;  %3335 = vmatpush.msra.mxu0 %v3320_v28  ;;  %v3317_v59 = vld [vmem:[#allocation8 + $0x28] sm:$0xff] }
  0xe5   : > { %v1281_v4 = vshrl.u32 %v1280_v45, 23  ;;  %13699 = vst [vmem:[#allocation36_spill] sm:$0xff] %v9154_v5  ;;  %v767_v41 = vmul.f32 %v9050_v18, %v9154_v5  ;;  %v9175_v40 = vpop.permute.xlu0 %709  ;;  %v1460_v45 = vor.u32 %v1459_v47, %v9126_v16  ;;  %vm2528_vm7 = vcmp.gt.s32.totalorder %v2527_v26, 0  ;;  %7825 = vmatpush.msra.mxu3 %v3320_v28  ;;  %7826 = vmatpush.msra.mxu1 %v3319_v42 }
  0xe6   : > { %13701 = vst [vmem:[#allocation38_spill] sm:$0xff] %v9175_v40  ;;  %v2985_v50 = vand.u32 2139095040, %v9161_v27  ;;  %v9186_v53 = vsel %vm1465_vm6, %v1468_v30, %v1470_v22  ;;  %v1472_v16 = vsel %vm1464_vm4, %v1451_v1, %v1454_v12  ;;  %vm1133_vm8 = vcmp.gt.s32.totalorder %v1132_v33, 0  ;;  %7827 = vmatpush.msra.mxu2 %v3319_v42  ;;  %3336 = vmatpush.msra.mxu0 %v3319_v42 }
  0xe7   : > { %v7448_v49 = vadd.s32 4294967169, %v1281_v4  ;;  %vm823_vm9 = vcmp.gt.s32.totalorder %v822_v35, 0  ;;  %v971_v47 = vshrl.u32 %v970_v10, 23  ;;  %v766_v60 = vmul.f32 %v9050_v18, %v9175_v40  ;;  %7828 = vmatpush.msra.mxu3 %v3319_v42  ;;  %7829 = vmatpush.msra.mxu1 %v3318_v51 }
  0xe8   : > { %v783_v61 = vmul.f32 6.2831855, %v767_v41  ;;  %v1476_v2 = vsel %vm1464_vm4, %v1454_v12, %v9142_v58  ;;  %v1478_v4 = vsel %vm1466_vm5, %v1460_v45, %v1477_v43  ;;  %v9199_v1 = vshll.u32 %v1440_v38, 8  ;;  %7830 = vmatpush.msra.mxu2 %v3318_v51  ;;  %v3316_v41 = vld [vmem:[#allocation8 + $0x20] sm:$0xff]  ;;  %3337 = vmatpush.msra.mxu0 %v3318_v51 }
  0xe9   : > { %v9201_v24 = vshrl.u32 %v2064_v8, 5  ;;  %v9204_v28 = vsub.s32 32, %v9178_v46  ;;  %v1287_v30 = vadd.s32 1, %v7448_v49  ;;  %v1473_v10 = vsel %vm1467_vm2, %v1460_v45, 920167782  ;;  %7831 = vmatpush.msra.mxu3 %v3318_v51  ;;  %7832 = vmatpush.msra.mxu1 %v3317_v59 }
  0xea   : > { %v2529_v12 = vsel %vm2528_vm7, %v2527_v26, 0  ;;  %v1134_v22 = vsel %vm1133_vm8, %v1132_v33, 0  ;;  %v824_v6 = vsel %vm823_vm9, %v822_v35, 0  ;;  %v2986_v38 = vshrl.u32 %v2985_v50, 23  ;;  %7833 = vmatpush.msra.mxu2 %v3317_v59  ;;  %v3315_v33 = vld [vmem:[#allocation8 + $0x18] sm:$0xff]  ;;  %3338 = vmatpush.msra.mxu0 %v3317_v59 }
  0xeb   : > { %v7442_v8 = vadd.s32 4294967169, %v971_v47  ;;  %v782_v42 = vmul.f32 6.2831855, %v766_v60  ;;  %v1479_v49 = vsel %vm1465_vm6, %v1476_v2, %v1478_v4  ;;  %v9214_v43 = vshrl.u32 %v9199_v1, 16  ;;  %7834 = vmatpush.msra.mxu3 %v3317_v59  ;;  %7835 = vmatpush.msra.mxu1 %v3316_v41 }
  0xec   : > { %v9217_v26 = vadd.f32 %v9056_v21, %v783_v61  ;;  %v1474_v35 = vsel %vm1466_vm5, %v9142_v58, %v1473_v10  ;;  %v9223_v45 = vand.u32 65535, %v9199_v1  ;;  %v1483_v50 = vand.u32 65535, %v1479_v49  ;;  %7836 = vmatpush.msra.mxu2 %v3316_v41  ;;  %v9235_v4 = vpop.permute.xlu1 %729  ;;  %v3314_v10 = vld [vmem:[#allocation8 + $0x10] sm:$0xff]  ;;  %3339 = vmatpush.msra.mxu0 %v3316_v41 }
  0xed   : > { %v9225_v51 = vshrl.u32 %v2529_v12, 5  ;;  %v9227_v47 = vand.u32 31, %v2529_v12  ;;  %v9229_v60 = vshrl.u32 %v1134_v22, 5  ;;  %vm1288_vm10 = vcmp.gt.s32.totalorder %v1287_v30, 0  ;;  %13707 = vst [vmem:[#allocation44_spill] sm:$0xff] %v9235_v4  ;;  %7837 = vmatpush.msra.mxu3 %v3316_v41  ;;  %7838 = vmatpush.msra.mxu1 %v3315_v33  ;;  %v9267_v7 = vpop.permute.xlu0 %724 }
  0xee   : > { %13702 = vst [vmem:[#allocation39_spill] sm:$0xff] %v9217_v26  ;;  %v9231_v61 = vand.u32 31, %v1134_v22  ;;  %v9233_v2 = vand.u32 31, %v824_v6  ;;  %v7481_v58 = vadd.s32 4294967169, %v2986_v38  ;;  %v1484_v57 = vshrl.u32 %v1479_v49, 16  ;;  %7839 = vmatpush.msra.mxu2 %v3315_v33  ;;  %3340 = vmatpush.msra.mxu0 %v3315_v33 }
  0xef   : > { %13703 = vst [vmem:[#allocation40_spill] sm:$0xff] %v9225_v51  ;;  %v977_v59 = vadd.s32 1, %v7442_v8  ;;  %v9238_v12 = vadd.f32 %v9056_v21, %v782_v42  ;;  %v1475_v48 = vsel %vm1465_vm6, %v1472_v16, %v1474_v35  ;;  %v9243_v22 = vmul.u32 %v1483_v50, %v9214_v43  ;;  %7840 = vmatpush.msra.mxu3 %v3315_v33 }
  0xf0   : > { %13704 = vst [vmem:[#allocation41_spill] sm:$0xff] %v9227_v47  ;;  %v1289_v38 = vsel %vm1288_vm10, %v1287_v30, 0  ;;  %v1900_v19 = vand.u32 2139095040, %v9217_v26  ;;  %v1485_v49 = vmul.u32 %v1483_v50, %v9223_v45  ;;  %v1486_v41 = vmul.u32 %v1484_v57, %v9223_v45  ;;  %7841 = vmatpush.msra.mxu1 %v3314_v10  ;;  %7842 = vmatpush.msra.mxu2 %v3314_v10  ;;  %v3312_v50 = vld [vmem:[#allocation8] sm:$0xff] }
  0xf1   : > { %13705 = vst [vmem:[#allocation42_spill] sm:$0xff] %v9229_v60  ;;  %v9250_v8 = vsub.s32 32, %v9227_v47  ;;  %v9252_v13 = vshrl.u32 %v824_v6, 5  ;;  %v770_v16 = vmul.f32 %v9050_v18, %v9235_v4  ;;  %v1505_v42 = vand.u32 65535, %v1475_v48  ;;  %3341 = vmatpush.msra.mxu0 %v3314_v10  ;;  %7843 = vmatpush.msra.mxu3 %v3314_v10 }
  0xf2   : > { %13706 = vst [vmem:[#allocation43_spill] sm:$0xff] %v9231_v61  ;;  %v9257_v30 = vsub.s32 32, %v9231_v61  ;;  %v9260_v35 = vsub.s32 32, %v9233_v2  ;;  %v1488_v33 = vmul.u32 %v1484_v57, %v9214_v43  ;;  %v1489_v11 = vshll.u32 %v1486_v41, 16  ;;  %7844 = vmatpush.msra.mxu1 %v3313_v15  ;;  %7845 = vmatpush.msra.mxu2 %v3313_v15 }
  0xf3   : > { %13708 = vst [vmem:[#allocation45_spill] sm:$0xff] %v9238_v12  ;;  %v9263_v6 = vadd.s32 1, %v7481_v58  ;;  %v9265_v9 = vand.u32 31, %v1289_v38  ;;  %vm978_vm11 = vcmp.gt.s32.totalorder %v977_v59, 0  ;;  %v1491_v0 = vshll.u32 %v9243_v22, 16  ;;  %3342 = vmatpush.msra.mxu0 %v3313_v15  ;;  %7846 = vmatpush.msra.mxu3 %v3313_v15 }
  0xf4   : > { %13709 = vst [vmem:[#allocation46_spill] sm:$0xff] %v9250_v8  ;;  %v1901_v3 = vshrl.u32 %v1900_v19, 23  ;;  %v1745_v34 = vand.u32 2139095040, %v9238_v12  ;;  %vm1493_vm12 = vc.u32 %v1485_v49, %v1489_v11  ;;  %v1495_v4 = vadd.s32 %v1489_v11, %v1485_v49  ;;  %7847 = vmatpush.msra.mxu1 %v3312_v50  ;;  %7848 = vmatpush.msra.mxu2 %v3312_v50 }
  0xf5   : > { %13710 = vst [vmem:[#allocation47_spill] sm:$0xff] %v9257_v30  ;;  %v786_v57 = vmul.f32 6.2831855, %v770_v16  ;;  %v13714_v58 = vmov 0   ;;  %v1506_v25 = vshrl.u32 %v1475_v48, 16  ;;  %v1509_v5 = vmul.u32 %v1505_v42, %v9214_v43  ;;  %3343 = vmatpush.msra.mxu0 %v3312_v50  ;;  %7849 = vmatpush.msra.mxu3 %v3312_v50 }
  0xf6   : > { %13711 = vst [vmem:[#allocation48_spill] sm:$0xff] %v9263_v6  ;;  %v1494_v10 = vsel %vm1493_vm12, 1, %v13714_v58  ;;  %v979_v40 = vsel %vm978_vm11, %v977_v59, 0  ;;  %v769_v44 = vmul.f32 %v9050_v18, %v9267_v7  ;;  %vm1497_vm13 = vc.u32 %v1495_v4, %v1491_v0 }
  0xf7   : > { %13712 = vst [vmem:[#allocation49_spill] sm:$0xff] %v9265_v9  ;;  %v1496_v19 = vadd.s32 %v1494_v10, %v1488_v33  ;;  %v1490_v11 = vshrl.u32 %v1486_v41, 16  ;;  %v1498_v15 = vsel %vm1497_vm13, 1, %v13714_v58  ;;  %v1507_v49 = vmul.u32 %v1505_v42, %v9223_v45 }
  0xf8   : > { %13713 = vst [vmem:[#allocation50_spill] sm:$0xff] %v9267_v7  ;;  %v1508_v16 = vmul.u32 %v1506_v25, %v9223_v45  ;;  %v9279_v48 = vshrl.u32 %v1289_v38, 5  ;;  %v9282_v20 = vsub.s32 32, %v9265_v9  ;;  %v7460_v59 = vadd.s32 4294967169, %v1901_v3 }
  0xf9   : > { %v1500_v17 = vadd.s32 %v1498_v15, %v1496_v19  ;;  %v1746_v31 = vshrl.u32 %v1745_v34, 23  ;;  %v1510_v33 = vmul.u32 %v1506_v25, %v9214_v43  ;;  %v1513_v4 = vshll.u32 %v1509_v5, 16 }
  0xfa   : > { %13715 = vst [vmem:[#allocation51_spill] sm:$0xff] %v9279_v48  ;;  %v1511_v0 = vshll.u32 %v1508_v16, 16  ;;  %v9285_v50 = vshrl.u32 %v979_v40, 5  ;;  %v9288_v41 = vadd.f32 %v9056_v21, %v786_v57  ;;  %v9290_v42 = vmul.f32 6.2831855, %v769_v44 }
  0xfb   : > { %13716 = vst [vmem:[#allocation52_spill] sm:$0xff] %v9282_v20  ;;  %v1492_v38 = vshrl.u32 %v9243_v22, 16  ;;  %v1501_v10 = vadd.s32 %v1500_v17, %v1490_v11  ;;  %v9294_v19 = vand.u32 31, %v979_v40  ;;  %v1525_v34 = vmul.u32 %v9199_v1, %v9186_v53 }
  0xfc   : > { %13717 = vst [vmem:[#allocation53_spill] sm:$0xff] %v9288_v41  ;;  %vm1515_vm14 = vc.u32 %v1507_v49, %v1511_v0  ;;  %v1517_v3 = vadd.s32 %v1511_v0, %v1507_v49  ;;  %v13718_v43 = vmov 683565275   ;;  %v1512_v15 = vshrl.u32 %v1508_v16, 16 }
  0xfd   : > { %v1516_v25 = vsel %vm1515_vm14, 1, %v13714_v58  ;;  %v1604_v57 = vshll.u32 %v13718_v43, %v9148_v63  ;;  %v1514_v44 = vshrl.u32 %v1509_v5, 16  ;;  %v13719_v17 = vand.u32 2147483647, %v9071_v32 }
  0xfe   : > { %v1518_v7 = vadd.s32 %v1516_v25, %v1510_v33  ;;  %vm1519_vm15 = vc.u32 %v1517_v3, %v1513_v4  ;;  %v13720_v40 = vmov 2475754826   ;;  %v9308_v0 = vadd.s32 %v1501_v10, %v1492_v38 }
  0xff   : > { %v1520_v45 = vsel %vm1519_vm15, 1, %v13714_v58  ;;  %v1594_v22 = vand.u32 8388607, %v13719_v17  ;;  %v1605_v11 = vshrl.u32 %v13720_v40, %v9171_v37  ;;  %v1607_v49 = vshll.u32 %v13720_v40, %v9148_v63 }
 0x100   : > { %v9310_v53 = vadd.s32 %v1517_v3, %v1513_v4  ;;  %v1522_v1 = vadd.s32 %v1520_v45, %v1518_v7  ;;  %v13721_v5 = vmov 2131351028   ;;  %v13722_v17 = vmov 2102212464  }
 0x101   : > { %v1608_v16 = vshrl.u32 %v13721_v5, %v9171_v37  ;;  %v1606_v33 = vor.u32 %v1605_v11, %v1604_v57  ;;  %v1610_v25 = vshll.u32 %v13721_v5, %v9148_v63  ;;  %v1611_v56 = vshrl.u32 %v13722_v17, %v9171_v37 }
 0x102   : > { %v1613_v36 = vshll.u32 %v13722_v17, %v9148_v63  ;;  %v1523_v27 = vadd.s32 %v1522_v1, %v1512_v15  ;;  %v13723_v38 = vmov 920167782   ;;  %v1595_v45 = vor.u32 8388608, %v1594_v22 }
 0x103   : > { %v1609_v6 = vor.u32 %v1608_v16, %v1607_v49  ;;  %v1614_v4 = vshrl.u32 %v13723_v38, %v9171_v37  ;;  %v1616_v7 = vshll.u32 %v13723_v38, %v9148_v63  ;;  %v1612_v10 = vor.u32 %v1611_v56, %v1610_v25 }
 0x104   : > { %v13724_v3 = vmov 1326507024   ;;  %vm1619_vm0 = vcmp.lt.s32.totalorder %v9168_v29, 1  ;;  %v1524_v11 = vadd.s32 %v1523_v27, %v1514_v44  ;;  %vm1621_vm1 = vcmp.lt.s32.totalorder %v9168_v29, 3 }
 0x105   : > { %v1617_v57 = vshrl.u32 %v13724_v3, %v9171_v37  ;;  %v1615_v51 = vor.u32 %v1614_v4, %v1613_v36  ;;  %vm1622_vm2 = vcmp.lt.s32.totalorder %v9168_v29, 4  ;;  %vm1527_vm3 = vc.u32 %v9308_v0, %v9310_v53 }
 0x106   : > { %vm1620_vm4 = vcmp.lt.s32.totalorder %v9168_v29, 2  ;;  %v1627_v56 = vsel %vm1619_vm0, %v1606_v33, %v1609_v6  ;;  %v9334_v63 = vadd.s32 1, %v7460_v59  ;;  %v1528_v22 = vadd.s32 1, %v1524_v11  ;;  %v9347_v59 = vpop.permute.xlu1 %744 }
 0x107   : > { %v1618_v15 = vor.u32 %v1617_v57, %v1616_v7  ;;  %v1628_v27 = vsel %vm1622_vm2, %v1615_v51, 920167782  ;;  %v1631_v36 = vsel %vm1619_vm0, %v1609_v6, %v1612_v10  ;;  %v7457_v44 = vadd.s32 4294967169, %v1746_v31  ;;  %13725 = vst [vmem:[#allocation54_spill] sm:$0xff] %v9347_v59 }
 0x108   : > { %v1629_v49 = vsel %vm1621_vm1, %v1612_v10, %v1628_v27  ;;  %v9344_v16 = vshll.u32 %v1595_v45, 8  ;;  %v1529_v4 = vsel %vm1527_vm3, %v1528_v22, %v1524_v11  ;;  %v9359_v11 = vadd.f32 %v9056_v21, %v9290_v42 }
 0x109   : > { %v1632_v1 = vsel %vm1622_vm2, %v1618_v15, 1326507024  ;;  %v1630_v7 = vsel %vm1620_vm4, %v1627_v56, %v1629_v49  ;;  %v1530_v31 = vadd.s32 %v1529_v4, %v1525_v34  ;;  %v9363_v56 = vmul.f32 %v9050_v18, %v9347_v59 }
 0x10a   : > { %v1633_v57 = vsel %vm1621_vm1, %v1615_v51, %v1632_v1  ;;  %v1636_v8 = vand.u32 65535, %v9344_v16  ;;  %v1637_v45 = vshrl.u32 %v9344_v16, 16  ;;  %v1660_v25 = vand.u32 65535, %v1630_v7 }
 0x10b   : > { %v1634_v27 = vsel %vm1620_vm4, %v1631_v36, %v1633_v57  ;;  %v1661_v52 = vshrl.u32 %v1630_v7, 16  ;;  %v1531_v51 = vadd.s32 536870912, %v1530_v31  ;;  %v1603_v34 = vshrl.u32 %v13718_v43, %v9171_v37 }
 0x10c   : > { %v1638_v15 = vand.u32 65535, %v1634_v27  ;;  %v1639_v47 = vshrl.u32 %v1634_v27, 16  ;;  %v9368_v22 = vsub.s32 32, %v9294_v19  ;;  %v1624_v7 = vsel %vm1622_vm2, %v1612_v10, 2102212464 }
 0x10d   : > { %v1532_v4 = vshrl.u32 %v1531_v51, 30  ;;  %v1663_v42 = vmul.u32 %v1661_v52, %v1636_v8  ;;  %vm1434_vm5 = vcmp.lt.s32.totalorder %v9059_v23, 0  ;;  %v1662_v59 = vmul.u32 %v1660_v25, %v1636_v8 }
 0x10e   : > { %v1640_v36 = vmul.u32 %v1638_v15, %v1636_v8  ;;  %v1641_v49 = vmul.u32 %v1639_v47, %v1636_v8  ;;  %v1642_v1 = vmul.u32 %v1638_v15, %v1637_v45  ;;  %v1643_v21 = vmul.u32 %v1639_v47, %v1637_v45 }
 0x10f   : > { %v1664_v26 = vmul.u32 %v1660_v25, %v1637_v45  ;;  %v9373_v48 = vadd.s32 1, %v7457_v44  ;;  %v1533_v37 = vshll.u32 %v1532_v4, 30  ;;  %v1623_v20 = vsel %vm1619_vm0, %v1603_v34, %v1606_v33 }
 0x110   : > { %v1644_v57 = vshll.u32 %v1641_v49, 16  ;;  %v1646_v27 = vshll.u32 %v1642_v1, 16  ;;  %v1666_v9 = vshll.u32 %v1663_v42, 16  ;;  %v1625_v15 = vsel %vm1621_vm1, %v1609_v6, %v1624_v7 }
 0x111   : > { %v13648_v47 = vand.u32 2147483647, %v9081_v39  ;;  %v9380_v51 = vsub.s32 %v1530_v31, %v1533_v37  ;;  %v1645_v14 = vshrl.u32 %v1641_v49, 16  ;;  %v1665_v25 = vmul.u32 %v1661_v52, %v1637_v45 }
 0x112   : > { %vm1648_vm6 = vc.u32 %v1640_v36, %v1644_v57  ;;  %v1650_v10 = vadd.s32 %v1644_v57, %v1640_v36  ;;  %v1668_v12 = vshll.u32 %v1664_v26, 16  ;;  %vm1670_vm8 = vc.u32 %v1662_v59, %v1666_v9  ;;  %v9388_v36 = vpop.permute.xlu0 %739 }
 0x113   : > { %v1649_v8 = vsel %vm1648_vm6, 1, %v13714_v58  ;;  %vm1535_vm9 = vcmp.lt.s32.totalorder %v9380_v51, 0  ;;  %v1536_v33 = vsub.s32 0, %v9380_v51  ;;  %v1626_v6 = vsel %vm1620_vm4, %v1623_v20, %v1625_v15  ;;  %13726 = vst [vmem:[#allocation55_spill] sm:$0xff] %v9388_v36 }
 0x114   : > { %v1651_v44 = vadd.s32 %v1649_v8, %v1643_v21  ;;  %vm1652_vm7 = vc.u32 %v1650_v10, %v1646_v27  ;;  %v1647_v31 = vshrl.u32 %v1642_v1, 16  ;;  %v1671_v7 = vsel %vm1670_vm8, 1, %v13714_v58 }
 0x115   : > { %v1653_v34 = vsel %vm1652_vm7, 1, %v13714_v58  ;;  %v1672_v52 = vadd.s32 %v1666_v9, %v1662_v59  ;;  %v1537_v45 = vsel %vm1535_vm9, %v1536_v33, %v9380_v51  ;;  %v1556_v21 = vsub.s32 4, %v1532_v4 }
 0x116   : > { %v1655_v49 = vadd.s32 %v1653_v34, %v1651_v44  ;;  %v1667_v57 = vshrl.u32 %v1663_v42, 16  ;;  %v1673_v27 = vadd.s32 %v1671_v7, %v1665_v25  ;;  %v1538_v37 = vclz %v1537_v45 }
 0x117   : > { %vm1674_vm10 = vc.u32 %v1672_v52, %v1668_v12  ;;  %v2059_v20 = vand.u32 8388607, %v13648_v47  ;;  %vm1908_vm11 = vcmp.gt.s32.totalorder %v9334_v63, 0  ;;  %v9397_v29 = vmul.f32 %v9050_v18, %v9388_v36 }
 0x118   : > { %v1656_v10 = vadd.s32 %v1655_v49, %v1645_v14  ;;  %v13727_v1 = vand.u32 2147483647, %v9059_v23  ;;  %v1526_v59 = vadd.s32 %v9310_v53, %v9308_v0  ;;  %v1675_v14 = vsel %vm1674_vm10, 1, %v13714_v58 }
 0x119   : > { %v9408_v42 = vadd.s32 %v1672_v52, %v1668_v12  ;;  %v7452_v15 = vadd.s32 4294967294, %v1538_v37  ;;  %v1669_v25 = vshrl.u32 %v1664_v26, 16  ;;  %v1677_v44 = vadd.s32 %v1675_v14, %v1673_v27 }
 0x11a   : > { %vm9401_vm12 = vcmp.le.f32.partialorder %v13727_v1, 0.7853982  ;;  %v9410_v8 = vadd.s32 %v1656_v10, %v1647_v31  ;;  %v1557_v18 = vsel %vm1434_vm5, %v1556_v21, %v1532_v4  ;;  %v1680_v33 = vmul.u32 %v9344_v16, %v1626_v6 }
 0x11b   : > { %v2069_v34 = vshll.u32 %v13718_v43, %v9178_v46  ;;  %v2070_v0 = vshrl.u32 %v13720_v40, %v9204_v28  ;;  %vm7453_vm13 = vcmp.lt.s32.totalorder %v7452_v15, 0  ;;  %v1678_v53 = vadd.s32 %v1677_v44, %v1667_v57 }
 0x11c   : > { %v2060_v12 = vor.u32 8388608, %v2059_v20  ;;  %v2072_v31 = vshll.u32 %v13720_v40, %v9178_v46  ;;  %v1541_v49 = vsel %vm7453_vm13, 0, %v7452_v15  ;;  %vm1682_vm14 = vc.u32 %v9410_v8, %v9408_v42 }
 0x11d   : > { %v2073_v26 = vshrl.u32 %v13721_v5, %v9204_v28  ;;  %v2075_v16 = vshll.u32 %v13721_v5, %v9178_v46  ;;  %v1542_v4 = vsub.s32 32, %v1541_v49  ;;  %v1543_v6 = vshll.u32 %v9380_v51, %v1541_v49 }
 0x11e   : > { %v1546_v7 = vsub.s32 4294967266, %v1541_v49  ;;  %v1679_v52 = vadd.s32 %v1678_v53, %v1669_v25  ;;  %v9428_v45 = vor.u32 %v2070_v0, %v2069_v34  ;;  %v2076_v21 = vshrl.u32 %v13722_v17, %v9204_v28 }
 0x11f   : > { %v2078_v57 = vshll.u32 %v13722_v17, %v9178_v46  ;;  %v2079_v27 = vshrl.u32 %v13723_v38, %v9204_v28  ;;  %v1544_v37 = vshrl.u32 %v1526_v59, %v1542_v4  ;;  %v2081_v1 = vshll.u32 %v13723_v38, %v9178_v46 }
 0x120   : > { %v1547_v10 = vadd.s32 127, %v1546_v7  ;;  %v1683_v20 = vadd.s32 1, %v1679_v52  ;;  %v9438_v51 = vor.u32 %v2073_v26, %v2072_v31  ;;  %v9440_v14 = vor.u32 %v2076_v21, %v2075_v16 }
 0x121   : > { %v2080_v15 = vor.u32 %v2079_v27, %v2078_v57  ;;  %v2082_v25 = vshrl.u32 %v13724_v3, %v9204_v28  ;;  %v1545_v44 = vor.u32 %v1544_v37, %v1543_v6  ;;  %vm2084_vm15 = vcmp.lt.s32.totalorder %v9201_v24, 1 }
 0x122   : > { %v1548_v34 = vshll.u32 %v1547_v10, 23  ;;  %v1684_v0 = vsel %vm1682_vm14, %v1683_v20, %v1679_v52  ;;  %vm2086_vm0 = vcmp.lt.s32.totalorder %v9201_v24, 3  ;;  %vm2087_vm1 = vcmp.lt.s32.totalorder %v9201_v24, 4 }
 0x123   : > { %v1685_v59 = vadd.s32 %v1684_v0, %v1680_v33  ;;  %v2083_v53 = vor.u32 %v2082_v25, %v2081_v1  ;;  %v1909_v46 = vsel %vm1908_vm11, %v9334_v63, 0  ;;  %v1552_v49 = vcvt.s32.f32 %v1545_v44 }
 0x124   : > { %v1549_v31 = vor.u32 4788187, %v1548_v34  ;;  %v1559_v26 = vsel %vm9401_vm12, 0, %v1557_v18  ;;  %vm2085_vm2 = vcmp.lt.s32.totalorder %v9201_v24, 2  ;;  %v2092_v33 = vsel %vm2084_vm15, %v9428_v45, %v9438_v51 }
 0x125   : > { %v1686_v16 = vadd.s32 536870912, %v1685_v59  ;;  %v2093_v4 = vsel %vm2087_vm1, %v2080_v15, 920167782  ;;  %v13730_v6 = vand.u32 2139095040, %v9288_v41  ;;  %v2096_v52 = vsel %vm2084_vm15, %v9438_v51, %v9440_v14 }
 0x126   : > { %v1550_v63 = vand.u32 2147483647, %v1549_v31  ;;  %v2094_v18 = vsel %vm2086_vm0, %v9440_v14, %v2093_v4  ;;  %v2097_v27 = vsel %vm2087_vm1, %v2083_v53, 1326507024  ;;  %v9478_v37 = vshll.u32 %v2060_v12, 8 }
 0x127   : > { %v9464_v7 = vshrl.u32 %v13730_v6, 23  ;;  %v9474_v57 = vshrl.u32 %v1686_v16, 30  ;;  %v1576_v20 = vadd.s32 3, %v1559_v26  ;;  %v2095_v1 = vsel %vm2085_vm2, %v2092_v33, %v2094_v18 }
 0x128   : > { %v1553_v10 = vmul.f32 %v1552_v49, %v1550_v63  ;;  %v2098_v25 = vsel %vm2086_vm0, %v2080_v15, %v2097_v27  ;;  %v9485_v44 = vmul.f32 6.2831855, %v9363_v56  ;;  %v2101_v53 = vand.u32 65535, %v9478_v37 }
 0x129   : > { %v1688_v34 = vshll.u32 %v9474_v57, 30  ;;  %v2099_v0 = vsel %vm2085_vm2, %v2096_v52, %v2098_v25  ;;  %v2102_v31 = vshrl.u32 %v9478_v37, 16  ;;  %v9492_v16 = vshrl.u32 %v1909_v46, 5 }
 0x12a   : > { %13731 = vst [vmem:[#allocation56_spill] sm:$0xff] %v9485_v44  ;;  %v1554_v12 = vxor.u32 2147483648, %v1553_v10  ;;  %v2103_v49 = vand.u32 65535, %v2099_v0  ;;  %v2104_v26 = vshrl.u32 %v2099_v0, 16  ;;  %v2068_v56 = vshrl.u32 %v13718_v43, %v9204_v28 }
 0x12b   : > { %13732 = vst [vmem:[#allocation57_spill] sm:$0xff] %v9492_v16  ;;  %v9494_v33 = vsub.s32 %v1685_v59, %v1688_v34  ;;  %v2126_v15 = vshrl.u32 %v2095_v1, 16  ;;  %v9498_v4 = vand.u32 31, %v1909_v46  ;;  %v9502_v63 = vand.u32 3, %v1576_v20 }
 0x12c   : > { %v1555_v6 = vsel %vm1434_vm5, %v1554_v12, %v1553_v10  ;;  %v2106_v18 = vmul.u32 %v2104_v26, %v2101_v53  ;;  %v2125_v27 = vand.u32 65535, %v2095_v1  ;;  %v2105_v46 = vmul.u32 %v2103_v49, %v2101_v53 }
 0x12d   : > { %13733 = vst [vmem:[#allocation58_spill] sm:$0xff] %v9498_v4  ;;  %v9507_v52 = vsel %vm9401_vm12, %v9059_v23, %v1555_v6  ;;  %vm1690_vm3 = vcmp.lt.s32.totalorder %v9494_v33, 0  ;;  %v1691_v59 = vsub.s32 0, %v9494_v33  ;;  %v9513_v25 = vmul.u32 %v2103_v49, %v2102_v31 }
 0x12e   : > { %v1560_v28 = vmul.f32 %v9507_v52, %v9507_v52  ;;  %v2109_v10 = vshll.u32 %v2106_v18, 16  ;;  %v1681_v20 = vadd.s32 %v9408_v42, %v9410_v8  ;;  %v9521_v9 = vsel %vm2084_vm15, %v2068_v56, %v9428_v45 }
 0x12f   : > { %v1692_v34 = vsel %vm1690_vm3, %v1691_v59, %v9494_v33  ;;  %v9523_v0 = vmul.u32 %v2126_v15, %v2101_v53  ;;  %v2108_v21 = vmul.u32 %v2104_v26, %v2102_v31  ;;  %vm1589_vm4 = vcmp.lt.s32.totalorder %v9071_v32, 0 }
 0x130   : > { %v1561_v1 = vmul.f32 -0.001358992, %v1560_v28  ;;  %v1568_v12 = vmul.f32 -0.00019511016, %v1560_v28  ;;  %v1693_v6 = vclz %v1692_v34  ;;  %v1711_v49 = vsub.s32 4, %v9474_v57 }
 0x131   : > { %v2089_v42 = vsel %vm2087_vm1, %v9440_v14, 2102212464  ;;  %v2111_v8 = vshll.u32 %v9513_v25, 16  ;;  %v2127_v59 = vmul.u32 %v2125_v27, %v2101_v53  ;;  %vm2113_vm5 = vc.u32 %v2105_v46, %v2109_v10 }
 0x132   : > { %v1562_v47 = vadd.f32 0.041655596, %v1561_v1  ;;  %v1569_v45 = vadd.f32 0.008332121, %v1568_v12  ;;  %v7455_v56 = vadd.s32 4294967294, %v1693_v6  ;;  %v2114_v36 = vsel %vm2113_vm5, 1, %v13714_v58 }
 0x133   : > { %v2115_v41 = vadd.s32 %v2109_v10, %v2105_v46  ;;  %v2129_v34 = vmul.u32 %v2125_v27, %v2102_v31  ;;  %v2131_v26 = vshll.u32 %v9523_v0, 16  ;;  %v2116_v30 = vadd.s32 %v2114_v36, %v2108_v21 }
 0x134   : > { %v1563_v16 = vmul.f32 %v1562_v47, %v1560_v28  ;;  %v1570_v60 = vmul.f32 %v1569_v45, %v1560_v28  ;;  %vm7456_vm6 = vcmp.lt.s32.totalorder %v7455_v56, 0  ;;  %v2110_v54 = vshrl.u32 %v2106_v18, 16 }
 0x135   : > { %v1696_v61 = vsel %vm7456_vm6, 0, %v7455_v56  ;;  %vm2117_vm7 = vc.u32 %v2115_v41, %v2111_v8  ;;  %v2130_v14 = vmul.u32 %v2126_v15, %v2102_v31  ;;  %v13734_v1 = vand.u32 2147483647, %v9071_v32 }
 0x136   : > { %v1564_v44 = vadd.f32 -0.4999988, %v1563_v16  ;;  %v1571_v53 = vadd.f32 -0.16666654, %v1570_v60  ;;  %v1697_v46 = vsub.s32 32, %v1696_v61  ;;  %v1698_v27 = vshll.u32 %v9494_v33, %v1696_v61 }
 0x137   : > { %vm9535_vm8 = vcmp.le.f32.partialorder %v13734_v1, 0.7853982  ;;  %vm1579_vm9 = vcmp.eq.s32.totalorder %v9502_v63, 0  ;;  %v1701_v47 = vsub.s32 4294967266, %v1696_v61  ;;  %v2118_v36 = vsel %vm2117_vm7, 1, %v13714_v58 }
 0x138   : > { %v2133_v21 = vshll.u32 %v2129_v34, 16  ;;  %vm2135_vm10 = vc.u32 %v2127_v59, %v2131_v26  ;;  %v1565_v41 = vmul.f32 %v1564_v44, %v1560_v28  ;;  %v1572_v31 = vmul.f32 %v1571_v53, %v1560_v28 }
 0x139   : > { %v1699_v16 = vshrl.u32 %v1681_v20, %v1697_v46  ;;  %v2120_v60 = vadd.s32 %v2118_v36, %v2116_v30  ;;  %v1702_v15 = vadd.s32 127, %v1701_v47  ;;  %v2112_v18 = vshrl.u32 %v9513_v25, 16 }
 0x13a   : > { %v2136_v10 = vsel %vm2135_vm10, 1, %v13714_v58  ;;  %v2137_v6 = vadd.s32 %v2131_v26, %v2127_v59  ;;  %v1566_v8 = vadd.f32 1.0, %v1565_v41  ;;  %v1573_v45 = vadd.f32 1.0, %v1572_v31 }
 0x13b   : > { %v1700_v33 = vor.u32 %v1699_v16, %v1698_v27  ;;  %v2121_v56 = vadd.s32 %v2120_v60, %v2110_v54  ;;  %v1703_v1 = vshll.u32 %v1702_v15, 23  ;;  %v2090_v61 = vsel %vm2086_vm0, %v9438_v51, %v2089_v42 }
 0x13c   : > { %v2138_v4 = vadd.s32 %v2136_v10, %v2130_v14  ;;  %vm2139_vm11 = vc.u32 %v2137_v6, %v2133_v21  ;;  %v1574_v44 = vmul.f32 %v1573_v45, %v9507_v52  ;;  %v1583_v30 = vxor.u32 2147483648, %v1566_v8 }
 0x13d   : > { %v1712_v28 = vsel %vm1589_vm4, %v1711_v49, %v9474_v57  ;;  %v2132_v25 = vshrl.u32 %v9523_v0, 16  ;;  %v1704_v20 = vor.u32 4788187, %v1703_v1  ;;  %v1707_v59 = vcvt.s32.f32 %v1700_v33 }
 0x13e   : > { %v2134_v26 = vshrl.u32 %v2129_v34, 16  ;;  %v2140_v54 = vsel %vm2139_vm11, 1, %v13714_v58  ;;  %v1580_v53 = vxor.u32 2147483648, %v1574_v44  ;;  %v9553_v46 = vadd.s32 %v2121_v56, %v2112_v18 }
 0x13f   : > { %v9555_v51 = vadd.s32 %v2137_v6, %v2133_v21  ;;  %v2142_v42 = vadd.s32 %v2140_v54, %v2138_v4  ;;  %vm1582_vm12 = vcmp.eq.s32.totalorder %v9502_v63, 2  ;;  %v1705_v52 = vand.u32 2147483647, %v1704_v20 }
 0x140   : > { %v2091_v57 = vsel %vm2085_vm2, %v9521_v9, %v2090_v61  ;;  %v812_v0 = vand.u32 2147483647, %v9099_v55  ;;  %vm1578_vm13 = vcmp.lt.s32.totalorder %v9502_v63, 2  ;;  %v1581_v49 = vsel %vm1579_vm9, %v1566_v8, %v1580_v53 }
 0x141   : > { %v1584_v34 = vsel %vm1582_vm12, %v1583_v30, %v1574_v44  ;;  %v2143_v14 = vadd.s32 %v2142_v42, %v2132_v25  ;;  %vm1575_vm14 = vweird.f32 %v9059_v23  ;;  %v1708_v4 = vmul.f32 %v1707_v59, %v1705_v52 }
 0x142   : > { %v1585_v27 = vsel %vm1578_vm13, %v1581_v49, %v1584_v34  ;;  %v1714_v47 = vsel %vm9535_vm8, 0, %v1712_v28  ;;  %v2145_v24 = vmul.u32 %v9478_v37, %v2091_v57  ;;  %vm2147_vm15 = vc.u32 %v9553_v46, %v9555_v51 }
 0x143   : > { %v1586_v36 = vsel %vm1575_vm14, nan, %v1585_v27  ;;  %v2144_v21 = vadd.s32 %v2143_v14, %v2134_v26  ;;  %vm1753_vm0 = vcmp.gt.s32.totalorder %v9373_v48, 0  ;;  %v1709_v63 = vxor.u32 2147483648, %v1708_v4 }
 0x144   : > { %3356 = vmatmul.f32.vlgmr.msra.gmra.mxu1 %v1586_v36  ;;  %v819_v9 = vand.u32 8388607, %v812_v0  ;;  %v830_v23 = vshrl.u32 %v13720_v40, %v9260_v35  ;;  %v833_v41 = vshrl.u32 %v13721_v5, %v9260_v35  ;;  %v832_v37 = vshll.u32 %v13720_v40, %v9233_v2 }
 0x145   : > { %v2148_v31 = vadd.s32 1, %v2144_v21  ;;  %v836_v16 = vshrl.u32 %v13722_v17, %v9260_v35  ;;  %v839_v60 = vshrl.u32 %v13723_v38, %v9260_v35  ;;  %v1710_v15 = vsel %vm1589_vm4, %v1709_v63, %v1708_v4 }
 0x146   : > { %v835_v18 = vshll.u32 %v13721_v5, %v9233_v2  ;;  %v841_v10 = vshll.u32 %v13723_v38, %v9233_v2  ;;  %v842_v6 = vshrl.u32 %v13724_v3, %v9260_v35  ;;  %v9595_v8 = vsel %vm9535_vm8, %v9071_v32, %v1710_v15 }
 0x147   : > { %v2149_v45 = vsel %vm2147_vm15, %v2148_v31, %v2144_v21  ;;  %v9600_v33 = vor.u32 %v833_v41, %v832_v37  ;;  %v838_v56 = vshll.u32 %v13722_v17, %v9233_v2  ;;  %v1715_v1 = vmul.f32 %v9595_v8, %v9595_v8 }
 0x148   : > { %v2150_v61 = vadd.s32 %v2149_v45, %v2145_v24  ;;  %v9606_v44 = vor.u32 %v836_v16, %v835_v18  ;;  %v843_v30 = vor.u32 %v842_v6, %v841_v10  ;;  %v1731_v28 = vadd.s32 3, %v1714_v47 }
 0x149   : > { %v820_v12 = vor.u32 8388608, %v819_v9  ;;  %v829_v25 = vshll.u32 %v13718_v43, %v9233_v2  ;;  %v840_v20 = vor.u32 %v839_v60, %v838_v56  ;;  %v1716_v59 = vmul.f32 -0.001358992, %v1715_v1 }
 0x14a   : > { %v1723_v26 = vmul.f32 -0.00019511016, %v1715_v1  ;;  %v2151_v54 = vadd.s32 536870912, %v2150_v61  ;;  %vm847_vm1 = vcmp.lt.s32.totalorder %v9252_v13, 4  ;;  %vm844_vm2 = vcmp.lt.s32.totalorder %v9252_v13, 1 }
 0x14b   : > { %v831_v53 = vor.u32 %v830_v23, %v829_v25  ;;  %vm846_vm3 = vcmp.lt.s32.totalorder %v9252_v13, 3  ;;  %v857_v42 = vsel %vm847_vm1, %v843_v30, 1326507024  ;;  %v1717_v52 = vadd.f32 0.041655596, %v1716_v59 }
 0x14c   : > { %v1724_v57 = vadd.f32 0.008332121, %v1723_v26  ;;  %v9615_v49 = vshrl.u32 %v2151_v54, 30  ;;  %v856_v2 = vsel %vm844_vm2, %v9600_v33, %v9606_v44  ;;  %v1732_v34 = vand.u32 3, %v1731_v28 }
 0x14d   : > { %v853_v14 = vsel %vm847_vm1, %v840_v20, 920167782  ;;  %v858_v27 = vsel %vm846_vm3, %v840_v20, %v857_v42  ;;  %v9625_v4 = vshll.u32 %v820_v12, 8  ;;  %v1718_v47 = vmul.f32 %v1717_v52, %v1715_v1 }
 0x14e   : > { %v1725_v36 = vmul.f32 %v1724_v57, %v1715_v1  ;;  %v2153_v21 = vshll.u32 %v9615_v49, 30  ;;  %vm845_vm4 = vcmp.lt.s32.totalorder %v9252_v13, 2  ;;  %v9632_v24 = vsel %vm1753_vm0, %v9373_v48, 0 }
 0x14f   : > { %v9635_v63 = vmul.f32 6.2831855, %v9397_v29  ;;  %v852_v9 = vsel %vm844_vm2, %v831_v53, %v9600_v33  ;;  %v859_v23 = vsel %vm845_vm4, %v856_v2, %v858_v27  ;;  %v1719_v41 = vadd.f32 -0.4999988, %v1718_v47 }
 0x150   : > { %v1726_v31 = vadd.f32 -0.16666654, %v1725_v36  ;;  %v9642_v37 = vsub.s32 %v2150_v61, %v2153_v21  ;;  %v854_v16 = vsel %vm846_vm3, %v9606_v44, %v853_v14  ;;  %v861_v48 = vand.u32 65535, %v9625_v4 }
 0x151   : > { %v9649_v29 = vshrl.u32 %v9625_v4, 16  ;;  %v863_v60 = vand.u32 65535, %v859_v23  ;;  %v864_v15 = vshrl.u32 %v859_v23, 16  ;;  %v1720_v18 = vmul.f32 %v1719_v41, %v1715_v1 }
 0x152   : > { %v1727_v10 = vmul.f32 %v1726_v31, %v1715_v1  ;;  %vm1733_vm5 = vcmp.lt.s32.totalorder %v1732_v34, 2  ;;  %vm2155_vm6 = vcmp.lt.s32.totalorder %v9642_v37, 0  ;;  %v2156_v6 = vsub.s32 0, %v9642_v37 }
 0x153   : > { %vm1730_vm7 = vweird.f32 %v9071_v32  ;;  %vm1734_vm8 = vcmp.eq.s32.totalorder %v1732_v34, 0  ;;  %v828_v45 = vshrl.u32 %v13718_v43, %v9260_v35  ;;  %v855_v56 = vsel %vm845_vm4, %v852_v9, %v854_v16 }
 0x154   : > { %v866_v61 = vmul.u32 %v864_v15, %v861_v48  ;;  %v1721_v30 = vadd.f32 1.0, %v1720_v18  ;;  %v1728_v28 = vadd.f32 1.0, %v1727_v10  ;;  %v2157_v12 = vsel %vm2155_vm6, %v2156_v6, %v9642_v37 }
 0x155   : > { %v867_v1 = vmul.u32 %v863_v60, %v9649_v29  ;;  %vm1737_vm9 = vcmp.eq.s32.totalorder %v1732_v34, 2  ;;  %vm2054_vm10 = vcmp.lt.s32.totalorder %v9081_v39, 0  ;;  %v2146_v25 = vadd.s32 %v9555_v51, %v9553_v46 }
 0x156   : > { %v2158_v20 = vclz %v2157_v12  ;;  %v869_v59 = vshll.u32 %v866_v61, 16  ;;  %v1729_v35 = vmul.f32 %v1728_v28, %v9595_v8  ;;  %v1738_v26 = vxor.u32 2147483648, %v1721_v30 }
 0x157   : > { %v9666_v54 = vsel %vm844_vm2, %v828_v45, %v831_v53  ;;  %v865_v42 = vmul.u32 %v863_v60, %v861_v48  ;;  %v2176_v57 = vsub.s32 4, %v9615_v49  ;;  %v868_v2 = vmul.u32 %v864_v15, %v9649_v29 }
 0x158   : > { %v7464_v52 = vadd.s32 4294967294, %v2158_v20  ;;  %v885_v14 = vand.u32 65535, %v855_v56  ;;  %v1735_v27 = vxor.u32 2147483648, %v1729_v35  ;;  %v13737_v47 = vand.u32 2147483647, %v9081_v39 }
 0x159   : > { %v871_v51 = vshll.u32 %v867_v1, 16  ;;  %vm873_vm12 = vc.u32 %v865_v42, %v869_v59  ;;  %v875_v8 = vadd.s32 %v869_v59, %v865_v42  ;;  %v1739_v53 = vsel %vm1737_vm9, %v1738_v26, %v1729_v35 }
 0x15a   : > { %vm9672_vm11 = vcmp.le.f32.partialorder %v13737_v47, 0.7853982  ;;  %vm7465_vm13 = vcmp.lt.s32.totalorder %v7464_v52, 0  ;;  %v874_v36 = vsel %vm873_vm12, 1, %v13714_v58  ;;  %v886_v21 = vshrl.u32 %v855_v56, 16 }
 0x15b   : > { %v1736_v9 = vsel %vm1734_vm8, %v1721_v30, %v1735_v27  ;;  %v2161_v23 = vsel %vm7465_vm13, 0, %v7464_v52  ;;  %v876_v41 = vadd.s32 %v874_v36, %v868_v2  ;;  %vm877_vm14 = vc.u32 %v875_v8, %v871_v51 }
 0x15c   : > { %v1740_v31 = vsel %vm1733_vm5, %v1736_v9, %v1739_v53  ;;  %v2162_v16 = vsub.s32 32, %v2161_v23  ;;  %v2166_v60 = vsub.s32 4294967266, %v2161_v23  ;;  %v870_v15 = vshrl.u32 %v866_v61, 16 }
 0x15d   : > { %v1741_v18 = vsel %vm1730_vm7, nan, %v1740_v31  ;;  %v878_v10 = vsel %vm877_vm14, 1, %v13714_v58  ;;  %v888_v6 = vmul.u32 %v886_v21, %v861_v48  ;;  %v889_v45 = vmul.u32 %v885_v14, %v9649_v29 }
 0x15e   : > { %3359 = vmatmul.f32.gmra.mxu1 %v1741_v18  ;;  %v2163_v56 = vshll.u32 %v9642_v37, %v2161_v23  ;;  %v2164_v30 = vshrl.u32 %v2146_v25, %v2162_v16  ;;  %v2167_v28 = vadd.s32 127, %v2166_v60  ;;  %v880_v12 = vadd.s32 %v878_v10, %v876_v41 }
 0x15f   : > { %v2177_v34 = vsel %vm2054_vm10, %v2176_v57, %v9615_v49  ;;  %v849_v32 = vsel %vm847_vm1, %v9606_v44, 2102212464  ;;  %v887_v61 = vmul.u32 %v885_v14, %v861_v48  ;;  %v891_v20 = vshll.u32 %v888_v6, 16 }
 0x160   : > { %v2165_v59 = vor.u32 %v2164_v30, %v2163_v56  ;;  %v2168_v35 = vshll.u32 %v2167_v28, 23  ;;  %v872_v26 = vshrl.u32 %v867_v1, 16  ;;  %v881_v42 = vadd.s32 %v880_v12, %v870_v15 }
 0x161   : > { %v890_v52 = vmul.u32 %v886_v21, %v9649_v29  ;;  %v893_v37 = vshll.u32 %v889_v45, 16  ;;  %vm895_vm15 = vc.u32 %v887_v61, %v891_v20  ;;  %v897_v25 = vadd.s32 %v891_v20, %v887_v61 }
 0x162   : > { %v2169_v2 = vor.u32 4788187, %v2168_v35  ;;  %v2179_v27 = vsel %vm9672_vm11, 0, %v2177_v34  ;;  %v850_v49 = vsel %vm846_vm3, %v9600_v33, %v849_v32  ;;  %v896_v44 = vsel %vm895_vm15, 1, %v13714_v58 }
 0x163   : > { %v9698_v48 = vadd.s32 %v881_v42, %v872_v26  ;;  %v898_v57 = vadd.s32 %v896_v44, %v890_v52  ;;  %vm899_vm0 = vc.u32 %v897_v25, %v893_v37  ;;  %v967_v1 = vand.u32 2147483647, %v9146_v62 }
 0x164   : > { %v9702_v29 = vadd.s32 4294967169, %v9464_v7  ;;  %v2170_v14 = vand.u32 2147483647, %v2169_v2  ;;  %v2172_v47 = vcvt.s32.f32 %v2165_v59  ;;  %v900_v51 = vsel %vm899_vm0, 1, %v13714_v58 }
 0x165   : > { %v13740_v8 = vand.u32 2139095040, %v9359_v11  ;;  %v892_v33 = vshrl.u32 %v888_v6, 16  ;;  %v9709_v36 = vadd.s32 %v897_v25, %v893_v37  ;;  %v902_v21 = vadd.s32 %v900_v51, %v898_v57 }
 0x166   : > { %v2173_v9 = vmul.f32 %v2172_v47, %v2170_v14  ;;  %v2196_v23 = vadd.s32 3, %v2179_v27  ;;  %v851_v41 = vsel %vm845_vm4, %v9666_v54, %v850_v49  ;;  %v894_v7 = vshrl.u32 %v889_v45, 16 }
 0x167   : > { %v9707_v53 = vshrl.u32 %v13740_v8, 23  ;;  %v903_v31 = vadd.s32 %v902_v21, %v892_v33  ;;  %vm907_vm1 = vc.u32 %v9698_v48, %v9709_v36  ;;  %v974_v16 = vand.u32 8388607, %v967_v1 }
 0x168   : > { %v988_v60 = vshrl.u32 %v13721_v5, %v9368_v22  ;;  %v2174_v15 = vxor.u32 2147483648, %v2173_v9  ;;  %v984_v18 = vshll.u32 %v13718_v43, %v9294_v19  ;;  %v985_v10 = vshrl.u32 %v13720_v40, %v9368_v22 }
 0x169   : > { %v991_v13 = vshrl.u32 %v13722_v17, %v9368_v22  ;;  %v904_v54 = vadd.s32 %v903_v31, %v894_v7  ;;  %v987_v6 = vshll.u32 %v13720_v40, %v9294_v19  ;;  %v990_v45 = vshll.u32 %v13721_v5, %v9294_v19 }
 0x16a   : > { %v994_v56 = vshrl.u32 %v13723_v38, %v9368_v22  ;;  %v2175_v30 = vsel %vm2054_vm10, %v2174_v15, %v2173_v9  ;;  %v993_v28 = vshll.u32 %v13722_v17, %v9294_v19  ;;  %v996_v12 = vshll.u32 %v13723_v38, %v9294_v19 }
 0x16b   : > { %v997_v34 = vshrl.u32 %v13724_v3, %v9368_v22  ;;  %v9743_v32 = vsel %vm9672_vm11, %v9081_v39, %v2175_v30  ;;  %v908_v61 = vadd.s32 1, %v904_v54  ;;  %v9745_v20 = vor.u32 %v988_v60, %v987_v6  ;;  %v13741_v6 = vld [vmem:[#allocation58_spill] sm:$0xff]  ;;  %v13742_v30 = vld [vmem:[#allocation56_spill] sm:$0xff] }
 0x16c   : > { %v992_v59 = vor.u32 %v991_v13, %v990_v45  ;;  %v2180_v35 = vmul.f32 %v9743_v32, %v9743_v32  ;;  %v905_v26 = vmul.u32 %v9625_v4, %v851_v41  ;;  %v975_v42 = vor.u32 8388608, %v974_v16 }
 0x16d   : > { %v998_v52 = vor.u32 %v997_v34, %v996_v12  ;;  %v909_v19 = vsel %vm907_vm1, %v908_v61, %v904_v54  ;;  %v9753_v37 = vor.u32 %v985_v10, %v984_v18  ;;  %v995_v46 = vor.u32 %v994_v56, %v993_v28  ;;  %v9792_v56 = vld [vmem:[#allocation5] ss:$0 sm:$0xff] }
 0x16e   : > { %vm999_vm2 = vcmp.lt.s32.totalorder %v9285_v50, 1  ;;  %v2181_v25 = vmul.f32 -0.001358992, %v2180_v35  ;;  %v2188_v2 = vmul.f32 -0.00019511016, %v2180_v35  ;;  %v910_v27 = vadd.s32 %v909_v19, %v905_v26 }
 0x16f   : > { %vm1002_vm3 = vcmp.lt.s32.totalorder %v9285_v50, 4  ;;  %v9757_v49 = vand.u32 3, %v2196_v23  ;;  %vm1000_vm4 = vcmp.lt.s32.totalorder %v9285_v50, 2  ;;  %v1011_v4 = vsel %vm999_vm2, %v9745_v20, %v992_v59 }
 0x170   : > { %v1012_v44 = vsel %vm1002_vm3, %v998_v52, 1326507024  ;;  %v2182_v57 = vadd.f32 0.041655596, %v2181_v25  ;;  %v2189_v14 = vadd.f32 0.008332121, %v2188_v2  ;;  %v1007_v51 = vsel %vm999_vm2, %v9753_v37, %v9745_v20 }
 0x171   : > { %v911_v47 = vadd.s32 536870912, %v910_v27  ;;  %vm1001_vm5 = vcmp.lt.s32.totalorder %v9285_v50, 3  ;;  %v1008_v8 = vsel %vm1002_vm3, %v995_v46, 920167782  ;;  %v9774_v21 = vshll.u32 %v975_v42, 8 }
 0x172   : > { %v1013_v33 = vsel %vm1001_vm5, %v995_v46, %v1012_v44  ;;  %v2183_v9 = vmul.f32 %v2182_v57, %v2180_v35  ;;  %v2190_v23 = vmul.f32 %v2189_v14, %v2180_v35  ;;  %v1009_v54 = vsel %vm1001_vm5, %v992_v59, %v1008_v8 }
 0x173   : > { %v9776_v41 = vshrl.u32 %v911_v47, 30  ;;  %v1014_v7 = vsel %vm1000_vm4, %v1011_v4, %v1013_v33  ;;  %v9781_v31 = vand.u32 65535, %v9774_v21  ;;  %v9784_v16 = vshrl.u32 %v9774_v21, 16 }
 0x174   : > { %v1018_v60 = vand.u32 65535, %v1014_v7  ;;  %v1019_v15 = vshrl.u32 %v1014_v7, 16  ;;  %v2184_v18 = vadd.f32 -0.4999988, %v2183_v9  ;;  %v2191_v10 = vadd.f32 -0.16666654, %v2190_v23 }
 0x175   : > { %v913_v13 = vshll.u32 %v9776_v41, 30  ;;  %v9790_v45 = vsub.s32 32, %v13741_v6  ;;  %v9796_v28 = vadd.f32 %v9792_v56, %v13742_v30  ;;  %vm2198_vm6 = vcmp.lt.s32.totalorder %v9757_v49, 2 }
 0x176   : > { %v1021_v12 = vmul.u32 %v1019_v15, %v9781_v31  ;;  %v9800_v34 = vmul.u32 %v1018_v60, %v9784_v16  ;;  %v2185_v61 = vmul.f32 %v2184_v18, %v2180_v35  ;;  %v2192_v26 = vmul.f32 %v2191_v10, %v2180_v35 }
 0x177   : > { %vm2199_vm7 = vcmp.eq.s32.totalorder %v9757_v49, 0  ;;  %v914_v42 = vsub.s32 %v910_v27, %v913_v13  ;;  %vm2195_vm8 = vweird.f32 %v9081_v39  ;;  %v1004_v52 = vsel %vm1002_vm3, %v992_v59, 2102212464 }
 0x178   : > { %v1010_v19 = vsel %vm1000_vm4, %v1007_v51, %v1009_v54  ;;  %v1020_v46 = vmul.u32 %v1018_v60, %v9781_v31  ;;  %v1024_v25 = vshll.u32 %v1021_v12, 16  ;;  %v2186_v2 = vadd.f32 1.0, %v2185_v61 }
 0x179   : > { %v2193_v4 = vadd.f32 1.0, %v2192_v26  ;;  %vm814_vm9 = vcmp.lt.s32.totalorder %v9099_v55, 0  ;;  %vm915_vm10 = vcmp.lt.s32.totalorder %v914_v42, 0  ;;  %v916_v35 = vsub.s32 0, %v914_v42 }
 0x17a   : > { %v1023_v44 = vmul.u32 %v1019_v15, %v9784_v16  ;;  %v1026_v27 = vshll.u32 %v9800_v34, 16  ;;  %vm1028_vm11 = vc.u32 %v1020_v46, %v1024_v25  ;;  %v1030_v57 = vadd.s32 %v1024_v25, %v1020_v46 }
 0x17b   : > { %v2194_v59 = vmul.f32 %v2193_v4, %v9743_v32  ;;  %v2203_v14 = vxor.u32 2147483648, %v2186_v2  ;;  %v917_v47 = vsel %vm915_vm10, %v916_v35, %v914_v42  ;;  %v1029_v51 = vsel %vm1028_vm11, 1, %v13714_v58 }
 0x17c   : > { %v918_v8 = vclz %v917_v47  ;;  %v983_v33 = vshrl.u32 %v13718_v43, %v9368_v22  ;;  %v1031_v9 = vadd.s32 %v1029_v51, %v1023_v44  ;;  %vm1032_vm12 = vc.u32 %v1030_v57, %v1026_v27  ;;  %v13745_v47 = vld [vmem:[#allocation32_spill] sm:$0xff] }
 0x17d   : > { %v2200_v23 = vxor.u32 2147483648, %v2194_v59  ;;  %vm2202_vm13 = vcmp.eq.s32.totalorder %v9757_v49, 2  ;;  %vm9820_vm14 = vcmp.le.f32.partialorder %v812_v0, 0.7853982  ;;  %v1033_v32 = vsel %vm1032_vm12, 1, %v13714_v58 }
 0x17e   : > { %v1040_v60 = vand.u32 65535, %v1010_v19  ;;  %v7440_v15 = vadd.s32 4294967294, %v918_v8  ;;  %v936_v18 = vsub.s32 4, %v9776_v41  ;;  %v1003_v22 = vsel %vm999_vm2, %v983_v33, %v9753_v37 }
 0x17f   : > { %v1005_v10 = vsel %vm1001_vm5, %v9745_v20, %v1004_v52  ;;  %v2201_v0 = vsel %vm2199_vm7, %v2186_v2, %v2200_v23  ;;  %v2204_v13 = vsel %vm2202_vm13, %v2203_v14, %v2194_v59  ;;  %v1035_v54 = vadd.s32 %v1033_v32, %v1031_v9 }
 0x180   : > { %v1041_v30 = vshrl.u32 %v1010_v19, 16  ;;  %v2205_v61 = vsel %vm2198_vm6, %v2201_v0, %v2204_v13  ;;  %v906_v26 = vadd.s32 %v9709_v36, %v9698_v48  ;;  %vm7441_vm15 = vcmp.lt.s32.totalorder %v7440_v15, 0  ;;  %v13747_v13 = vld [vmem:[#allocation47_spill] sm:$0xff] }
 0x181   : > { %v1025_v46 = vshrl.u32 %v1021_v12, 16  ;;  %v2206_v37 = vsel %vm2195_vm8, nan, %v2205_v61  ;;  %v921_v25 = vsel %vm7441_vm15, 0, %v7440_v15  ;;  %v1044_v52 = vmul.u32 %v1040_v60, %v9784_v16 }
 0x182   : > { %v1043_v20 = vmul.u32 %v1041_v30, %v9781_v31  ;;  %3368 = vmatmul.f32.vlgmr.msra.gmra.mxu2 %v2206_v37  ;;  %v922_v2 = vsub.s32 32, %v921_v25  ;;  %v926_v4 = vsub.s32 4294967266, %v921_v25  ;;  %v937_v49 = vsel %vm814_vm9, %v936_v18, %v9776_v41 }
 0x183   : > { %v9847_v48 = vsel %vm1000_vm4, %v1003_v22, %v1005_v10  ;;  %v1027_v36 = vshrl.u32 %v9800_v34, 16  ;;  %v1036_v39 = vadd.s32 %v1035_v54, %v1025_v46  ;;  %v1042_v12 = vmul.u32 %v1040_v60, %v9781_v31  ;;  %v13746_v22 = vld [vmem:[#allocation43_spill] sm:$0xff] }
 0x184   : > { %v1046_v19 = vshll.u32 %v1043_v20, 16  ;;  %v923_v35 = vshll.u32 %v914_v42, %v921_v25  ;;  %v924_v44 = vshrl.u32 %v906_v26, %v922_v2  ;;  %v927_v27 = vadd.s32 127, %v926_v4 }
 0x185   : > { %v1045_v57 = vmul.u32 %v1041_v30, %v9784_v16  ;;  %v1048_v59 = vshll.u32 %v1044_v52, 16  ;;  %v1122_v41 = vand.u32 2147483647, %v13745_v47  ;;  %v939_v8 = vsel %vm9820_vm14, 0, %v937_v49 }
 0x186   : > { %vm1050_vm0 = vc.u32 %v1042_v12, %v1046_v19  ;;  %v1052_v14 = vadd.s32 %v1046_v19, %v1042_v12  ;;  %v925_v51 = vor.u32 %v924_v44, %v923_v35  ;;  %v928_v50 = vshll.u32 %v927_v27, 23 }
 0x187   : > { %v1051_v34 = vsel %vm1050_vm0, 1, %v13714_v58  ;;  %v9856_v33 = vadd.s32 %v1036_v39, %v1027_v36  ;;  %v1047_v31 = vshrl.u32 %v1043_v20, 16  ;;  %v1049_v23 = vshrl.u32 %v1044_v52, 16 }
 0x188   : > { %v1053_v42 = vadd.s32 %v1051_v34, %v1045_v57  ;;  %vm1054_vm1 = vc.u32 %v1052_v14, %v1048_v59  ;;  %v929_v9 = vor.u32 4788187, %v928_v50  ;;  %v9859_v32 = vadd.s32 %v1052_v14, %v1048_v59  ;;  %v13748_v14 = vld [vmem:[#allocation42_spill] sm:$0xff] }
 0x189   : > { %v1055_v16 = vsel %vm1054_vm1, 1, %v13714_v58  ;;  %v932_v60 = vcvt.s32.f32 %v925_v51  ;;  %v1129_v18 = vand.u32 8388607, %v1122_v41  ;;  %v1139_v10 = vshll.u32 %v13718_v43, %v13746_v22 }
 0x18a   : > { %v1057_v15 = vadd.s32 %v1055_v16, %v1053_v42  ;;  %v930_v0 = vand.u32 2147483647, %v929_v9  ;;  %v1140_v54 = vshrl.u32 %v13720_v40, %v13747_v13  ;;  %v1142_v30 = vshll.u32 %v13720_v40, %v13746_v22 }
 0x18b   : > { %v1143_v61 = vshrl.u32 %v13721_v5, %v13747_v13  ;;  %v1145_v46 = vshll.u32 %v13721_v5, %v13746_v22  ;;  %v1146_v37 = vshrl.u32 %v13722_v17, %v13747_v13  ;;  %v1148_v25 = vshll.u32 %v13722_v17, %v13746_v22 }
 0x18c   : > { %v1058_v26 = vadd.s32 %v1057_v15, %v1047_v31  ;;  %v933_v20 = vmul.f32 %v932_v60, %v930_v0  ;;  %v956_v52 = vadd.s32 3, %v939_v8  ;;  %vm1062_vm2 = vc.u32 %v9856_v33, %v9859_v32 }
 0x18d   : > { %v1149_v2 = vshrl.u32 %v13723_v38, %v13747_v13  ;;  %v1130_v49 = vor.u32 8388608, %v1129_v18  ;;  %v1151_v36 = vshll.u32 %v13723_v38, %v13746_v22  ;;  %v1152_v39 = vshrl.u32 %v13724_v3, %v13747_v13 }
 0x18e   : > { %v1059_v4 = vadd.s32 %v1058_v26, %v1049_v23  ;;  %v934_v12 = vxor.u32 2147483648, %v933_v20  ;;  %v9885_v19 = vor.u32 %v1140_v54, %v1139_v10  ;;  %v9887_v35 = vor.u32 %v1143_v61, %v1142_v30 }
 0x18f   : > { %v1150_v44 = vor.u32 %v1149_v2, %v1148_v25  ;;  %v1147_v57 = vor.u32 %v1146_v37, %v1145_v46  ;;  %v1153_v59 = vor.u32 %v1152_v39, %v1151_v36  ;;  %vm1157_vm3 = vcmp.lt.s32.totalorder %v13748_v14, 4 }
 0x190   : > { %v1063_v27 = vadd.s32 1, %v1059_v4  ;;  %v9891_v51 = vshrl.u32 %v9632_v24, 5  ;;  %v935_v50 = vsel %vm814_vm9, %v934_v12, %v933_v20  ;;  %v1060_v8 = vmul.u32 %v9774_v21, %v9847_v48 }
 0x191   : > { %vm1154_vm4 = vcmp.lt.s32.totalorder %v13748_v14, 1  ;;  %v9901_v34 = vsel %vm9820_vm14, %v9099_v55, %v935_v50  ;;  %v9903_v31 = vand.u32 3, %v956_v52  ;;  %vm1156_vm5 = vcmp.lt.s32.totalorder %v13748_v14, 3 }
 0x192   : > { %v1064_v42 = vsel %vm1062_vm2, %v1063_v27, %v1059_v4  ;;  %v940_v9 = vmul.f32 %v9901_v34, %v9901_v34  ;;  %vm1155_vm6 = vcmp.lt.s32.totalorder %v13748_v14, 2  ;;  %v1163_v21 = vsel %vm1157_vm3, %v1150_v44, 920167782 }
 0x193   : > { %v1065_v23 = vadd.s32 %v1064_v42, %v1060_v8  ;;  %v1162_v7 = vsel %vm1154_vm4, %v9885_v19, %v9887_v35  ;;  %v1166_v48 = vsel %vm1154_vm4, %v9887_v35, %v1147_v57  ;;  %v1167_v16 = vsel %vm1157_vm3, %v1153_v59, 1326507024 }
 0x194   : > { %v9923_v60 = vshll.u32 %v1130_v49, 8  ;;  %v941_v15 = vmul.f32 -0.001358992, %v940_v9  ;;  %v948_v18 = vmul.f32 -0.00019511016, %v940_v9  ;;  %v1168_v10 = vsel %vm1156_vm5, %v1150_v44, %v1167_v16 }
 0x195   : > { %v1066_v22 = vadd.s32 536870912, %v1065_v23  ;;  %v1164_v0 = vsel %vm1156_vm5, %v1147_v57, %v1163_v21  ;;  %v1169_v54 = vsel %vm1155_vm6, %v1166_v48, %v1168_v10  ;;  %v9936_v20 = vand.u32 31, %v9632_v24 }
 0x196   : > { %v1171_v30 = vand.u32 65535, %v9923_v60  ;;  %v1172_v61 = vshrl.u32 %v9923_v60, 16  ;;  %v942_v26 = vadd.f32 0.041655596, %v941_v15  ;;  %v949_v46 = vadd.f32 0.008332121, %v948_v18 }
 0x197   : > { %v9933_v37 = vshrl.u32 %v1066_v22, 30  ;;  %v1173_v25 = vand.u32 65535, %v1169_v54  ;;  %v9939_v52 = vadd.s32 1, %v9702_v29  ;;  %v9943_v2 = vadd.f32 %v9792_v56, %v9635_v63 }
 0x198   : > { %v1174_v4 = vshrl.u32 %v1169_v54, 16  ;;  %v943_v49 = vmul.f32 %v942_v26, %v940_v9  ;;  %v950_v36 = vmul.f32 %v949_v46, %v940_v9  ;;  %v1165_v12 = vsel %vm1155_vm6, %v1162_v7, %v1164_v0 }
 0x199   : > { %v1068_v39 = vshll.u32 %v9933_v37, 30  ;;  %v1138_v44 = vshrl.u32 %v13718_v43, %v13747_v13  ;;  %v1175_v24 = vmul.u32 %v1173_v25, %v1171_v30  ;;  %v9950_v59 = vmul.u32 %v1173_v25, %v1172_v61 }
 0x19a   : > { %v1176_v27 = vmul.u32 %v1174_v4, %v1171_v30  ;;  %v944_v29 = vadd.f32 -0.4999988, %v943_v49  ;;  %v951_v50 = vadd.f32 -0.16666654, %v950_v36  ;;  %vm962_vm7 = vcmp.eq.s32.totalorder %v9903_v31, 2 }
 0x19b   : > { %v9953_v63 = vsub.s32 %v1065_v23, %v1068_v39  ;;  %v1195_v56 = vand.u32 65535, %v1165_v12  ;;  %vm959_vm8 = vcmp.eq.s32.totalorder %v9903_v31, 0  ;;  %v1178_v8 = vmul.u32 %v1174_v4, %v1172_v61 }
 0x19c   : > { %v1179_v42 = vshll.u32 %v1176_v27, 16  ;;  %v1181_v21 = vshll.u32 %v9950_v59, 16  ;;  %v1196_v7 = vshrl.u32 %v1165_v12, 16  ;;  %v945_v48 = vmul.f32 %v944_v29, %v940_v9 }
 0x19d   : > { %v952_v13 = vmul.f32 %v951_v50, %v940_v9  ;;  %vm958_vm9 = vcmp.lt.s32.totalorder %v9903_v31, 2  ;;  %vm1070_vm10 = vcmp.lt.s32.totalorder %v9953_v63, 0  ;;  %v1071_v16 = vsub.s32 0, %v9953_v63 }
 0x19e   : > { %vm955_vm11 = vweird.f32 %v9099_v55  ;;  %v1061_v23 = vadd.s32 %v9859_v32, %v9856_v33  ;;  %v1159_v15 = vsel %vm1157_vm3, %v1147_v57, 2102212464  ;;  %vm1183_vm12 = vc.u32 %v1175_v24, %v1179_v42 }
 0x19f   : > { %v1185_v18 = vadd.s32 %v1179_v42, %v1175_v24  ;;  %v946_v22 = vadd.f32 1.0, %v945_v48  ;;  %v953_v10 = vadd.f32 1.0, %v952_v13  ;;  %v1072_v9 = vsel %vm1070_vm10, %v1071_v16, %v9953_v63 }
 0x1a0   : > { %v1184_v0 = vsel %vm1183_vm12, 1, %v13714_v58  ;;  %vm969_vm13 = vcmp.lt.s32.totalorder %v9146_v62, 0  ;;  %v1073_v54 = vclz %v1072_v9  ;;  %v1199_v46 = vmul.u32 %v1195_v56, %v1172_v61 }
 0x1a1   : > { %v1186_v26 = vadd.s32 %v1184_v0, %v1178_v8  ;;  %vm1187_vm14 = vc.u32 %v1185_v18, %v1181_v21  ;;  %v954_v25 = vmul.f32 %v953_v10, %v9901_v34  ;;  %v963_v33 = vxor.u32 2147483648, %v946_v22  ;;  %v13749_v0 = vld [vmem:[#allocation45_spill] sm:$0xff] }
 0x1a2   : > { %v1188_v32 = vsel %vm1187_vm14, 1, %v13714_v58  ;;  %v1198_v57 = vmul.u32 %v1196_v7, %v1171_v30  ;;  %v7443_v4 = vadd.s32 4294967294, %v1073_v54  ;;  %v1158_v49 = vsel %vm1154_vm4, %v1138_v44, %v9885_v19 }
 0x1a3   : > { %v1160_v36 = vsel %vm1156_vm5, %v9887_v35, %v1159_v15  ;;  %v1197_v39 = vmul.u32 %v1195_v56, %v1171_v30  ;;  %v960_v12 = vxor.u32 2147483648, %v954_v25  ;;  %v1091_v24 = vsub.s32 4, %v9933_v37 }
 0x1a4   : > { %v1180_v29 = vshrl.u32 %v1176_v27, 16  ;;  %v1190_v50 = vadd.s32 %v1188_v32, %v1186_v26  ;;  %v964_v34 = vsel %vm962_vm7, %v963_v33, %v954_v25  ;;  %vm7444_vm15 = vcmp.lt.s32.totalorder %v7443_v4, 0 }
 0x1a5   : > { %v1200_v8 = vmul.u32 %v1196_v7, %v1172_v61  ;;  %v1201_v42 = vshll.u32 %v1198_v57, 16  ;;  %v961_v21 = vsel %vm959_vm8, %v946_v22, %v960_v12  ;;  %v1076_v19 = vsel %vm7444_vm15, 0, %v7443_v4 }
 0x1a6   : > { %v1191_v44 = vadd.s32 %v1190_v50, %v1180_v29  ;;  %v1203_v48 = vshll.u32 %v1199_v46, 16  ;;  %v965_v35 = vsel %vm958_vm9, %v961_v21, %v964_v34  ;;  %v1077_v30 = vsub.s32 32, %v1076_v19 }
 0x1a7   : > { %v1081_v56 = vsub.s32 4294967266, %v1076_v19  ;;  %v1161_v27 = vsel %vm1155_vm6, %v1158_v49, %v1160_v36  ;;  %v966_v13 = vsel %vm955_vm11, nan, %v965_v35  ;;  %v1182_v61 = vshrl.u32 %v9950_v59, 16 }
 0x1a8   : > { %vm1205_vm0 = vc.u32 %v1197_v39, %v1201_v42  ;;  %v1207_v7 = vadd.s32 %v1201_v42, %v1197_v39  ;;  %3344 = vmatmul.f32.vlgmr.msra.gmra.mxu0 %v966_v13  ;;  %v1078_v16 = vshll.u32 %v9953_v63, %v1076_v19  ;;  %v1079_v15 = vshrl.u32 %v1061_v23, %v1077_v30 }
 0x1a9   : > { %v1082_v18 = vadd.s32 127, %v1081_v56  ;;  %v1206_v31 = vsel %vm1205_vm0, 1, %v13714_v58  ;;  %v1092_v22 = vsel %vm969_vm13, %v1091_v24, %v9933_v37  ;;  %v9993_v14 = vadd.s32 %v1191_v44, %v1182_v61 }
 0x1aa   : > { %v1208_v10 = vadd.s32 %v1206_v31, %v1200_v8  ;;  %vm1209_vm1 = vc.u32 %v1207_v7, %v1203_v48  ;;  %v1080_v55 = vor.u32 %v1079_v15, %v1078_v16  ;;  %v1742_v54 = vand.u32 2147483647, %v13749_v0 }
 0x1ab   : > { %v1083_v9 = vshll.u32 %v1082_v18, 23  ;;  %v1210_v59 = vsel %vm1209_vm1, 1, %v13714_v58  ;;  %v9998_v63 = vsub.s32 32, %v9936_v20  ;;  %v7466_v23 = vadd.s32 4294967169, %v9707_v53 }
 0x1ac   : > { %v1202_v26 = vshrl.u32 %v1198_v57, 16  ;;  %v1212_v25 = vadd.s32 %v1210_v59, %v1208_v10  ;;  %v2830_v33 = vand.u32 2139095040, %v9796_v28  ;;  %vm10004_vm2 = vcmp.le.f32.partialorder %v967_v1, 0.7853982 }
 0x1ad   : > { %v1084_v32 = vor.u32 4788187, %v1083_v9  ;;  %v10008_v4 = vadd.s32 %v1207_v7, %v1203_v48  ;;  %v1094_v49 = vsel %vm10004_vm2, 0, %v1092_v22  ;;  %v1204_v36 = vshrl.u32 %v1199_v46, 16 }
 0x1ae   : > { %v1213_v39 = vadd.s32 %v1212_v25, %v1202_v26  ;;  %v1215_v53 = vmul.u32 %v9923_v60, %v1161_v27  ;;  %v1087_v12 = vcvt.s32.f32 %v1080_v55  ;;  %v1749_v1 = vand.u32 8388607, %v1742_v54 }
 0x1af   : > { %v1085_v57 = vand.u32 2147483647, %v1084_v32  ;;  %vm1217_vm3 = vc.u32 %v9993_v14, %v10008_v4  ;;  %v1760_v29 = vshrl.u32 %v13720_v40, %v9998_v63  ;;  %v1763_v50 = vshrl.u32 %v13721_v5, %v9998_v63 }
 0x1b0   : > { %v1214_v24 = vadd.s32 %v1213_v39, %v1204_v36  ;;  %v1766_v46 = vshrl.u32 %v13722_v17, %v9998_v63  ;;  %v1762_v60 = vshll.u32 %v13720_v40, %v9936_v20  ;;  %v1768_v8 = vshll.u32 %v13722_v17, %v9936_v20 }
 0x1b1   : > { %v1088_v34 = vmul.f32 %v1087_v12, %v1085_v57  ;;  %v1769_v42 = vshrl.u32 %v13723_v38, %v9998_v63  ;;  %v1765_v19 = vshll.u32 %v13721_v5, %v9936_v20  ;;  %v1771_v44 = vshll.u32 %v13723_v38, %v9936_v20 }
 0x1b2   : > { %v1218_v21 = vadd.s32 1, %v1214_v24  ;;  %v1772_v48 = vshrl.u32 %v13724_v3, %v9998_v63  ;;  %v1750_v30 = vor.u32 8388608, %v1749_v1  ;;  %v1759_v56 = vshll.u32 %v13718_v43, %v9936_v20 }
 0x1b3   : > { %v1089_v35 = vxor.u32 2147483648, %v1088_v34  ;;  %v1770_v27 = vor.u32 %v1769_v42, %v1768_v8  ;;  %v10040_v61 = vor.u32 %v1763_v50, %v1762_v60  ;;  %v1767_v7 = vor.u32 %v1766_v46, %v1765_v19 }
 0x1b4   : > { %v1219_v13 = vsel %vm1217_vm3, %v1218_v21, %v1214_v24  ;;  %v1773_v16 = vor.u32 %v1772_v48, %v1771_v44  ;;  %v2675_v15 = vand.u32 2139095040, %v9943_v2  ;;  %v1111_v31 = vadd.s32 3, %v1094_v49 }
 0x1b5   : > { %v1090_v18 = vsel %vm969_vm13, %v1089_v35, %v1088_v34  ;;  %v1220_v22 = vadd.s32 %v1219_v13, %v1215_v53  ;;  %v10050_v10 = vor.u32 %v1760_v29, %v1759_v56  ;;  %vm1774_vm4 = vcmp.lt.s32.totalorder %v9891_v51, 1 }
 0x1b6   : > { %v10048_v20 = vsel %vm10004_vm2, %v9146_v62, %v1090_v18  ;;  %vm1777_vm5 = vcmp.lt.s32.totalorder %v9891_v51, 4  ;;  %vm1775_vm6 = vcmp.lt.s32.totalorder %v9891_v51, 2  ;;  %vm1776_vm7 = vcmp.lt.s32.totalorder %v9891_v51, 3 }
 0x1b7   : > { %v1095_v55 = vmul.f32 %v10048_v20, %v10048_v20  ;;  %v1221_v9 = vadd.s32 536870912, %v1220_v22  ;;  %v1783_v59 = vsel %vm1777_vm5, %v1770_v27, 920167782  ;;  %v1786_v26 = vsel %vm1774_vm4, %v10040_v61, %v1767_v7 }
 0x1b8   : > { %v1787_v25 = vsel %vm1777_vm5, %v1773_v16, 1326507024  ;;  %v10065_v37 = vshll.u32 %v1750_v30, 8  ;;  %v10071_v53 = vadd.s32 1, %v7466_v23  ;;  %v1782_v57 = vsel %vm1774_vm4, %v10050_v10, %v10040_v61 }
 0x1b9   : > { %v1096_v32 = vmul.f32 -0.001358992, %v1095_v55  ;;  %v1103_v49 = vmul.f32 -0.00019511016, %v1095_v55  ;;  %v10067_v36 = vshrl.u32 %v1221_v9, 30  ;;  %v1788_v39 = vsel %vm1776_vm7, %v1770_v27, %v1787_v25 }
 0x1ba   : > { %v1784_v12 = vsel %vm1776_vm7, %v1767_v7, %v1783_v59  ;;  %v1789_v1 = vsel %vm1775_vm6, %v1786_v26, %v1788_v39  ;;  %v10081_v50 = vand.u32 3, %v1111_v31  ;;  %v1791_v23 = vand.u32 65535, %v10065_v37 }
 0x1bb   : > { %v1097_v24 = vadd.f32 0.041655596, %v1096_v32  ;;  %v1104_v29 = vadd.f32 0.008332121, %v1103_v49  ;;  %v1223_v46 = vshll.u32 %v10067_v36, 30  ;;  %v10086_v34 = vshrl.u32 %v10065_v37, 16 }
 0x1bc   : > { %v1793_v60 = vand.u32 65535, %v1789_v1  ;;  %v1794_v8 = vshrl.u32 %v1789_v1, 16  ;;  %v1785_v44 = vsel %vm1775_vm6, %v1782_v57, %v1784_v12  ;;  %v1216_v48 = vadd.s32 %v10008_v4, %v9993_v14 }
 0x1bd   : > { %v1098_v42 = vmul.f32 %v1097_v24, %v1095_v55  ;;  %v1105_v21 = vmul.f32 %v1104_v29, %v1095_v55  ;;  %v10088_v19 = vsub.s32 %v1220_v22, %v1223_v46  ;;  %v1758_v35 = vshrl.u32 %v13718_v43, %v9998_v63 }
 0x1be   : > { %v1796_v30 = vmul.u32 %v1794_v8, %v1791_v23  ;;  %v10097_v56 = vmul.u32 %v1793_v60, %v10086_v34  ;;  %vm1124_vm8 = vcmp.lt.s32.totalorder %v13745_v47, 0  ;;  %vm1114_vm10 = vcmp.eq.s32.totalorder %v10081_v50, 0 }
 0x1bf   : > { %v1099_v27 = vadd.f32 -0.4999988, %v1098_v42  ;;  %v1106_v13 = vadd.f32 -0.16666654, %v1105_v21  ;;  %vm1225_vm9 = vcmp.lt.s32.totalorder %v10088_v19, 0  ;;  %v1226_v16 = vsub.s32 0, %v10088_v19 }
 0x1c0   : > { %vm1117_vm11 = vcmp.eq.s32.totalorder %v10081_v50, 2  ;;  %v1779_v14 = vsel %vm1777_vm5, %v1767_v7, 2102212464  ;;  %v1795_v63 = vmul.u32 %v1793_v60, %v1791_v23  ;;  %v1799_v4 = vshll.u32 %v1796_v30, 16 }
 0x1c1   : > { %v1815_v18 = vand.u32 65535, %v1785_v44  ;;  %v1100_v31 = vmul.f32 %v1099_v27, %v1095_v55  ;;  %v1107_v22 = vmul.f32 %v1106_v13, %v1095_v55  ;;  %vm1113_vm12 = vcmp.lt.s32.totalorder %v10081_v50, 2 }
 0x1c2   : > { %v1227_v9 = vsel %vm1225_vm9, %v1226_v16, %v10088_v19  ;;  %v1816_v59 = vshrl.u32 %v1785_v44, 16  ;;  %vm1110_vm13 = vweird.f32 %v9146_v62  ;;  %v1798_v25 = vmul.u32 %v1794_v8, %v10086_v34 }
 0x1c3   : > { %v1228_v26 = vclz %v1227_v9  ;;  %v1801_v32 = vshll.u32 %v10097_v56, 16  ;;  %vm1803_vm14 = vc.u32 %v1795_v63, %v1799_v4  ;;  %v1101_v49 = vadd.f32 1.0, %v1100_v31 }
 0x1c4   : > { %v1108_v7 = vadd.f32 1.0, %v1107_v22  ;;  %v1804_v39 = vsel %vm1803_vm14, 1, %v13714_v58  ;;  %v1805_v57 = vadd.s32 %v1799_v4, %v1795_v63  ;;  %v1246_v55 = vsub.s32 4, %v10067_v36 }
 0x1c5   : > { %v7446_v12 = vadd.s32 4294967294, %v1228_v26  ;;  %v1778_v1 = vsel %vm1774_vm4, %v1758_v35, %v10050_v10  ;;  %v1780_v24 = vsel %vm1776_vm7, %v10040_v61, %v1779_v14  ;;  %v1118_v46 = vxor.u32 2147483648, %v1101_v49 }
 0x1c6   : > { %v1109_v29 = vmul.f32 %v1108_v7, %v10048_v20  ;;  %v1806_v60 = vadd.s32 %v1804_v39, %v1798_v25  ;;  %vm1807_vm15 = vc.u32 %v1805_v57, %v1801_v32  ;;  %v1817_v42 = vmul.u32 %v1815_v18, %v1791_v23 }
 0x1c7   : > { %vm7447_vm0 = vcmp.lt.s32.totalorder %v7446_v12, 0  ;;  %v1808_v8 = vsel %vm1807_vm15, 1, %v13714_v58  ;;  %v1818_v21 = vmul.u32 %v1816_v59, %v1791_v23  ;;  %v1819_v16 = vmul.u32 %v1815_v18, %v10086_v34 }
 0x1c8   : > { %v1115_v44 = vxor.u32 2147483648, %v1109_v29  ;;  %v1231_v27 = vsel %vm7447_vm0, 0, %v7446_v12  ;;  %v1810_v13 = vadd.s32 %v1808_v8, %v1806_v60  ;;  %v10125_v61 = vsel %vm1124_vm8, %v1246_v55, %v10067_v36  ;;  %v13754_v12 = vld [vmem:[#allocation35_spill] sm:$0xff] }
 0x1c9   : > { %v1232_v10 = vsub.s32 32, %v1231_v27  ;;  %v1236_v35 = vsub.s32 4294967266, %v1231_v27  ;;  %v1800_v20 = vshrl.u32 %v1796_v30, 16  ;;  %v1119_v63 = vsel %vm1117_vm11, %v1118_v46, %v1109_v29 }
 0x1ca   : > { %v1116_v14 = vsel %vm1114_vm10, %v1101_v49, %v1115_v44  ;;  %v1233_v23 = vshll.u32 %v10088_v19, %v1231_v27  ;;  %v1821_v4 = vshll.u32 %v1818_v21, 16  ;;  %v1820_v9 = vmul.u32 %v1816_v59, %v10086_v34  ;;  %v13755_v44 = vld [vmem:[#allocation49_spill] sm:$0xff] }
 0x1cb   : > { %v1120_v18 = vsel %vm1113_vm12, %v1116_v14, %v1119_v63  ;;  %v1234_v31 = vshrl.u32 %v1216_v48, %v1232_v10  ;;  %v1237_v22 = vadd.s32 127, %v1236_v35  ;;  %v1811_v30 = vadd.s32 %v1810_v13, %v1800_v20 }
 0x1cc   : > { %v1121_v36 = vsel %vm1110_vm13, nan, %v1120_v18  ;;  %v1823_v26 = vshll.u32 %v1819_v16, 16  ;;  %vm1825_vm1 = vc.u32 %v1817_v42, %v1821_v4  ;;  %v1827_v19 = vadd.s32 %v1821_v4, %v1817_v42 }
 0x1cd   : > { %3347 = vmatmul.f32.gmra.mxu0 %v1121_v36  ;;  %v1235_v25 = vor.u32 %v1234_v31, %v1233_v23  ;;  %v1238_v32 = vshll.u32 %v1237_v22, 23  ;;  %v1826_v49 = vsel %vm1825_vm1, 1, %v13714_v58  ;;  %v10140_v50 = vshrl.u32 %v2830_v33, 23 }
 0x1ce   : > { %vm10144_vm2 = vcmp.le.f32.partialorder %v1122_v41, 0.7853982  ;;  %v1802_v62 = vshrl.u32 %v10097_v56, 16  ;;  %v1828_v48 = vadd.s32 %v1826_v49, %v1820_v9  ;;  %vm2373_vm3 = vcmp.gt.s32.totalorder %v9939_v52, 0 }
 0x1cf   : > { %v1239_v59 = vor.u32 4788187, %v1238_v32  ;;  %v1249_v7 = vsel %vm10144_vm2, 0, %v10125_v61  ;;  %v1781_v33 = vsel %vm1775_vm6, %v1778_v1, %v1780_v24  ;;  %vm1829_vm4 = vc.u32 %v1827_v19, %v1823_v26  ;;  %v13756_v1 = vld [vmem:[#allocation52_spill] sm:$0xff]  ;;  %v13757_v32 = vld [vmem:[#allocation51_spill] sm:$0xff] }
 0x1d0   : > { %v10155_v39 = vadd.s32 %v1811_v30, %v1802_v62  ;;  %v1822_v41 = vshrl.u32 %v1818_v21, 16  ;;  %v1830_v57 = vsel %vm1829_vm4, 1, %v13714_v58  ;;  %v1277_v55 = vand.u32 2147483647, %v13754_v12 }
 0x1d1   : > { %v1240_v56 = vand.u32 2147483647, %v1239_v59  ;;  %v1242_v29 = vcvt.s32.f32 %v1235_v25  ;;  %v1824_v46 = vshrl.u32 %v1819_v16, 16  ;;  %v1832_v60 = vadd.s32 %v1830_v57, %v1828_v48 }
 0x1d2   : > { %v10159_v8 = vadd.s32 %v1827_v19, %v1823_v26  ;;  %v1835_v42 = vmul.u32 %v10065_v37, %v1781_v33  ;;  %v1294_v51 = vshll.u32 %v13718_v43, %v13755_v44  ;;  %v1295_v24 = vshrl.u32 %v13720_v40, %v13756_v1 }
 0x1d3   : > { %v1243_v27 = vmul.f32 %v1242_v29, %v1240_v56  ;;  %v1833_v21 = vadd.s32 %v1832_v60, %v1822_v41  ;;  %v1297_v13 = vshll.u32 %v13720_v40, %v13755_v44  ;;  %v1298_v10 = vshrl.u32 %v13721_v5, %v13756_v1  ;;  %v10214_v29 = vpop.permute.xlu0 %754 }
 0x1d4   : > { %v1284_v16 = vand.u32 8388607, %v1277_v55  ;;  %v1300_v37 = vshll.u32 %v13721_v5, %v13755_v44  ;;  %v1301_v35 = vshrl.u32 %v13722_v17, %v13756_v1  ;;  %v1303_v61 = vshll.u32 %v13722_v17, %v13755_v44 }
 0x1d5   : > { %v1244_v20 = vxor.u32 2147483648, %v1243_v27  ;;  %v1834_v14 = vadd.s32 %v1833_v21, %v1824_v46  ;;  %vm1837_vm5 = vc.u32 %v10155_v39, %v10159_v8  ;;  %v1304_v63 = vshrl.u32 %v13723_v38, %v13756_v1 }
 0x1d6   : > { %v10182_v23 = vor.u32 %v1295_v24, %v1294_v51  ;;  %v10184_v4 = vor.u32 %v1298_v10, %v1297_v13  ;;  %v1306_v18 = vshll.u32 %v13723_v38, %v13755_v44  ;;  %v1307_v31 = vshrl.u32 %v13724_v3, %v13756_v1 }
 0x1d7   : > { %v1245_v22 = vsel %vm1124_vm8, %v1244_v20, %v1243_v27  ;;  %v1838_v9 = vadd.s32 1, %v1834_v14  ;;  %v1302_v36 = vor.u32 %v1301_v35, %v1300_v37  ;;  %v1305_v30 = vor.u32 %v1304_v63, %v1303_v61 }
 0x1d8   : > { %v10195_v26 = vsel %vm10144_vm2, %v13745_v47, %v1245_v22  ;;  %v1308_v25 = vor.u32 %v1307_v31, %v1306_v18  ;;  %vm1309_vm6 = vcmp.lt.s32.totalorder %v13757_v32, 1  ;;  %vm1312_vm7 = vcmp.lt.s32.totalorder %v13757_v32, 4 }
 0x1d9   : > { %v1250_v49 = vmul.f32 %v10195_v26, %v10195_v26  ;;  %v1839_v19 = vsel %vm1837_vm5, %v1838_v9, %v1834_v14  ;;  %v1285_v62 = vor.u32 8388608, %v1284_v16  ;;  %vm1311_vm8 = vcmp.lt.s32.totalorder %v13757_v32, 3  ;;  %v8356_v16 = vld [vmem:[%s13583_s3] ss:$0 sm:$0xff] }
 0x1da   : > { %v10205_v48 = vsel %vm2373_vm3, %v9939_v52, 0  ;;  %v1266_v34 = vadd.s32 3, %v1249_v7  ;;  %v1840_v59 = vadd.s32 %v1839_v19, %v1835_v42  ;;  %v1318_v33 = vsel %vm1312_vm7, %v1305_v30, 920167782 }
 0x1db   : > { %v1251_v41 = vmul.f32 -0.001358992, %v1250_v49  ;;  %v1258_v57 = vmul.f32 -0.00019511016, %v1250_v49  ;;  %vm1310_vm9 = vcmp.lt.s32.totalorder %v13757_v32, 2  ;;  %v1317_v56 = vsel %vm1309_vm6, %v10182_v23, %v10184_v4 }
 0x1dc   : > { %v1841_v46 = vadd.s32 536870912, %v1840_v59  ;;  %v1319_v52 = vsel %vm1311_vm8, %v1302_v36, %v1318_v33  ;;  %v1321_v7 = vsel %vm1309_vm6, %v10184_v4, %v1302_v36  ;;  %v1322_v60 = vsel %vm1312_vm7, %v1308_v25, 1326507024 }
 0x1dd   : > { %v1252_v42 = vadd.f32 0.041655596, %v1251_v41  ;;  %v1259_v44 = vadd.f32 0.008332121, %v1258_v57  ;;  %v1323_v51 = vsel %vm1311_vm8, %v1305_v30, %v1322_v60  ;;  %v10225_v24 = vshll.u32 %v1285_v62, 8 }
 0x1de   : > { %v10229_v27 = vshrl.u32 %v2675_v15, 23  ;;  %v1267_v21 = vand.u32 3, %v1266_v34  ;;  %v1842_v13 = vshrl.u32 %v1841_v46, 30  ;;  %v1324_v10 = vsel %vm1310_vm9, %v1321_v7, %v1323_v51 }
 0x1df   : > { %v10237_v37 = vmul.f32 %v8356_v16, %v10214_v29  ;;  %v1253_v35 = vmul.f32 %v1252_v42, %v1250_v49  ;;  %v1260_v61 = vmul.f32 %v1259_v44, %v1250_v49  ;;  %v1320_v20 = vsel %vm1310_vm9, %v1317_v56, %v1319_v52 }
 0x1e0   : > { %v1843_v14 = vshll.u32 %v1842_v13, 30  ;;  %v1326_v15 = vand.u32 65535, %v10225_v24  ;;  %v1328_v63 = vand.u32 65535, %v1324_v10  ;;  %v1329_v18 = vshrl.u32 %v1324_v10, 16 }
 0x1e1   : > { %v1254_v31 = vadd.f32 -0.4999988, %v1253_v35  ;;  %v1261_v22 = vadd.f32 -0.16666654, %v1260_v61  ;;  %vm1744_vm10 = vcmp.lt.s32.totalorder %v13749_v0, 0  ;;  %v1836_v9 = vadd.s32 %v10159_v8, %v10155_v39 }
 0x1e2   : > { %vm1269_vm11 = vcmp.eq.s32.totalorder %v1267_v21, 0  ;;  %vm1272_vm12 = vcmp.eq.s32.totalorder %v1267_v21, 2  ;;  %v10245_v30 = vsub.s32 %v1840_v59, %v1843_v14  ;;  %v1293_v25 = vshrl.u32 %v13718_v43, %v13756_v1 }
 0x1e3   : > { %v1331_v19 = vmul.u32 %v1329_v18, %v1326_v15  ;;  %v1351_v62 = vshrl.u32 %v1320_v20, 16  ;;  %v1255_v34 = vmul.f32 %v1254_v31, %v1250_v49  ;;  %v1262_v33 = vmul.f32 %v1261_v22, %v1250_v49 }
 0x1e4   : > { %vm1268_vm13 = vcmp.lt.s32.totalorder %v1267_v21, 2  ;;  %v1314_v41 = vsel %vm1312_vm7, %v1302_v36, 2102212464  ;;  %v1327_v57 = vshrl.u32 %v10225_v24, 16  ;;  %vm1265_vm14 = vweird.f32 %v13745_v47 }
 0x1e5   : > { %vm1845_vm15 = vcmp.lt.s32.totalorder %v10245_v30, 0  ;;  %v1846_v39 = vsub.s32 0, %v10245_v30  ;;  %v1330_v8 = vmul.u32 %v1328_v63, %v1326_v15  ;;  %v1350_v59 = vand.u32 65535, %v1320_v20 }
 0x1e6   : > { %v1256_v56 = vadd.f32 1.0, %v1255_v34  ;;  %v1263_v1 = vadd.f32 1.0, %v1262_v33  ;;  %v1332_v46 = vmul.u32 %v1328_v63, %v1327_v57  ;;  %v1334_v52 = vshll.u32 %v1331_v19, 16 }
 0x1e7   : > { %v1847_v49 = vsel %vm1845_vm15, %v1846_v39, %v10245_v30  ;;  %v1866_v7 = vsub.s32 4, %v1842_v13  ;;  %v1313_v36 = vsel %vm1309_vm6, %v1293_v25, %v10182_v23  ;;  %v1353_v60 = vmul.u32 %v1351_v62, %v1326_v15 }
 0x1e8   : > { %v1264_v42 = vmul.f32 %v1263_v1, %v10195_v26  ;;  %v1273_v44 = vxor.u32 2147483648, %v1256_v56  ;;  %v1848_v51 = vclz %v1847_v49  ;;  %vm1338_vm0 = vc.u32 %v1330_v8, %v1334_v52 }
 0x1e9   : > { %v1315_v10 = vsel %vm1311_vm8, %v10184_v4, %v1314_v41  ;;  %v1333_v16 = vmul.u32 %v1329_v18, %v1327_v57  ;;  %v1339_v35 = vsel %vm1338_vm0, 1, %v13714_v58  ;;  %v1352_v61 = vmul.u32 %v1350_v59, %v1326_v15 }
 0x1ea   : > { %v1270_v20 = vxor.u32 2147483648, %v1264_v42  ;;  %v7458_v14 = vadd.s32 4294967294, %v1848_v51  ;;  %v1336_v63 = vshll.u32 %v1332_v46, 16  ;;  %v1340_v31 = vadd.s32 %v1334_v52, %v1330_v8 }
 0x1eb   : > { %v1867_v23 = vsel %vm1744_vm10, %v1866_v7, %v1842_v13  ;;  %v1341_v22 = vadd.s32 %v1339_v35, %v1333_v16  ;;  %v1354_v26 = vmul.u32 %v1350_v59, %v1327_v57  ;;  %v1356_v25 = vshll.u32 %v1353_v60, 16 }
 0x1ec   : > { %v1271_v34 = vsel %vm1269_vm11, %v1256_v56, %v1270_v20  ;;  %v1274_v33 = vsel %vm1272_vm12, %v1273_v44, %v1264_v42  ;;  %vm7459_vm1 = vcmp.lt.s32.totalorder %v7458_v14, 0  ;;  %vm1342_vm2 = vc.u32 %v1340_v31, %v1336_v63 }
 0x1ed   : > { %v1275_v4 = vsel %vm1268_vm13, %v1271_v34, %v1274_v33  ;;  %v1851_v18 = vsel %vm7459_vm1, 0, %v7458_v14  ;;  %v1335_v15 = vshrl.u32 %v1331_v19, 16  ;;  %v1343_v41 = vsel %vm1342_vm2, 1, %v13714_v58  ;;  %v13760_v14 = vld [vmem:[#allocation39_spill] sm:$0xff] }
 0x1ee   : > { %v1276_v39 = vsel %vm1265_vm14, nan, %v1275_v4  ;;  %v1852_v8 = vsub.s32 32, %v1851_v18  ;;  %v1856_v13 = vsub.s32 4294967266, %v1851_v18  ;;  %v1355_v1 = vmul.u32 %v1351_v62, %v1327_v57 }
 0x1ef   : > { %3350 = vmatmul.f32.gmra.mxu0 %v1276_v39  ;;  %v1345_v59 = vadd.s32 %v1343_v41, %v1341_v22  ;;  %v1358_v52 = vshll.u32 %v1354_v26, 16  ;;  %vm1360_vm3 = vc.u32 %v1352_v61, %v1356_v25  ;;  %v1362_v56 = vadd.s32 %v1356_v25, %v1352_v61 }
 0x1f0   : > { %v1853_v49 = vshll.u32 %v10245_v30, %v1851_v18  ;;  %v1854_v7 = vshrl.u32 %v1836_v9, %v1852_v8  ;;  %v1857_v21 = vadd.s32 127, %v1856_v13  ;;  %v1361_v42 = vsel %vm1360_vm3, 1, %v13714_v58 }
 0x1f1   : > { %v1337_v19 = vshrl.u32 %v1332_v46, 16  ;;  %v1346_v44 = vadd.s32 %v1345_v59, %v1335_v15  ;;  %v1363_v51 = vadd.s32 %v1361_v42, %v1355_v1  ;;  %vm1364_vm4 = vc.u32 %v1362_v56, %v1358_v52 }
 0x1f2   : > { %vm10276_vm5 = vcmp.le.f32.partialorder %v1742_v54, 0.7853982  ;;  %v1855_v62 = vor.u32 %v1854_v7, %v1853_v49  ;;  %v1858_v57 = vshll.u32 %v1857_v21, 23  ;;  %v1365_v16 = vsel %vm1364_vm4, 1, %v13714_v58 }
 0x1f3   : > { %v1869_v9 = vsel %vm10276_vm5, 0, %v1867_v23  ;;  %v10283_v30 = vadd.s32 %v1346_v44, %v1337_v19  ;;  %v1357_v35 = vshrl.u32 %v1353_v60, 16  ;;  %v1367_v46 = vadd.s32 %v1365_v16, %v1363_v51  ;;  %v13761_v16 = vld [vmem:[#allocation57_spill] sm:$0xff] }
 0x1f4   : > { %v10286_v61 = vshrl.u32 %v10205_v48, 5  ;;  %v1859_v20 = vor.u32 4788187, %v1858_v57  ;;  %v1316_v54 = vsel %vm1310_vm9, %v1313_v36, %v1315_v10  ;;  %v1897_v63 = vand.u32 2147483647, %v13760_v14 }
 0x1f5   : > { %v10292_v31 = vand.u32 31, %v10205_v48  ;;  %v1359_v22 = vshrl.u32 %v1354_v26, 16  ;;  %v10294_v25 = vadd.s32 %v1362_v56, %v1358_v52  ;;  %v1368_v23 = vadd.s32 %v1367_v46, %v1357_v35 }
 0x1f6   : > { %vm2218_vm6 = vcmp.gt.s32.totalorder %v10071_v53, 0  ;;  %v1860_v60 = vand.u32 2147483647, %v1859_v20  ;;  %v1862_v34 = vcvt.s32.f32 %v1855_v62  ;;  %v1886_v33 = vadd.s32 3, %v1869_v9 }
 0x1f7   : > { %v1369_v4 = vadd.s32 %v1368_v23, %v1359_v22  ;;  %v1370_v18 = vmul.u32 %v10225_v24, %v1316_v54  ;;  %vm1372_vm7 = vc.u32 %v10283_v30, %v10294_v25  ;;  %v1918_v32 = vshrl.u32 %v13721_v5, %v9790_v45 }
 0x1f8   : > { %v1863_v48 = vmul.f32 %v1862_v34, %v1860_v60  ;;  %v1904_v36 = vand.u32 8388607, %v1897_v63  ;;  %v1915_v10 = vshrl.u32 %v13720_v40, %v9790_v45  ;;  %v1921_v26 = vshrl.u32 %v13722_v17, %v9790_v45 }
 0x1f9   : > { %v1373_v15 = vadd.s32 1, %v1369_v4  ;;  %v1917_v24 = vshll.u32 %v13720_v40, %v13741_v6  ;;  %v1923_v41 = vshll.u32 %v13722_v17, %v13741_v6  ;;  %v1924_v39 = vshrl.u32 %v13723_v38, %v9790_v45 }
 0x1fa   : > { %v1864_v8 = vxor.u32 2147483648, %v1863_v48  ;;  %v1920_v13 = vshll.u32 %v13721_v5, %v13741_v6  ;;  %v1926_v1 = vshll.u32 %v13723_v38, %v13741_v6  ;;  %v1927_v59 = vshrl.u32 %v13724_v3, %v9790_v45 }
 0x1fb   : > { %v1374_v52 = vsel %vm1372_vm7, %v1373_v15, %v1369_v4  ;;  %v1914_v56 = vshll.u32 %v13718_v43, %v13741_v6  ;;  %v10322_v49 = vor.u32 %v1918_v32, %v1917_v24  ;;  %v1925_v7 = vor.u32 %v1924_v39, %v1923_v41 }
 0x1fc   : > { %v1865_v21 = vsel %vm1744_vm10, %v1864_v8, %v1863_v48  ;;  %v1375_v42 = vadd.s32 %v1374_v52, %v1370_v18  ;;  %v10326_v19 = vor.u32 %v1921_v26, %v1920_v13  ;;  %v1928_v44 = vor.u32 %v1927_v59, %v1926_v1 }
 0x1fd   : > { %v10331_v51 = vsel %vm10276_vm5, %v13749_v0, %v1865_v21  ;;  %v1905_v62 = vor.u32 8388608, %v1904_v36  ;;  %v1916_v57 = vor.u32 %v1915_v10, %v1914_v56  ;;  %vm1932_vm8 = vcmp.lt.s32.totalorder %v13761_v16, 4 }
 0x1fe   : > { %v10337_v6 = vsel %vm2218_vm6, %v10071_v53, 0  ;;  %v1870_v9 = vmul.f32 %v10331_v51, %v10331_v51  ;;  %v1376_v35 = vadd.s32 536870912, %v1375_v42  ;;  %v1938_v46 = vsel %vm1932_vm8, %v1925_v7, 920167782 }
 0x1ff   : > { %v10343_v20 = vand.u32 3, %v1886_v33  ;;  %vm1929_vm9 = vcmp.lt.s32.totalorder %v13761_v16, 1  ;;  %vm1931_vm10 = vcmp.lt.s32.totalorder %v13761_v16, 3  ;;  %v1942_v47 = vsel %vm1932_vm8, %v1928_v44, 1326507024 }
 0x200   : > { %v1871_v54 = vmul.f32 -0.001358992, %v1870_v9  ;;  %v1878_v22 = vmul.f32 -0.00019511016, %v1870_v9  ;;  %v10349_v53 = vshrl.u32 %v1376_v35, 30  ;;  %v1941_v23 = vsel %vm1929_vm9, %v10322_v49, %v10326_v19 }
 0x201   : > { %v1937_v60 = vsel %vm1929_vm9, %v1916_v57, %v10322_v49  ;;  %v1939_v34 = vsel %vm1931_vm10, %v10326_v19, %v1938_v46  ;;  %v1943_v33 = vsel %vm1931_vm10, %v1925_v7, %v1942_v47  ;;  %v10363_v4 = vshll.u32 %v1905_v62, 8 }
 0x202   : > { %v1872_v18 = vadd.f32 0.041655596, %v1871_v54  ;;  %v1879_v32 = vadd.f32 0.008332121, %v1878_v22  ;;  %v1378_v48 = vshll.u32 %v10349_v53, 30  ;;  %vm1930_vm11 = vcmp.lt.s32.totalorder %v13761_v16, 2 }
 0x203   : > { %v10368_v36 = vand.u32 31, %v10337_v6  ;;  %v10371_v10 = vadd.s32 4294967169, %v10140_v50  ;;  %v10374_v26 = vadd.s32 4294967169, %v10229_v27  ;;  %v1944_v15 = vsel %vm1930_vm11, %v1941_v23, %v1943_v33 }
 0x204   : > { %v1873_v24 = vmul.f32 %v1872_v18, %v1870_v9  ;;  %v1880_v41 = vmul.f32 %v1879_v32, %v1870_v9  ;;  %v10378_v39 = vsub.s32 %v1375_v42, %v1378_v48  ;;  %v10382_v8 = vsel %vm1930_vm11, %v1937_v60, %v1939_v34 }
 0x205   : > { %v1913_v13 = vshrl.u32 %v13718_v43, %v9790_v45  ;;  %v1946_v50 = vand.u32 65535, %v10363_v4  ;;  %v1948_v1 = vand.u32 65535, %v1944_v15  ;;  %v1949_v59 = vshrl.u32 %v1944_v15, 16 }
 0x206   : > { %v1874_v27 = vadd.f32 -0.4999988, %v1873_v24  ;;  %v1881_v52 = vadd.f32 -0.16666654, %v1880_v41  ;;  %vm1892_vm12 = vcmp.eq.s32.totalorder %v10343_v20, 2  ;;  %vm1380_vm13 = vcmp.lt.s32.totalorder %v10378_v39, 0 }
 0x207   : > { %v1381_v56 = vsub.s32 0, %v10378_v39  ;;  %vm1889_vm14 = vcmp.eq.s32.totalorder %v10343_v20, 0  ;;  %v1371_v7 = vadd.s32 %v10294_v25, %v10283_v30  ;;  %v1947_v21 = vshrl.u32 %v10363_v4, 16 }
 0x208   : > { %v1951_v45 = vmul.u32 %v1949_v59, %v1946_v50  ;;  %v1970_v42 = vand.u32 65535, %v10382_v8  ;;  %v1875_v44 = vmul.f32 %v1874_v27, %v1870_v9  ;;  %v1882_v62 = vmul.f32 %v1881_v52, %v1870_v9 }
 0x209   : > { %vm1888_vm15 = vcmp.lt.s32.totalorder %v10343_v20, 2  ;;  %v1382_v35 = vsel %vm1380_vm13, %v1381_v56, %v10378_v39  ;;  %v10399_v46 = vsel %vm1929_vm9, %v1913_v13, %v1916_v57  ;;  %vm1885_vm0 = vweird.f32 %v13749_v0 }
 0x20a   : > { %vm1279_vm1 = vcmp.lt.s32.totalorder %v13754_v12, 0  ;;  %v1383_v30 = vclz %v1382_v35  ;;  %v1952_v25 = vmul.u32 %v1948_v1, %v1947_v21  ;;  %v1954_v47 = vshll.u32 %v1951_v45, 16 }
 0x20b   : > { %v1971_v54 = vshrl.u32 %v10382_v8, 16  ;;  %v1876_v22 = vadd.f32 1.0, %v1875_v44  ;;  %v1883_v23 = vadd.f32 1.0, %v1882_v62  ;;  %v1401_v9 = vsub.s32 4, %v10349_v53 }
 0x20c   : > { %v1950_v60 = vmul.u32 %v1948_v1, %v1946_v50  ;;  %v7449_v34 = vadd.s32 4294967294, %v1383_v30  ;;  %v1953_v33 = vmul.u32 %v1949_v59, %v1947_v21  ;;  %v1955_v18 = vshrl.u32 %v1951_v45, 16 }
 0x20d   : > { %v1972_v32 = vmul.u32 %v1970_v42, %v1946_v50  ;;  %v1884_v57 = vmul.f32 %v1883_v23, %v10331_v51  ;;  %v1893_v48 = vxor.u32 2147483648, %v1876_v22  ;;  %vm10408_vm3 = vcmp.le.f32.partialorder %v1277_v55, 0.7853982 }
 0x20e   : > { %vm1958_vm2 = vc.u32 %v1950_v60, %v1954_v47  ;;  %v1960_v15 = vadd.s32 %v1954_v47, %v1950_v60  ;;  %vm7450_vm4 = vcmp.lt.s32.totalorder %v7449_v34, 0  ;;  %v1956_v41 = vshll.u32 %v1952_v25, 16 }
 0x20f   : > { %v1959_v8 = vsel %vm1958_vm2, 1, %v13714_v58  ;;  %v1973_v13 = vmul.u32 %v1971_v54, %v1946_v50  ;;  %v1890_v1 = vxor.u32 2147483648, %v1884_v57  ;;  %v1386_v59 = vsel %vm7450_vm4, 0, %v7449_v34 }
 0x210   : > { %v1961_v27 = vadd.s32 %v1959_v8, %v1953_v33  ;;  %v1974_v52 = vmul.u32 %v1970_v42, %v1947_v21  ;;  %v1894_v51 = vsel %vm1892_vm12, %v1893_v48, %v1884_v57  ;;  %v1387_v56 = vsub.s32 32, %v1386_v59 }
 0x211   : > { %v1391_v45 = vsub.s32 4294967266, %v1386_v59  ;;  %vm1962_vm5 = vc.u32 %v1960_v15, %v1956_v41  ;;  %v1891_v55 = vsel %vm1889_vm14, %v1876_v22, %v1890_v1  ;;  %v1388_v44 = vshll.u32 %v10378_v39, %v1386_v59 }
 0x212   : > { %v1963_v62 = vsel %vm1962_vm5, 1, %v13714_v58  ;;  %v1976_v35 = vshll.u32 %v1973_v13, 16  ;;  %v1895_v50 = vsel %vm1888_vm15, %v1891_v55, %v1894_v51  ;;  %v1389_v30 = vshrl.u32 %v1371_v7, %v1387_v56 }
 0x213   : > { %v1392_v47 = vadd.s32 127, %v1391_v45  ;;  %v1965_v42 = vadd.s32 %v1963_v62, %v1961_v27  ;;  %v1896_v23 = vsel %vm1885_vm0, nan, %v1895_v50  ;;  %v1402_v60 = vsel %vm1279_vm1, %v1401_v9, %v10349_v53 }
 0x214   : > { %v1934_v39 = vsel %vm1932_vm8, %v10326_v19, 2102212464  ;;  %v1975_v22 = vmul.u32 %v1971_v54, %v1947_v21  ;;  %3362 = vmatmul.f32.gmra.mxu1 %v1896_v23  ;;  %v1390_v34 = vor.u32 %v1389_v30, %v1388_v44  ;;  %vm1980_vm6 = vc.u32 %v1972_v32, %v1976_v35 }
 0x215   : > { %v1393_v33 = vshll.u32 %v1392_v47, 23  ;;  %v1966_v20 = vadd.s32 %v1965_v42, %v1955_v18  ;;  %v1957_v7 = vshrl.u32 %v1952_v25, 16  ;;  %v1978_v57 = vshll.u32 %v1974_v52, 16 }
 0x216   : > { %v1981_v48 = vsel %vm1980_vm6, 1, %v13714_v58  ;;  %v1982_v0 = vadd.s32 %v1976_v35, %v1972_v32  ;;  %v1935_v53 = vsel %vm1931_vm10, %v10322_v49, %v1934_v39  ;;  %v2207_v41 = vand.u32 2147483647, %v9359_v11 }
 0x217   : > { %v1394_v15 = vor.u32 4788187, %v1393_v33  ;;  %v1983_v9 = vadd.s32 %v1981_v48, %v1975_v22  ;;  %v10435_v19 = vsub.s32 32, %v10368_v36  ;;  %v1404_v21 = vsel %vm10408_vm3, 0, %v1402_v60 }
 0x218   : > { %v10439_v54 = vadd.s32 %v1966_v20, %v1957_v7  ;;  %vm1984_vm7 = vc.u32 %v1982_v0, %v1978_v57  ;;  %v10442_v25 = vshrl.u32 %v10337_v6, 5  ;;  %v1397_v32 = vcvt.s32.f32 %v1390_v34 }
 0x219   : > { %v1395_v18 = vand.u32 2147483647, %v1394_v15  ;;  %v1985_v8 = vsel %vm1984_vm7, 1, %v13714_v58  ;;  %v1936_v49 = vsel %vm1930_vm11, %v10399_v46, %v1935_v53  ;;  %v1977_v1 = vshrl.u32 %v1973_v13, 16 }
 0x21a   : > { %v10448_v59 = vadd.s32 %v1982_v0, %v1978_v57  ;;  %v1987_v27 = vadd.s32 %v1985_v8, %v1983_v9  ;;  %v1421_v56 = vadd.s32 3, %v1404_v21  ;;  %v1979_v45 = vshrl.u32 %v1974_v52, 16 }
 0x21b   : > { %v1398_v51 = vmul.f32 %v1397_v32, %v1395_v18  ;;  %v2214_v55 = vand.u32 8388607, %v2207_v41  ;;  %v2228_v44 = vshrl.u32 %v13721_v5, %v10435_v19  ;;  %v2231_v16 = vshrl.u32 %v13722_v17, %v10435_v19 }
 0x21c   : > { %v1988_v6 = vadd.s32 %v1987_v27, %v1977_v1  ;;  %vm1992_vm8 = vc.u32 %v10439_v54, %v10448_v59  ;;  %v2224_v13 = vshll.u32 %v13718_v43, %v10368_v36  ;;  %v2233_v52 = vshll.u32 %v13722_v17, %v10368_v36 }
 0x21d   : > { %v1399_v46 = vxor.u32 2147483648, %v1398_v51  ;;  %v2234_v62 = vshrl.u32 %v13723_v38, %v10435_v19  ;;  %v2225_v50 = vshrl.u32 %v13720_v40, %v10435_v19  ;;  %v2227_v30 = vshll.u32 %v13720_v40, %v10368_v36 }
 0x21e   : > { %v1989_v35 = vadd.s32 %v1988_v6, %v1979_v45  ;;  %v2230_v47 = vshll.u32 %v13721_v5, %v10368_v36  ;;  %v2236_v60 = vshll.u32 %v13723_v38, %v10368_v36  ;;  %v2237_v39 = vshrl.u32 %v13724_v3, %v10435_v19 }
 0x21f   : > { %v1400_v42 = vsel %vm1279_vm1, %v1399_v46, %v1398_v51  ;;  %v2235_v23 = vor.u32 %v2234_v62, %v2233_v52  ;;  %v10479_v33 = vor.u32 %v2228_v44, %v2227_v30  ;;  %v1990_v57 = vmul.u32 %v10363_v4, %v1936_v49 }
 0x220   : > { %v1403_v22 = vsel %vm10408_vm3, %v13754_v12, %v1400_v42  ;;  %v1993_v34 = vadd.s32 1, %v1989_v35  ;;  %v2232_v20 = vor.u32 %v2231_v16, %v2230_v47  ;;  %v2215_v48 = vor.u32 8388608, %v2214_v55 }
 0x221   : > { %v1405_v7 = vmul.f32 %v1403_v22, %v1403_v22  ;;  %v2238_v0 = vor.u32 %v2237_v39, %v2236_v60  ;;  %v10485_v15 = vor.u32 %v2225_v50, %v2224_v13  ;;  %vm2239_vm9 = vcmp.lt.s32.totalorder %v10442_v25, 1 }
 0x222   : > { %v1994_v36 = vsel %vm1992_vm8, %v1993_v34, %v1989_v35  ;;  %vm2242_vm10 = vcmp.lt.s32.totalorder %v10442_v25, 4  ;;  %v10491_v18 = vand.u32 3, %v1421_v56  ;;  %vm2240_vm11 = vcmp.lt.s32.totalorder %v10442_v25, 2 }
 0x223   : > { %v1406_v24 = vmul.f32 -0.001358992, %v1405_v7  ;;  %v1413_v53 = vmul.f32 -0.00019511016, %v1405_v7  ;;  %v1995_v9 = vadd.s32 %v1994_v36, %v1990_v57  ;;  %v2248_v21 = vsel %vm2242_vm10, %v2235_v23, 920167782 }
 0x224   : > { %v2251_v4 = vsel %vm2239_vm9, %v10479_v33, %v2232_v20  ;;  %v2252_v32 = vsel %vm2242_vm10, %v2238_v0, 1326507024  ;;  %vm2241_vm12 = vcmp.lt.s32.totalorder %v10442_v25, 3  ;;  %v2247_v27 = vsel %vm2239_vm9, %v10485_v15, %v10479_v33 }
 0x225   : > { %v1407_v8 = vadd.f32 0.041655596, %v1406_v24  ;;  %v1414_v49 = vadd.f32 0.008332121, %v1413_v53  ;;  %v1996_v1 = vadd.s32 536870912, %v1995_v9  ;;  %v2249_v51 = vsel %vm2241_vm12, %v2232_v20, %v2248_v21 }
 0x226   : > { %v2253_v56 = vsel %vm2241_vm12, %v2235_v23, %v2252_v32  ;;  %v10508_v45 = vshll.u32 %v2215_v48, 8  ;;  %v2250_v47 = vsel %vm2240_vm11, %v2247_v27, %v2249_v51  ;;  %v10522_v42 = vadd.s32 1, %v10374_v26 }
 0x227   : > { %v1408_v55 = vmul.f32 %v1407_v8, %v1405_v7  ;;  %v1415_v6 = vmul.f32 %v1414_v49, %v1405_v7  ;;  %v10510_v44 = vshrl.u32 %v1996_v1, 30  ;;  %v2254_v16 = vsel %vm2240_vm11, %v2251_v4, %v2253_v56 }
 0x228   : > { %v2256_v46 = vand.u32 65535, %v10508_v45  ;;  %v10516_v13 = vshrl.u32 %v10508_v45, 16  ;;  %v2258_v52 = vand.u32 65535, %v2254_v16  ;;  %v2259_v62 = vshrl.u32 %v2254_v16, 16 }
 0x229   : > { %v1409_v35 = vadd.f32 -0.4999988, %v1408_v55  ;;  %v1416_v50 = vadd.f32 -0.16666654, %v1415_v6  ;;  %v1998_v30 = vshll.u32 %v10510_v44, 30  ;;  %vm1424_vm13 = vcmp.eq.s32.totalorder %v10491_v18, 0 }
 0x22a   : > { %v2261_v23 = vmul.u32 %v2259_v62, %v2256_v46  ;;  %v10526_v60 = vmul.u32 %v2258_v52, %v10516_v13  ;;  %vm1423_vm14 = vcmp.lt.s32.totalorder %v10491_v18, 2  ;;  %v2244_v48 = vsel %vm2242_vm10, %v2232_v20, 2102212464 }
 0x22b   : > { %v1410_v39 = vmul.f32 %v1409_v35, %v1405_v7  ;;  %v1417_v34 = vmul.f32 %v1416_v50, %v1405_v7  ;;  %v10529_v57 = vsub.s32 %v1995_v9, %v1998_v30  ;;  %vm1420_vm15 = vweird.f32 %v13754_v12 }
 0x22c   : > { %v2260_v0 = vmul.u32 %v2258_v52, %v2256_v46  ;;  %v2264_v26 = vshll.u32 %v2261_v23, 16  ;;  %v2280_v36 = vand.u32 65535, %v2250_v47  ;;  %v2281_v24 = vshrl.u32 %v2250_v47, 16 }
 0x22d   : > { %v1411_v53 = vadd.f32 1.0, %v1410_v39  ;;  %v1418_v21 = vadd.f32 1.0, %v1417_v34  ;;  %vm2000_vm0 = vcmp.lt.s32.totalorder %v10529_v57, 0  ;;  %v2001_v4 = vsub.s32 0, %v10529_v57 }
 0x22e   : > { %v2263_v7 = vmul.u32 %v2259_v62, %v10516_v13  ;;  %v2266_v9 = vshll.u32 %v10526_v60, 16  ;;  %vm2268_vm1 = vc.u32 %v2260_v0, %v2264_v26  ;;  %v2270_v32 = vadd.s32 %v2264_v26, %v2260_v0 }
 0x22f   : > { %v1419_v8 = vmul.f32 %v1418_v21, %v1403_v22  ;;  %v1428_v20 = vxor.u32 2147483648, %v1411_v53  ;;  %v2002_v49 = vsel %vm2000_vm0, %v2001_v4, %v10529_v57  ;;  %v2269_v1 = vsel %vm2268_vm1, 1, %v13714_v58 }
 0x230   : > { %vm2683_vm2 = vcmp.gt.s32.totalorder %v10522_v42, 0  ;;  %vm1899_vm3 = vcmp.lt.s32.totalorder %v13760_v14, 0  ;;  %v2003_v27 = vclz %v2002_v49  ;;  %v2223_v51 = vshrl.u32 %v13718_v43, %v10435_v19 }
 0x231   : > { %v2271_v56 = vadd.s32 %v2269_v1, %v2263_v7  ;;  %vm2272_vm4 = vc.u32 %v2270_v32, %v2266_v9  ;;  %v1425_v55 = vxor.u32 2147483648, %v1419_v8  ;;  %vm1427_vm5 = vcmp.eq.s32.totalorder %v10491_v18, 2 }
 0x232   : > { %v1991_v22 = vadd.s32 %v10448_v59, %v10439_v54  ;;  %v2273_v6 = vsel %vm2272_vm4, 1, %v13714_v58  ;;  %v1429_v16 = vsel %vm1427_vm5, %v1428_v20, %v1419_v8  ;;  %v7461_v52 = vadd.s32 4294967294, %v2003_v27  ;;  %v13764_v8 = vld [vmem:[#allocation53_spill] sm:$0xff] }
 0x233   : > { %v2243_v62 = vsel %vm2239_vm9, %v2223_v51, %v10485_v15  ;;  %v2245_v19 = vsel %vm2241_vm12, %v10479_v33, %v2244_v48  ;;  %v1426_v35 = vsel %vm1424_vm13, %v1411_v53, %v1425_v55  ;;  %v2275_v50 = vadd.s32 %v2273_v6, %v2271_v56 }
 0x234   : > { %v2283_v30 = vmul.u32 %v2281_v24, %v2256_v46  ;;  %v2284_v47 = vmul.u32 %v2280_v36, %v10516_v13  ;;  %v1430_v54 = vsel %vm1423_vm14, %v1426_v35, %v1429_v16  ;;  %vm7462_vm6 = vcmp.lt.s32.totalorder %v7461_v52, 0 }
 0x235   : > { %v2021_v59 = vsub.s32 4, %v10510_v44  ;;  %v2265_v39 = vshrl.u32 %v2261_v23, 16  ;;  %v1431_v15 = vsel %vm1420_vm15, nan, %v1430_v54  ;;  %v2006_v34 = vsel %vm7462_vm6, 0, %v7461_v52 }
 0x236   : > { %v2282_v0 = vmul.u32 %v2280_v36, %v2256_v46  ;;  %v2286_v33 = vshll.u32 %v2283_v30, 16  ;;  %3353 = vmatmul.f32.gmra.mxu0 %v1431_v15  ;;  %v2007_v48 = vsub.s32 32, %v2006_v34  ;;  %v2011_v26 = vsub.s32 4294967266, %v2006_v34 }
 0x237   : > { %v2267_v53 = vshrl.u32 %v10526_v60, 16  ;;  %v2276_v21 = vadd.s32 %v2275_v50, %v2265_v39  ;;  %v2008_v4 = vshll.u32 %v10529_v57, %v2006_v34  ;;  %v2285_v18 = vmul.u32 %v2281_v24, %v10516_v13 }
 0x238   : > { %v2288_v7 = vshll.u32 %v2284_v47, 16  ;;  %vm2290_vm7 = vc.u32 %v2282_v0, %v2286_v33  ;;  %v2009_v9 = vshrl.u32 %v1991_v22, %v2007_v48  ;;  %v2012_v23 = vadd.s32 127, %v2011_v26 }
 0x239   : > { %v2291_v12 = vsel %vm2290_vm7, 1, %v13714_v58  ;;  %v2292_v32 = vadd.s32 %v2286_v33, %v2282_v0  ;;  %v10567_v46 = vsub.s32 32, %v10292_v31  ;;  %v2022_v36 = vsel %vm1899_vm3, %v2021_v59, %v10510_v44 }
 0x23a   : > { %v2293_v60 = vadd.s32 %v2291_v12, %v2285_v18  ;;  %v2362_v20 = vand.u32 2147483647, %v13764_v8  ;;  %v2010_v57 = vor.u32 %v2009_v9, %v2008_v4  ;;  %v2013_v49 = vshll.u32 %v2012_v23, 23 }
 0x23b   : > { %v10573_v13 = vadd.s32 %v2276_v21, %v2267_v53  ;;  %vm2294_vm8 = vc.u32 %v2292_v32, %v2288_v7  ;;  %v10578_v24 = vsel %vm2683_vm2, %v10522_v42, 0  ;;  %vm10582_vm9 = vcmp.le.f32.partialorder %v1897_v63, 0.7853982 }
 0x23c   : > { %v2246_v44 = vsel %vm2240_vm11, %v2243_v62, %v2245_v19  ;;  %v2295_v27 = vsel %vm2294_vm8, 1, %v13714_v58  ;;  %v2014_v51 = vor.u32 4788187, %v2013_v49  ;;  %v2287_v56 = vshrl.u32 %v2283_v30, 16 }
 0x23d   : > { %v10589_v55 = vadd.s32 %v2292_v32, %v2288_v7  ;;  %v2297_v22 = vadd.s32 %v2295_v27, %v2293_v60  ;;  %v2017_v6 = vcvt.s32.f32 %v2010_v57  ;;  %v2024_v42 = vsel %vm10582_vm9, 0, %v2022_v36 }
 0x23e   : > { %v2289_v16 = vshrl.u32 %v2284_v47, 16  ;;  %v2369_v63 = vand.u32 8388607, %v2362_v20  ;;  %v2015_v52 = vand.u32 2147483647, %v2014_v51  ;;  %v2383_v25 = vshrl.u32 %v13721_v5, %v10567_v46 }
 0x23f   : > { %v2298_v35 = vadd.s32 %v2297_v22, %v2287_v56  ;;  %vm2302_vm10 = vc.u32 %v10573_v13, %v10589_v55  ;;  %v2380_v62 = vshrl.u32 %v13720_v40, %v10567_v46  ;;  %v2382_v19 = vshll.u32 %v13720_v40, %v10292_v31 }
 0x240   : > { %v2385_v50 = vshll.u32 %v13721_v5, %v10292_v31  ;;  %v2386_v30 = vshrl.u32 %v13722_v17, %v10567_v46  ;;  %v2018_v47 = vmul.f32 %v2017_v6, %v2015_v52  ;;  %v2388_v59 = vshll.u32 %v13722_v17, %v10292_v31 }
 0x241   : > { %v2299_v54 = vadd.s32 %v2298_v35, %v2289_v16  ;;  %v2389_v39 = vshrl.u32 %v13723_v38, %v10567_v46  ;;  %v2379_v15 = vshll.u32 %v13718_v43, %v10292_v31  ;;  %v10613_v34 = vor.u32 %v2383_v25, %v2382_v19 }
 0x242   : > { %v2391_v0 = vshll.u32 %v13723_v38, %v10292_v31  ;;  %v2392_v33 = vshrl.u32 %v13724_v3, %v10567_v46  ;;  %v2019_v48 = vxor.u32 2147483648, %v2018_v47  ;;  %v10619_v53 = vor.u32 %v2386_v30, %v2385_v50 }
 0x243   : > { %v2303_v26 = vadd.s32 1, %v2299_v54  ;;  %v2390_v21 = vor.u32 %v2389_v39, %v2388_v59  ;;  %v2300_v4 = vmul.u32 %v10508_v45, %v2246_v44  ;;  %v2370_v18 = vor.u32 8388608, %v2369_v63 }
 0x244   : > { %v10622_v7 = vor.u32 %v2380_v62, %v2379_v15  ;;  %v2393_v9 = vor.u32 %v2392_v33, %v2391_v0  ;;  %v2020_v23 = vsel %vm1899_vm3, %v2019_v48, %v2018_v47  ;;  %v2041_v12 = vadd.s32 3, %v2024_v42 }
 0x245   : > { %v2304_v31 = vsel %vm2302_vm10, %v2303_v26, %v2299_v54  ;;  %vm2397_vm11 = vcmp.lt.s32.totalorder %v10286_v61, 4  ;;  %v10633_v32 = vsel %vm10582_vm9, %v13760_v14, %v2020_v23  ;;  %vm2394_vm12 = vcmp.lt.s32.totalorder %v10286_v61, 1 }
 0x246   : > { %v2305_v45 = vadd.s32 %v2304_v31, %v2300_v4  ;;  %v2403_v36 = vsel %vm2397_vm11, %v2390_v21, 920167782  ;;  %v2025_v60 = vmul.f32 %v10633_v32, %v10633_v32  ;;  %vm2395_vm13 = vcmp.lt.s32.totalorder %v10286_v61, 2 }
 0x247   : > { %vm2396_vm14 = vcmp.lt.s32.totalorder %v10286_v61, 3  ;;  %v2406_v57 = vsel %vm2394_vm12, %v10613_v34, %v10619_v53  ;;  %v2402_v1 = vsel %vm2394_vm12, %v10622_v7, %v10613_v34  ;;  %v2407_v44 = vsel %vm2397_vm11, %v2393_v9, 1326507024 }
 0x248   : > { %v2306_v49 = vadd.s32 536870912, %v2305_v45  ;;  %v10652_v27 = vshll.u32 %v2370_v18, 8  ;;  %v2026_v51 = vmul.f32 -0.001358992, %v2025_v60  ;;  %v2033_v56 = vmul.f32 -0.00019511016, %v2025_v60 }
 0x249   : > { %v2404_v22 = vsel %vm2396_vm14, %v10619_v53, %v2403_v36  ;;  %v2408_v6 = vsel %vm2396_vm14, %v2390_v21, %v2407_v44  ;;  %v10660_v42 = vand.u32 31, %v10578_v24  ;;  %v10665_v50 = vand.u32 3, %v2041_v12 }
 0x24a   : > { %v2307_v16 = vshrl.u32 %v2306_v49, 30  ;;  %v2409_v63 = vsel %vm2395_vm13, %v2406_v57, %v2408_v6  ;;  %v2411_v52 = vand.u32 65535, %v10652_v27  ;;  %v2027_v35 = vadd.f32 0.041655596, %v2026_v51 }
 0x24b   : > { %v2034_v25 = vadd.f32 0.008332121, %v2033_v56  ;;  %v2413_v62 = vand.u32 65535, %v2409_v63  ;;  %v2414_v19 = vshrl.u32 %v2409_v63, 16  ;;  %v2405_v47 = vsel %vm2395_vm13, %v2402_v1, %v2404_v22 }
 0x24c   : > { %v2308_v30 = vshll.u32 %v2307_v16, 30  ;;  %v2412_v54 = vshrl.u32 %v10652_v27, 16  ;;  %v10671_v59 = vmul.f32 6.2831855, %v10237_v37  ;;  %v2028_v39 = vmul.f32 %v2027_v35, %v2025_v60 }
 0x24d   : > { %v2035_v15 = vmul.f32 %v2034_v25, %v2025_v60  ;;  %v2416_v0 = vmul.u32 %v2414_v19, %v2411_v52  ;;  %v10674_v33 = vsub.s32 32, %v10660_v42  ;;  %vm2209_vm15 = vcmp.lt.s32.totalorder %v9359_v11, 0 }
 0x24e   : > { %v10677_v48 = vsub.s32 %v2305_v45, %v2308_v30  ;;  %v10679_v26 = vmul.u32 %v2413_v62, %v2412_v54  ;;  %v2029_v21 = vadd.f32 -0.4999988, %v2028_v39  ;;  %v2435_v9 = vand.u32 65535, %v2405_v47 }
 0x24f   : > { %v2036_v4 = vadd.f32 -0.16666654, %v2035_v15  ;;  %v2419_v18 = vshll.u32 %v2416_v0, 16  ;;  %vm2044_vm0 = vcmp.eq.s32.totalorder %v10665_v50, 0  ;;  %vm2047_vm1 = vcmp.eq.s32.totalorder %v10665_v50, 2 }
 0x250   : > { %vm2310_vm2 = vcmp.lt.s32.totalorder %v10677_v48, 0  ;;  %v2311_v37 = vsub.s32 0, %v10677_v48  ;;  %v2331_v23 = vsub.s32 4, %v2307_v16  ;;  %v2415_v12 = vmul.u32 %v2413_v62, %v2411_v52 }
 0x251   : > { %v2030_v31 = vmul.f32 %v2029_v21, %v2025_v60  ;;  %v2037_v36 = vmul.f32 %v2036_v4, %v2025_v60  ;;  %vm2043_vm3 = vcmp.lt.s32.totalorder %v10665_v50, 2  ;;  %v2418_v45 = vmul.u32 %v2414_v19, %v2412_v54 }
 0x252   : > { %v2436_v57 = vshrl.u32 %v2405_v47, 16  ;;  %vm2040_vm4 = vweird.f32 %v13760_v14  ;;  %v2312_v49 = vsel %vm2310_vm2, %v2311_v37, %v10677_v48  ;;  %v2421_v1 = vshll.u32 %v10679_v26, 16 }
 0x253   : > { %vm2423_vm5 = vc.u32 %v2415_v12, %v2419_v18  ;;  %v2425_v44 = vadd.s32 %v2419_v18, %v2415_v12  ;;  %v2031_v51 = vadd.f32 1.0, %v2030_v31  ;;  %v2038_v56 = vadd.f32 1.0, %v2037_v36 }
 0x254   : > { %v2313_v22 = vclz %v2312_v49  ;;  %v2424_v6 = vsel %vm2423_vm5, 1, %v13714_v58  ;;  %v2301_v60 = vadd.s32 %v10589_v55, %v10573_v13  ;;  %v2378_v63 = vshrl.u32 %v13718_v43, %v10567_v46 }
 0x255   : > { %v2399_v35 = vsel %vm2397_vm11, %v10619_v53, 2102212464  ;;  %v2426_v25 = vadd.s32 %v2424_v6, %v2418_v45  ;;  %v2039_v62 = vmul.f32 %v2038_v56, %v10633_v32  ;;  %v2048_v19 = vxor.u32 2147483648, %v2031_v51 }
 0x256   : > { %vm10700_vm6 = vcmp.le.f32.partialorder %v2207_v41, 0.7853982  ;;  %v7467_v47 = vadd.s32 4294967294, %v2313_v22  ;;  %vm2427_vm7 = vc.u32 %v2425_v44, %v2421_v1  ;;  %v2332_v13 = vsel %vm2209_vm15, %v2331_v23, %v2307_v16 }
 0x257   : > { %v2428_v46 = vsel %vm2427_vm7, 1, %v13714_v58  ;;  %v2437_v55 = vmul.u32 %v2435_v9, %v2411_v52  ;;  %v2438_v39 = vmul.u32 %v2436_v57, %v2411_v52  ;;  %v2045_v53 = vxor.u32 2147483648, %v2039_v62 }
 0x258   : > { %vm7468_vm8 = vcmp.lt.s32.totalorder %v7467_v47, 0  ;;  %v2420_v15 = vshrl.u32 %v2416_v0, 16  ;;  %v2430_v32 = vadd.s32 %v2428_v46, %v2426_v25  ;;  %v2439_v4 = vmul.u32 %v2435_v9, %v2412_v54 }
 0x259   : > { %v2316_v21 = vsel %vm7468_vm8, 0, %v7467_v47  ;;  %v2440_v18 = vmul.u32 %v2436_v57, %v2412_v54  ;;  %v2441_v41 = vshll.u32 %v2438_v39, 16  ;;  %v2046_v37 = vsel %vm2044_vm0, %v2031_v51, %v2045_v53 }
 0x25a   : > { %v2049_v12 = vsel %vm2047_vm1, %v2048_v19, %v2039_v62  ;;  %v2317_v31 = vsub.s32 32, %v2316_v21  ;;  %v2321_v16 = vsub.s32 4294967266, %v2316_v21  ;;  %v2318_v52 = vshll.u32 %v10677_v48, %v2316_v21 }
 0x25b   : > { %v2050_v23 = vsel %vm2043_vm3, %v2046_v37, %v2049_v12  ;;  %v2431_v36 = vadd.s32 %v2430_v32, %v2420_v15  ;;  %vm2445_vm9 = vc.u32 %v2437_v55, %v2441_v41  ;;  %v2422_v57 = vshrl.u32 %v10679_v26, 16 }
 0x25c   : > { %v2051_v0 = vsel %vm2040_vm4, nan, %v2050_v23  ;;  %v2319_v54 = vshrl.u32 %v2301_v60, %v2317_v31  ;;  %v2322_v9 = vadd.s32 127, %v2321_v16  ;;  %v2446_v45 = vsel %vm2445_vm9, 1, %v13714_v58 }
 0x25d   : > { %3365 = vmatmul.f32.gmra.mxu1 %v2051_v0  ;;  %v2443_v49 = vshll.u32 %v2439_v4, 16  ;;  %v2447_v1 = vadd.s32 %v2441_v41, %v2437_v55  ;;  %v2448_v44 = vadd.s32 %v2446_v45, %v2440_v18  ;;  %v2398_v48 = vsel %vm2394_vm12, %v2378_v63, %v10622_v7 }
 0x25e   : > { %v2320_v51 = vor.u32 %v2319_v54, %v2318_v52  ;;  %v2323_v50 = vshll.u32 %v2322_v9, 23  ;;  %v2400_v14 = vsel %vm2396_vm14, %v10613_v34, %v2399_v35  ;;  %v2334_v56 = vsel %vm10700_vm6, 0, %v2332_v13 }
 0x25f   : > { %v10726_v22 = vadd.s32 %v2431_v36, %v2422_v57  ;;  %vm2449_vm10 = vc.u32 %v2447_v1, %v2443_v49  ;;  %v2672_v26 = vand.u32 2147483647, %v9943_v2  ;;  %v10730_v6 = vadd.s32 1, %v10371_v10 }
 0x260   : > { %v10733_v60 = vshrl.u32 %v10578_v24, 5  ;;  %v2324_v25 = vor.u32 4788187, %v2323_v50  ;;  %v2450_v7 = vsel %vm2449_vm10, 1, %v13714_v58  ;;  %v2401_v34 = vsel %vm2395_vm13, %v2398_v48, %v2400_v14 }
 0x261   : > { %v2442_v63 = vshrl.u32 %v2438_v39, 16  ;;  %v10738_v35 = vadd.s32 %v2447_v1, %v2443_v49  ;;  %v2452_v62 = vadd.s32 %v2450_v7, %v2448_v44  ;;  %v2327_v47 = vcvt.s32.f32 %v2320_v51 }
 0x262   : > { %v2325_v19 = vand.u32 2147483647, %v2324_v25  ;;  %v2351_v13 = vadd.s32 3, %v2334_v56  ;;  %v2444_v46 = vshrl.u32 %v2439_v4, 16  ;;  %v2679_v10 = vand.u32 8388607, %v2672_v26 }
 0x263   : > { %v2453_v55 = vadd.s32 %v2452_v62, %v2442_v63  ;;  %vm2457_vm11 = vc.u32 %v10726_v22, %v10738_v35  ;;  %v2693_v24 = vshrl.u32 %v13721_v5, %v10674_v33  ;;  %v2690_v39 = vshrl.u32 %v13720_v40, %v10674_v33 }
 0x264   : > { %v2328_v61 = vmul.f32 %v2327_v47, %v2325_v19  ;;  %v2692_v53 = vshll.u32 %v13720_v40, %v10660_v42  ;;  %v2696_v15 = vshrl.u32 %v13722_v17, %v10674_v33  ;;  %v2695_v21 = vshll.u32 %v13721_v5, %v10660_v42 }
 0x265   : > { %v2454_v32 = vadd.s32 %v2453_v55, %v2444_v46  ;;  %v2698_v4 = vshll.u32 %v13722_v17, %v10660_v42  ;;  %v2699_v18 = vshrl.u32 %v13723_v38, %v10674_v33  ;;  %vm2838_vm12 = vcmp.gt.s32.totalorder %v10730_v6, 0 }
 0x266   : > { %v2329_v41 = vxor.u32 2147483648, %v2328_v61  ;;  %v2689_v37 = vshll.u32 %v13718_v43, %v10660_v42  ;;  %v2701_v12 = vshll.u32 %v13723_v38, %v10660_v42  ;;  %v2702_v31 = vshrl.u32 %v13724_v3, %v10674_v33 }
 0x267   : > { %v2458_v16 = vadd.s32 1, %v2454_v32  ;;  %v10765_v23 = vor.u32 %v2693_v24, %v2692_v53  ;;  %v2697_v52 = vor.u32 %v2696_v15, %v2695_v21  ;;  %v2700_v36 = vor.u32 %v2699_v18, %v2698_v4  ;;  %v8357_v21 = vld [vmem:[#allocation5] ss:$0 sm:$0xff] }
 0x268   : > { %v2330_v0 = vsel %vm2209_vm15, %v2329_v41, %v2328_v61  ;;  %v2455_v54 = vmul.u32 %v10652_v27, %v2401_v34  ;;  %v2680_v9 = vor.u32 8388608, %v2679_v10  ;;  %v2703_v45 = vor.u32 %v2702_v31, %v2701_v12 }
 0x269   : > { %v10773_v57 = vsel %vm10700_vm6, %v9359_v11, %v2330_v0  ;;  %v2459_v42 = vsel %vm2457_vm11, %v2458_v16, %v2454_v32  ;;  %v10778_v49 = vor.u32 %v2690_v39, %v2689_v37  ;;  %vm2707_vm13 = vcmp.lt.s32.totalorder %v10733_v60, 4 }
 0x26a   : > { %v2335_v1 = vmul.f32 %v10773_v57, %v10773_v57  ;;  %v2460_v44 = vadd.s32 %v2459_v42, %v2455_v54  ;;  %vm2704_vm14 = vcmp.lt.s32.totalorder %v10733_v60, 1  ;;  %v2713_v27 = vsel %vm2707_vm13, %v2700_v36, 920167782 }
 0x26b   : > { %v10786_v30 = vand.u32 3, %v2351_v13  ;;  %vm2705_vm15 = vcmp.lt.s32.totalorder %v10733_v60, 2  ;;  %v2716_v51 = vsel %vm2704_vm14, %v10765_v23, %v2697_v52  ;;  %v2717_v50 = vsel %vm2707_vm13, %v2703_v45, 1326507024 }
 0x26c   : > { %v2336_v48 = vmul.f32 -0.001358992, %v2335_v1  ;;  %v2343_v14 = vmul.f32 -0.00019511016, %v2335_v1  ;;  %v2461_v56 = vadd.s32 536870912, %v2460_v44  ;;  %vm2706_vm0 = vcmp.lt.s32.totalorder %v10733_v60, 3 }
 0x26d   : > { %v2712_v25 = vsel %vm2704_vm14, %v10778_v49, %v10765_v23  ;;  %v2714_v7 = vsel %vm2706_vm0, %v2697_v52, %v2713_v27  ;;  %v2718_v34 = vsel %vm2706_vm0, %v2700_v36, %v2717_v50  ;;  %v10803_v63 = vshll.u32 %v2680_v9, 8 }
 0x26e   : > { %v2337_v62 = vadd.f32 0.041655596, %v2336_v48  ;;  %v2344_v19 = vadd.f32 0.008332121, %v2343_v14  ;;  %v2462_v47 = vshrl.u32 %v2461_v56, 30  ;;  %v2719_v13 = vsel %vm2705_vm15, %v2716_v51, %v2718_v34 }
 0x26f   : > { %v10808_v46 = vand.u32 65535, %v10803_v63  ;;  %v10811_v55 = vshrl.u32 %v10803_v63, 16  ;;  %v2723_v10 = vand.u32 65535, %v2719_v13  ;;  %v2724_v24 = vshrl.u32 %v2719_v13, 16 }
 0x270   : > { %v2338_v61 = vmul.f32 %v2337_v62, %v2335_v1  ;;  %v2345_v39 = vmul.f32 %v2344_v19, %v2335_v1  ;;  %v2463_v53 = vshll.u32 %v2462_v47, 30  ;;  %v10815_v15 = vsel %vm2705_vm15, %v2712_v25, %v2714_v7 }
 0x271   : > { %v10820_v32 = vsel %vm2838_vm12, %v10730_v6, 0  ;;  %v10823_v4 = vadd.f32 %v8357_v21, %v10671_v59  ;;  %v2726_v18 = vmul.u32 %v2724_v24, %v10808_v46  ;;  %v10827_v41 = vmul.u32 %v2723_v10, %v10811_v55 }
 0x272   : > { %v2339_v37 = vadd.f32 -0.4999988, %v2338_v61  ;;  %v2346_v12 = vadd.f32 -0.16666654, %v2345_v39  ;;  %vm2364_vm1 = vcmp.lt.s32.totalorder %v13764_v8, 0  ;;  %v10830_v31 = vsub.s32 %v2460_v44, %v2463_v53 }
 0x273   : > { %v2688_v16 = vshrl.u32 %v13718_v43, %v10674_v33  ;;  %vm2354_vm2 = vcmp.eq.s32.totalorder %v10786_v30, 0  ;;  %v2709_v59 = vsel %vm2707_vm13, %v2697_v52, 2102212464  ;;  %v2725_v6 = vmul.u32 %v2723_v10, %v10808_v46 }
 0x274   : > { %v2729_v36 = vshll.u32 %v2726_v18, 16  ;;  %v2746_v0 = vshrl.u32 %v10815_v15, 16  ;;  %v2340_v54 = vmul.f32 %v2339_v37, %v2335_v1  ;;  %v2347_v9 = vmul.f32 %v2346_v12, %v2335_v1 }
 0x275   : > { %vm2353_vm3 = vcmp.lt.s32.totalorder %v10786_v30, 2  ;;  %vm2465_vm4 = vcmp.lt.s32.totalorder %v10830_v31, 0  ;;  %v2466_v45 = vsub.s32 0, %v10830_v31  ;;  %vm2350_vm5 = vweird.f32 %v9359_v11 }
 0x276   : > { %vm10845_vm6 = vcmp.le.f32.partialorder %v2362_v20, 0.7853982  ;;  %v2728_v52 = vmul.u32 %v2724_v24, %v10811_v55  ;;  %v2731_v42 = vshll.u32 %v10827_v41, 16  ;;  %vm2733_vm7 = vc.u32 %v2725_v6, %v2729_v36 }
 0x277   : > { %v2735_v1 = vadd.s32 %v2729_v36, %v2725_v6  ;;  %v2341_v44 = vadd.f32 1.0, %v2340_v54  ;;  %v2348_v27 = vadd.f32 1.0, %v2347_v9  ;;  %v2467_v51 = vsel %vm2465_vm4, %v2466_v45, %v10830_v31 }
 0x278   : > { %v2734_v50 = vsel %vm2733_vm7, 1, %v13714_v58  ;;  %v2468_v48 = vclz %v2467_v51  ;;  %v2486_v14 = vsub.s32 4, %v2462_v47  ;;  %v2745_v34 = vand.u32 65535, %v10815_v15 }
 0x279   : > { %v2736_v56 = vadd.s32 %v2734_v50, %v2728_v52  ;;  %vm2737_vm8 = vc.u32 %v2735_v1, %v2731_v42  ;;  %v2349_v20 = vmul.f32 %v2348_v27, %v10773_v57  ;;  %v2358_v25 = vxor.u32 2147483648, %v2341_v44 }
 0x27a   : > { %v2738_v7 = vsel %vm2737_vm8, 1, %v13714_v58  ;;  %vm2357_vm9 = vcmp.eq.s32.totalorder %v10786_v30, 2  ;;  %v2456_v62 = vadd.s32 %v10738_v35, %v10726_v22  ;;  %v7470_v19 = vadd.s32 4294967294, %v2468_v48 }
 0x27b   : > { %v2708_v13 = vsel %vm2704_vm14, %v2688_v16, %v10778_v49  ;;  %v2355_v10 = vxor.u32 2147483648, %v2349_v20  ;;  %v2710_v57 = vsel %vm2706_vm0, %v10765_v23, %v2709_v59  ;;  %v2740_v24 = vadd.s32 %v2738_v7, %v2736_v56 }
 0x27c   : > { %v2748_v61 = vmul.u32 %v2746_v0, %v10808_v46  ;;  %v2359_v39 = vsel %vm2357_vm9, %v2358_v25, %v2349_v20  ;;  %vm7471_vm10 = vcmp.lt.s32.totalorder %v7470_v19, 0  ;;  %v2487_v53 = vsel %vm2364_vm1, %v2486_v14, %v2462_v47 }
 0x27d   : > { %v2730_v15 = vshrl.u32 %v2726_v18, 16  ;;  %v2356_v22 = vsel %vm2354_vm2, %v2341_v44, %v2355_v10  ;;  %v2471_v35 = vsel %vm7471_vm10, 0, %v7470_v19  ;;  %v2749_v49 = vmul.u32 %v2745_v34, %v10811_v55  ;;  %v13773_v10 = vld [vmem:[#allocation46_spill] sm:$0xff] }
 0x27e   : > { %v2751_v21 = vshll.u32 %v2748_v61, 16  ;;  %v2360_v37 = vsel %vm2353_vm3, %v2356_v22, %v2359_v39  ;;  %v2472_v23 = vsub.s32 32, %v2471_v35  ;;  %v2476_v12 = vsub.s32 4294967266, %v2471_v35 }
 0x27f   : > { %v2747_v16 = vmul.u32 %v2745_v34, %v10808_v46  ;;  %v2361_v59 = vsel %vm2350_vm5, nan, %v2360_v37  ;;  %v2489_v47 = vsel %vm10845_vm6, 0, %v2487_v53  ;;  %v2741_v18 = vadd.s32 %v2740_v24, %v2730_v15  ;;  %v13771_v46 = vld [vmem:[#allocation31_spill] sm:$0xff] }
 0x280   : > { %v2750_v6 = vmul.u32 %v2746_v0, %v10811_v55  ;;  %3371 = vmatmul.f32.gmra.mxu2 %v2361_v59  ;;  %v2473_v36 = vshll.u32 %v10830_v31, %v2471_v35  ;;  %v2474_v54 = vshrl.u32 %v2456_v62, %v2472_v23  ;;  %v2477_v9 = vadd.s32 127, %v2476_v12  ;;  %v13772_v62 = vld [vmem:[#allocation41_spill] sm:$0xff] }
 0x281   : > { %vm2755_vm11 = vc.u32 %v2747_v16, %v2751_v21  ;;  %v2753_v30 = vshll.u32 %v2749_v49, 16  ;;  %v2757_v52 = vadd.s32 %v2751_v21, %v2747_v16  ;;  %v2517_v42 = vand.u32 2147483647, %v13771_v46 }
 0x282   : > { %v2756_v45 = vsel %vm2755_vm11, 1, %v13714_v58  ;;  %v2475_v11 = vor.u32 %v2474_v54, %v2473_v36  ;;  %v2478_v1 = vshll.u32 %v2477_v9, 23  ;;  %v2732_v44 = vshrl.u32 %v10827_v41, 16 }
 0x283   : > { %v2758_v27 = vadd.s32 %v2756_v45, %v2750_v6  ;;  %v10884_v51 = vand.u32 31, %v10820_v32  ;;  %v2506_v55 = vadd.s32 3, %v2489_v47  ;;  %v2711_v31 = vsel %vm2705_vm15, %v2708_v13, %v2710_v57  ;;  %v13774_v6 = vld [vmem:[#allocation40_spill] sm:$0xff] }
 0x284   : > { %vm2759_vm12 = vc.u32 %v2757_v52, %v2753_v30  ;;  %v2479_v0 = vor.u32 4788187, %v2478_v1  ;;  %v10888_v50 = vadd.s32 %v2741_v18, %v2732_v44  ;;  %v2752_v48 = vshrl.u32 %v2748_v61, 16 }
 0x285   : > { %v2760_v14 = vsel %vm2759_vm12, 1, %v13714_v58  ;;  %v2754_v56 = vshrl.u32 %v2749_v49, 16  ;;  %v10891_v20 = vadd.s32 %v2757_v52, %v2753_v30  ;;  %v2524_v41 = vand.u32 8388607, %v2517_v42 }
 0x286   : > { %v2762_v25 = vadd.s32 %v2760_v14, %v2758_v27  ;;  %v2480_v7 = vand.u32 2147483647, %v2479_v0  ;;  %v2482_v34 = vcvt.s32.f32 %v2475_v11  ;;  %v2534_v60 = vshll.u32 %v13718_v43, %v13772_v62 }
 0x287   : > { %v2537_v19 = vshll.u32 %v13720_v40, %v13772_v62  ;;  %v2538_v57 = vshrl.u32 %v13721_v5, %v13773_v10  ;;  %v2540_v24 = vshll.u32 %v13721_v5, %v13772_v62  ;;  %v2541_v61 = vshrl.u32 %v13722_v17, %v13773_v10 }
 0x288   : > { %v2763_v13 = vadd.s32 %v2762_v25, %v2752_v48  ;;  %v2483_v39 = vmul.f32 %v2482_v34, %v2480_v7  ;;  %v2535_v53 = vshrl.u32 %v13720_v40, %v13773_v10  ;;  %v2543_v15 = vshll.u32 %v13722_v17, %v13772_v62 }
 0x289   : > { %v2544_v22 = vshrl.u32 %v13723_v38, %v13773_v10  ;;  %v2765_v49 = vmul.u32 %v10803_v63, %v2711_v31  ;;  %vm2767_vm13 = vc.u32 %v10888_v50, %v10891_v20  ;;  %v2546_v21 = vshll.u32 %v13723_v38, %v13772_v62 }
 0x28a   : > { %v2764_v35 = vadd.s32 %v2763_v13, %v2754_v56  ;;  %v2484_v37 = vxor.u32 2147483648, %v2483_v39  ;;  %v2525_v23 = vor.u32 8388608, %v2524_v41  ;;  %v2547_v16 = vshrl.u32 %v13724_v3, %v13773_v10 }
 0x28b   : > { %v2545_v12 = vor.u32 %v2544_v22, %v2543_v15  ;;  %v2539_v47 = vor.u32 %v2538_v57, %v2537_v19  ;;  %v2542_v18 = vor.u32 %v2541_v61, %v2540_v24  ;;  %vm2552_vm14 = vcmp.lt.s32.totalorder %v13774_v6, 4 }
 0x28c   : > { %v2768_v59 = vadd.s32 1, %v2764_v35  ;;  %v2485_v63 = vsel %vm2364_vm1, %v2484_v37, %v2483_v39  ;;  %v2536_v36 = vor.u32 %v2535_v53, %v2534_v60  ;;  %v2548_v54 = vor.u32 %v2547_v16, %v2546_v21 }
 0x28d   : > { %vm2549_vm15 = vcmp.lt.s32.totalorder %v13774_v6, 1  ;;  %v10925_v9 = vsel %vm10845_vm6, %v13764_v8, %v2485_v63  ;;  %v10927_v30 = vand.u32 3, %v2506_v55  ;;  %v2533_v52 = vshrl.u32 %v13718_v43, %v13773_v10 }
 0x28e   : > { %v2769_v45 = vsel %vm2767_vm13, %v2768_v59, %v2764_v35  ;;  %v2490_v11 = vmul.f32 %v10925_v9, %v10925_v9  ;;  %vm2551_vm0 = vcmp.lt.s32.totalorder %v13774_v6, 3  ;;  %v2558_v33 = vsel %vm2552_vm14, %v2545_v12, 920167782 }
 0x28f   : > { %v2770_v1 = vadd.s32 %v2769_v45, %v2765_v49  ;;  %vm2550_vm1 = vcmp.lt.s32.totalorder %v13774_v6, 2  ;;  %v2561_v44 = vsel %vm2549_vm15, %v2539_v47, %v2542_v18  ;;  %v2562_v27 = vsel %vm2552_vm14, %v2548_v54, 1326507024 }
 0x290   : > { %v10944_v55 = vshll.u32 %v2525_v23, 8  ;;  %v2491_v31 = vmul.f32 -0.001358992, %v2490_v11  ;;  %v2498_v0 = vmul.f32 -0.00019511016, %v2490_v11  ;;  %v2557_v14 = vsel %vm2549_vm15, %v2536_v36, %v2539_v47 }
 0x291   : > { %v2771_v48 = vadd.s32 536870912, %v2770_v1  ;;  %v2559_v56 = vsel %vm2551_vm0, %v2542_v18, %v2558_v33  ;;  %v2563_v25 = vsel %vm2551_vm0, %v2545_v12, %v2562_v27  ;;  %v10961_v13 = vsub.s32 32, %v10884_v51 }
 0x292   : > { %v2566_v41 = vand.u32 65535, %v10944_v55  ;;  %v10954_v7 = vshrl.u32 %v10944_v55, 16  ;;  %v2492_v34 = vadd.f32 0.041655596, %v2491_v31  ;;  %v2499_v62 = vadd.f32 0.008332121, %v2498_v0 }
 0x293   : > { %v10956_v60 = vshrl.u32 %v2771_v48, 30  ;;  %v2564_v19 = vsel %vm2550_vm1, %v2561_v44, %v2563_v25  ;;  %v3140_v10 = vand.u32 2139095040, %v10823_v4  ;;  %v2560_v15 = vsel %vm2550_vm1, %v2557_v14, %v2559_v56  ;;  %v13775_v48 = vld [vmem:[#allocation48_spill] sm:$0xff] }
 0x294   : > { %v2568_v57 = vand.u32 65535, %v2564_v19  ;;  %v2569_v24 = vshrl.u32 %v2564_v19, 16  ;;  %v2493_v61 = vmul.f32 %v2492_v34, %v2490_v11  ;;  %v2500_v39 = vmul.f32 %v2499_v62, %v2490_v11 }
 0x295   : > { %v2773_v53 = vshll.u32 %v10956_v60, 30  ;;  %v2553_v22 = vsel %vm2549_vm15, %v2533_v52, %v2536_v36  ;;  %vm2512_vm2 = vcmp.eq.s32.totalorder %v10927_v30, 2  ;;  %v2554_v16 = vsel %vm2552_vm14, %v2542_v18, 2102212464 }
 0x296   : > { %v2570_v35 = vmul.u32 %v2568_v57, %v2566_v41  ;;  %v2571_v49 = vmul.u32 %v2569_v24, %v2566_v41  ;;  %v10970_v21 = vmul.u32 %v2568_v57, %v10954_v7  ;;  %v2494_v37 = vadd.f32 -0.4999988, %v2493_v61 }
 0x297   : > { %v2501_v23 = vadd.f32 -0.16666654, %v2500_v39  ;;  %v10973_v12 = vsub.s32 %v2770_v1, %v2773_v53  ;;  %vm2509_vm3 = vcmp.eq.s32.totalorder %v10927_v30, 0  ;;  %v2573_v59 = vmul.u32 %v2569_v24, %v10954_v7 }
 0x298   : > { %v2574_v63 = vshll.u32 %v2571_v49, 16  ;;  %v2576_v36 = vshll.u32 %v10970_v21, 16  ;;  %v2591_v54 = vshrl.u32 %v2560_v15, 16  ;;  %v2495_v45 = vmul.f32 %v2494_v37, %v2490_v11 }
 0x299   : > { %v2502_v52 = vmul.f32 %v2501_v23, %v2490_v11  ;;  %vm2508_vm4 = vcmp.lt.s32.totalorder %v10927_v30, 2  ;;  %vm2775_vm5 = vcmp.lt.s32.totalorder %v10973_v12, 0  ;;  %v2776_v1 = vsub.s32 0, %v10973_v12 }
 0x29a   : > { %vm2505_vm6 = vweird.f32 %v13764_v8  ;;  %vm2674_vm7 = vcmp.lt.s32.totalorder %v9943_v2, 0  ;;  %v2555_v18 = vsel %vm2551_vm0, %v2539_v47, %v2554_v16  ;;  %vm2578_vm8 = vc.u32 %v2570_v35, %v2574_v63 }
 0x29b   : > { %v2580_v33 = vadd.s32 %v2574_v63, %v2570_v35  ;;  %v2590_v44 = vand.u32 65535, %v2560_v15  ;;  %v2496_v27 = vadd.f32 1.0, %v2495_v45  ;;  %v2503_v31 = vadd.f32 1.0, %v2502_v52 }
 0x29c   : > { %v2777_v11 = vsel %vm2775_vm5, %v2776_v1, %v10973_v12  ;;  %v2579_v0 = vsel %vm2578_vm8, 1, %v13714_v58  ;;  %vm2993_vm9 = vcmp.gt.s32.totalorder %v13775_v48, 0  ;;  %v2575_v56 = vshrl.u32 %v2571_v49, 16 }
 0x29d   : > { %v2778_v14 = vclz %v2777_v11  ;;  %v2581_v25 = vadd.s32 %v2579_v0, %v2573_v59  ;;  %vm2582_vm10 = vc.u32 %v2580_v33, %v2576_v36  ;;  %v2504_v34 = vmul.f32 %v2503_v31, %v10925_v9 }
 0x29e   : > { %v2513_v62 = vxor.u32 2147483648, %v2496_v27  ;;  %v2583_v47 = vsel %vm2582_vm10, 1, %v13714_v58  ;;  %v2593_v19 = vmul.u32 %v2591_v54, %v2566_v41  ;;  %v2766_v57 = vadd.s32 %v10891_v20, %v10888_v50 }
 0x29f   : > { %v7476_v24 = vadd.s32 4294967294, %v2778_v14  ;;  %v10996_v61 = vsel %vm2550_vm1, %v2553_v22, %v2555_v18  ;;  %v2592_v39 = vmul.u32 %v2590_v44, %v2566_v41  ;;  %v2510_v53 = vxor.u32 2147483648, %v2504_v34 }
 0x2a0   : > { %v2796_v15 = vsub.s32 4, %v10956_v60  ;;  %v2585_v35 = vadd.s32 %v2583_v47, %v2581_v25  ;;  %v2594_v49 = vmul.u32 %v2590_v44, %v10954_v7  ;;  %v2514_v9 = vsel %vm2512_vm2, %v2513_v62, %v2504_v34 }
 0x2a1   : > { %vm7477_vm11 = vcmp.lt.s32.totalorder %v7476_v24, 0  ;;  %v2577_v37 = vshrl.u32 %v10970_v21, 16  ;;  %v2596_v23 = vshll.u32 %v2593_v19, 16  ;;  %v2511_v50 = vsel %vm2509_vm3, %v2496_v27, %v2510_v53 }
 0x2a2   : > { %v2781_v20 = vsel %vm7477_vm11, 0, %v7476_v24  ;;  %v2586_v6 = vadd.s32 %v2585_v35, %v2575_v56  ;;  %v2595_v41 = vmul.u32 %v2591_v54, %v10954_v7  ;;  %v2515_v22 = vsel %vm2508_vm4, %v2511_v50, %v2514_v9 }
 0x2a3   : > { %v2782_v16 = vsub.s32 32, %v2781_v20  ;;  %v2786_v59 = vsub.s32 4294967266, %v2781_v20  ;;  %v2598_v63 = vshll.u32 %v2594_v49, 16  ;;  %v2516_v36 = vsel %vm2505_vm6, nan, %v2515_v22 }
 0x2a4   : > { %v2783_v45 = vshll.u32 %v10973_v12, %v2781_v20  ;;  %v2797_v21 = vsel %vm2674_vm7, %v2796_v15, %v10956_v60  ;;  %vm2600_vm12 = vc.u32 %v2592_v39, %v2596_v23  ;;  %3374 = vmatmul.f32.gmra.mxu2 %v2516_v36  ;;  %v2602_v30 = vadd.s32 %v2596_v23, %v2592_v39 }
 0x2a5   : > { %v2784_v52 = vshrl.u32 %v2766_v57, %v2782_v16  ;;  %v2787_v1 = vadd.s32 127, %v2786_v59  ;;  %v2601_v7 = vsel %vm2600_vm12, 1, %v13714_v58  ;;  %v11015_v54 = vadd.s32 %v2586_v6, %v2577_v37 }
 0x2a6   : > { %v2597_v18 = vshrl.u32 %v2593_v19, 16  ;;  %v2603_v33 = vadd.s32 %v2601_v7, %v2595_v41  ;;  %v2827_v8 = vand.u32 2147483647, %v9796_v28  ;;  %vm2604_vm13 = vc.u32 %v2602_v30, %v2598_v63 }
 0x2a7   : > { %v2785_v44 = vor.u32 %v2784_v52, %v2783_v45  ;;  %v2788_v27 = vshll.u32 %v2787_v1, 23  ;;  %v11018_v12 = vadd.s32 %v2602_v30, %v2598_v63  ;;  %v11023_v60 = vsel %vm2993_vm9, %v13775_v48, 0 }
 0x2a8   : > { %v11026_v31 = vshrl.u32 %v10820_v32, 5  ;;  %v3141_v11 = vshrl.u32 %v3140_v10, 23  ;;  %v2605_v0 = vsel %vm2604_vm13, 1, %v13714_v58  ;;  %vm11033_vm14 = vcmp.le.f32.partialorder %v2672_v26, 0.7853982 }
 0x2a9   : > { %v2789_v56 = vor.u32 4788187, %v2788_v27  ;;  %v2599_v25 = vshrl.u32 %v2594_v49, 16  ;;  %v2607_v34 = vadd.s32 %v2605_v0, %v2603_v33  ;;  %v2792_v62 = vcvt.s32.f32 %v2785_v44 }
 0x2aa   : > { %v2799_v48 = vsel %vm11033_vm14, 0, %v2797_v21  ;;  %v2610_v32 = vmul.u32 %v10944_v55, %v10996_v61  ;;  %v2834_v10 = vand.u32 8388607, %v2827_v8  ;;  %vm2612_vm15 = vc.u32 %v11015_v54, %v11018_v12 }
 0x2ab   : > { %v2790_v47 = vand.u32 2147483647, %v2789_v56  ;;  %v2608_v19 = vadd.s32 %v2607_v34, %v2597_v18  ;;  %v2845_v26 = vshrl.u32 %v13720_v40, %v10961_v13  ;;  %v2847_v57 = vshll.u32 %v13720_v40, %v10884_v51 }
 0x2ac   : > { %v2848_v24 = vshrl.u32 %v13721_v5, %v10961_v13  ;;  %v2850_v55 = vshll.u32 %v13721_v5, %v10884_v51  ;;  %v2851_v61 = vshrl.u32 %v13722_v17, %v10961_v13  ;;  %v2853_v15 = vshll.u32 %v13722_v17, %v10884_v51 }
 0x2ad   : > { %v2793_v39 = vmul.f32 %v2792_v62, %v2790_v47  ;;  %v2609_v53 = vadd.s32 %v2608_v19, %v2599_v25  ;;  %v2854_v35 = vshrl.u32 %v13723_v38, %v10961_v13  ;;  %v2844_v49 = vshll.u32 %v13718_v43, %v10884_v51 }
 0x2ae   : > { %v11061_v9 = vor.u32 %v2848_v24, %v2847_v57  ;;  %v2856_v37 = vshll.u32 %v13723_v38, %v10884_v51  ;;  %v2857_v23 = vshrl.u32 %v13724_v3, %v10961_v13  ;;  %v2852_v6 = vor.u32 %v2851_v61, %v2850_v55 }
 0x2af   : > { %v2794_v50 = vxor.u32 2147483648, %v2793_v39  ;;  %v2613_v20 = vadd.s32 1, %v2609_v53  ;;  %v2855_v41 = vor.u32 %v2854_v35, %v2853_v15  ;;  %v11068_v22 = vand.u32 31, %v11023_v60 }
 0x2b0   : > { %v7484_v16 = vadd.s32 4294967169, %v3141_v11  ;;  %v2835_v59 = vor.u32 8388608, %v2834_v10  ;;  %v2858_v63 = vor.u32 %v2857_v23, %v2856_v37  ;;  %v2816_v45 = vadd.s32 3, %v2799_v48 }
 0x2b1   : > { %v2795_v36 = vsel %vm2674_vm7, %v2794_v50, %v2793_v39  ;;  %v2614_v51 = vsel %vm2612_vm15, %v2613_v20, %v2609_v53  ;;  %v11075_v21 = vor.u32 %v2845_v26, %v2844_v49  ;;  %vm2859_vm0 = vcmp.lt.s32.totalorder %v11026_v31, 1 }
 0x2b2   : > { %v11080_v52 = vsel %vm11033_vm14, %v9943_v2, %v2795_v36  ;;  %v2615_v1 = vadd.s32 %v2614_v51, %v2610_v32  ;;  %vm2862_vm1 = vcmp.lt.s32.totalorder %v11026_v31, 4  ;;  %vm2860_vm2 = vcmp.lt.s32.totalorder %v11026_v31, 2 }
 0x2b3   : > { %v2800_v7 = vmul.f32 %v11080_v52, %v11080_v52  ;;  %v2868_v30 = vsel %vm2862_vm1, %v2855_v41, 920167782  ;;  %v2871_v18 = vsel %vm2859_vm0, %v11061_v9, %v2852_v6  ;;  %vm2861_vm3 = vcmp.lt.s32.totalorder %v11026_v31, 3 }
 0x2b4   : > { %v2616_v33 = vadd.s32 536870912, %v2615_v1  ;;  %v2872_v44 = vsel %vm2862_vm1, %v2858_v63, 1326507024  ;;  %v11095_v27 = vshll.u32 %v2835_v59, 8  ;;  %v2867_v14 = vsel %vm2859_vm0, %v11075_v21, %v11061_v9 }
 0x2b5   : > { %v2801_v11 = vmul.f32 -0.001358992, %v2800_v7  ;;  %v2808_v0 = vmul.f32 -0.00019511016, %v2800_v7  ;;  %v2873_v56 = vsel %vm2861_vm3, %v2855_v41, %v2872_v44  ;;  %v2869_v34 = vsel %vm2861_vm3, %v2852_v6, %v2868_v30 }
 0x2b6   : > { %v2617_v25 = vshrl.u32 %v2616_v33, 30  ;;  %v2874_v62 = vsel %vm2860_vm2, %v2871_v18, %v2873_v56  ;;  %v2876_v48 = vand.u32 65535, %v11095_v27  ;;  %v11108_v26 = vadd.s32 1, %v7484_v16 }
 0x2b7   : > { %v2802_v32 = vadd.f32 0.041655596, %v2801_v11  ;;  %v2809_v10 = vadd.f32 0.008332121, %v2808_v0  ;;  %v2878_v47 = vand.u32 65535, %v2874_v62  ;;  %v2879_v19 = vshrl.u32 %v2874_v62, 16 }
 0x2b8   : > { %v11110_v57 = vand.u32 3, %v2816_v45  ;;  %v2618_v24 = vshll.u32 %v2617_v25, 30  ;;  %v2877_v55 = vshrl.u32 %v11095_v27, 16  ;;  %vm2519_vm4 = vcmp.lt.s32.totalorder %v13771_v46, 0 }
 0x2b9   : > { %v2803_v61 = vmul.f32 %v2802_v32, %v2800_v7  ;;  %v2810_v39 = vmul.f32 %v2809_v10, %v2800_v7  ;;  %v2881_v53 = vmul.u32 %v2879_v19, %v2876_v48  ;;  %v2864_v35 = vsel %vm2862_vm1, %v2852_v6, 2102212464 }
 0x2ba   : > { %v11114_v15 = vsub.s32 %v2615_v1, %v2618_v24  ;;  %v2870_v49 = vsel %vm2860_vm2, %v2867_v14, %v2869_v34  ;;  %v11120_v37 = vmul.u32 %v2878_v47, %v2877_v55  ;;  %v2843_v20 = vshrl.u32 %v13718_v43, %v10961_v13 }
 0x2bb   : > { %v2804_v23 = vadd.f32 -0.4999988, %v2803_v61  ;;  %v2811_v50 = vadd.f32 -0.16666654, %v2810_v39  ;;  %v2884_v41 = vshll.u32 %v2881_v53, 16  ;;  %vm2819_vm5 = vcmp.eq.s32.totalorder %v11110_v57, 0 }
 0x2bc   : > { %vm2822_vm6 = vcmp.eq.s32.totalorder %v11110_v57, 2  ;;  %vm2620_vm7 = vcmp.lt.s32.totalorder %v11114_v15, 0  ;;  %v2621_v16 = vsub.s32 0, %v11114_v15  ;;  %v2641_v6 = vsub.s32 4, %v2617_v25 }
 0x2bd   : > { %v2880_v59 = vmul.u32 %v2878_v47, %v2876_v48  ;;  %v2805_v63 = vmul.f32 %v2804_v23, %v2800_v7  ;;  %v2812_v36 = vmul.f32 %v2811_v50, %v2800_v7  ;;  %vm2818_vm8 = vcmp.lt.s32.totalorder %v11110_v57, 2 }
 0x2be   : > { %v2883_v45 = vmul.u32 %v2879_v19, %v2877_v55  ;;  %v2901_v51 = vshrl.u32 %v2870_v49, 16  ;;  %vm2815_vm9 = vweird.f32 %v9943_v2  ;;  %v2622_v13 = vsel %vm2620_vm7, %v2621_v16, %v11114_v15 }
 0x2bf   : > { %v2886_v1 = vshll.u32 %v11120_v37, 16  ;;  %vm2888_vm10 = vc.u32 %v2880_v59, %v2884_v41  ;;  %v2890_v30 = vadd.s32 %v2884_v41, %v2880_v59  ;;  %vm3148_vm11 = vcmp.gt.s32.totalorder %v11108_v26, 0 }
 0x2c0   : > { %v2806_v18 = vadd.f32 1.0, %v2805_v63  ;;  %v2813_v33 = vadd.f32 1.0, %v2812_v36  ;;  %vm11135_vm12 = vcmp.le.f32.partialorder %v2517_v42, 0.7853982  ;;  %v2623_v44 = vclz %v2622_v13 }
 0x2c1   : > { %v2889_v11 = vsel %vm2888_vm10, 1, %v13714_v58  ;;  %v2611_v0 = vadd.s32 %v11018_v12, %v11015_v54  ;;  %v2863_v14 = vsel %vm2859_vm0, %v2843_v20, %v11075_v21  ;;  %v2900_v34 = vand.u32 65535, %v2870_v49 }
 0x2c2   : > { %v2891_v56 = vadd.s32 %v2889_v11, %v2883_v45  ;;  %v2814_v62 = vmul.f32 %v2813_v33, %v11080_v52  ;;  %v2823_v32 = vxor.u32 2147483648, %v2806_v18  ;;  %v7473_v10 = vadd.s32 4294967294, %v2623_v44 }
 0x2c3   : > { %vm2892_vm13 = vc.u32 %v2890_v30, %v2886_v1  ;;  %v2642_v42 = vsel %vm2519_vm4, %v2641_v6, %v2617_v25  ;;  %v2865_v47 = vsel %vm2861_vm3, %v11061_v9, %v2864_v35  ;;  %v2903_v12 = vmul.u32 %v2901_v51, %v2876_v48 }
 0x2c4   : > { %v2893_v54 = vsel %vm2892_vm13, 1, %v13714_v58  ;;  %v2820_v19 = vxor.u32 2147483648, %v2814_v62  ;;  %vm7474_vm14 = vcmp.lt.s32.totalorder %v7473_v10, 0  ;;  %v2885_v21 = vshrl.u32 %v2881_v53, 16 }
 0x2c5   : > { %v2895_v24 = vadd.s32 %v2893_v54, %v2891_v56  ;;  %v2626_v61 = vsel %vm7474_vm14, 0, %v7473_v10  ;;  %v2902_v39 = vmul.u32 %v2900_v34, %v2876_v48  ;;  %v2904_v52 = vmul.u32 %v2900_v34, %v2877_v55 }
 0x2c6   : > { %v2906_v49 = vshll.u32 %v2903_v12, 16  ;;  %v2821_v23 = vsel %vm2819_vm5, %v2806_v18, %v2820_v19  ;;  %v2824_v25 = vsel %vm2822_vm6, %v2823_v32, %v2814_v62  ;;  %v2627_v50 = vsub.s32 32, %v2626_v61 }
 0x2c7   : > { %v2631_v20 = vsub.s32 4294967266, %v2626_v61  ;;  %v2825_v9 = vsel %vm2818_vm8, %v2821_v23, %v2824_v25  ;;  %v2628_v35 = vshll.u32 %v11114_v15, %v2626_v61  ;;  %v2896_v41 = vadd.s32 %v2895_v24, %v2885_v21 }
 0x2c8   : > { %v2905_v53 = vmul.u32 %v2901_v51, %v2877_v55  ;;  %v2826_v48 = vsel %vm2815_vm9, nan, %v2825_v9  ;;  %v2629_v16 = vshrl.u32 %v2611_v0, %v2627_v50  ;;  %vm2910_vm15 = vc.u32 %v2902_v39, %v2906_v49  ;;  %v13780_v0 = vld [vmem:[#allocation37_spill] sm:$0xff] }
 0x2c9   : > { %v2632_v6 = vadd.s32 127, %v2631_v20  ;;  %3380 = vmatmul.f32.vlgmr.msra.gmra.mxu3 %v2826_v48  ;;  %v2644_v59 = vsel %vm11135_vm12, 0, %v2642_v42  ;;  %v2908_v63 = vshll.u32 %v2904_v52, 16  ;;  %v2911_v36 = vsel %vm2910_vm15, 1, %v13714_v58 }
 0x2ca   : > { %v2912_v45 = vadd.s32 %v2906_v49, %v2902_v39  ;;  %v2630_v57 = vor.u32 %v2629_v16, %v2628_v35  ;;  %v2887_v15 = vshrl.u32 %v11120_v37, 16  ;;  %v2913_v1 = vadd.s32 %v2911_v36, %v2905_v53 }
 0x2cb   : > { %v2633_v13 = vshll.u32 %v2632_v6, 23  ;;  %v11166_v55 = vshrl.u32 %v11023_v60, 5  ;;  %v11169_v2 = vsub.s32 32, %v11068_v22  ;;  %v11174_v51 = vsel %vm3148_vm11, %v11108_v26, 0 }
 0x2cc   : > { %vm2914_vm0 = vc.u32 %v2912_v45, %v2908_v63  ;;  %v2866_v18 = vsel %vm2860_vm2, %v2863_v14, %v2865_v47  ;;  %v11178_v33 = vadd.s32 %v2896_v41, %v2887_v15  ;;  %v2661_v44 = vadd.s32 3, %v2644_v59 }
 0x2cd   : > { %v2634_v30 = vor.u32 4788187, %v2633_v13  ;;  %v2915_v37 = vsel %vm2914_vm0, 1, %v13714_v58  ;;  %v2907_v60 = vshrl.u32 %v2903_v12, 16  ;;  %v2982_v56 = vand.u32 2147483647, %v13780_v0 }
 0x2ce   : > { %v2917_v11 = vadd.s32 %v2915_v37, %v2913_v1  ;;  %v2637_v62 = vcvt.s32.f32 %v2630_v57  ;;  %v2909_v32 = vshrl.u32 %v2904_v52, 16  ;;  %v11182_v10 = vadd.s32 %v2912_v45, %v2908_v63 }
 0x2cf   : > { %v2635_v34 = vand.u32 2147483647, %v2634_v30  ;;  %v3002_v42 = vshll.u32 %v13720_v40, %v11068_v22  ;;  %v3003_v31 = vshrl.u32 %v13721_v5, %v11169_v2  ;;  %v3005_v14 = vshll.u32 %v13721_v5, %v11068_v22 }
 0x2d0   : > { %v2918_v26 = vadd.s32 %v2917_v11, %v2907_v60  ;;  %v2920_v54 = vmul.u32 %v11095_v27, %v2866_v18  ;;  %vm2922_vm1 = vc.u32 %v11178_v33, %v11182_v10  ;;  %v3006_v12 = vshrl.u32 %v13722_v17, %v11169_v2 }
 0x2d1   : > { %v2638_v47 = vmul.f32 %v2637_v62, %v2635_v34  ;;  %v2989_v21 = vand.u32 8388607, %v2982_v56  ;;  %v3008_v24 = vshll.u32 %v13722_v17, %v11068_v22  ;;  %v3009_v61 = vshrl.u32 %v13723_v38, %v11169_v2 }
 0x2d2   : > { %v2919_v19 = vadd.s32 %v2918_v26, %v2909_v32  ;;  %v2999_v27 = vshll.u32 %v13718_v43, %v11068_v22  ;;  %v3011_v52 = vshll.u32 %v13723_v38, %v11068_v22  ;;  %v3012_v49 = vshrl.u32 %v13724_v3, %v11169_v2 }
 0x2d3   : > { %v2639_v39 = vxor.u32 2147483648, %v2638_v47  ;;  %v3000_v25 = vshrl.u32 %v13720_v40, %v11169_v2  ;;  %v11209_v50 = vor.u32 %v3003_v31, %v3002_v42  ;;  %v11211_v20 = vor.u32 %v3006_v12, %v3005_v14 }
 0x2d4   : > { %v2923_v23 = vadd.s32 1, %v2919_v19  ;;  %v3013_v35 = vor.u32 %v3012_v49, %v3011_v52  ;;  %vm3014_vm2 = vcmp.lt.s32.totalorder %v11166_v55, 1  ;;  %vm3017_vm3 = vcmp.lt.s32.totalorder %v11166_v55, 4 }
 0x2d5   : > { %v2640_v9 = vsel %vm2519_vm4, %v2639_v39, %v2638_v47  ;;  %v2990_v53 = vor.u32 8388608, %v2989_v21  ;;  %v3010_v48 = vor.u32 %v3009_v61, %v3008_v24  ;;  %vm3016_vm4 = vcmp.lt.s32.totalorder %v11166_v55, 3 }
 0x2d6   : > { %v11220_v22 = vsel %vm11135_vm12, %v13771_v46, %v2640_v9  ;;  %v2924_v41 = vsel %vm2922_vm1, %v2923_v23, %v2919_v19  ;;  %v11229_v59 = vand.u32 31, %v11174_v51  ;;  %vm3015_vm5 = vcmp.lt.s32.totalorder %v11166_v55, 2 }
 0x2d7   : > { %v2645_v16 = vmul.f32 %v11220_v22, %v11220_v22  ;;  %v2925_v6 = vadd.s32 %v2924_v41, %v2920_v54  ;;  %v3026_v7 = vsel %vm3014_vm2, %v11209_v50, %v11211_v20  ;;  %v3027_v63 = vsel %vm3017_vm3, %v3013_v35, 1326507024 }
 0x2d8   : > { %v11238_v57 = vand.u32 3, %v2661_v44  ;;  %v11240_v15 = vor.u32 %v3000_v25, %v2999_v27  ;;  %v3023_v1 = vsel %vm3017_vm3, %v3010_v48, 920167782  ;;  %v3028_v30 = vsel %vm3016_vm4, %v3010_v48, %v3027_v63 }
 0x2d9   : > { %v2646_v36 = vmul.f32 -0.001358992, %v2645_v16  ;;  %v2653_v45 = vmul.f32 -0.00019511016, %v2645_v16  ;;  %v2926_v13 = vadd.s32 536870912, %v2925_v6  ;;  %v11246_v18 = vshll.u32 %v2990_v53, 8 }
 0x2da   : > { %v3029_v34 = vsel %vm3015_vm5, %v3026_v7, %v3028_v30  ;;  %v11257_v42 = vsub.s32 32, %v11229_v59  ;;  %v3022_v54 = vsel %vm3014_vm2, %v11240_v15, %v11209_v50  ;;  %v3024_v27 = vsel %vm3016_vm4, %v11211_v20, %v3023_v1 }
 0x2db   : > { %v2647_v37 = vadd.f32 0.041655596, %v2646_v36  ;;  %v2654_v60 = vadd.f32 0.008332121, %v2653_v45  ;;  %v11248_v11 = vshrl.u32 %v2926_v13, 30  ;;  %v3031_v44 = vand.u32 65535, %v11246_v18 }
 0x2dc   : > { %v11254_v62 = vshrl.u32 %v11246_v18, 16  ;;  %v3033_v32 = vand.u32 65535, %v3029_v34  ;;  %v3034_v26 = vshrl.u32 %v3029_v34, 16  ;;  %vm2664_vm6 = vcmp.eq.s32.totalorder %v11238_v57, 0 }
 0x2dd   : > { %v2648_v31 = vmul.f32 %v2647_v37, %v2645_v16  ;;  %v2655_v14 = vmul.f32 %v2654_v60, %v2645_v16  ;;  %v2928_v47 = vshll.u32 %v11248_v11, 30  ;;  %vm2667_vm7 = vcmp.eq.s32.totalorder %v11238_v57, 2 }
 0x2de   : > { %v3035_v12 = vmul.u32 %v3033_v32, %v3031_v44  ;;  %v3036_v19 = vmul.u32 %v3034_v26, %v3031_v44  ;;  %v11265_v21 = vmul.u32 %v3033_v32, %v11254_v62  ;;  %v3038_v52 = vmul.u32 %v3034_v26, %v11254_v62 }
 0x2df   : > { %v2649_v24 = vadd.f32 -0.4999988, %v2648_v31  ;;  %v2656_v61 = vadd.f32 -0.16666654, %v2655_v14  ;;  %v11267_v39 = vsub.s32 %v2925_v6, %v2928_v47  ;;  %vm2663_vm8 = vcmp.lt.s32.totalorder %v11238_v57, 2 }
 0x2e0   : > { %v3039_v49 = vshll.u32 %v3036_v19, 16  ;;  %v3041_v23 = vshll.u32 %v11265_v21, 16  ;;  %vm2660_vm10 = vweird.f32 %v13771_v46  ;;  %v2998_v41 = vshrl.u32 %v13718_v43, %v11169_v2 }
 0x2e1   : > { %v2650_v25 = vmul.f32 %v2649_v24, %v2645_v16  ;;  %v2657_v9 = vmul.f32 %v2656_v61, %v2645_v16  ;;  %vm2930_vm9 = vcmp.lt.s32.totalorder %v11267_v39, 0  ;;  %v2931_v35 = vsub.s32 0, %v11267_v39 }
 0x2e2   : > { %v3025_v53 = vsel %vm3015_vm5, %v3022_v54, %v3024_v27  ;;  %vm3043_vm11 = vc.u32 %v3035_v12, %v3039_v49  ;;  %v3045_v48 = vadd.s32 %v3039_v49, %v3035_v12  ;;  %vm2829_vm12 = vcmp.lt.s32.totalorder %v9796_v28, 0 }
 0x2e3   : > { %v2651_v6 = vadd.f32 1.0, %v2650_v25  ;;  %v2658_v7 = vadd.f32 1.0, %v2657_v9  ;;  %v2932_v16 = vsel %vm2930_vm9, %v2931_v35, %v11267_v39  ;;  %v3044_v63 = vsel %vm3043_vm11, 1, %v13714_v58 }
 0x2e4   : > { %v2933_v36 = vclz %v2932_v16  ;;  %v3040_v45 = vshrl.u32 %v3036_v19, 16  ;;  %v3046_v13 = vadd.s32 %v3044_v63, %v3038_v52  ;;  %vm3047_vm13 = vc.u32 %v3045_v48, %v3041_v23 }
 0x2e5   : > { %v2659_v1 = vmul.f32 %v2658_v7, %v11220_v22  ;;  %v2668_v2 = vxor.u32 2147483648, %v2651_v6  ;;  %v3048_v30 = vsel %vm3047_vm13, 1, %v13714_v58  ;;  %v3055_v37 = vand.u32 65535, %v3025_v53 }
 0x2e6   : > { %v2921_v60 = vadd.s32 %v11182_v10, %v11178_v33  ;;  %v7479_v34 = vadd.s32 4294967294, %v2933_v36  ;;  %v2951_v32 = vsub.s32 4, %v11248_v11  ;;  %v3019_v26 = vsel %vm3017_vm3, %v11211_v20, 2102212464 }
 0x2e7   : > { %v2665_v31 = vxor.u32 2147483648, %v2659_v1  ;;  %v3042_v14 = vshrl.u32 %v11265_v21, 16  ;;  %v3050_v47 = vadd.s32 %v3048_v30, %v3046_v13  ;;  %v3056_v54 = vshrl.u32 %v3025_v53, 16 }
 0x2e8   : > { %v2669_v22 = vsel %vm2667_vm7, %v2668_v2, %v2659_v1  ;;  %vm7480_vm14 = vcmp.lt.s32.totalorder %v7479_v34, 0  ;;  %v3057_v12 = vmul.u32 %v3055_v37, %v3031_v44  ;;  %v3059_v19 = vmul.u32 %v3055_v37, %v11254_v62 }
 0x2e9   : > { %v2666_v33 = vsel %vm2664_vm6, %v2651_v6, %v2665_v31  ;;  %v2936_v10 = vsel %vm7480_vm14, 0, %v7479_v34  ;;  %v3051_v24 = vadd.s32 %v3050_v47, %v3040_v45  ;;  %v3058_v61 = vmul.u32 %v3056_v54, %v3031_v44 }
 0x2ea   : > { %v2670_v20 = vsel %vm2663_vm8, %v2666_v33, %v2669_v22  ;;  %v2937_v27 = vsub.s32 32, %v2936_v10  ;;  %v2941_v21 = vsub.s32 4294967266, %v2936_v10  ;;  %v3018_v52 = vsel %vm3014_vm2, %v2998_v41, %v11240_v15 }
 0x2eb   : > { %v2671_v49 = vsel %vm2660_vm10, nan, %v2670_v20  ;;  %v3020_v23 = vsel %vm3016_vm4, %v11209_v50, %v3019_v26  ;;  %v3060_v25 = vmul.u32 %v3056_v54, %v11254_v62  ;;  %v3061_v9 = vshll.u32 %v3058_v61, 16 }
 0x2ec   : > { %3377 = vmatmul.f32.gmra.mxu2 %v2671_v49  ;;  %v2938_v57 = vshll.u32 %v11267_v39, %v2936_v10  ;;  %v2939_v44 = vshrl.u32 %v2921_v60, %v2937_v27  ;;  %v2942_v35 = vadd.s32 127, %v2941_v21  ;;  %v3063_v53 = vshll.u32 %v3059_v19, 16 }
 0x2ed   : > { %v2952_v15 = vsel %vm2829_vm12, %v2951_v32, %v11248_v11  ;;  %v11316_v41 = vadd.s32 %v3051_v24, %v3042_v14  ;;  %vm3065_vm15 = vc.u32 %v3057_v12, %v3061_v9  ;;  %v3067_v46 = vadd.s32 %v3061_v9, %v3057_v12 }
 0x2ee   : > { %v2940_v48 = vor.u32 %v2939_v44, %v2938_v57  ;;  %v2943_v6 = vshll.u32 %v2942_v35, 23  ;;  %v3062_v50 = vshrl.u32 %v3058_v61, 16  ;;  %v3066_v62 = vsel %vm3065_vm15, 1, %v13714_v58 }
 0x2ef   : > { %v3068_v7 = vadd.s32 %v3066_v62, %v3060_v25  ;;  %vm3069_vm0 = vc.u32 %v3067_v46, %v3063_v53  ;;  %v11319_v16 = vadd.s32 %v3067_v46, %v3063_v53  ;;  %v3137_v39 = vand.u32 2147483647, %v10823_v4 }
 0x2f0   : > { %v2944_v63 = vor.u32 4788187, %v2943_v6  ;;  %v3070_v36 = vsel %vm3069_vm0, 1, %v13714_v58  ;;  %v11324_v11 = vshrl.u32 %v11174_v51, 5  ;;  %vm11328_vm1 = vcmp.le.f32.partialorder %v2827_v8, 0.7853982 }
 0x2f1   : > { %v3064_v13 = vshrl.u32 %v3059_v19, 16  ;;  %v3072_v1 = vadd.s32 %v3070_v36, %v3068_v7  ;;  %v2947_v30 = vcvt.s32.f32 %v2940_v48  ;;  %v2954_v37 = vsel %vm11328_vm1, 0, %v2952_v15 }
 0x2f2   : > { %v2945_v2 = vand.u32 2147483647, %v2944_v63  ;;  %v3021_v60 = vsel %vm3015_vm5, %v3018_v52, %v3020_v23  ;;  %vm3077_vm2 = vc.u32 %v11316_v41, %v11319_v16  ;;  %v3144_v8 = vand.u32 8388607, %v3137_v39 }
 0x2f3   : > { %v3073_v34 = vadd.s32 %v3072_v1, %v3062_v50  ;;  %v3158_v51 = vshrl.u32 %v13721_v5, %v11257_v42  ;;  %v3155_v26 = vshrl.u32 %v13720_v40, %v11257_v42  ;;  %v3157_v31 = vshll.u32 %v13720_v40, %v11229_v59 }
 0x2f4   : > { %v2948_v32 = vmul.f32 %v2947_v30, %v2945_v2  ;;  %v3161_v55 = vshrl.u32 %v13722_v17, %v11257_v42  ;;  %v3160_v47 = vshll.u32 %v13721_v5, %v11229_v59  ;;  %v3163_v54 = vshll.u32 %v13722_v17, %v11229_v59 }
 0x2f5   : > { %v3074_v14 = vadd.s32 %v3073_v34, %v3064_v13  ;;  %v3164_v22 = vshrl.u32 %v13723_v38, %v11257_v42  ;;  %v3154_v19 = vshll.u32 %v13718_v43, %v11229_v59  ;;  %v3166_v40 = vshll.u32 %v13723_v38, %v11229_v59 }
 0x2f6   : > { %v2949_v12 = vxor.u32 2147483648, %v2948_v32  ;;  %v3167_v33 = vshrl.u32 %v13724_v3, %v11257_v42  ;;  %v11360_v24 = vor.u32 %v3158_v51, %v3157_v31  ;;  %v11362_v5 = vor.u32 %v3161_v55, %v3160_v47 }
 0x2f7   : > { %v3078_v10 = vadd.s32 1, %v3074_v14  ;;  %v3165_v61 = vor.u32 %v3164_v22, %v3163_v54  ;;  %v3075_v20 = vmul.u32 %v11246_v18, %v3021_v60  ;;  %v3145_v27 = vor.u32 8388608, %v3144_v8 }
 0x2f8   : > { %v2950_v17 = vsel %vm2829_vm12, %v2949_v12, %v2948_v32  ;;  %v3168_v21 = vor.u32 %v3167_v33, %v3166_v40  ;;  %v11373_v59 = vor.u32 %v3155_v26, %v3154_v19  ;;  %vm3172_vm3 = vcmp.lt.s32.totalorder %v11324_v11, 4 }
 0x2f9   : > { %v2953_v38 = vsel %vm11328_vm1, %v9796_v28, %v2950_v17  ;;  %v3079_v3 = vsel %vm3077_vm2, %v3078_v10, %v3074_v14  ;;  %vm3169_vm4 = vcmp.lt.s32.totalorder %v11324_v11, 1  ;;  %v3178_v18 = vsel %vm3172_vm3, %v3165_v61, 920167782 }
 0x2fa   : > { %v2955_v52 = vmul.f32 %v2953_v38, %v2953_v38  ;;  %v3080_v49 = vadd.s32 %v3079_v3, %v3075_v20  ;;  %v2971_v23 = vadd.s32 3, %v2954_v37  ;;  %vm3170_vm5 = vcmp.lt.s32.totalorder %v11324_v11, 2 }
 0x2fb   : > { %v3181_v25 = vsel %vm3169_vm4, %v11360_v24, %v11362_v5  ;;  %v3182_v9 = vsel %vm3172_vm3, %v3168_v21, 1326507024  ;;  %vm3171_vm6 = vcmp.lt.s32.totalorder %v11324_v11, 3  ;;  %v3177_v53 = vsel %vm3169_vm4, %v11373_v59, %v11360_v24 }
 0x2fc   : > { %v2956_v57 = vmul.f32 -0.001358992, %v2955_v52  ;;  %v2963_v44 = vmul.f32 -0.00019511016, %v2955_v52  ;;  %v3081_v35 = vadd.s32 536870912, %v3080_v49  ;;  %v3179_v15 = vsel %vm3171_vm6, %v11362_v5, %v3178_v18 }
 0x2fd   : > { %v3183_v46 = vsel %vm3171_vm6, %v3165_v61, %v3182_v9  ;;  %v11396_v48 = vshll.u32 %v3145_v27, 8  ;;  %v3180_v32 = vsel %vm3170_vm5, %v3177_v53, %v3179_v15  ;;  %v2972_v26 = vand.u32 3, %v2971_v23 }
 0x2fe   : > { %v2957_v6 = vadd.f32 0.041655596, %v2956_v57  ;;  %v2964_v50 = vadd.f32 0.008332121, %v2963_v44  ;;  %v11398_v62 = vshrl.u32 %v3081_v35, 30  ;;  %v3184_v7 = vsel %vm3170_vm5, %v3181_v25, %v3183_v46 }
 0x2ff   : > { %v3186_v63 = vand.u32 65535, %v11396_v48  ;;  %v3187_v36 = vshrl.u32 %v11396_v48, 16  ;;  %v3188_v45 = vand.u32 65535, %v3184_v7  ;;  %v3189_v13 = vshrl.u32 %v3184_v7, 16 }
 0x300   : > { %v2958_v1 = vmul.f32 %v2957_v6, %v2955_v52  ;;  %v2965_v2 = vmul.f32 %v2964_v50, %v2955_v52  ;;  %v3083_v30 = vshll.u32 %v11398_v62, 30  ;;  %v3211_v19 = vshrl.u32 %v3180_v32, 16 }
 0x301   : > { %v3191_v37 = vmul.u32 %v3189_v13, %v3186_v63  ;;  %v11405_v60 = vmul.u32 %v3188_v45, %v3187_v36  ;;  %v3190_v31 = vmul.u32 %v3188_v45, %v3186_v63  ;;  %v3193_v20 = vmul.u32 %v3189_v13, %v3187_v36 }
 0x302   : > { %v2959_v34 = vadd.f32 -0.4999988, %v2958_v1  ;;  %v2966_v8 = vadd.f32 -0.16666654, %v2965_v2  ;;  %v3084_v51 = vsub.s32 %v3080_v49, %v3083_v30  ;;  %v3210_v27 = vand.u32 65535, %v3180_v32 }
 0x303   : > { %v3194_v55 = vshll.u32 %v3191_v37, 16  ;;  %v3196_v22 = vshll.u32 %v11405_v60, 16  ;;  %vm2970_vm10 = vweird.f32 %v9796_v28  ;;  %vm2973_vm11 = vcmp.lt.s32.totalorder %v2972_v26, 2 }
 0x304   : > { %v2960_v14 = vmul.f32 %v2959_v34, %v2955_v52  ;;  %v2967_v47 = vmul.f32 %v2966_v8, %v2955_v52  ;;  %vm3085_vm7 = vcmp.lt.s32.totalorder %v3084_v51, 0  ;;  %v3086_v54 = vsub.s32 0, %v3084_v51 }
 0x305   : > { %vm3198_vm8 = vc.u32 %v3190_v31, %v3194_v55  ;;  %v3200_v12 = vadd.s32 %v3194_v55, %v3190_v31  ;;  %vm2974_vm12 = vcmp.eq.s32.totalorder %v2972_v26, 0  ;;  %vm2977_vm13 = vcmp.eq.s32.totalorder %v2972_v26, 2 }
 0x306   : > { %v2961_v40 = vadd.f32 1.0, %v2960_v14  ;;  %v2968_v33 = vadd.f32 1.0, %v2967_v47  ;;  %v3087_v10 = vsel %vm3085_vm7, %v3086_v54, %v3084_v51  ;;  %v3199_v61 = vsel %vm3198_vm8, 1, %v13714_v58 }
 0x307   : > { %v3088_v17 = vclz %v3087_v10  ;;  %vm3202_vm9 = vc.u32 %v3200_v12, %v3196_v22  ;;  %v3201_v49 = vadd.s32 %v3199_v61, %v3193_v20  ;;  %v3213_v25 = vmul.u32 %v3211_v19, %v3186_v63 }
 0x308   : > { %v2969_v21 = vmul.f32 %v2968_v33, %v2953_v38  ;;  %v2978_v3 = vxor.u32 2147483648, %v2961_v40  ;;  %v3203_v23 = vsel %vm3202_vm9, 1, %v13714_v58  ;;  %v3076_v57 = vadd.s32 %v11319_v16, %v11316_v41 }
 0x309   : > { %v7482_v52 = vadd.s32 4294967294, %v3088_v17  ;;  %v3212_v44 = vmul.u32 %v3210_v27, %v3186_v63  ;;  %v3214_v53 = vmul.u32 %v3210_v27, %v3187_v36  ;;  %v3216_v15 = vshll.u32 %v3213_v25, 16 }
 0x30a   : > { %v2975_v18 = vxor.u32 2147483648, %v2969_v21  ;;  %v2979_v9 = vsel %vm2977_vm13, %v2978_v3, %v2969_v21  ;;  %v3205_v7 = vadd.s32 %v3203_v23, %v3201_v49  ;;  %v3195_v13 = vshrl.u32 %v3191_v37, 16 }
 0x30b   : > { %vm7483_vm14 = vcmp.lt.s32.totalorder %v7482_v52, 0  ;;  %v3215_v1 = vmul.u32 %v3211_v19, %v3187_v36  ;;  %vm3220_vm15 = vc.u32 %v3212_v44, %v3216_v15  ;;  %v3218_v16 = vshll.u32 %v3214_v53, 16 }
 0x30c   : > { %v2976_v35 = vsel %vm2974_vm12, %v2961_v40, %v2975_v18  ;;  %v3091_v38 = vsel %vm7483_vm14, 0, %v7482_v52  ;;  %v3221_v63 = vsel %vm3220_vm15, 1, %v13714_v58  ;;  %v3222_v34 = vadd.s32 %v3216_v15, %v3212_v44 }
 0x30d   : > { %v2980_v46 = vsel %vm2973_vm11, %v2976_v35, %v2979_v9  ;;  %v3092_v6 = vsub.s32 32, %v3091_v38  ;;  %v3096_v50 = vsub.s32 4294967266, %v3091_v38  ;;  %v3093_v2 = vshll.u32 %v3084_v51, %v3091_v38 }
 0x30e   : > { %v2981_v45 = vsel %vm2970_vm10, nan, %v2980_v46  ;;  %v3206_v26 = vadd.s32 %v3205_v7, %v3195_v13  ;;  %v3223_v31 = vadd.s32 %v3221_v63, %v3215_v1  ;;  %v3153_v55 = vshrl.u32 %v13718_v43, %v11257_v42 }
 0x30f   : > { %3383 = vmatmul.f32.gmra.mxu3 %v2981_v45  ;;  %v3094_v30 = vshrl.u32 %v3076_v57, %v3092_v6  ;;  %v3097_v41 = vadd.s32 127, %v3096_v50  ;;  %v3174_v28 = vsel %vm3172_vm3, %v11362_v5, 2102212464  ;;  %vm3224_vm0 = vc.u32 %v3222_v34, %v3218_v16 }
 0x310   : > { %v3197_v37 = vshrl.u32 %v11405_v60, 16  ;;  %v3225_v51 = vsel %vm3224_vm0, 1, %v13714_v58  ;;  %v3173_v14 = vsel %vm3169_vm4, %v3153_v55, %v11373_v59  ;;  %v3217_v47 = vshrl.u32 %v3213_v25, 16 }
 0x311   : > { %v3095_v8 = vor.u32 %v3094_v30, %v3093_v2  ;;  %v3098_v32 = vshll.u32 %v3097_v41, 23  ;;  %v3227_v54 = vadd.s32 %v3225_v51, %v3223_v31  ;;  %v3175_v43 = vsel %vm3171_vm6, %v11360_v24, %v3174_v28 }
 0x312   : > { %v3207_v42 = vadd.s32 %v3206_v26, %v3197_v37  ;;  %v3219_v5 = vshrl.u32 %v3214_v53, 16  ;;  %v3226_v33 = vadd.s32 %v3222_v34, %v3218_v16  ;;  %v3176_v58 = vsel %vm3170_vm5, %v3173_v14, %v3175_v43 }
 0x313   : > { %v3099_v36 = vor.u32 4788187, %v3098_v32  ;;  %v3102_v12 = vcvt.s32.f32 %v3095_v8  ;;  %v3228_v19 = vadd.s32 %v3227_v54, %v3217_v47  ;;  %vm2984_vm2 = vcmp.lt.s32.totalorder %v13780_v0, 0 }
 0x314   : > { %vm3232_vm1 = vc.u32 %v3207_v42, %v3226_v33  ;;  %vm11437_vm3 = vcmp.le.f32.partialorder %v2982_v56, 0.7853982  ;;  %v3230_v17 = vmul.u32 %v11396_v48, %v3176_v58  ;;  %v3106_v20 = vsub.s32 4, %v11398_v62 }
 0x315   : > { %v3100_v22 = vand.u32 2147483647, %v3099_v36  ;;  %v3229_v60 = vadd.s32 %v3228_v19, %v3219_v5  ;;  %vm3125_vm5 = vweird.f32 %v13780_v0  ;;  %v3231_v31 = vadd.s32 %v3226_v33, %v3207_v42 }
 0x316   : > { %v3107_v56 = vsel %vm2984_vm2, %v3106_v20, %v11398_v62  ;;  %vm3139_vm10 = vcmp.lt.s32.totalorder %v10823_v4, 0  ;;  %vm11460_vm11 = vcmp.le.f32.partialorder %v3137_v39, 0.7853982  ;;  %vm3280_vm15 = vweird.f32 %v10823_v4 }
 0x317   : > { %v3103_v40 = vmul.f32 %v3102_v12, %v3100_v22  ;;  %v3233_v59 = vadd.s32 1, %v3229_v60  ;;  %v3109_v48 = vsel %vm11437_vm3, 0, %v3107_v56  ;;  %v3429_v56 = vld [vmem:[%s8993_s10] sm:$0xff] }
 0x318   : > { %v3126_v46 = vadd.s32 3, %v3109_v48 }
 0x319   : > { %v3104_v10 = vxor.u32 2147483648, %v3103_v40  ;;  %v3234_v27 = vsel %vm3232_vm1, %v3233_v59, %v3229_v60 }
 0x31a   : > { %v3235_v3 = vadd.s32 %v3234_v27, %v3230_v17  ;;  %v3127_v1 = vand.u32 3, %v3126_v46  ;;  %v3345_v27 = vpop.f32.mrf.mxu0  ;;  %v13788_v46 = vld [vmem:[#allocation33_spill] sm:$0xff] }
 0x31b   : > { %v3105_v24 = vsel %vm2984_vm2, %v3104_v10, %v3103_v40  ;;  %v11464_v40 = vld [vmem:[#allocation7] ss:$0 sm:$0xff]  ;;  %v3782_v10 = vld [vmem:[%s11455_s25 + $0x8] sm:$0xff] }
 0x31c   : > { %v3108_v11 = vsel %vm11437_vm3, %v13780_v0, %v3105_v24  ;;  %v3236_v18 = vadd.s32 536870912, %v3235_v3  ;;  %vm3129_vm6 = vcmp.eq.s32.totalorder %v3127_v1, 0  ;;  %vm3132_vm7 = vcmp.eq.s32.totalorder %v3127_v1, 2  ;;  %3799 = vadd.xlane.f32.xlu2 %v3782_v10  ;;  %v13787_v24 = vld [vmem:[#allocation29_spill] sm:$0xff] }
 0x31d   : > { %v3110_v21 = vmul.f32 %v3108_v11, %v3108_v11  ;;  %vm3128_vm9 = vcmp.lt.s32.totalorder %v3127_v1, 2  ;;  %v3296_v39 = vmul.f32 %v11464_v40, %v13787_v24  ;;  %v3431_v24 = vld [vmem:[%s8993_s10 + $0x10] sm:$0xff] }
 0x31e   : > { %v3237_v9 = vshrl.u32 %v3236_v18, 30  ;;  %v11474_v18 = vld [vmem:[#allocation10] ss:$0 sm:$0xff] }
 0x31f   : > { %v3111_v52 = vmul.f32 -0.001358992, %v3110_v21  ;;  %v3118_v49 = vmul.f32 -0.00019511016, %v3110_v21 }
 0x320   : > { %v3238_v35 = vshll.u32 %v3237_v9, 30  ;;  %v3261_v33 = vsub.s32 4, %v3237_v9 }
 0x321   : > { %v3112_v23 = vadd.f32 0.041655596, %v3111_v52  ;;  %v3119_v25 = vadd.f32 0.008332121, %v3118_v49 }
 0x322   : > { %v3239_v15 = vsub.s32 %v3235_v3, %v3238_v35  ;;  %v3262_v17 = vsel %vm3139_vm10, %v3261_v33, %v3237_v9  ;;  %v3348_v1 = vpop.f32.mrf.mxu0 }
 0x323   : > { %v3113_v57 = vmul.f32 %v3112_v23, %v3110_v21  ;;  %v3120_v44 = vmul.f32 %v3119_v25, %v3110_v21  ;;  %v3264_v3 = vsel %vm11460_vm11, 0, %v3262_v17 }
 0x324   : > { %vm3240_vm4 = vcmp.lt.s32.totalorder %v3239_v15, 0  ;;  %v3241_v7 = vsub.s32 0, %v3239_v15 }
 0x325   : > { %v3114_v38 = vadd.f32 -0.4999988, %v3113_v57  ;;  %v3121_v53 = vadd.f32 -0.16666654, %v3120_v44  ;;  %v3281_v57 = vadd.s32 3, %v3264_v3  ;;  %v3433_v3 = vld [vmem:[%s8993_s10 + $0x20] sm:$0xff] }
 0x326   : > { %v3242_v62 = vsel %vm3240_vm4, %v3241_v7, %v3239_v15  ;;  %v3781_v7 = vld [vmem:[%s11455_s25] sm:$0xff] }
 0x327   : > { %v3115_v6 = vmul.f32 %v3114_v38, %v3110_v21  ;;  %v3122_v50 = vmul.f32 %v3121_v53, %v3110_v21  ;;  %v3243_v2 = vclz %v3242_v62  ;;  %v3393_v21 = vadd.f32 %v3345_v27, %v3296_v39  ;;  %v4164_v38 = vld [vmem:[#allocation11 + $0x78] sm:$0xff]  ;;  %3797 = vadd.xlane.f32.xlu1 %v3781_v7  ;;  %v4159_v39 = vld [vmem:[#allocation11 + $0x50] sm:$0xff] }
 0x328   : > { %v4831_v53 = vld [vmem:[#allocation13 + $0x78] sm:$0xff]  ;;  %4165 = vmatpush.msrb.mxu1 %v4164_v38 }
 0x329   : > { %v3116_v45 = vadd.f32 1.0, %v3115_v6  ;;  %v3123_v13 = vadd.f32 1.0, %v3122_v50  ;;  %v7485_v16 = vadd.s32 4294967294, %v3243_v2  ;;  %v3413_v48 = vadd.f32 %v11474_v18, %v3393_v21  ;;  %4832 = vmatpush.msrb.mxu0 %v4831_v53  ;;  %v4825_v53 = vld [vmem:[#allocation13 + $0x48] sm:$0xff] }
 0x32a   : > { %v3297_v6 = vmul.f32 %v11464_v40, %v13788_v46  ;;  %v3830_v50 = vmul.f32 %v3782_v10, %v3782_v10  ;;  %v3282_v2 = vand.u32 3, %v3281_v57  ;;  %v4160_v10 = vld [vmem:[#allocation11 + $0x58] sm:$0xff] }
 0x32b   : > { %v3124_v30 = vmul.f32 %v3123_v13, %v3108_v11  ;;  %v3133_v41 = vxor.u32 2147483648, %v3116_v45  ;;  %vm7486_vm8 = vcmp.lt.s32.totalorder %v7485_v16, 0  ;;  %v11478_v35 = vadd.f32 %v3429_v56, %v3413_v48  ;;  %v4826_v56 = vld [vmem:[#allocation13 + $0x50] sm:$0xff] }
 0x32c   : > { %v3246_v32 = vsel %vm7486_vm8, 0, %v7485_v16  ;;  %3847 = vadd.xlane.f32.xlu2 %v3830_v50  ;;  %vm3284_vm12 = vcmp.eq.s32.totalorder %v3282_v2, 0  ;;  %vm3287_vm13 = vcmp.eq.s32.totalorder %v3282_v2, 2  ;;  %vm3283_vm14 = vcmp.lt.s32.totalorder %v3282_v2, 2 }
 0x32d   : > { %v3130_v63 = vxor.u32 2147483648, %v3124_v30  ;;  %v3134_v8 = vsel %vm3132_vm7, %v3133_v41, %v3124_v30  ;;  %v3247_v55 = vsub.s32 32, %v3246_v32  ;;  %v3251_v28 = vsub.s32 4294967266, %v3246_v32 }
 0x32e   : > { %v3248_v37 = vshll.u32 %v3239_v15, %v3246_v32  ;;  %v4163_v15 = vld [vmem:[#allocation11 + $0x70] sm:$0xff]  ;;  %v7487_v62 = vmul.f32 -1.442695, %v11478_v35  ;;  %v3394_v30 = vadd.f32 %v3348_v1, %v3297_v6  ;;  %v3430_v32 = vld [vmem:[%s8993_s10 + $0x8] sm:$0xff] }
 0x32f   : > { %v3131_v34 = vsel %vm3129_vm6, %v3116_v45, %v3130_v63  ;;  %v3249_v51 = vshrl.u32 %v3231_v31, %v3247_v55  ;;  %v3252_v14 = vadd.s32 127, %v3251_v28  ;;  %4166 = vmatpush.msrb.mxu1 %v4163_v15  ;;  %v13789_v55 = vld [vmem:[#allocation27_spill] sm:$0xff]  ;;  %v4157_v15 = vld [vmem:[#allocation11 + $0x40] sm:$0xff] }
 0x330   : > { %v3135_v26 = vsel %vm3128_vm9, %v3131_v34, %v3134_v8  ;;  %v3357_v34 = vpop.f32.mrf.mxu1  ;;  %8003 = vpow2.f32 %v7487_v62  ;;  %v3414_v8 = vadd.f32 %v11474_v18, %v3394_v30  ;;  %v3298_v28 = vmul.f32 %v11464_v40, %v13789_v55  ;;  %v3784_v1 = vld [vmem:[%s11455_s25 + $0x18] sm:$0xff]  ;;  %v3434_v30 = vld [vmem:[%s8993_s10 + $0x28] sm:$0xff] }
 0x331   : > { %v3136_v36 = vsel %vm3125_vm5, nan, %v3135_v26  ;;  %v3250_v47 = vor.u32 %v3249_v51, %v3248_v37  ;;  %v3253_v54 = vshll.u32 %v3252_v14, 23  ;;  %v4830_v14 = vld [vmem:[#allocation13 + $0x70] sm:$0xff] }
 0x332   : > { %3386 = vmatmul.f32.gmra.mxu3 %v3136_v36  ;;  %v11489_v51 = vadd.f32 %v3430_v32, %v3414_v8  ;;  %4833 = vmatpush.msrb.mxu0 %v4830_v14  ;;  %v13793_v55 = vld [vmem:[#allocation38_spill] sm:$0xff] }
 0x333   : > { %v3254_v0 = vor.u32 4788187, %v3253_v54  ;;  %v3257_v12 = vcvt.s32.f32 %v3250_v47  ;;  %v4162_v47 = vld [vmem:[#allocation11 + $0x68] sm:$0xff] }
 0x334   : > { %v4829_v54 = vld [vmem:[#allocation13 + $0x68] sm:$0xff]  ;;  %4167 = vmatpush.msrb.mxu1 %v4162_v47  ;;  %3803 = vadd.xlane.f32.xlu2 %v3784_v1 }
 0x335   : > { %v3255_v22 = vand.u32 2147483647, %v3254_v0  ;;  %v3351_v0 = vpop.f32.mrf.mxu0  ;;  %4834 = vmatpush.msrb.mxu0 %v4829_v54 }
 0x336   : > { %v3395_v42 = vadd.f32 %v3351_v0, %v3298_v28  ;;  %v3302_v28 = vmul.f32 %v11464_v40, %v13793_v55 }
 0x337   : > { %v3258_v43 = vmul.f32 %v3257_v12, %v3255_v22  ;;  %v13790_v22 = vld [vmem:[#allocation24_spill] sm:$0xff] }
 0x338   : > { %v3300_v12 = vmul.f32 %v11464_v40, %v13790_v22  ;;  %v3360_v17 = vpop.f32.mrf.mxu1 }
 0x339   : > { %v3259_v5 = vxor.u32 2147483648, %v3258_v43 }
 0x33a   : > { %v3397_v33 = vadd.f32 %v3357_v34, %v3300_v12 }
 0x33b   : > { %v3260_v19 = vsel %vm3139_vm10, %v3259_v5, %v3258_v43  ;;  %v3829_v43 = vmul.f32 %v3781_v7, %v3781_v7  ;;  %v4161_v5 = vld [vmem:[#allocation11 + $0x60] sm:$0xff] }
 0x33c   : > { %v3263_v58 = vsel %vm11460_vm11, %v10823_v4, %v3260_v19  ;;  %v8004_v19 = vpop.eup %8003  ;;  %v4828_v4 = vld [vmem:[#allocation13 + $0x60] sm:$0xff]  ;;  %4168 = vmatpush.msrb.mxu1 %v4161_v5  ;;  %v3417_v27 = vadd.f32 %v11474_v18, %v3397_v33  ;;  %v4154_v33 = vld [vmem:[#allocation11 + $0x28] sm:$0xff] }
 0x33d   : > { %v3265_v60 = vmul.f32 %v3263_v58, %v3263_v58  ;;  %3845 = vadd.xlane.f32.xlu0 %v3829_v43  ;;  %4835 = vmatpush.msrb.mxu0 %v4828_v4  ;;  %v3354_v48 = vpop.f32.mrf.mxu0  ;;  %v4824_v7 = vld [vmem:[#allocation13 + $0x40] sm:$0xff]  ;;  %v4822_v4 = vld [vmem:[#allocation13 + $0x30] sm:$0xff] }
 0x33e   : > { %4169 = vmatpush.msrb.mxu1 %v4160_v10  ;;  %v11511_v38 = vadd.f32 %v3433_v3, %v3417_v27 }
 0x33f   : > { %v3266_v59 = vmul.f32 -0.001358992, %v3265_v60  ;;  %v3273_v61 = vmul.f32 -0.00019511016, %v3265_v60 }
 0x340   : > { %4170 = vmatpush.msrb.mxu1 %v4159_v39  ;;  %v7491_v34 = vmul.f32 -1.442695, %v11511_v38  ;;  %v3363_v8 = vpop.f32.mrf.mxu1  ;;  %v3435_v39 = vld [vmem:[%s8993_s10 + $0x30] sm:$0xff] }
 0x341   : > { %v3267_v20 = vadd.f32 0.041655596, %v3266_v59  ;;  %v3274_v11 = vadd.f32 0.008332121, %v3273_v61  ;;  %v3415_v59 = vadd.f32 %v11474_v18, %v3395_v42  ;;  %v4827_v61 = vld [vmem:[#allocation13 + $0x58] sm:$0xff]  ;;  %v3399_v47 = vadd.f32 %v3363_v8, %v3302_v28  ;;  %v4149_v8 = vld [vmem:[#allocation11] sm:$0xff] }
 0x342   : > { %4836 = vmatpush.msrb.mxu0 %v4827_v61  ;;  %v4153_v61 = vld [vmem:[#allocation11 + $0x20] sm:$0xff] }
 0x343   : > { %v3268_v52 = vmul.f32 %v3267_v20, %v3265_v60  ;;  %v3275_v49 = vmul.f32 %v3274_v11, %v3265_v60  ;;  %v13791_v20 = vld [vmem:[#allocation25_spill] sm:$0xff]  ;;  %v11502_v21 = vadd.f32 %v3431_v24, %v3415_v59  ;;  %v3419_v59 = vadd.f32 %v11474_v18, %v3399_v47  ;;  %v13799_v47 = vld [vmem:[#allocation26_spill] sm:$0xff] }
 0x344   : > { %v3301_v11 = vmul.f32 %v11464_v40, %v13791_v20  ;;  %4837 = vmatpush.msrb.mxu0 %v4826_v56  ;;  %v4820_v20 = vld [vmem:[#allocation13 + $0x20] sm:$0xff] }
 0x345   : > { %v3269_v23 = vadd.f32 -0.4999988, %v3268_v52  ;;  %v3276_v25 = vadd.f32 -0.16666654, %v3275_v49  ;;  %v7489_v49 = vmul.f32 -1.442695, %v11502_v21 }
 0x346   : > { %v3398_v52 = vadd.f32 %v3360_v17, %v3301_v11  ;;  %4838 = vmatpush.msrb.mxu0 %v4825_v53  ;;  %v3832_v17 = vmul.f32 %v3784_v1, %v3784_v1  ;;  %v4152_v11 = vld [vmem:[#allocation11 + $0x18] sm:$0xff]  ;;  %v13796_v56 = vld [vmem:[#allocation36_spill] sm:$0xff]  ;;  %v4818_v1 = vld [vmem:[#allocation13 + $0x10] sm:$0xff] }
 0x347   : > { %v3270_v44 = vmul.f32 %v3269_v23, %v3265_v60  ;;  %v3277_v9 = vmul.f32 %v3276_v25, %v3265_v60  ;;  %v7488_v60 = vmul.f32 -1.442695, %v11489_v51  ;;  %v4158_v23 = vld [vmem:[#allocation11 + $0x48] sm:$0xff] }
 0x348   : > { %v3783_v25 = vld [vmem:[%s11455_s25 + $0x10] sm:$0xff]  ;;  %4171 = vmatpush.msrb.mxu1 %v4158_v23  ;;  %4839 = vmatpush.msrb.mxu0 %v4824_v7  ;;  %v3303_v23 = vmul.f32 %v11464_v40, %v13796_v56  ;;  %v3369_v7 = vpop.f32.mrf.mxu2 }
 0x349   : > { %v3271_v45 = vadd.f32 1.0, %v3270_v44  ;;  %v3278_v13 = vadd.f32 1.0, %v3277_v9  ;;  %v13792_v44 = vld [vmem:[#allocation30_spill] sm:$0xff]  ;;  %v3831_v46 = vmul.f32 %v3783_v25, %v3783_v25  ;;  %3801 = vadd.xlane.f32.xlu1 %v3783_v25 }
 0x34a   : > { %v3299_v9 = vmul.f32 %v11464_v40, %v13792_v44  ;;  %4172 = vmatpush.msrb.mxu1 %v4157_v15  ;;  %v11561_v44 = vadd.f32 %v3435_v39, %v3419_v59  ;;  %v4819_v15 = vld [vmem:[#allocation13 + $0x18] sm:$0xff]  ;;  %v13806_v39 = vld [vmem:[#allocation28_spill] sm:$0xff] }
 0x34b   : > { %v3279_v41 = vmul.f32 %v3278_v13, %v3263_v58  ;;  %v3288_v16 = vxor.u32 2147483648, %v3271_v45  ;;  %v11493_v58 = vadd.f32 1.0, %v8004_v19  ;;  %v3418_v13 = vadd.f32 %v11474_v18, %v3398_v52  ;;  %3849 = vadd.xlane.f32.xlu0 %v3831_v46  ;;  %v3366_v52 = vpop.f32.mrf.mxu1  ;;  %v4151_v46 = vld [vmem:[#allocation11 + $0x10] sm:$0xff] }
 0x34c   : > { %v3396_v2 = vadd.f32 %v3354_v48, %v3299_v9  ;;  %v3400_v53 = vadd.f32 %v3366_v52, %v3303_v23  ;;  %v13802_v23 = vld [vmem:[#allocation50_spill] sm:$0xff] }
 0x34d   : > { %v3285_v63 = vxor.u32 2147483648, %v3279_v41  ;;  %v3289_v31 = vsel %vm3287_vm13, %v3288_v16, %v3279_v41  ;;  %8005 = vrcp.f32 %v11493_v58  ;;  %v4823_v16 = vld [vmem:[#allocation13 + $0x38] sm:$0xff]  ;;  %v3536_v43 = vand.u32 2147483648, %v11493_v58 }
 0x34e   : > { %8007 = vpow2.f32 %v7488_v60  ;;  %4840 = vmatpush.msrb.mxu0 %v4823_v16  ;;  %vm3530_vm1 = vweird.f32 %v11493_v58  ;;  %v3534_v42 = vand.u32 2147483647, %v11493_v58  ;;  %v4821_v60 = vld [vmem:[#allocation13 + $0x28] sm:$0xff] }
 0x34f   : > { %v3286_v26 = vsel %vm3284_vm12, %v3271_v45, %v3285_v63  ;;  %8009 = vpow2.f32 %v7489_v49  ;;  %v4156_v45 = vld [vmem:[#allocation11 + $0x38] sm:$0xff]  ;;  %v4155_v63 = vld [vmem:[#allocation11 + $0x30] sm:$0xff]  ;;  %v3537_v3 = vor.u32 1.1754944e-38, %v3536_v43 }
 0x350   : > { %v3290_v36 = vsel %vm3283_vm14, %v3286_v26, %v3289_v31  ;;  %4173 = vmatpush.msrb.mxu1 %v4156_v45  ;;  %v3432_v26 = vld [vmem:[%s8993_s10 + $0x18] sm:$0xff]  ;;  %4841 = vmatpush.msrb.mxu0 %v4822_v4  ;;  %vm3535_vm3 = vcmp.eq.f32.partialorder %v3534_v42, 8.507059e+37 }
 0x351   : > { %v3291_v37 = vsel %vm3280_vm15, nan, %v3290_v36  ;;  %v11526_v36 = vadd.f32 %v3434_v30, %v3418_v13  ;;  %3851 = vadd.xlane.f32.xlu1 %v3832_v17  ;;  %v3785_v30 = vld [vmem:[%s11455_s25 + $0x20] sm:$0xff]  ;;  %v3436_v43 = vld [vmem:[%s8993_s10 + $0x38] sm:$0xff] }
 0x352   : > { %3389 = vmatmul.f32.gmra.mxu3 %v3291_v37  ;;  %4174 = vmatpush.msrb.mxu1 %v4155_v63  ;;  %v3416_v37 = vadd.f32 %v11474_v18, %v3396_v2  ;;  %v4150_v2 = vld [vmem:[#allocation11 + $0x8] sm:$0xff] }
 0x353   : > { %v11507_v57 = vpop.eup %8005  ;;  %v7492_v12 = vmul.f32 -1.442695, %v11526_v36  ;;  %4842 = vmatpush.msrb.mxu0 %v4821_v60  ;;  %3805 = vadd.xlane.f32.xlu2 %v3785_v30  ;;  %v3372_v60 = vpop.f32.mrf.mxu2 }
 0x354   : > { %v8008_v6 = vpop.eup %8007  ;;  %v3526_v50 = vmul.f32 %v11507_v57, %v11493_v58  ;;  %v11531_v54 = vadd.f32 %v3432_v26, %v3416_v37  ;;  %vm3531_vm0 = vweird.f32 %v11507_v57  ;;  %4175 = vmatpush.msrb.mxu1 %v4154_v33  ;;  %v3420_v37 = vadd.f32 %v11474_v18, %v3400_v53  ;;  %v3438_v26 = vld [vmem:[%s8993_s10 + $0x48] sm:$0xff] }
 0x355   : > { %v11516_v62 = vadd.f32 1.0, %v8008_v6  ;;  %v8010_v31 = vpop.eup %8009  ;;  %vm11545_vm2 = vmor %vm3530_vm1, %vm3531_vm0  ;;  %4843 = vmatpush.msrb.mxu0 %v4820_v20 }
 0x356   : > { %v3527_v41 = vsub.f32 1.0, %v3526_v50  ;;  %v11529_v14 = vadd.f32 1.0, %v8010_v31  ;;  %v7490_v5 = vmul.f32 -1.442695, %v11531_v54  ;;  %4176 = vmatpush.msrb.mxu1 %v4153_v61  ;;  %v11600_v4 = vadd.f32 %v3436_v43, %v3420_v37 }
 0x357   : > { %8011 = vrcp.f32 %v11516_v62  ;;  %vm3545_vm5 = vweird.f32 %v11516_v62  ;;  %v3551_v45 = vand.u32 2147483648, %v11516_v62  ;;  %4844 = vmatpush.msrb.mxu0 %v4819_v15  ;;  %v3549_v16 = vand.u32 2147483647, %v11516_v62 }
 0x358   : > { %v3528_v32 = vmul.f32 %v11507_v57, %v3527_v41  ;;  %8013 = vpow2.f32 %v7491_v34  ;;  %4177 = vmatpush.msrb.mxu1 %v4152_v11  ;;  %v4817_v34 = vld [vmem:[#allocation13 + $0x8] sm:$0xff]  ;;  %v3566_v33 = vand.u32 2147483648, %v11529_v14  ;;  %vm3560_vm9 = vweird.f32 %v11529_v14 }
 0x359   : > { %8015 = vrcp.f32 %v11529_v14  ;;  %4845 = vmatpush.msrb.mxu0 %v4818_v1  ;;  %vm3550_vm7 = vcmp.eq.f32.partialorder %v3549_v16, 8.507059e+37  ;;  %v3564_v61 = vand.u32 2147483647, %v11529_v14 }
 0x35a   : > { %v3529_v0 = vadd.f32 %v11507_v57, %v3528_v32  ;;  %8017 = vpow2.f32 %v7490_v5  ;;  %4178 = vmatpush.msrb.mxu1 %v4151_v46  ;;  %v3833_v32 = vmul.f32 %v3785_v30, %v3785_v30 }
 0x35b   : > { %8019 = vpow2.f32 %v7492_v12  ;;  %v3552_v12 = vor.u32 1.1754944e-38, %v3551_v45  ;;  %4846 = vmatpush.msrb.mxu0 %v4817_v34  ;;  %vm3565_vm11 = vcmp.eq.f32.partialorder %v3564_v61, 8.507059e+37 }
 0x35c   : > { %v3533_v58 = vsel %vm11545_vm2, %v11507_v57, %v3529_v0  ;;  %4179 = vmatpush.msrb.mxu1 %v4150_v2  ;;  %v3304_v0 = vmul.f32 %v11464_v40, %v13799_v47  ;;  %3853 = vadd.xlane.f32.xlu1 %v3833_v32  ;;  %v3375_v2 = vpop.f32.mrf.mxu2 }
 0x35d   : > { %v11536_v22 = vpop.eup %8011  ;;  %v3538_v48 = vsel %vm3535_vm3, %v3537_v3, %v3533_v58  ;;  %v3786_v58 = vld [vmem:[%s11455_s25 + $0x28] sm:$0xff]  ;;  %v3567_v3 = vor.u32 1.1754944e-38, %v3566_v33 }
 0x35e   : > { %v3541_v19 = vmul.f32 %v11536_v22, %v11516_v62  ;;  %v8014_v27 = vpop.eup %8013  ;;  %vm3546_vm4 = vweird.f32 %v11536_v22  ;;  %v11571_v41 = vmul.f32 %v3538_v48, %v11478_v35  ;;  %v7493_v35 = vmul.f32 -1.442695, %v11561_v44  ;;  %v4816_v62 = vld [vmem:[#allocation13] sm:$0xff]  ;;  %4180 = vmatpush.msrb.mxu1 %v4149_v8  ;;  %3807 = vadd.xlane.f32.xlu0 %v3786_v58 }
 0x35f   : > { %v11554_v49 = vpop.eup %8015  ;;  %v11565_v50 = vadd.f32 1.0, %v8014_v27  ;;  %vm11580_vm6 = vmor %vm3545_vm5, %vm3546_vm4  ;;  %v3401_v5 = vadd.f32 %v3369_v7, %v3304_v0  ;;  %4847 = vmatpush.msrb.mxu0 %v4816_v62  ;;  %v3834_v20 = vmul.f32 %v3786_v58, %v3786_v58  ;;  %v3437_v27 = vld [vmem:[%s8993_s10 + $0x40] sm:$0xff] }
 0x360   : > { %v3542_v24 = vsub.f32 1.0, %v3541_v19  ;;  %v3556_v57 = vmul.f32 %v11554_v49, %v11529_v14  ;;  %v8018_v6 = vpop.eup %8017  ;;  %4181 = vmatmul.f32.vlgmr.msrb.gmra.mxu1 %v11571_v41  ;;  %vm3561_vm8 = vweird.f32 %v11554_v49  ;;  %4848 = vmatmul.f32.vlgmr.msrb.gmra.mxu0 %v11571_v41  ;;  %v7494_v14 = vmul.f32 -1.442695, %v11600_v4 }
 0x361   : > { %v11574_v63 = vadd.f32 1.0, %v8018_v6  ;;  %v8020_v31 = vpop.eup %8019  ;;  %vm11612_vm10 = vmor %vm3560_vm9, %vm3561_vm8  ;;  %3855 = vadd.xlane.f32.xlu2 %v3834_v20  ;;  %vm3590_vm1 = vweird.f32 %v11565_v50 }
 0x362   : > { %v3543_v25 = vmul.f32 %v11536_v22, %v3542_v24  ;;  %v3557_v13 = vsub.f32 1.0, %v3556_v57 }
 0x363   : > { %8021 = vrcp.f32 %v11574_v63  ;;  %v3581_v6 = vand.u32 2147483648, %v11574_v63  ;;  %vm3575_vm13 = vweird.f32 %v11574_v63  ;;  %v3579_v1 = vand.u32 2147483647, %v11574_v63 }
 0x364   : > { %v3544_v9 = vadd.f32 %v11536_v22, %v3543_v25  ;;  %v3558_v28 = vmul.f32 %v11554_v49, %v3557_v13  ;;  %8023 = vrcp.f32 %v11565_v50  ;;  %v3305_v25 = vmul.f32 %v11464_v40, %v13802_v23 }
 0x365   : > { %8025 = vpow2.f32 %v7493_v35  ;;  %v3582_v32 = vor.u32 1.1754944e-38, %v3581_v6  ;;  %v13803_v35 = vld [vmem:[#allocation44_spill] sm:$0xff]  ;;  %vm3580_vm15 = vcmp.eq.f32.partialorder %v3579_v1, 8.507059e+37  ;;  %v13809_v1 = vld [vmem:[#allocation55_spill] sm:$0xff] }
 0x366   : > { %v3548_v55 = vsel %vm11580_vm6, %v11536_v22, %v3544_v9  ;;  %v11596_v22 = vadd.f32 1.0, %v8020_v31  ;;  %v3559_v19 = vadd.f32 %v11554_v49, %v3558_v28  ;;  %v3306_v31 = vmul.f32 %v11464_v40, %v13803_v35 }
 0x367   : > { %v3553_v42 = vsel %vm3550_vm7, %v3552_v12, %v3548_v55 }
 0x368   : > { %v11605_v59 = vmul.f32 %v3553_v42, %v11489_v51  ;;  %8027 = vrcp.f32 %v11596_v22  ;;  %v3421_v51 = vadd.f32 %v11474_v18, %v3401_v5  ;;  %v3563_v11 = vsel %vm11612_vm10, %v11554_v49, %v3559_v19 }
 0x369   : > { %v8022_v10 = vpop.eup %8021  ;;  %v3568_v57 = vsel %vm3565_vm11, %v3567_v3, %v3563_v11  ;;  %8029 = vpow2.f32 %v7494_v14  ;;  %v3402_v49 = vadd.f32 %v3372_v60, %v3305_v25  ;;  %v3403_v37 = vadd.f32 %v3375_v2, %v3306_v31  ;;  %v13812_v60 = vld [vmem:[#allocation54_spill] sm:$0xff] }
 0x36a   : > { %v11610_v24 = vpop.eup %8023  ;;  %v3571_v17 = vmul.f32 %v8022_v10, %v11574_v63  ;;  %4184 = vmatmul.f32.gmra.mxu1 %v11605_v59  ;;  %v11629_v53 = vadd.f32 %v3437_v27, %v3421_v51  ;;  %vm3576_vm12 = vweird.f32 %v8022_v10  ;;  %4851 = vmatmul.f32.gmra.mxu0 %v11605_v59  ;;  %v11638_v13 = vmul.f32 %v3568_v57, %v11502_v21 }
 0x36b   : > { %v8026_v56 = vpop.eup %8025  ;;  %v3586_v48 = vmul.f32 %v11610_v24, %v11565_v50  ;;  %vm3577_vm14 = vmor %vm3575_vm13, %vm3576_vm12  ;;  %v3422_v34 = vadd.f32 %v11474_v18, %v3402_v49  ;;  %vm3591_vm0 = vweird.f32 %v11610_v24  ;;  %v3596_v5 = vand.u32 2147483648, %v11565_v50 }
 0x36c   : > { %v3572_v52 = vsub.f32 1.0, %v3571_v17  ;;  %v11632_v15 = vadd.f32 1.0, %v8026_v56  ;;  %v7495_v30 = vmul.f32 -1.442695, %v11629_v53  ;;  %v3594_v42 = vand.u32 2147483647, %v11565_v50  ;;  %vm11669_vm2 = vmor %vm3590_vm1, %vm3591_vm0 }
 0x36d   : > { %v3587_v45 = vsub.f32 1.0, %v3586_v48  ;;  %v11652_v28 = vadd.f32 %v3438_v26, %v3422_v34  ;;  %v3423_v33 = vadd.f32 %v11474_v18, %v3403_v37  ;;  %v3307_v17 = vmul.f32 %v11464_v40, %v13806_v39  ;;  %v3381_v48 = vpop.f32.mrf.mxu3  ;;  %v3787_v34 = vld [vmem:[%s11455_s25 + $0x30] sm:$0xff] }
 0x36e   : > { %v3573_v9 = vmul.f32 %v8022_v10, %v3572_v52  ;;  %v11635_v7 = vpop.eup %8027  ;;  %8031 = vrcp.f32 %v11632_v15  ;;  %v3597_v51 = vor.u32 1.1754944e-38, %v3596_v5  ;;  %vm3595_vm3 = vcmp.eq.f32.partialorder %v3594_v42, 8.507059e+37  ;;  %3809 = vadd.xlane.f32.xlu0 %v3787_v34 }
 0x36f   : > { %v3601_v8 = vmul.f32 %v11635_v7, %v11596_v22  ;;  %v8030_v21 = vpop.eup %8029  ;;  %v3588_v63 = vmul.f32 %v11610_v24, %v3587_v45  ;;  %8033 = vpow2.f32 %v7495_v30  ;;  %v7496_v19 = vmul.f32 -1.442695, %v11652_v28  ;;  %v3378_v61 = vpop.f32.mrf.mxu2  ;;  %v3440_v45 = vld [vmem:[%s8993_s10 + $0x58] sm:$0xff] }
 0x370   : > { %v3574_v46 = vadd.f32 %v8022_v10, %v3573_v9  ;;  %v11655_v47 = vadd.f32 1.0, %v8030_v21  ;;  %v3404_v14 = vadd.f32 %v3378_v61, %v3307_v17  ;;  %vm3606_vm4 = vweird.f32 %v11635_v7 }
 0x371   : > { %v3602_v62 = vsub.f32 1.0, %v3601_v8  ;;  %v3589_v0 = vadd.f32 %v11610_v24, %v3588_v63  ;;  %v3611_v52 = vand.u32 2147483648, %v11596_v22  ;;  %vm3605_vm5 = vweird.f32 %v11596_v22 }
 0x372   : > { %v3578_v16 = vsel %vm3577_vm14, %v8022_v10, %v3574_v46  ;;  %4187 = vmatmul.f32.gmra.mxu1 %v11638_v13  ;;  %4854 = vmatmul.f32.gmra.mxu0 %v11638_v13  ;;  %8035 = vrcp.f32 %v11655_v47  ;;  %v3609_v25 = vand.u32 2147483647, %v11596_v22  ;;  %vm11699_vm6 = vmor %vm3605_vm5, %vm3606_vm4  ;;  %v3424_v46 = vadd.f32 %v11474_v18, %v3404_v14 }
 0x373   : > { %v3583_v55 = vsel %vm3580_vm15, %v3582_v32, %v3578_v16  ;;  %v3603_v10 = vmul.f32 %v11635_v7, %v3602_v62  ;;  %v3593_v50 = vsel %vm11669_vm2, %v11610_v24, %v3589_v0  ;;  %8037 = vpow2.f32 %v7496_v19  ;;  %v3441_v19 = vld [vmem:[%s8993_s10 + $0x60] sm:$0xff] }
 0x374   : > { %v11660_v12 = vmul.f32 %v3583_v55, %v11531_v54  ;;  %v11662_v43 = vpop.eup %8031  ;;  %v3439_v54 = vld [vmem:[%s8993_s10 + $0x50] sm:$0xff]  ;;  %v3598_v27 = vsel %vm3595_vm3, %v3597_v51, %v3593_v50  ;;  %v3612_v2 = vor.u32 1.1754944e-38, %v3611_v52  ;;  %vm3610_vm7 = vcmp.eq.f32.partialorder %v3609_v25, 8.507059e+37 }
 0x375   : > { %v8034_v58 = vpop.eup %8033  ;;  %v3616_v20 = vmul.f32 %v11662_v43, %v11632_v15  ;;  %v11684_v11 = vadd.f32 %v3439_v54, %v3423_v33  ;;  %v3604_v3 = vadd.f32 %v11635_v7, %v3603_v10  ;;  %v11697_v57 = vmul.f32 %v3598_v27, %v11511_v38 }
 0x376   : > { %v11689_v24 = vadd.f32 1.0, %v8034_v58  ;;  %v3308_v38 = vmul.f32 %v11464_v40, %v13809_v1  ;;  %v3835_v8 = vmul.f32 %v3787_v34, %v3787_v34  ;;  %v11717_v26 = vadd.f32 %v3440_v45, %v3424_v46 }
 0x377   : > { %v3617_v56 = vsub.f32 1.0, %v3616_v20  ;;  %v7497_v49 = vmul.f32 -1.442695, %v11684_v11  ;;  %v3608_v6 = vsel %vm11699_vm6, %v11635_v7, %v3604_v3  ;;  %vm3621_vm8 = vweird.f32 %v11662_v43 }
 0x378   : > { %v11692_v23 = vpop.eup %8035  ;;  %8039 = vrcp.f32 %v11689_v24  ;;  %v3613_v7 = vsel %vm3610_vm7, %v3612_v2, %v3608_v6  ;;  %v3405_v32 = vadd.f32 %v3381_v48, %v3308_v38  ;;  %3857 = vadd.xlane.f32.xlu2 %v3835_v8  ;;  %v3626_v37 = vand.u32 2147483648, %v11632_v15  ;;  %v3442_v48 = vld [vmem:[%s8993_s10 + $0x68] sm:$0xff] }
 0x379   : > { %v8038_v22 = vpop.eup %8037  ;;  %v3618_v30 = vmul.f32 %v11662_v43, %v3617_v56  ;;  %v3631_v16 = vmul.f32 %v11692_v23, %v11655_v47  ;;  %8041 = vpow2.f32 %v7497_v49  ;;  %v11727_v55 = vmul.f32 %v3613_v7, %v11526_v36 }
 0x37a   : > { %4190 = vmatmul.f32.gmra.mxu1 %v11660_v12  ;;  %4857 = vmatmul.f32.gmra.mxu0 %v11660_v12  ;;  %v11720_v21 = vadd.f32 1.0, %v8038_v22  ;;  %vm3620_vm9 = vweird.f32 %v11632_v15  ;;  %v3624_v62 = vand.u32 2147483647, %v11632_v15  ;;  %v3425_v0 = vadd.f32 %v11474_v18, %v3405_v32 }
 0x37b   : > { %v3619_v35 = vadd.f32 %v11662_v43, %v3618_v30  ;;  %v3632_v31 = vsub.f32 1.0, %v3631_v16  ;;  %v7498_v5 = vmul.f32 -1.442695, %v11717_v26  ;;  %vm11734_vm10 = vmor %vm3620_vm9, %vm3621_vm8  ;;  %v3309_v10 = vmul.f32 %v11464_v40, %v13812_v60 }
 0x37c   : > { %8043 = vrcp.f32 %v11720_v21  ;;  %v3627_v58 = vor.u32 1.1754944e-38, %v3626_v37  ;;  %vm3625_vm11 = vcmp.eq.f32.partialorder %v3624_v62, 8.507059e+37  ;;  %v11749_v39 = vadd.f32 %v3441_v19, %v3425_v0 }
 0x37d   : > { %v3623_v15 = vsel %vm11734_vm10, %v11662_v43, %v3619_v35  ;;  %v3633_v61 = vmul.f32 %v11692_v23, %v3632_v31  ;;  %8045 = vpow2.f32 %v7498_v5  ;;  %vm3636_vm12 = vweird.f32 %v11692_v23  ;;  %v13813_v5 = vld [vmem:[#allocation34_spill] sm:$0xff] }
 0x37e   : > { %v11724_v63 = vpop.eup %8039  ;;  %v3628_v50 = vsel %vm3625_vm11, %v3627_v58, %v3623_v15  ;;  %vm3635_vm13 = vweird.f32 %v11655_v47  ;;  %v3641_v27 = vand.u32 2147483648, %v11655_v47  ;;  %v3639_v52 = vand.u32 2147483647, %v11655_v47 }
 0x37f   : > { %v8042_v36 = vpop.eup %8041  ;;  %v3646_v54 = vmul.f32 %v11724_v63, %v11689_v24  ;;  %v3634_v14 = vadd.f32 %v11692_v23, %v3633_v61  ;;  %v11761_v3 = vmul.f32 %v3628_v50, %v11561_v44  ;;  %v7499_v56 = vmul.f32 -1.442695, %v11749_v39  ;;  %vm3637_vm14 = vmor %vm3635_vm13, %vm3636_vm12  ;;  %v3443_v61 = vld [vmem:[%s8993_s10 + $0x70] sm:$0xff] }
 0x380   : > { %v11752_v20 = vadd.f32 1.0, %v8042_v36  ;;  %v3642_v44 = vor.u32 1.1754944e-38, %v3641_v27  ;;  %vm3640_vm15 = vcmp.eq.f32.partialorder %v3639_v52, 8.507059e+37  ;;  %vm3651_vm0 = vweird.f32 %v11724_v63 }
 0x381   : > { %v3647_v51 = vsub.f32 1.0, %v3646_v54  ;;  %v3638_v46 = vsel %vm3637_vm14, %v11692_v23, %v3634_v14  ;;  %v3656_v2 = vand.u32 2147483648, %v11689_v24  ;;  %vm3650_vm1 = vweird.f32 %v11689_v24 }
 0x382   : > { %4193 = vmatmul.f32.gmra.mxu1 %v11697_v57  ;;  %4860 = vmatmul.f32.gmra.mxu0 %v11697_v57  ;;  %v11756_v43 = vpop.eup %8043  ;;  %8047 = vrcp.f32 %v11752_v20  ;;  %v3643_v45 = vsel %vm3640_vm15, %v3642_v44, %v3638_v46  ;;  %v3654_v30 = vand.u32 2147483647, %v11689_v24  ;;  %vm3652_vm2 = vmor %vm3650_vm1, %vm3651_vm0  ;;  %v3671_v0 = vand.u32 2147483648, %v11720_v21 }
 0x383   : > { %v8046_v9 = vpop.eup %8045  ;;  %v3648_v49 = vmul.f32 %v11724_v63, %v3647_v51  ;;  %v3661_v6 = vmul.f32 %v11756_v43, %v11720_v21  ;;  %8049 = vpow2.f32 %v7499_v56  ;;  %v11786_v16 = vmul.f32 %v3643_v45, %v11600_v4 }
 0x384   : > { %v11776_v22 = vadd.f32 1.0, %v8046_v9  ;;  %v3657_v31 = vor.u32 1.1754944e-38, %v3656_v2  ;;  %vm3655_vm3 = vcmp.eq.f32.partialorder %v3654_v30, 8.507059e+37  ;;  %vm3666_vm4 = vweird.f32 %v11756_v43 }
 0x385   : > { %v3649_v1 = vadd.f32 %v11724_v63, %v3648_v49  ;;  %v3662_v23 = vsub.f32 1.0, %v3661_v6  ;;  %v3310_v42 = vmul.f32 %v11464_v40, %v13813_v5  ;;  %vm3665_vm5 = vweird.f32 %v11720_v21 }
 0x386   : > { %8051 = vrcp.f32 %v11776_v22  ;;  %vm11810_vm6 = vmor %vm3665_vm5, %vm3666_vm4  ;;  %v3686_v56 = vand.u32 2147483648, %v11752_v20  ;;  %vm3680_vm9 = vweird.f32 %v11752_v20  ;;  %vm3695_vm13 = vweird.f32 %v11776_v22 }
 0x387   : > { %v3653_v7 = vsel %vm3652_vm2, %v11724_v63, %v3649_v1  ;;  %v3663_v32 = vmul.f32 %v11756_v43, %v3662_v23  ;;  %v3701_v23 = vand.u32 2147483648, %v11776_v22  ;;  %v3699_v30 = vand.u32 2147483647, %v11776_v22 }
 0x388   : > { %v11780_v38 = vpop.eup %8047  ;;  %v3658_v4 = vsel %vm3655_vm3, %v3657_v31, %v3653_v7 }
 0x389   : > { %v8050_v8 = vpop.eup %8049  ;;  %v3676_v35 = vmul.f32 %v11780_v38, %v11752_v20  ;;  %v3664_v37 = vadd.f32 %v11756_v43, %v3663_v32  ;;  %v11806_v19 = vmul.f32 %v3658_v4, %v11629_v53  ;;  %vm3681_vm8 = vweird.f32 %v11780_v38 }
 0x38a   : > { %4196 = vmatmul.f32.gmra.mxu1 %v11727_v55  ;;  %4863 = vmatmul.f32.gmra.mxu0 %v11727_v55  ;;  %v11796_v24 = vadd.f32 1.0, %v8050_v8  ;;  %vm3682_vm10 = vmor %vm3680_vm9, %vm3681_vm8  ;;  %vm3700_vm15 = vcmp.eq.f32.partialorder %v3699_v30, 8.507059e+37  ;;  %v5297_v30 = vld [vmem:[#allocation11 + $0xf8] sm:$0xff] }
 0x38b   : > { %v3677_v63 = vsub.f32 1.0, %v3676_v35  ;;  %v3668_v40 = vsel %vm11810_vm6, %v11756_v43, %v3664_v37  ;;  %v3702_v35 = vor.u32 1.1754944e-38, %v3701_v23  ;;  %5298 = vmatpush.msra.mxu1 %v5297_v30 }
 0x38c   : > { %v11800_v62 = vpop.eup %8051  ;;  %v3716_v4 = vand.u32 2147483648, %v11796_v24  ;;  %vm3710_vm1 = vweird.f32 %v11796_v24  ;;  %v3714_v37 = vand.u32 2147483647, %v11796_v24 }
 0x38d   : > { %v3678_v53 = vmul.f32 %v11780_v38, %v3677_v63  ;;  %v3691_v54 = vmul.f32 %v11800_v62, %v11776_v22  ;;  %vm3696_vm12 = vweird.f32 %v11800_v62 }
 0x38e   : > { %vm3697_vm14 = vmor %vm3695_vm13, %vm3696_vm12  ;;  %vm3715_vm3 = vcmp.eq.f32.partialorder %v3714_v37, 8.507059e+37  ;;  %v5966_v37 = vld [vmem:[#allocation13 + $0xe0] sm:$0xff] }
 0x38f   : > { %v3679_v43 = vadd.f32 %v11780_v38, %v3678_v53  ;;  %v3692_v27 = vsub.f32 1.0, %v3691_v54 }
 0x391   : > { %v3683_v49 = vsel %vm3682_vm10, %v11780_v38, %v3679_v43  ;;  %v3693_v6 = vmul.f32 %v11800_v62, %v3692_v27  ;;  %v8359_v27 = vld [vmem:[#allocation10] ss:$0 sm:$0xff] }
 0x392   : > { %v3384_v33 = vpop.f32.mrf.mxu3  ;;  %4199 = vmatmul.f32.gmra.mxu1 %v11761_v3  ;;  %4866 = vmatmul.f32.gmra.mxu0 %v11761_v3 }
 0x393   : > { %v3406_v17 = vadd.f32 %v3384_v33, %v3309_v10  ;;  %v3669_v33 = vand.u32 2147483647, %v11720_v21  ;;  %v3672_v21 = vor.u32 1.1754944e-38, %v3671_v0  ;;  %v3694_v45 = vadd.f32 %v11800_v62, %v3693_v6 }
 0x395   : > { %v3426_v25 = vadd.f32 %v11474_v18, %v3406_v17  ;;  %vm3670_vm7 = vcmp.eq.f32.partialorder %v3669_v33, 8.507059e+37  ;;  %v11825_v17 = vld [vmem:[%s11455_s25 + $0x38] sm:$0xff]  ;;  %v3698_v7 = vsel %vm3697_vm14, %v11800_v62, %v3694_v45  ;;  %v3717_v33 = vor.u32 1.1754944e-38, %v3716_v4  ;;  %v3791_v45 = vld [vmem:[%s11455_s25 + $0x50] sm:$0xff]  ;;  %v5294_v4 = vld [vmem:[#allocation11 + $0xe0] sm:$0xff] }
 0x396   : > { %v3673_v50 = vsel %vm3670_vm7, %v3672_v21, %v3668_v40  ;;  %3811 = vadd.xlane.f32.xlu1 %v11825_v17  ;;  %v3836_v14 = vmul.f32 %v11825_v17, %v11825_v17 }
 0x397   : > { %v11773_v47 = vadd.f32 %v3442_v48, %v3426_v25  ;;  %v11839_v25 = vmul.f32 %v3673_v50, %v11652_v28  ;;  %v3684_v48 = vand.u32 2147483647, %v11752_v20  ;;  %v3687_v28 = vor.u32 1.1754944e-38, %v3686_v56  ;;  %v11886_v56 = vld [vmem:[%s11455_s25 + $0x40] sm:$0xff] }
 0x398   : > { %3859 = vadd.xlane.f32.xlu0 %v3836_v14 }
 0x399   : > { %v7500_v34 = vmul.f32 -1.442695, %v11773_v47  ;;  %vm3685_vm11 = vcmp.eq.f32.partialorder %v3684_v48, 8.507059e+37  ;;  %v11889_v48 = vld [vmem:[%s11455_s25 + $0x48] sm:$0xff] }
 0x39a   : > { %4202 = vmatmul.f32.gmra.mxu1 %v11786_v16  ;;  %4869 = vmatmul.f32.gmra.mxu0 %v11786_v16  ;;  %v3688_v44 = vsel %vm3685_vm11, %v3687_v28, %v3683_v49  ;;  %v3837_v49 = vmul.f32 %v11886_v56, %v11886_v56 }
 0x39b   : > { %8053 = vpow2.f32 %v7500_v34  ;;  %v11854_v2 = vmul.f32 %v3688_v44, %v11684_v11  ;;  %v3703_v11 = vsel %vm3700_vm15, %v3702_v35, %v3698_v7  ;;  %3815 = vadd.xlane.f32.xlu2 %v11889_v48  ;;  %v3838_v44 = vmul.f32 %v11889_v48, %v11889_v48  ;;  %v5968_v7 = vld [vmem:[#allocation13 + $0xf0] sm:$0xff]  ;;  %v5967_v35 = vld [vmem:[#allocation13 + $0xe8] sm:$0xff] }
 0x39c   : > { %8055 = vrcp.f32 %v11796_v24  ;;  %v11869_v63 = vmul.f32 %v3703_v11, %v11717_v26 }
 0x39e   : > { %3813 = vadd.xlane.f32.xlu1 %v11886_v56 }
 0x3a0   : > { %3861 = vadd.xlane.f32.xlu0 %v3837_v49  ;;  %v5961_v49 = vld [vmem:[#allocation13 + $0xb8] sm:$0xff] }
 0x3a1   : > { %v8054_v10 = vpop.eup %8053 }
 0x3a2   : > { %4205 = vmatmul.f32.gmra.mxu1 %v11806_v19  ;;  %4872 = vmatmul.f32.gmra.mxu0 %v11806_v19  ;;  %v11828_v51 = vadd.f32 1.0, %v8054_v10 }
 0x3a3   : > { %3817 = vadd.xlane.f32.xlu2 %v3791_v45 }
 0x3a4   : > { %8057 = vrcp.f32 %v11828_v51  ;;  %vm3725_vm5 = vweird.f32 %v11828_v51  ;;  %v3729_v40 = vand.u32 2147483647, %v11828_v51 }
 0x3a6   : > { %vm3730_vm7 = vcmp.eq.f32.partialorder %v3729_v40, 8.507059e+37  ;;  %3863 = vadd.xlane.f32.xlu1 %v3838_v44  ;;  %v5291_v40 = vld [vmem:[#allocation11 + $0xc8] sm:$0xff] }
 0x3aa   : > { %4208 = vmatmul.f32.gmra.mxu1 %v11839_v25  ;;  %4875 = vmatmul.f32.gmra.mxu0 %v11839_v25 }
 0x3b2   : > { %4211 = vmatmul.f32.gmra.mxu1 %v11854_v2  ;;  %4878 = vmatmul.f32.gmra.mxu0 %v11854_v2 }
 0x3b5   : > { %v3387_v60 = vpop.f32.mrf.mxu3 }
 0x3b6   : > { %v3407_v15 = vadd.f32 %v3387_v60, %v3310_v42 }
 0x3b8   : > { %v3427_v58 = vadd.f32 %v11474_v18, %v3407_v15  ;;  %v8056_v18 = vpop.eup %8055  ;;  %v8358_v15 = vld [vmem:[#allocation7] ss:$0 sm:$0xff] }
 0x3b9   : > { %v3706_v46 = vmul.f32 %v8056_v18, %v11796_v24  ;;  %v8058_v1 = vpop.eup %8057  ;;  %vm3711_vm0 = vweird.f32 %v8056_v18  ;;  %v3731_v24 = vand.u32 2147483648, %v11828_v51  ;;  %v3311_v21 = vmul.f32 %v8358_v15, %v10214_v29  ;;  %v3794_v15 = vld [vmem:[%s11455_s25 + $0x68] sm:$0xff] }
 0x3ba   : > { %v11835_v52 = vadd.f32 %v3443_v61, %v3427_v58  ;;  %v3721_v32 = vmul.f32 %v8058_v1, %v11828_v51  ;;  %vm3712_vm2 = vmor %vm3710_vm1, %vm3711_vm0  ;;  %4214 = vmatmul.f32.gmra.mxu1 %v11869_v63  ;;  %4881 = vmatmul.f32.gmra.mxu0 %v11869_v63  ;;  %vm3726_vm4 = vweird.f32 %v8058_v1  ;;  %v3444_v51 = vld [vmem:[%s8993_s10 + $0x78] sm:$0xff]  ;;  %s7233_s10 = scalar_lea.hbm %s13887_s12, %s7801_s9 }
 0x3bb   : > { %v3707_v20 = vsub.f32 1.0, %v3706_v46  ;;  %vm3727_vm6 = vmor %vm3725_vm5, %vm3726_vm4  ;;  %v3732_v61 = vor.u32 1.1754944e-38, %v3731_v24  ;;  %s7236_s21 = sshll.u32 %s7233_s10, 4  ;;  %s7237_s21 = int_to_ptr.hbm [resolvable:$true] %s7236_s21 }
 0x3bc   : > { %v7501_v9 = vmul.f32 -1.442695, %v11835_v52  ;;  %v3722_v22 = vsub.f32 1.0, %v3721_v32  ;;  %v5295_v32 = vld [vmem:[#allocation11 + $0xe8] sm:$0xff]  ;;  %s8671_s22 = sshra.s32 %s7237_s21, 4  ;;  %s8672_s22 = int_to_ptr.hbm [resolvable:$true] %s8671_s22 }
 0x3bd   : > { %v3708_v8 = vmul.f32 %v8056_v18, %v3707_v20  ;;  %s8673_s18 = scalar_lea.hbm %s8672_s22, 128  ;;  %p8678_p7 = scmp.lt.s32.totalorder %s8672_s22, %s13887_s12 }
 0x3be   : > { %8059 = vpow2.f32 %v7501_v9  ;;  %v3723_v5 = vmul.f32 %v8058_v1, %v3722_v22  ;;  %p8674_p1 = scmp.ne.s32.totalorder %s8672_s22, %s8673_s18  ;;  %p8679_p8 = scmp.lt.s32.totalorder %s8677_s13, %s8673_s18 }
 0x3bf   : > { %v3709_v31 = vadd.f32 %v8056_v18, %v3708_v8  ;;  %v5296_v8 = vld [vmem:[#allocation11 + $0xf0] sm:$0xff] }
 0x3c0   : > { %v3724_v60 = vadd.f32 %v8058_v1, %v3723_v5  ;;  %5299 = vmatpush.msra.mxu1 %v5296_v8  ;;  %v7760_v5 = vld [vmem:[#allocation14 + $0x38] sm:$0xff]  ;;  %p8675_p4 = pnand %p8674_p1, %p8953_p5  ;;  %p8680_p9 = por %p8679_p8, %p8678_p7 }
 0x3c1   : > { %v3713_v0 = vsel %vm3712_vm2, %v8056_v18, %v3709_v31  ;;  %v3839_v31 = vmul.f32 %v3791_v45, %v3791_v45  ;;  %4322 = vmatpush.bf16.msrb.mxu2 %v7760_v5  ;;  %v5288_v45 = vld [vmem:[#allocation11 + $0xb0] sm:$0xff] }
 0x3c2   : > { %v3718_v36 = vsel %vm3715_vm3, %v3717_v33, %v3713_v0  ;;  %v3728_v53 = vsel %vm3727_vm6, %v8058_v1, %v3724_v60  ;;  %v11909_v1 = vld [vmem:[%s11455_s25 + $0x58] sm:$0xff]  ;;  %5300 = vmatpush.msra.mxu1 %v5295_v32  ;;  %v3798_v33 = vpop.xlane.xlu1 %3797  ;;  %v5959_v32 = vld [vmem:[#allocation13 + $0xa8] sm:$0xff]  ;;  %p8676_p12 = pneg %p8675_p4 }
 0x3c3   : > { %v11876_v26 = vmul.f32 %v3718_v36, %v11749_v39  ;;  %v3733_v39 = vsel %vm3730_vm7, %v3732_v61, %v3728_v53  ;;  %3819 = vadd.xlane.f32.xlu0 %v11909_v1  ;;  %v3840_v22 = vmul.f32 %v11909_v1, %v11909_v1  ;;  %v5965_v0 = vld [vmem:[#allocation13 + $0xd8] sm:$0xff]  ;;  %3865 = vadd.xlane.f32.xlu1 %v3839_v31  ;;  %v5292_v36 = vld [vmem:[#allocation11 + $0xd0] sm:$0xff]  ;;  %v5963_v53 = vld [vmem:[#allocation13 + $0xc8] sm:$0xff] }
 0x3c4   : > { %v8060_v38 = vpop.eup %8059  ;;  %v11892_v29 = vmul.f32 %v3733_v39, %v11773_v47  ;;  %5301 = vmatpush.msra.mxu1 %v5294_v4  ;;  %v5964_v60 = vld [vmem:[#allocation13 + $0xd0] sm:$0xff]  ;;  %v3846_v39 = vpop.xlane.xlu0 %3845  ;;  %p8681_p10 = pnand %p8680_p9, %p8676_p12 }
 0x3c5   : > { %v11858_v34 = vadd.f32 1.0, %v8060_v38  ;;  %4217 = vmatmul.f32.gmra.mxu1 %v11876_v26  ;;  %4884 = vmatmul.f32.gmra.mxu0 %v11876_v26  ;;  %v3800_v38 = vpop.xlane.xlu2 %3799  ;;  %v3893_v44 = vmul.f32 0.0625, %v3846_v39  ;;  %v3795_v31 = vld [vmem:[%s11455_s25 + $0x70] sm:$0xff] }
 0x3c6   : > { %3867 = vadd.xlane.f32.xlu2 %v3840_v22  ;;  %v5955_v39 = vld [vmem:[#allocation13 + $0x88] sm:$0xff] }
 0x3c7   : > { %8061 = vrcp.f32 %v11858_v34  ;;  %v3746_v43 = vand.u32 2147483648, %v11858_v34  ;;  %vm3740_vm9 = vweird.f32 %v11858_v34  ;;  %v3744_v9 = vand.u32 2147483647, %v11858_v34 }
 0x3c9   : > { %v3747_v47 = vor.u32 1.1754944e-38, %v3746_v43  ;;  %vm3745_vm11 = vcmp.eq.f32.partialorder %v3744_v9, 8.507059e+37  ;;  %v5289_v9 = vld [vmem:[#allocation11 + $0xb8] sm:$0xff] }
 0x3cb   : > { %3823 = vadd.xlane.f32.xlu1 %v3794_v15 }
 0x3cd   : > { %v8062_v62 = vpop.eup %8061  ;;  %4220 = vmatmul.f32.gmra.mxu1 %v11892_v29  ;;  %4887 = vmatmul.f32.gmra.mxu0 %v11892_v29  ;;  %v3848_v24 = vpop.xlane.xlu2 %3847 }
 0x3ce   : > { %v3736_v42 = vmul.f32 %v8062_v62, %v11858_v34  ;;  %vm3741_vm8 = vweird.f32 %v8062_v62  ;;  %v5969_v34 = vld [vmem:[#allocation13 + $0xf8] sm:$0xff] }
 0x3cf   : > { %vm3742_vm10 = vmor %vm3740_vm9, %vm3741_vm8  ;;  %5970 = vmatpush.msra.mxu0 %v5969_v34 }
 0x3d0   : > { %v3737_v10 = vsub.f32 1.0, %v3736_v42  ;;  %v3793_v42 = vld [vmem:[%s11455_s25 + $0x60] sm:$0xff] }
 0x3d1   : > { %5971 = vmatpush.msra.mxu0 %v5968_v7  ;;  %3821 = vadd.xlane.f32.xlu0 %v3793_v42  ;;  %v5287_v7 = vld [vmem:[#allocation11 + $0xa8] sm:$0xff] }
 0x3d2   : > { %v3738_v54 = vmul.f32 %v8062_v62, %v3737_v10  ;;  %v11923_v10 = vmul.f32 0.0625, %v3800_v38  ;;  %v5960_v38 = vld [vmem:[#allocation13 + $0xb0] sm:$0xff] }
 0x3d3   : > { %5972 = vmatpush.msra.mxu0 %v5967_v35  ;;  %v7757_v35 = vld [vmem:[#allocation14 + $0x20] sm:$0xff]  ;;  %3825 = vadd.xlane.f32.xlu1 %v3795_v31 }
 0x3d4   : > { %v3739_v14 = vadd.f32 %v8062_v62, %v3738_v54  ;;  %v7759_v54 = vld [vmem:[#allocation14 + $0x30] sm:$0xff]  ;;  %v3910_v43 = vmul.f32 %v11923_v10, %v11923_v10 }
 0x3d5   : > { %v3390_v58 = vpop.f32.mrf.mxu3  ;;  %5973 = vmatpush.msra.mxu0 %v5966_v37  ;;  %4323 = vmatpush.bf16.msrb.mxu2 %v7759_v54  ;;  %v5286_v37 = vld [vmem:[#allocation11 + $0xa0] sm:$0xff]  ;;  %v5284_v54 = vld [vmem:[#allocation11 + $0x90] sm:$0xff] }
 0x3d6   : > { %v3408_v50 = vadd.f32 %v3390_v58, %v3311_v21  ;;  %v3743_v6 = vsel %vm3742_vm10, %v8062_v62, %v3739_v14  ;;  %v5293_v62 = vld [vmem:[#allocation11 + $0xd8] sm:$0xff]  ;;  %v11926_v21 = vmul.f32 0.0625, %v3798_v33  ;;  %v3841_v58 = vmul.f32 %v3793_v42, %v3793_v42  ;;  %v5962_v14 = vld [vmem:[#allocation13 + $0xc0] sm:$0xff] }
 0x3d7   : > { %v3748_v20 = vsel %vm3745_vm11, %v3747_v47, %v3743_v6  ;;  %5302 = vmatpush.msra.mxu1 %v5293_v62  ;;  %5974 = vmatpush.msra.mxu0 %v5965_v0  ;;  %v7758_v6 = vld [vmem:[#allocation14 + $0x28] sm:$0xff]  ;;  %v5958_v62 = vld [vmem:[#allocation13 + $0xa0] sm:$0xff]  ;;  %v11941_v42 = vld [vmem:[%s11455_s25 + $0x78] sm:$0xff] }
 0x3d8   : > { %v3428_v18 = vadd.f32 %v8359_v27, %v3408_v50  ;;  %v11912_v23 = vmul.f32 %v3748_v20, %v11835_v52  ;;  %v5290_v50 = vld [vmem:[#allocation11 + $0xc0] sm:$0xff]  ;;  %v3894_v27 = vmul.f32 0.0625, %v3848_v24  ;;  %3869 = vadd.xlane.f32.xlu2 %v3841_v58  ;;  %v5285_v24 = vld [vmem:[#allocation11 + $0x98] sm:$0xff]  ;;  %v3844_v58 = vmul.f32 %v11941_v42, %v11941_v42 }
 0x3d9   : > { %5303 = vmatpush.msra.mxu1 %v5292_v36  ;;  %5975 = vmatpush.msra.mxu0 %v5964_v60  ;;  %v3843_v36 = vmul.f32 %v3795_v31, %v3795_v31  ;;  %v3804_v31 = vpop.xlane.xlu2 %3803 }
 0x3da   : > { %v11900_v46 = vadd.f32 %v3444_v51, %v3428_v18  ;;  %4223 = vmatmul.f32.gmra.mxu1 %v11912_v23  ;;  %4890 = vmatmul.f32.gmra.mxu0 %v11912_v23  ;;  %v3842_v18 = vmul.f32 %v3794_v15, %v3794_v15  ;;  %v3926_v8 = vsub.f32 %v3894_v27, %v3910_v43  ;;  %v5283_v15 = vld [vmem:[#allocation11 + $0x88] sm:$0xff] }
 0x3db   : > { %5304 = vmatpush.msra.mxu1 %v5291_v40  ;;  %5976 = vmatpush.msra.mxu0 %v5963_v53  ;;  %v7756_v40 = vld [vmem:[#allocation14 + $0x18] sm:$0xff]  ;;  %v7754_v43 = vld [vmem:[#allocation14 + $0x8] sm:$0xff] }
 0x3dc   : > { %v7502_v28 = vmul.f32 -1.442695, %v11900_v46  ;;  %3871 = vadd.xlane.f32.xlu0 %v3842_v18  ;;  %4324 = vmatpush.bf16.msrb.mxu2 %v7758_v6  ;;  %v11938_v5 = vadd.f32 1e-05, %v3926_v8  ;;  %v5957_v53 = vld [vmem:[#allocation13 + $0x98] sm:$0xff] }
 0x3dd   : > { %5305 = vmatpush.msra.mxu1 %v5290_v50  ;;  %5977 = vmatpush.msra.mxu0 %v5962_v14  ;;  %v5282_v50 = vld [vmem:[#allocation11 + $0x80] sm:$0xff] }
 0x3de   : > { %8063 = vpow2.f32 %v7502_v28  ;;  %v3909_v28 = vmul.f32 %v11926_v21, %v11926_v21  ;;  %v5954_v14 = vld [vmem:[#allocation13 + $0x80] sm:$0xff]  ;;  %3875 = vadd.xlane.f32.xlu1 %v3844_v58  ;;  %vm3989_vm0 = vweird.f32 %v11938_v5 }
 0x3df   : > { %5306 = vmatpush.msra.mxu1 %v5289_v9  ;;  %5978 = vmatpush.msra.mxu0 %v5961_v49 }
 0x3e0   : > { %v3925_v22 = vsub.f32 %v3893_v44, %v3909_v28  ;;  %4325 = vmatpush.bf16.msrb.mxu2 %v7757_v35  ;;  %3827 = vadd.xlane.f32.xlu2 %v11941_v42  ;;  %v4182_v28 = vpop.f32.mrf.mxu1 }
 0x3e1   : > { %5307 = vmatpush.msra.mxu1 %v5288_v45  ;;  %5979 = vmatpush.msra.mxu0 %v5960_v38  ;;  %v3802_v38 = vpop.xlane.xlu1 %3801  ;;  %v3806_v58 = vpop.xlane.xlu2 %3805 }
 0x3e2   : > { %v3957_v60 = vadd.f32 1e-05, %v3925_v22 }
 0x3e3   : > { %5308 = vmatpush.msra.mxu1 %v5287_v7  ;;  %5980 = vmatpush.msra.mxu0 %v5959_v32  ;;  %v8360_v7 = vld [vmem:[%s11455_s25 + $0x8] sm:$0xff] }
 0x3e4   : > { %v8064_v11 = vpop.eup %8063  ;;  %3873 = vadd.xlane.f32.xlu0 %v3843_v36  ;;  %4326 = vmatpush.bf16.msrb.mxu2 %v7756_v40  ;;  %vm3979_vm2 = vweird.f32 %v3957_v60  ;;  %v3942_v32 = vsub.f32 %v8360_v7, %v11923_v10 }
 0x3e5   : > { %v11916_v52 = vadd.f32 1.0, %v8064_v11  ;;  %5309 = vmatpush.msra.mxu1 %v5286_v37  ;;  %5981 = vmatpush.msra.mxu0 %v5958_v62  ;;  %v3850_v62 = vpop.xlane.xlu0 %3849 }
 0x3e7   : > { %8065 = vrcp.f32 %v11916_v52  ;;  %v3761_v20 = vand.u32 2147483648, %v11916_v52  ;;  %v3759_v34 = vand.u32 2147483647, %v11916_v52  ;;  %vm3755_vm13 = vweird.f32 %v11916_v52  ;;  %5310 = vmatpush.msra.mxu1 %v5285_v24  ;;  %5982 = vmatpush.msra.mxu0 %v5957_v53 }
 0x3e8   : > { %8067 = vrsqrt.f32 %v11938_v5  ;;  %v4185_v8 = vpop.f32.mrf.mxu1  ;;  %v11975_v24 = vmul.f32 0.0625, %v3804_v31 }
 0x3e9   : > { %v3762_v4 = vor.u32 1.1754944e-38, %v3761_v20  ;;  %vm3760_vm15 = vcmp.eq.f32.partialorder %v3759_v34, 8.507059e+37  ;;  %8069 = vrsqrt.f32 %v3957_v60  ;;  %5311 = vmatpush.msra.mxu1 %v5284_v54  ;;  %v3852_v40 = vpop.xlane.xlu1 %3851 }
 0x3eb   : > { %5312 = vmatpush.msra.mxu1 %v5283_v15  ;;  %v3912_v15 = vmul.f32 %v11975_v24, %v11975_v24 }
 0x3ed   : > { %v8066_v61 = vpop.eup %8065  ;;  %5313 = vmatpush.msra.mxu1 %v5282_v50 }
 0x3ee   : > { %v3751_v51 = vmul.f32 %v8066_v61, %v11916_v52  ;;  %vm3756_vm12 = vweird.f32 %v8066_v61 }
 0x3ef   : > { %vm3757_vm14 = vmor %vm3755_vm13, %vm3756_vm12 }
 0x3f0   : > { %v3752_v47 = vsub.f32 1.0, %v3751_v51  ;;  %v8068_v51 = vpop.eup %8067 }
 0x3f1   : > { %v8070_v27 = vpop.eup %8069  ;;  %v3984_v18 = vmul.f32 %v8068_v51, %v11938_v5  ;;  %vm3990_vm1 = vweird.f32 %v8068_v51 }
 0x3f2   : > { %v3753_v30 = vmul.f32 %v8066_v61, %v3752_v47  ;;  %v3974_v9 = vmul.f32 %v8070_v27, %v3957_v60  ;;  %vm3980_vm3 = vweird.f32 %v8070_v27  ;;  %vm3991_vm4 = vmor %vm3989_vm0, %vm3990_vm1  ;;  %v3895_v60 = vmul.f32 0.0625, %v3850_v62 }
 0x3f3   : > { %v3985_v49 = vmul.f32 %v8068_v51, %v3984_v18  ;;  %vm11962_vm5 = vmor %vm3979_vm2, %vm3980_vm3  ;;  %v11984_v18 = vmul.f32 0.0625, %v3806_v58 }
 0x3f4   : > { %v3754_v11 = vadd.f32 %v8066_v61, %v3753_v30  ;;  %v3975_v6 = vmul.f32 %v8070_v27, %v3974_v9  ;;  %v3854_v9 = vpop.xlane.xlu1 %3853 }
 0x3f5   : > { %v3986_v47 = vmul.f32 0.5, %v3985_v49 }
 0x3f6   : > { %v3758_v0 = vsel %vm3757_vm14, %v8066_v61, %v3754_v11  ;;  %v7755_v61 = vld [vmem:[#allocation14 + $0x10] sm:$0xff]  ;;  %v3976_v44 = vmul.f32 0.5, %v3975_v6  ;;  %v11966_v11 = vmul.f32 0.0625, %v3802_v38 }
 0x3f7   : > { %v3763_v33 = vsel %vm3760_vm15, %v3762_v4, %v3758_v0  ;;  %4327 = vmatpush.bf16.msrb.mxu2 %v7755_v61  ;;  %v3987_v20 = vsub.f32 1.5, %v3986_v47  ;;  %v8361_v4 = vld [vmem:[%s11455_s25] sm:$0xff]  ;;  %v4186_v0 = vadd.f32 1.0, %v4185_v8  ;;  %v3896_v61 = vmul.f32 0.0625, %v3852_v40 }
 0x3f8   : > { %v11944_v52 = vmul.f32 %v3763_v33, %v11900_v46  ;;  %v5956_v46 = vld [vmem:[#allocation13 + $0x90] sm:$0xff]  ;;  %v3977_v45 = vsub.f32 1.5, %v3976_v44  ;;  %v3941_v37 = vsub.f32 %v8361_v4, %v11926_v21  ;;  %v4183_v33 = vadd.f32 1.0, %v4182_v28  ;;  %v3856_v44 = vpop.xlane.xlu2 %3855 }
 0x3f9   : > { %5983 = vmatpush.msra.mxu0 %v5956_v46  ;;  %v3988_v30 = vmul.f32 %v8068_v51, %v3987_v20  ;;  %v3911_v10 = vmul.f32 %v11966_v11, %v11966_v11  ;;  %v3913_v47 = vmul.f32 %v11984_v18, %v11984_v18  ;;  %v3897_v28 = vmul.f32 0.0625, %v3854_v9 }
 0x3fa   : > { %4226 = vmatmul.f32.gmra.mxu1 %v11944_v52  ;;  %4893 = vmatmul.f32.gmra.mxu0 %v11944_v52  ;;  %v3978_v34 = vmul.f32 %v8070_v27, %v3977_v45  ;;  %v3898_v38 = vmul.f32 0.0625, %v3856_v44 }
 0x3fb   : > { %5984 = vmatpush.msra.mxu0 %v5955_v39  ;;  %4328 = vmatpush.bf16.msrb.mxu2 %v7754_v43  ;;  %v3992_v22 = vsel %vm3991_vm4, %v8068_v51, %v3988_v30  ;;  %v3927_v46 = vsub.f32 %v3895_v60, %v3911_v10  ;;  %v7753_v39 = vld [vmem:[#allocation14] sm:$0xff]  ;;  %v3928_v43 = vsub.f32 %v3896_v61, %v3912_v15 }
 0x3fc   : > { %v3982_v5 = vsel %vm11962_vm5, %v8070_v27, %v3978_v34  ;;  %v4134_v36 = vmul.f32 %v3992_v22, %v3942_v32  ;;  %v11982_v27 = vpop.f32.mrf.mxu0  ;;  %v3929_v34 = vsub.f32 %v3897_v28, %v3913_v47 }
 0x3fd   : > { %5985 = vmatpush.msra.mxu0 %v5954_v14  ;;  %v4133_v53 = vmul.f32 %v3982_v5, %v3941_v37  ;;  %v3808_v14 = vpop.xlane.xlu0 %3807  ;;  %v3959_v51 = vadd.f32 1e-05, %v3927_v46  ;;  %v11986_v49 = vadd.f32 1e-05, %v3928_v43 }
 0x3fe   : > { %v4231_v21 = vmul.f32 %v4186_v0, %v4134_v36  ;;  %v11988_v6 = vmul.f32 0.0625, %v3808_v14  ;;  %v12002_v22 = vadd.f32 1e-05, %v3929_v34 }
 0x3ff   : > { %v4230_v54 = vmul.f32 %v4183_v33, %v4133_v53  ;;  %4329 = vmatpush.bf16.msrb.mxu2 %v7753_v39  ;;  %8071 = vrsqrt.f32 %v3959_v51  ;;  %vm3999_vm6 = vweird.f32 %v3959_v51  ;;  %vm4009_vm8 = vweird.f32 %v11986_v49 }
 0x400   : > { %8073 = vrsqrt.f32 %v11986_v49  ;;  %v3914_v45 = vmul.f32 %v11988_v6, %v11988_v6  ;;  %v3858_v36 = vpop.xlane.xlu2 %3857  ;;  %vm4019_vm12 = vweird.f32 %v12002_v22 }
 0x401   : > { %v4246_v50 = vpack.c.bf16 %v4231_v21, %v4230_v54  ;;  %8075 = vrsqrt.f32 %v12002_v22  ;;  %v4188_v21 = vpop.f32.mrf.mxu1  ;;  %v3899_v15 = vmul.f32 0.0625, %v3858_v36 }
 0x402   : > { %5314 = vmatmul.f32.vlgmr.msra.gmra.mxu1 %v11571_v41  ;;  %5986 = vmatmul.f32.vlgmr.msra.gmra.mxu0 %v11571_v41  ;;  %v3930_v32 = vsub.f32 %v3898_v38, %v3914_v45 }
 0x403   : > { %4330 = vmatmul.bf16.vlgmr.msrb.gmra.mxu2 %v4246_v50 }
 0x404   : > { %v11999_v8 = vpop.f32.mrf.mxu0  ;;  %v12010_v0 = vadd.f32 1e-05, %v3930_v32 }
 0x405   : > { %v3810_v20 = vpop.xlane.xlu0 %3809  ;;  %v11997_v30 = vpop.eup %8071 }
 0x406   : > { %v3994_v7 = vmul.f32 %v11997_v30, %v3959_v51  ;;  %v8074_v31 = vpop.eup %8073  ;;  %v12013_v33 = vmul.f32 0.0625, %v3810_v20  ;;  %8077 = vrsqrt.f32 %v12010_v0  ;;  %vm4000_vm7 = vweird.f32 %v11997_v30 }
 0x407   : > { %v4004_v62 = vmul.f32 %v8074_v31, %v11986_v49  ;;  %v12023_v61 = vpop.eup %8075  ;;  %vm4010_vm9 = vweird.f32 %v8074_v31  ;;  %vm12035_vm10 = vmor %vm3999_vm6, %vm4000_vm7  ;;  %v8362_v49 = vld [vmem:[%s11455_s25 + $0x10] sm:$0xff]  ;;  %vm4029_vm14 = vweird.f32 %v12010_v0 }
 0x408   : > { %v3995_v37 = vmul.f32 %v11997_v30, %v3994_v7  ;;  %v3915_v46 = vmul.f32 %v12013_v33, %v12013_v33  ;;  %v4014_v9 = vmul.f32 %v12023_v61, %v12002_v22  ;;  %v3943_v32 = vsub.f32 %v8362_v49, %v11966_v11  ;;  %vm4011_vm11 = vmor %vm4009_vm8, %vm4010_vm9 }
 0x409   : > { %v3812_v35 = vpop.xlane.xlu1 %3811  ;;  %v4005_v53 = vmul.f32 %v8074_v31, %v4004_v62  ;;  %v4191_v34 = vpop.f32.mrf.mxu1  ;;  %vm4020_vm13 = vweird.f32 %v12023_v61 }
 0x40a   : > { %5317 = vmatmul.f32.gmra.mxu1 %v11605_v59  ;;  %5989 = vmatmul.f32.gmra.mxu0 %v11605_v59  ;;  %v12005_v4 = vmul.f32 0.0625, %v3812_v35  ;;  %v3996_v40 = vmul.f32 0.5, %v3995_v37  ;;  %v3931_v14 = vsub.f32 %v3899_v15, %v3915_v46  ;;  %v4015_v38 = vmul.f32 %v12023_v61, %v4014_v9  ;;  %v8363_v35 = vld [vmem:[%s11455_s25 + $0x18] sm:$0xff]  ;;  %vm12077_vm0 = vmor %vm4019_vm12, %vm4020_vm13 }
 0x40b   : > { %v4006_v50 = vmul.f32 0.5, %v4005_v53  ;;  %v3944_v37 = vsub.f32 %v8363_v35, %v11975_v24 }
 0x40c   : > { %v3916_v10 = vmul.f32 %v12005_v4, %v12005_v4  ;;  %v12018_v54 = vpop.f32.mrf.mxu0  ;;  %v3997_v39 = vsub.f32 1.5, %v3996_v40  ;;  %v12026_v43 = vpop.eup %8077  ;;  %v12041_v45 = vadd.f32 1e-05, %v3931_v14  ;;  %v4016_v11 = vmul.f32 0.5, %v4015_v38 }
 0x40d   : > { %v3860_v5 = vpop.xlane.xlu0 %3859  ;;  %v4007_v28 = vsub.f32 1.5, %v4006_v50  ;;  %v4024_v51 = vmul.f32 %v12026_v43, %v12010_v0  ;;  %vm4030_vm15 = vweird.f32 %v12026_v43 }
 0x40e   : > { %v3900_v60 = vmul.f32 0.0625, %v3860_v5  ;;  %v3998_v44 = vmul.f32 %v11997_v30, %v3997_v39  ;;  %v4017_v50 = vsub.f32 1.5, %v4016_v11  ;;  %vm12087_vm1 = vmor %vm4029_vm14, %vm4030_vm15  ;;  %vm4039_vm4 = vweird.f32 %v12041_v45 }
 0x40f   : > { %v4008_v5 = vmul.f32 %v8074_v31, %v4007_v28  ;;  %v4025_v36 = vmul.f32 %v12026_v43, %v4024_v51 }
 0x410   : > { %v3932_v58 = vsub.f32 %v3900_v60, %v3916_v10  ;;  %v4002_v62 = vsel %vm12035_vm10, %v11997_v30, %v3998_v44  ;;  %v4189_v10 = vadd.f32 1.0, %v4188_v21  ;;  %v4192_v60 = vadd.f32 1.0, %v4191_v34  ;;  %v3816_v44 = vpop.xlane.xlu2 %3815 }
 0x411   : > { %v4012_v40 = vsel %vm4011_vm11, %v8074_v31, %v4008_v5  ;;  %v4135_v53 = vmul.f32 %v4002_v62, %v3943_v32  ;;  %v4026_v15 = vmul.f32 0.5, %v4025_v36  ;;  %v4194_v14 = vpop.f32.mrf.mxu1  ;;  %v3814_v21 = vpop.xlane.xlu1 %3813  ;;  %v4018_v34 = vmul.f32 %v12023_v61, %v4017_v50 }
 0x412   : > { %5320 = vmatmul.f32.gmra.mxu1 %v11638_v13  ;;  %5992 = vmatmul.f32.gmra.mxu0 %v11638_v13  ;;  %v12031_v47 = vadd.f32 1e-05, %v3932_v58  ;;  %v4136_v24 = vmul.f32 %v4012_v40, %v3944_v37  ;;  %v12072_v51 = vmul.f32 0.0625, %v3814_v21  ;;  %v12083_v0 = vmul.f32 0.0625, %v3816_v44  ;;  %v8364_v37 = vld [vmem:[%s11455_s25 + $0x28] sm:$0xff] }
 0x413   : > { %v4232_v58 = vmul.f32 %v4189_v10, %v4135_v53  ;;  %v4027_v20 = vsub.f32 1.5, %v4026_v15  ;;  %v3946_v62 = vsub.f32 %v8364_v37, %v11988_v6  ;;  %v8365_v10 = vld [vmem:[%s11455_s25 + $0x20] sm:$0xff]  ;;  %v4022_v6 = vsel %vm12077_vm0, %v12023_v61, %v4018_v34 }
 0x414   : > { %v12044_v7 = vpop.f32.mrf.mxu0  ;;  %8079 = vrsqrt.f32 %v12031_v47  ;;  %v4233_v39 = vmul.f32 %v4192_v60, %v4136_v24  ;;  %v3917_v32 = vmul.f32 %v12072_v51, %v12072_v51  ;;  %v3945_v60 = vsub.f32 %v8365_v10, %v11984_v18 }
 0x415   : > { %8081 = vrsqrt.f32 %v12041_v45  ;;  %v3862_v38 = vpop.xlane.xlu0 %3861  ;;  %v4028_v40 = vmul.f32 %v12026_v43, %v4027_v20  ;;  %v4195_v24 = vadd.f32 1.0, %v4194_v14  ;;  %vm4049_vm2 = vweird.f32 %v12031_v47 }
 0x416   : > { %v4247_v9 = vpack.c.bf16 %v4233_v39, %v4232_v58  ;;  %v3901_v35 = vmul.f32 0.0625, %v3862_v38  ;;  %v3918_v39 = vmul.f32 %v12083_v0, %v12083_v0  ;;  %v4137_v44 = vmul.f32 %v4022_v6, %v3945_v60 }
 0x417   : > { %v4032_v18 = vsel %vm12087_vm1, %v12026_v43, %v4028_v40 }
 0x418   : > { %4335 = vmatmul.bf16.gmra.mxu2 %v4247_v9  ;;  %v3933_v11 = vsub.f32 %v3901_v35, %v3917_v32  ;;  %v4138_v21 = vmul.f32 %v4032_v18, %v3946_v62  ;;  %v4234_v43 = vmul.f32 %v4195_v24, %v4137_v44 }
 0x419   : > { %v4197_v15 = vpop.f32.mrf.mxu1  ;;  %v3864_v9 = vpop.xlane.xlu1 %3863 }
 0x41a   : > { %5323 = vmatmul.f32.gmra.mxu1 %v11660_v12  ;;  %5995 = vmatmul.f32.gmra.mxu0 %v11660_v12  ;;  %v12058_v46 = vpop.eup %8079  ;;  %v12100_v58 = vadd.f32 1e-05, %v3933_v11  ;;  %v4198_v50 = vadd.f32 1.0, %v4197_v15  ;;  %v3902_v61 = vmul.f32 0.0625, %v3864_v9  ;;  %v3948_v9 = vsub.f32 %v11825_v17, %v12005_v4 }
 0x41b   : > { %v12061_v30 = vpop.eup %8081  ;;  %v4044_v31 = vmul.f32 %v12058_v46, %v12031_v47  ;;  %vm4050_vm3 = vweird.f32 %v12058_v46 }
 0x41c   : > { %v12063_v28 = vpop.f32.mrf.mxu0  ;;  %v4034_v22 = vmul.f32 %v12061_v30, %v12041_v45  ;;  %8083 = vrsqrt.f32 %v12100_v58  ;;  %v4235_v34 = vmul.f32 %v4198_v50, %v4138_v21  ;;  %v3934_v49 = vsub.f32 %v3902_v61, %v3918_v39  ;;  %vm12131_vm6 = vmor %vm4049_vm2, %vm4050_vm3 }
 0x41d   : > { %v4045_v36 = vmul.f32 %v12058_v46, %v4044_v31  ;;  %v3818_v31 = vpop.xlane.xlu2 %3817  ;;  %vm4040_vm5 = vweird.f32 %v12061_v30  ;;  %vm4059_vm10 = vweird.f32 %v12100_v58 }
 0x41e   : > { %v4035_v53 = vmul.f32 %v12061_v30, %v4034_v22  ;;  %v12111_v32 = vmul.f32 0.0625, %v3818_v31  ;;  %v12115_v5 = vadd.f32 1e-05, %v3934_v49  ;;  %vm12138_vm7 = vmor %vm4039_vm4, %vm4040_vm5 }
 0x41f   : > { %v4046_v14 = vmul.f32 0.5, %v4045_v36  ;;  %v4248_v36 = vpack.c.bf16 %v4235_v34, %v4234_v43 }
 0x420   : > { %v4036_v20 = vmul.f32 0.5, %v4035_v53  ;;  %8085 = vrsqrt.f32 %v12115_v5  ;;  %v3919_v11 = vmul.f32 %v12111_v32, %v12111_v32  ;;  %vm4069_vm8 = vweird.f32 %v12115_v5 }
 0x421   : > { %v4047_v37 = vsub.f32 1.5, %v4046_v14  ;;  %v4200_v10 = vpop.f32.mrf.mxu1 }
 0x422   : > { %5326 = vmatmul.f32.gmra.mxu1 %v11697_v57  ;;  %5998 = vmatmul.f32.gmra.mxu0 %v11697_v57  ;;  %v4037_v62 = vsub.f32 1.5, %v4036_v20  ;;  %v12120_v60 = vpop.eup %8083 }
 0x423   : > { %v4048_v24 = vmul.f32 %v12058_v46, %v4047_v37  ;;  %v4054_v50 = vmul.f32 %v12120_v60, %v12100_v58  ;;  %vm4060_vm11 = vweird.f32 %v12120_v60 }
 0x424   : > { %v12109_v22 = vpop.f32.mrf.mxu0  ;;  %v4038_v45 = vmul.f32 %v12061_v30, %v4037_v62  ;;  %vm12202_vm13 = vmor %vm4059_vm10, %vm4060_vm11 }
 0x425   : > { %v4052_v44 = vsel %vm12131_vm6, %v12058_v46, %v4048_v24  ;;  %v4055_v37 = vmul.f32 %v12120_v60, %v4054_v50  ;;  %v4201_v46 = vadd.f32 1.0, %v4200_v10 }
 0x426   : > { %v12149_v20 = vpop.eup %8085 }
 0x427   : > { %v4064_v17 = vmul.f32 %v12149_v20, %v12115_v5  ;;  %v4056_v15 = vmul.f32 0.5, %v4055_v37  ;;  %vm4070_vm9 = vweird.f32 %v12149_v20  ;;  %v6434_v5 = vld [vmem:[#allocation11 + $0x170] sm:$0xff] }
 0x428   : > { %4340 = vmatmul.bf16.gmra.mxu2 %v4248_v36  ;;  %v4042_v36 = vsel %vm12138_vm7, %v12061_v30, %v4038_v45  ;;  %vm12191_vm12 = vmor %vm4069_vm8, %vm4070_vm9 }
 0x429   : > { %v4203_v4 = vpop.f32.mrf.mxu1 }
 0x42a   : > { %5329 = vmatmul.f32.gmra.mxu1 %v11727_v55  ;;  %6001 = vmatmul.f32.gmra.mxu0 %v11727_v55  ;;  %v4204_v62 = vadd.f32 1.0, %v4203_v4 }
 0x42c   : > { %v12144_v61 = vpop.f32.mrf.mxu0 }
 0x431   : > { %v4206_v37 = vpop.f32.mrf.mxu1 }
 0x432   : > { %5332 = vmatmul.f32.gmra.mxu1 %v11761_v3  ;;  %6004 = vmatmul.f32.gmra.mxu0 %v11761_v3 }
 0x436   : > { %v3820_v38 = vpop.xlane.xlu0 %3819  ;;  %v3866_v47 = vpop.xlane.xlu1 %3865 }
 0x437   : > { %v12113_v35 = vmul.f32 0.0625, %v3820_v38  ;;  %v3903_v6 = vmul.f32 0.0625, %v3866_v47  ;;  %v8366_v38 = vld [vmem:[%s11455_s25 + $0x30] sm:$0xff] }
 0x438   : > { %v3947_v34 = vsub.f32 %v8366_v38, %v12013_v33  ;;  %v4065_v33 = vmul.f32 %v12149_v20, %v4064_v17  ;;  %v4057_v38 = vsub.f32 1.5, %v4056_v15 }
 0x439   : > { %v3920_v40 = vmul.f32 %v12113_v35, %v12113_v35  ;;  %v3868_v53 = vpop.xlane.xlu2 %3867  ;;  %v3935_v31 = vsub.f32 %v3903_v6, %v3919_v11  ;;  %v4140_v11 = vmul.f32 %v4052_v44, %v3948_v9 }
 0x43a   : > { %5335 = vmatmul.f32.gmra.mxu1 %v11786_v16  ;;  %6007 = vmatmul.f32.gmra.mxu0 %v11786_v16  ;;  %v3904_v39 = vmul.f32 0.0625, %v3868_v53  ;;  %v4139_v24 = vmul.f32 %v4042_v36, %v3947_v34  ;;  %v4066_v6 = vmul.f32 0.5, %v4065_v33  ;;  %v12178_v34 = vpop.f32.mrf.mxu0  ;;  %v6435_v33 = vld [vmem:[#allocation11 + $0x178] sm:$0xff]  ;;  %v4058_v15 = vmul.f32 %v12120_v60, %v4057_v38 }
 0x43b   : > { %v12153_v49 = vadd.f32 1e-05, %v3935_v31  ;;  %v4237_v30 = vmul.f32 %v4204_v62, %v4140_v11  ;;  %6436 = vmatpush.msrb.mxu1 %v6435_v33  ;;  %v7104_v33 = vld [vmem:[#allocation13 + $0x160] sm:$0xff] }
 0x43c   : > { %v3936_v21 = vsub.f32 %v3904_v39, %v3920_v40  ;;  %v4236_v14 = vmul.f32 %v4201_v46, %v4139_v24  ;;  %v4067_v9 = vsub.f32 1.5, %v4066_v6  ;;  %v7106_v6 = vld [vmem:[#allocation13 + $0x170] sm:$0xff]  ;;  %v7103_v24 = vld [vmem:[#allocation13 + $0x158] sm:$0xff] }
 0x43d   : > { %6437 = vmatpush.msrb.mxu1 %v6434_v5  ;;  %v6431_v5 = vld [vmem:[#allocation11 + $0x158] sm:$0xff]  ;;  %vm4079_vm0 = vweird.f32 %v12153_v49 }
 0x43e   : > { %v12155_v43 = vadd.f32 1e-05, %v3936_v21  ;;  %v3824_v47 = vpop.xlane.xlu1 %3823  ;;  %v4249_v21 = vpack.c.bf16 %v4237_v30, %v4236_v14  ;;  %v4068_v11 = vmul.f32 %v12149_v20, %v4067_v9  ;;  %v3949_v9 = vsub.f32 %v11886_v56, %v12072_v51  ;;  %v6433_v51 = vld [vmem:[#allocation11 + $0x168] sm:$0xff] }
 0x43f   : > { %v12170_v53 = vmul.f32 0.0625, %v3824_v47  ;;  %v7107_v47 = vld [vmem:[#allocation13 + $0x178] sm:$0xff]  ;;  %6438 = vmatpush.msrb.mxu1 %v6433_v51 }
 0x440   : > { %8087 = vrsqrt.f32 %v12155_v43  ;;  %4345 = vmatmul.bf16.gmra.mxu2 %v4249_v21  ;;  %7108 = vmatpush.msrb.mxu0 %v7107_v47  ;;  %v4072_v58 = vsel %vm12191_vm12, %v12149_v20, %v4068_v11  ;;  %v4209_v21 = vpop.f32.mrf.mxu1  ;;  %vm4089_vm14 = vweird.f32 %v12155_v43 }
 0x441   : > { %8089 = vrsqrt.f32 %v12153_v49  ;;  %v3922_v50 = vmul.f32 %v12170_v53, %v12170_v53  ;;  %v4210_v56 = vadd.f32 1.0, %v4209_v21 }
 0x442   : > { %5338 = vmatmul.f32.gmra.mxu1 %v11806_v19  ;;  %6010 = vmatmul.f32.gmra.mxu0 %v11806_v19 }
 0x443   : > { %7109 = vmatpush.msrb.mxu0 %v7106_v6 }
 0x444   : > { %v3822_v18 = vpop.xlane.xlu0 %3821 }
 0x445   : > { %v12167_v40 = vmul.f32 0.0625, %v3822_v18 }
 0x446   : > { %v12176_v44 = vpop.eup %8087  ;;  %v3826_v46 = vpop.xlane.xlu1 %3825 }
 0x447   : > { %v3921_v18 = vmul.f32 %v12167_v40, %v12167_v40  ;;  %v12181_v17 = vpop.eup %8089  ;;  %v4084_v36 = vmul.f32 %v12176_v44, %v12155_v43  ;;  %v12230_v47 = vmul.f32 0.0625, %v3826_v46  ;;  %vm4090_vm15 = vweird.f32 %v12176_v44 }
 0x448   : > { %v4074_v30 = vmul.f32 %v12181_v17, %v12153_v49  ;;  %v4212_v51 = vpop.f32.mrf.mxu1  ;;  %vm4080_vm1 = vweird.f32 %v12181_v17  ;;  %vm12249_vm2 = vmor %vm4089_vm14, %vm4090_vm15  ;;  %v8367_v49 = vld [vmem:[%s11455_s25 + $0x50] sm:$0xff] }
 0x449   : > { %vm12262_vm3 = vmor %vm4079_vm0, %vm4080_vm1 }
 0x44a   : > { %5341 = vmatmul.f32.gmra.mxu1 %v11839_v25  ;;  %6013 = vmatmul.f32.gmra.mxu0 %v11839_v25 }
 0x44b   : > { %v3870_v10 = vpop.xlane.xlu2 %3869 }
 0x44c   : > { %v3905_v31 = vmul.f32 0.0625, %v3870_v10 }
 0x44e   : > { %v3937_v62 = vsub.f32 %v3905_v31, %v3921_v18  ;;  %v4075_v31 = vmul.f32 %v12181_v17, %v4074_v30 }
 0x44f   : > { %v3872_v39 = vpop.xlane.xlu0 %3871 }
 0x450   : > { %v3906_v45 = vmul.f32 0.0625, %v3872_v39  ;;  %v12213_v18 = vadd.f32 1e-05, %v3937_v62  ;;  %v4076_v30 = vmul.f32 0.5, %v4075_v31 }
 0x451   : > { %v3876_v62 = vpop.xlane.xlu1 %3875 }
 0x452   : > { %5344 = vmatmul.f32.gmra.mxu1 %v11854_v2  ;;  %6016 = vmatmul.f32.gmra.mxu0 %v11854_v2  ;;  %v3938_v4 = vsub.f32 %v3906_v45, %v3922_v50  ;;  %v3950_v50 = vsub.f32 %v11889_v48, %v12083_v0  ;;  %v4085_v45 = vmul.f32 %v12176_v44, %v4084_v36  ;;  %v4207_v0 = vadd.f32 1.0, %v4206_v37  ;;  %v12227_v36 = vpop.f32.mrf.mxu0 }
 0x453   : > { %v3828_v14 = vpop.xlane.xlu2 %3827  ;;  %v4062_v48 = vsel %vm12202_vm13, %v12120_v60, %v4058_v15  ;;  %v6432_v60 = vld [vmem:[#allocation11 + $0x160] sm:$0xff]  ;;  %vm4099_vm6 = vweird.f32 %v12213_v18 }
 0x454   : > { %v12206_v39 = vadd.f32 1e-05, %v3938_v4  ;;  %v12224_v38 = vmul.f32 0.0625, %v3828_v14  ;;  %v7105_v4 = vld [vmem:[#allocation13 + $0x168] sm:$0xff]  ;;  %v4086_v20 = vmul.f32 0.5, %v4085_v45  ;;  %v4142_v11 = vmul.f32 %v4072_v58, %v3950_v50  ;;  %6439 = vmatpush.msrb.mxu1 %v6432_v60  ;;  %v6430_v14 = vld [vmem:[#allocation11 + $0x150] sm:$0xff] }
 0x455   : > { %7110 = vmatpush.msrb.mxu0 %v7105_v4  ;;  %v4141_v37 = vmul.f32 %v4062_v48, %v3949_v9  ;;  %v3908_v50 = vmul.f32 0.0625, %v3876_v62  ;;  %v7102_v58 = vld [vmem:[#allocation13 + $0x150] sm:$0xff]  ;;  %v3923_v9 = vmul.f32 %v12230_v47, %v12230_v47  ;;  %v6429_v60 = vld [vmem:[#allocation11 + $0x148] sm:$0xff] }
 0x456   : > { %8091 = vrsqrt.f32 %v12206_v39  ;;  %v4239_v6 = vmul.f32 %v4210_v56, %v4142_v11  ;;  %v3924_v10 = vmul.f32 %v12224_v38, %v12224_v38  ;;  %v4087_v21 = vsub.f32 1.5, %v4086_v20  ;;  %6440 = vmatpush.msrb.mxu1 %v6431_v5  ;;  %v6425_v62 = vld [vmem:[#allocation11 + $0x128] sm:$0xff] }
 0x457   : > { %8093 = vrsqrt.f32 %v12213_v18  ;;  %v3874_v15 = vpop.xlane.xlu0 %3873  ;;  %7111 = vmatpush.msrb.mxu0 %v7104_v33  ;;  %v4238_v45 = vmul.f32 %v4207_v0, %v4141_v37  ;;  %v4077_v56 = vsub.f32 1.5, %v4076_v30  ;;  %v7101_v33 = vld [vmem:[#allocation13 + $0x148] sm:$0xff]  ;;  %v6428_v30 = vld [vmem:[#allocation11 + $0x140] sm:$0xff]  ;;  %vm4109_vm4 = vweird.f32 %v12206_v39 }
 0x458   : > { %v3907_v31 = vmul.f32 0.0625, %v3874_v15  ;;  %6441 = vmatpush.msrb.mxu1 %v6430_v14  ;;  %v3940_v4 = vsub.f32 %v3908_v50, %v3924_v10  ;;  %v4088_v43 = vmul.f32 %v12176_v44, %v4087_v21  ;;  %v7100_v15 = vld [vmem:[#allocation13 + $0x140] sm:$0xff]  ;;  %v3952_v10 = vsub.f32 %v11909_v1, %v12113_v35  ;;  %v7099_v14 = vld [vmem:[#allocation13 + $0x138] sm:$0xff]  ;;  %v4215_v35 = vpop.f32.mrf.mxu1 }
 0x459   : > { %7112 = vmatpush.msrb.mxu0 %v7103_v24  ;;  %v4250_v48 = vpack.c.bf16 %v4239_v6, %v4238_v45  ;;  %v4078_v24 = vmul.f32 %v12181_v17, %v4077_v56  ;;  %v6427_v45 = vld [vmem:[#allocation11 + $0x138] sm:$0xff]  ;;  %v7098_v56 = vld [vmem:[#allocation13 + $0x130] sm:$0xff] }
 0x45a   : > { %5347 = vmatmul.f32.gmra.mxu1 %v11869_v63  ;;  %6019 = vmatmul.f32.gmra.mxu0 %v11869_v63  ;;  %v3939_v11 = vsub.f32 %v3907_v31, %v3923_v9  ;;  %v12255_v5 = vpop.f32.mrf.mxu0  ;;  %v12268_v50 = vadd.f32 1e-05, %v3940_v4  ;;  %v4092_v21 = vsel %vm12249_vm2, %v12176_v44, %v4088_v43  ;;  %v3951_v9 = vsub.f32 %v8367_v49, %v12111_v32  ;;  %v7097_v32 = vld [vmem:[#allocation13 + $0x128] sm:$0xff]  ;;  %v7095_v6 = vld [vmem:[#allocation13 + $0x118] sm:$0xff] }
 0x45b   : > { %7113 = vmatpush.msrb.mxu0 %v7102_v58  ;;  %4350 = vmatmul.bf16.gmra.mxu2 %v4250_v48  ;;  %v6426_v48 = vld [vmem:[#allocation11 + $0x130] sm:$0xff]  ;;  %v4082_v4 = vsel %vm12262_vm3, %v12181_v17, %v4078_v24  ;;  %v4213_v44 = vadd.f32 1.0, %v4212_v51  ;;  %v4144_v43 = vmul.f32 %v4092_v21, %v3952_v10  ;;  %v6423_v24 = vld [vmem:[#allocation11 + $0x118] sm:$0xff] }
 0x45c   : > { %v12234_v46 = vpop.eup %8091  ;;  %6442 = vmatpush.msrb.mxu1 %v6429_v60  ;;  %v12276_v31 = vadd.f32 1e-05, %v3939_v11  ;;  %8095 = vrsqrt.f32 %v12268_v50  ;;  %v4143_v60 = vmul.f32 %v4082_v4, %v3951_v9  ;;  %v7094_v21 = vld [vmem:[#allocation13 + $0x110] sm:$0xff]  ;;  %v7093_v4 = vld [vmem:[#allocation13 + $0x108] sm:$0xff]  ;;  %vm4129_vm10 = vweird.f32 %v12268_v50 }
 0x45d   : > { %v12240_v0 = vpop.eup %8093  ;;  %v4104_v20 = vmul.f32 %v12234_v46, %v12206_v39  ;;  %7114 = vmatpush.msrb.mxu0 %v7101_v33  ;;  %vm4110_vm5 = vweird.f32 %v12234_v46 }
 0x45e   : > { %v4094_v37 = vmul.f32 %v12240_v0, %v12213_v18  ;;  %6443 = vmatpush.msrb.mxu1 %v6428_v30  ;;  %8097 = vrsqrt.f32 %v12276_v31  ;;  %v7096_v30 = vld [vmem:[#allocation13 + $0x120] sm:$0xff]  ;;  %v4240_v17 = vmul.f32 %v4213_v44, %v4143_v60  ;;  %vm4100_vm7 = vweird.f32 %v12240_v0  ;;  %vm12294_vm8 = vmor %vm4109_vm4, %vm4110_vm5 }
 0x45f   : > { %v4105_v58 = vmul.f32 %v12234_v46, %v4104_v20  ;;  %7115 = vmatpush.msrb.mxu0 %v7100_v15  ;;  %v4216_v20 = vadd.f32 1.0, %v4215_v35  ;;  %v6421_v35 = vld [vmem:[#allocation11 + $0x108] sm:$0xff]  ;;  %v6420_v44 = vld [vmem:[#allocation11 + $0x100] sm:$0xff]  ;;  %vm12308_vm9 = vmor %vm4099_vm6, %vm4100_vm7  ;;  %vm4119_vm12 = vweird.f32 %v12276_v31 }
 0x460   : > { %v4095_v1 = vmul.f32 %v12240_v0, %v4094_v37  ;;  %6444 = vmatpush.msrb.mxu1 %v6427_v45  ;;  %v6424_v37 = vld [vmem:[#allocation11 + $0x120] sm:$0xff]  ;;  %v4218_v9 = vpop.f32.mrf.mxu1 }
 0x461   : > { %7116 = vmatpush.msrb.mxu0 %v7099_v14  ;;  %v4106_v11 = vmul.f32 0.5, %v4105_v58  ;;  %v4241_v33 = vmul.f32 %v4216_v20, %v4144_v43  ;;  %v6422_v58 = vld [vmem:[#allocation11 + $0x110] sm:$0xff] }
 0x462   : > { %5350 = vmatmul.f32.gmra.mxu1 %v11876_v26  ;;  %6022 = vmatmul.f32.gmra.mxu0 %v11876_v26  ;;  %v4096_v15 = vmul.f32 0.5, %v4095_v1  ;;  %v12284_v45 = vpop.f32.mrf.mxu0  ;;  %v12286_v10 = vpop.eup %8095 }
 0x463   : > { %6445 = vmatpush.msrb.mxu1 %v6426_v48  ;;  %7117 = vmatpush.msrb.mxu0 %v7098_v56  ;;  %v4107_v51 = vsub.f32 1.5, %v4106_v11  ;;  %v4251_v14 = vpack.c.bf16 %v4241_v33, %v4240_v17  ;;  %v4124_v39 = vmul.f32 %v12286_v10, %v12268_v50  ;;  %v8368_v11 = vld [vmem:[%s11455_s25 + $0x68] sm:$0xff]  ;;  %vm4130_vm11 = vweird.f32 %v12286_v10 }
 0x464   : > { %v4097_v49 = vsub.f32 1.5, %v4096_v15  ;;  %v12290_v48 = vpop.eup %8097  ;;  %v3954_v60 = vsub.f32 %v8368_v11, %v12170_v53  ;;  %vm4131_vm14 = vmor %vm4129_vm10, %vm4130_vm11 }
 0x465   : > { %6446 = vmatpush.msrb.mxu1 %v6425_v62  ;;  %7118 = vmatpush.msrb.mxu0 %v7097_v32  ;;  %v4108_v1 = vmul.f32 %v12234_v46, %v4107_v51  ;;  %v4114_v20 = vmul.f32 %v12290_v48, %v12276_v31  ;;  %v7092_v62 = vld [vmem:[#allocation13 + $0x100] sm:$0xff]  ;;  %v4125_v33 = vmul.f32 %v12286_v10, %v4124_v39  ;;  %vm4120_vm13 = vweird.f32 %v12290_v48 }
 0x466   : > { %v4098_v43 = vmul.f32 %v12240_v0, %v4097_v49  ;;  %vm4121_vm15 = vmor %vm4119_vm12, %vm4120_vm13 }
 0x467   : > { %6447 = vmatpush.msrb.mxu1 %v6424_v37  ;;  %7119 = vmatpush.msrb.mxu0 %v7096_v30  ;;  %v4112_v37 = vsel %vm12294_vm8, %v12234_v46, %v4108_v1  ;;  %v8369_v30 = vld [vmem:[%s11455_s25 + $0x60] sm:$0xff]  ;;  %v4115_v18 = vmul.f32 %v12290_v48, %v4114_v20 }
 0x468   : > { %v3953_v15 = vsub.f32 %v8369_v30, %v12167_v40  ;;  %v4221_v53 = vpop.f32.mrf.mxu1  ;;  %v4146_v51 = vmul.f32 %v4112_v37, %v3954_v60 }
 0x469   : > { %6448 = vmatpush.msrb.mxu1 %v6423_v24  ;;  %7120 = vmatpush.msrb.mxu0 %v7095_v6  ;;  %v4102_v24 = vsel %vm12308_vm9, %v12240_v0, %v4098_v43  ;;  %v4219_v6 = vadd.f32 1.0, %v4218_v9  ;;  %v4222_v46 = vadd.f32 1.0, %v4221_v53  ;;  %v4116_v40 = vmul.f32 0.5, %v4115_v18  ;;  %v7767_v18 = vld [vmem:[#allocation16 + $0x30] sm:$0xff] }
 0x46a   : > { %5353 = vmatmul.f32.gmra.mxu1 %v11892_v29  ;;  %6025 = vmatmul.f32.gmra.mxu0 %v11892_v29  ;;  %v12323_v17 = vpop.f32.mrf.mxu0 }
 0x46b   : > { %6449 = vmatpush.msrb.mxu1 %v6422_v58  ;;  %7121 = vmatpush.msrb.mxu0 %v7094_v21  ;;  %v4145_v58 = vmul.f32 %v4102_v24, %v3953_v15  ;;  %v4243_v21 = vmul.f32 %v4222_v46, %v4146_v51 }
 0x46c   : > { %4355 = vmatmul.bf16.gmra.mxu2 %v4251_v14  ;;  %v4126_v14 = vmul.f32 0.5, %v4125_v33 }
 0x46d   : > { %6450 = vmatpush.msrb.mxu1 %v6421_v35  ;;  %7122 = vmatpush.msrb.mxu0 %v7093_v4  ;;  %v4242_v49 = vmul.f32 %v4219_v6, %v4145_v58  ;;  %v8370_v4 = vld [vmem:[%s11455_s25 + $0x70] sm:$0xff] }
 0x46e   : > { %v4127_v56 = vsub.f32 1.5, %v4126_v14 }
 0x46f   : > { %6451 = vmatpush.msrb.mxu1 %v6420_v44  ;;  %7123 = vmatpush.msrb.mxu0 %v7092_v62  ;;  %v4252_v39 = vpack.c.bf16 %v4243_v21, %v4242_v49  ;;  %v3955_v44 = vsub.f32 %v8370_v4, %v12230_v47 }
 0x470   : > { %v4224_v0 = vpop.f32.mrf.mxu1  ;;  %v4128_v1 = vmul.f32 %v12286_v10, %v4127_v56 }
 0x471   : > { %v4225_v43 = vadd.f32 1.0, %v4224_v0  ;;  %v7766_v0 = vld [vmem:[#allocation16 + $0x28] sm:$0xff] }
 0x472   : > { %5356 = vmatmul.f32.gmra.mxu1 %v11912_v23  ;;  %6028 = vmatmul.f32.gmra.mxu0 %v11912_v23  ;;  %v12334_v9 = vpop.f32.mrf.mxu0  ;;  %v4132_v50 = vsel %vm4131_vm14, %v12286_v10, %v4128_v1 }
 0x478   : > { %v4227_v31 = vpop.f32.mrf.mxu1 }
 0x479   : > { %v4228_v62 = vadd.f32 1.0, %v4227_v31 }
 0x47a   : > { %5359 = vmatmul.f32.gmra.mxu1 %v11944_v52  ;;  %6031 = vmatmul.f32.gmra.mxu0 %v11944_v52  ;;  %v12346_v33 = vpop.f32.mrf.mxu0 }
 0x47c   : > { %4360 = vmatmul.bf16.gmra.mxu2 %v4252_v39 }
 0x482   : > { %6452 = vmatmul.f32.vlgmr.msrb.gmra.mxu1 %v11571_v41  ;;  %7124 = vmatmul.f32.vlgmr.msrb.gmra.mxu0 %v11571_v41  ;;  %v4117_v41 = vsub.f32 1.5, %v4116_v40  ;;  %v12358_v30 = vpop.f32.mrf.mxu0 }
 0x484   : > { %v4118_v35 = vmul.f32 %v12290_v48, %v4117_v41 }
 0x486   : > { %v4122_v20 = vsel %vm4121_vm15, %v12290_v48, %v4118_v35  ;;  %v7768_v48 = vld [vmem:[#allocation16 + $0x38] sm:$0xff] }
 0x487   : > { %v4147_v11 = vmul.f32 %v4122_v20, %v3955_v44  ;;  %4767 = vmatpush.bf16.msrb.mxu3 %v7768_v48  ;;  %v7764_v44 = vld [vmem:[#allocation16 + $0x18] sm:$0xff] }
 0x48a   : > { %6455 = vmatmul.f32.gmra.mxu1 %v11605_v59  ;;  %7127 = vmatmul.f32.gmra.mxu0 %v11605_v59  ;;  %v3956_v59 = vsub.f32 %v11941_v42, %v12224_v38  ;;  %v4244_v42 = vmul.f32 %v4225_v43, %v4147_v11  ;;  %v4331_v38 = vpop.f32.mrf.mxu2  ;;  %v12369_v6 = vpop.f32.mrf.mxu0 }
 0x48b   : > { %4768 = vmatpush.bf16.msrb.mxu3 %v7767_v18 }
 0x48c   : > { %v4148_v32 = vmul.f32 %v4132_v50, %v3956_v59  ;;  %v7765_v59 = vld [vmem:[#allocation16 + $0x20] sm:$0xff] }
 0x48e   : > { %v4245_v60 = vmul.f32 %v4228_v62, %v4148_v32 }
 0x48f   : > { %4769 = vmatpush.bf16.msrb.mxu3 %v7766_v0 }
 0x490   : > { %v4253_v10 = vpack.c.bf16 %v4245_v60, %v4244_v42 }
 0x492   : > { %6458 = vmatmul.f32.gmra.mxu1 %v11638_v13  ;;  %7130 = vmatmul.f32.gmra.mxu0 %v11638_v13  ;;  %v12353_v13 = vld [vmem:[%s13591_s11] ss:$0 sm:$0xff]  ;;  %v4333_v37 = vpop.f32.mrf.mxu2  ;;  %v12375_v58 = vpop.f32.mrf.mxu0 }
 0x493   : > { %4365 = vmatmul.bf16.gmra.mxu2 %v4253_v10  ;;  %v12356_v47 = vadd.f32 %v12353_v13, %v4331_v38  ;;  %v12361_v15 = vadd.f32 %v12353_v13, %v4333_v37  ;;  %4770 = vmatpush.bf16.msrb.mxu3 %v7765_v59  ;;  %v7763_v10 = vld [vmem:[#allocation16 + $0x10] sm:$0xff] }
 0x495   : > { %v7536_v53 = vmul.f32 -1.442695, %v12361_v15 }
 0x497   : > { %8099 = vpow2.f32 %v7536_v53  ;;  %4771 = vmatpush.bf16.msrb.mxu3 %v7764_v44 }
 0x49a   : > { %6461 = vmatmul.f32.gmra.mxu1 %v11660_v12  ;;  %7133 = vmatmul.f32.gmra.mxu0 %v11660_v12  ;;  %v7535_v12 = vmul.f32 -1.442695, %v12356_v47  ;;  %v12381_v39 = vpop.f32.mrf.mxu0 }
 0x49b   : > { %v4336_v1 = vpop.f32.mrf.mxu2  ;;  %4772 = vmatpush.bf16.msrb.mxu3 %v7763_v10 }
 0x49c   : > { %8101 = vpow2.f32 %v7535_v12  ;;  %v12384_v35 = vadd.f32 %v12353_v13, %v4336_v1 }
 0x49d   : > { %v8100_v24 = vpop.eup %8099 }
 0x49e   : > { %v4420_v51 = vadd.f32 1.0, %v8100_v24 }
 0x4a0   : > { %8103 = vrcp.f32 %v4420_v51  ;;  %v4461_v43 = vand.u32 2147483648, %v4420_v51  ;;  %vm4455_vm2 = vweird.f32 %v4420_v51  ;;  %v4459_v11 = vand.u32 2147483647, %v4420_v51 }
 0x4a2   : > { %6464 = vmatmul.f32.gmra.mxu1 %v11697_v57  ;;  %7136 = vmatmul.f32.gmra.mxu0 %v11697_v57  ;;  %v8102_v46 = vpop.eup %8101  ;;  %v12373_v57 = vpop.f32.mrf.mxu1  ;;  %v4462_v12 = vor.u32 1.1754944e-38, %v4461_v43  ;;  %vm4460_vm6 = vcmp.eq.f32.partialorder %v4459_v11, 8.507059e+37 }
 0x4a3   : > { %v4419_v14 = vadd.f32 1.0, %v8102_v46  ;;  %v12391_v62 = vpop.f32.mrf.mxu0  ;;  %v4338_v60 = vpop.f32.mrf.mxu2 }
 0x4a4   : > { %v12398_v38 = vadd.f32 %v12353_v13, %v4338_v60 }
 0x4a5   : > { %8105 = vrcp.f32 %v4419_v14  ;;  %v4446_v42 = vand.u32 2147483648, %v4419_v14  ;;  %vm4440_vm4 = vweird.f32 %v4419_v14  ;;  %v4444_v48 = vand.u32 2147483647, %v4419_v14 }
 0x4a6   : > { %v8104_v21 = vpop.eup %8103  ;;  %v7538_v53 = vmul.f32 -1.442695, %v12398_v38 }
 0x4a7   : > { %vm4456_vm0 = vweird.f32 %v8104_v21  ;;  %vm4445_vm7 = vcmp.eq.f32.partialorder %v4444_v48, 8.507059e+37 }
 0x4a8   : > { %vm12393_vm3 = vmor %vm4455_vm2, %vm4456_vm0 }
 0x4aa   : > { %6467 = vmatmul.f32.gmra.mxu1 %v11727_v55  ;;  %7139 = vmatmul.f32.gmra.mxu0 %v11727_v55  ;;  %v4451_v55 = vmul.f32 %v8104_v21, %v4420_v51  ;;  %v12379_v56 = vpop.f32.mrf.mxu1  ;;  %v4447_v51 = vor.u32 1.1754944e-38, %v4446_v42 }
 0x4ab   : > { %v8106_v40 = vpop.eup %8105  ;;  %v12417_v1 = vpop.f32.mrf.mxu0 }
 0x4ac   : > { %v4436_v49 = vmul.f32 %v8106_v40, %v4419_v14  ;;  %v4452_v41 = vsub.f32 1.0, %v4451_v55  ;;  %vm4441_vm1 = vweird.f32 %v8106_v40 }
 0x4ad   : > { %vm4442_vm5 = vmor %vm4440_vm4, %vm4441_vm1 }
 0x4ae   : > { %v4453_v50 = vmul.f32 %v8104_v21, %v4452_v41 }
 0x4b0   : > { %v4454_v31 = vadd.f32 %v8104_v21, %v4453_v50 }
 0x4b2   : > { %6470 = vmatmul.f32.gmra.mxu1 %v11761_v3  ;;  %7142 = vmatmul.f32.gmra.mxu0 %v11761_v3  ;;  %v4437_v3 = vsub.f32 1.0, %v4436_v49  ;;  %v12389_v20 = vpop.f32.mrf.mxu1  ;;  %v4458_v37 = vsel %vm12393_vm3, %v8104_v21, %v4454_v31  ;;  %v7762_v21 = vld [vmem:[#allocation16 + $0x8] sm:$0xff]  ;;  %v4341_v49 = vpop.f32.mrf.mxu2 }
 0x4b3   : > { %v4463_v55 = vsel %vm4460_vm6, %v4462_v12, %v4458_v37  ;;  %v12413_v0 = vadd.f32 %v12353_v13, %v4341_v49  ;;  %4773 = vmatpush.bf16.msrb.mxu3 %v7762_v21 }
 0x4b4   : > { %v4438_v4 = vmul.f32 %v8106_v40, %v4437_v3 }
 0x4b5   : > { %v7539_v50 = vmul.f32 -1.442695, %v12413_v0 }
 0x4b6   : > { %v4439_v32 = vadd.f32 %v8106_v40, %v4438_v4 }
 0x4b8   : > { %v4443_v24 = vsel %vm4442_vm5, %v8106_v40, %v4439_v32  ;;  %v7761_v40 = vld [vmem:[#allocation16] sm:$0xff] }
 0x4b9   : > { %v4448_v14 = vsel %vm4445_vm7, %v4447_v51, %v4443_v24  ;;  %4774 = vmatpush.bf16.msrb.mxu3 %v7761_v40 }
 0x4ba   : > { %6473 = vmatmul.f32.gmra.mxu1 %v11786_v16  ;;  %7145 = vmatmul.f32.gmra.mxu0 %v11786_v16  ;;  %v7537_v16 = vmul.f32 -1.442695, %v12384_v35  ;;  %v12410_v41 = vpop.f32.mrf.mxu1  ;;  %v4675_v3 = vmul.f32 %v4448_v14, %v12356_v47  ;;  %v4343_v43 = vpop.f32.mrf.mxu2 }
 0x4bb   : > { %v12423_v47 = vadd.f32 %v12353_v13, %v4343_v43 }
 0x4bc   : > { %8107 = vpow2.f32 %v7537_v16 }
 0x4bd   : > { %8109 = vpow2.f32 %v7538_v53  ;;  %v7540_v60 = vmul.f32 -1.442695, %v12423_v47 }
 0x4c2   : > { %6476 = vmatmul.f32.gmra.mxu1 %v11806_v19  ;;  %7148 = vmatmul.f32.gmra.mxu0 %v11806_v19  ;;  %v8108_v18 = vpop.eup %8107  ;;  %v12427_v11 = vpop.f32.mrf.mxu1 }
 0x4c3   : > { %v12406_v46 = vadd.f32 1.0, %v8108_v18  ;;  %v8110_v59 = vpop.eup %8109  ;;  %v12430_v19 = vpop.f32.mrf.mxu0 }
 0x4c4   : > { %v4422_v16 = vadd.f32 1.0, %v8110_v59  ;;  %v4346_v12 = vpop.f32.mrf.mxu2 }
 0x4c5   : > { %8111 = vrcp.f32 %v12406_v46  ;;  %vm4470_vm9 = vweird.f32 %v12406_v46  ;;  %v4476_v18 = vand.u32 2147483648, %v12406_v46  ;;  %v12443_v24 = vadd.f32 %v12353_v13, %v4346_v12 }
 0x4c6   : > { %8113 = vpow2.f32 %v7539_v50  ;;  %v4491_v14 = vand.u32 2147483648, %v4422_v16  ;;  %v4489_v49 = vand.u32 2147483647, %v4422_v16  ;;  %vm4485_vm13 = vweird.f32 %v4422_v16 }
 0x4c7   : > { %8115 = vrcp.f32 %v4422_v16 }
 0x4c8   : > { %8117 = vpow2.f32 %v7540_v60  ;;  %vm4490_vm15 = vcmp.eq.f32.partialorder %v4489_v49, 8.507059e+37 }
 0x4ca   : > { %6479 = vmatmul.f32.gmra.mxu1 %v11839_v25  ;;  %7151 = vmatmul.f32.gmra.mxu0 %v11839_v25  ;;  %v4676_v25 = vmul.f32 %v4463_v55, %v12361_v15  ;;  %v12454_v50 = vpop.f32.mrf.mxu1 }
 0x4cb   : > { %v8112_v15 = vpop.eup %8111 }
 0x4cc   : > { %v4691_v4 = vpack.c.bf16 %v4676_v25, %v4675_v3  ;;  %v4466_v44 = vmul.f32 %v8112_v15, %v12406_v46  ;;  %v8114_v32 = vpop.eup %8113  ;;  %vm4471_vm8 = vweird.f32 %v8112_v15  ;;  %v4477_v3 = vor.u32 1.1754944e-38, %v4476_v18 }
 0x4cd   : > { %v8116_v42 = vpop.eup %8115  ;;  %v12432_v10 = vadd.f32 1.0, %v8114_v32  ;;  %vm12438_vm10 = vmor %vm4470_vm9, %vm4471_vm8  ;;  %v4348_v32 = vpop.f32.mrf.mxu2 }
 0x4ce   : > { %v4467_v31 = vsub.f32 1.0, %v4466_v44  ;;  %4775 = vmatmul.bf16.vlgmr.msrb.gmra.mxu3 %v4691_v4  ;;  %v4481_v37 = vmul.f32 %v8116_v42, %v4422_v16  ;;  %v8118_v21 = vpop.eup %8117  ;;  %vm4486_vm11 = vweird.f32 %v8116_v42  ;;  %v12458_v44 = vpop.f32.mrf.mxu0 }
 0x4cf   : > { %8119 = vrcp.f32 %v12432_v10  ;;  %v12452_v59 = vadd.f32 1.0, %v8118_v21  ;;  %vm4487_vm14 = vmor %vm4485_vm13, %vm4486_vm11  ;;  %vm4500_vm1 = vweird.f32 %v12432_v10  ;;  %v4506_v21 = vand.u32 2147483648, %v12432_v10 }
 0x4d0   : > { %v4482_v51 = vsub.f32 1.0, %v4481_v37  ;;  %v12463_v37 = vadd.f32 %v12353_v13, %v4348_v32 }
 0x4d1   : > { %v4507_v32 = vor.u32 1.1754944e-38, %v4506_v21  ;;  %vm4515_vm5 = vweird.f32 %v12452_v59 }
 0x4d2   : > { %6482 = vmatmul.f32.gmra.mxu1 %v11854_v2  ;;  %7154 = vmatmul.f32.gmra.mxu0 %v11854_v2  ;;  %v4468_v2 = vmul.f32 %v8112_v15, %v4467_v31  ;;  %v4483_v25 = vmul.f32 %v8116_v42, %v4482_v51  ;;  %v4492_v31 = vor.u32 1.1754944e-38, %v4491_v14  ;;  %v7542_v12 = vmul.f32 -1.442695, %v12463_v37 }
 0x4d3   : > { %v4504_v14 = vand.u32 2147483647, %v12432_v10 }
 0x4d4   : > { %v4469_v48 = vadd.f32 %v8112_v15, %v4468_v2  ;;  %v4484_v4 = vadd.f32 %v8116_v42, %v4483_v25 }
 0x4d5   : > { %v12450_v40 = vpop.eup %8119  ;;  %vm4505_vm4 = vcmp.eq.f32.partialorder %v4504_v14, 8.507059e+37 }
 0x4d6   : > { %v4473_v55 = vsel %vm12438_vm10, %v8112_v15, %v4469_v48  ;;  %v4496_v15 = vmul.f32 %v12450_v40, %v12432_v10  ;;  %v4488_v2 = vsel %vm4487_vm14, %v8116_v42, %v4484_v4  ;;  %vm4501_vm0 = vweird.f32 %v12450_v40 }
 0x4d7   : > { %v4493_v60 = vsel %vm4490_vm15, %v4492_v31, %v4488_v2  ;;  %vm12483_vm2 = vmor %vm4500_vm1, %vm4501_vm0  ;;  %v4521_v4 = vand.u32 2147483648, %v12452_v59 }
 0x4d8   : > { %v4497_v43 = vsub.f32 1.0, %v4496_v15 }
 0x4da   : > { %6485 = vmatmul.f32.gmra.mxu1 %v11869_v63  ;;  %7157 = vmatmul.f32.gmra.mxu0 %v11869_v63  ;;  %v4474_v63 = vand.u32 2147483647, %v12406_v46  ;;  %v7541_v46 = vmul.f32 -1.442695, %v12443_v24  ;;  %v4498_v16 = vmul.f32 %v12450_v40, %v4497_v43  ;;  %v4519_v43 = vand.u32 2147483647, %v12452_v59 }
 0x4dc   : > { %vm4475_vm12 = vcmp.eq.f32.partialorder %v4474_v63, 8.507059e+37  ;;  %8121 = vpow2.f32 %v7541_v46  ;;  %v4678_v63 = vmul.f32 %v4493_v60, %v12398_v38  ;;  %v12475_v38 = vpop.f32.mrf.mxu1  ;;  %vm4520_vm7 = vcmp.eq.f32.partialorder %v4519_v43, 8.507059e+37 }
 0x4dd   : > { %8123 = vrcp.f32 %v12452_v59 }
 0x4de   : > { %8125 = vpow2.f32 %v7542_v12  ;;  %v4351_v46 = vpop.f32.mrf.mxu2 }
 0x4df   : > { %v12488_v49 = vadd.f32 %v12353_v13, %v4351_v46 }
 0x4e2   : > { %6488 = vmatmul.f32.gmra.mxu1 %v11876_v26  ;;  %7160 = vmatmul.f32.gmra.mxu0 %v11876_v26  ;;  %v4478_v26 = vsel %vm4475_vm12, %v4477_v3, %v4473_v55  ;;  %v8122_v18 = vpop.eup %8121 }
 0x4e3   : > { %v4677_v48 = vmul.f32 %v4478_v26, %v12384_v35  ;;  %v8124_v53 = vpop.eup %8123  ;;  %v12470_v51 = vadd.f32 1.0, %v8122_v18  ;;  %v4499_v35 = vadd.f32 %v12450_v40, %v4498_v16  ;;  %v7543_v26 = vmul.f32 -1.442695, %v12488_v49 }
 0x4e4   : > { %v4511_v55 = vmul.f32 %v8124_v53, %v12452_v59  ;;  %v8126_v10 = vpop.eup %8125  ;;  %vm4516_vm3 = vweird.f32 %v8124_v53 }
 0x4e5   : > { %v4692_v42 = vpack.c.bf16 %v4678_v63, %v4677_v48  ;;  %8127 = vrcp.f32 %v12470_v51  ;;  %v4503_v15 = vsel %vm12483_vm2, %v12450_v40, %v4499_v35  ;;  %v4426_v60 = vadd.f32 1.0, %v8126_v10  ;;  %vm4517_vm6 = vmor %vm4515_vm5, %vm4516_vm3 }
 0x4e6   : > { %v4512_v3 = vsub.f32 1.0, %v4511_v55  ;;  %8129 = vpow2.f32 %v7543_v26  ;;  %v4508_v40 = vsel %vm4505_vm4, %v4507_v32, %v4503_v15  ;;  %v4353_v12 = vpop.f32.mrf.mxu2  ;;  %v12501_v55 = vpop.f32.mrf.mxu1  ;;  %vm4530_vm9 = vweird.f32 %v12470_v51 }
 0x4e7   : > { %4780 = vmatmul.bf16.gmra.mxu3 %v4692_v42  ;;  %8131 = vrcp.f32 %v4426_v60  ;;  %v4679_v35 = vmul.f32 %v4508_v40, %v12413_v0  ;;  %v12504_v14 = vadd.f32 %v12353_v13, %v4353_v12  ;;  %v4534_v10 = vand.u32 2147483647, %v12470_v51 }
 0x4e8   : > { %v4513_v31 = vmul.f32 %v8124_v53, %v4512_v3  ;;  %vm4545_vm13 = vweird.f32 %v4426_v60 }
 0x4e9   : > { %v7544_v25 = vmul.f32 -1.442695, %v12504_v14  ;;  %vm4535_vm12 = vcmp.eq.f32.partialorder %v4534_v10, 8.507059e+37 }
 0x4ea   : > { %6491 = vmatmul.f32.gmra.mxu1 %v11892_v29  ;;  %7163 = vmatmul.f32.gmra.mxu0 %v11892_v29  ;;  %v12478_v29 = vpop.f32.mrf.mxu0  ;;  %v4514_v63 = vadd.f32 %v8124_v53, %v4513_v31 }
 0x4eb   : > { %v8128_v2 = vpop.eup %8127  ;;  %8133 = vpow2.f32 %v7544_v25 }
 0x4ec   : > { %v4526_v48 = vmul.f32 %v8128_v2, %v12470_v51  ;;  %v4518_v18 = vsel %vm4517_vm6, %v8124_v53, %v4514_v63  ;;  %v8130_v53 = vpop.eup %8129  ;;  %vm4531_vm8 = vweird.f32 %v8128_v2  ;;  %v4551_v63 = vand.u32 2147483648, %v4426_v60 }
 0x4ed   : > { %v8132_v15 = vpop.eup %8131  ;;  %v12512_v0 = vadd.f32 1.0, %v8130_v53  ;;  %vm12518_vm10 = vmor %vm4530_vm9, %vm4531_vm8 }
 0x4ee   : > { %v4527_v16 = vsub.f32 1.0, %v4526_v48  ;;  %vm4546_vm11 = vweird.f32 %v8132_v15 }
 0x4ef   : > { %8135 = vrcp.f32 %v12512_v0  ;;  %v4356_v26 = vpop.f32.mrf.mxu2  ;;  %vm4547_vm14 = vmor %vm4545_vm13, %vm4546_vm11  ;;  %vm4560_vm1 = vweird.f32 %v12512_v0 }
 0x4f0   : > { %v4528_v46 = vmul.f32 %v8128_v2, %v4527_v16  ;;  %v12523_v43 = vadd.f32 %v12353_v13, %v4356_v26 }
 0x4f1   : > { %v8134_v40 = vpop.eup %8133 }
 0x4f2   : > { %6494 = vmatmul.f32.gmra.mxu1 %v11912_v23  ;;  %7166 = vmatmul.f32.gmra.mxu0 %v11912_v23  ;;  %v4522_v23 = vor.u32 1.1754944e-38, %v4521_v4  ;;  %v12508_v59 = vpop.f32.mrf.mxu0  ;;  %v4529_v4 = vadd.f32 %v8128_v2, %v4528_v46 }
 0x4f4   : > { %v4523_v42 = vsel %vm4520_vm7, %v4522_v23, %v4518_v18  ;;  %v4533_v48 = vsel %vm12518_vm10, %v8128_v2, %v4529_v4  ;;  %v7545_v23 = vmul.f32 -1.442695, %v12523_v43  ;;  %v4549_v18 = vand.u32 2147483647, %v4426_v60 }
 0x4f5   : > { %v4680_v21 = vmul.f32 %v4523_v42, %v12423_v47  ;;  %v4541_v47 = vmul.f32 %v8132_v15, %v4426_v60  ;;  %v4428_v42 = vadd.f32 1.0, %v8134_v40  ;;  %v4552_v2 = vor.u32 1.1754944e-38, %v4551_v63 }
 0x4f6   : > { %8137 = vpow2.f32 %v7545_v23  ;;  %vm4550_vm15 = vcmp.eq.f32.partialorder %v4549_v18, 8.507059e+37  ;;  %v4564_v63 = vand.u32 2147483647, %v12512_v0 }
 0x4f7   : > { %v4693_v3 = vpack.c.bf16 %v4680_v21, %v4679_v35  ;;  %v4542_v32 = vsub.f32 1.0, %v4541_v47  ;;  %8139 = vrcp.f32 %v4428_v42  ;;  %vm4575_vm5 = vweird.f32 %v4428_v42 }
 0x4f8   : > { %vm4565_vm4 = vcmp.eq.f32.partialorder %v4564_v63, 8.507059e+37 }
 0x4f9   : > { %4785 = vmatmul.bf16.gmra.mxu3 %v4693_v3  ;;  %v4543_v16 = vmul.f32 %v8132_v15, %v4542_v32  ;;  %v4358_v3 = vpop.f32.mrf.mxu2 }
 0x4fa   : > { %6497 = vmatmul.f32.gmra.mxu1 %v11944_v52  ;;  %7169 = vmatmul.f32.gmra.mxu0 %v11944_v52  ;;  %v4536_v52 = vand.u32 2147483648, %v12470_v51  ;;  %v8136_v51 = vpop.eup %8135  ;;  %v12531_v10 = vadd.f32 %v12353_v13, %v4358_v3 }
 0x4fb   : > { %v4556_v35 = vmul.f32 %v8136_v51, %v12512_v0  ;;  %v4544_v21 = vadd.f32 %v8132_v15, %v4543_v16  ;;  %vm4561_vm0 = vweird.f32 %v8136_v51 }
 0x4fc   : > { %v4537_v12 = vor.u32 1.1754944e-38, %v4536_v52  ;;  %v8138_v31 = vpop.eup %8137  ;;  %v7546_v60 = vmul.f32 -1.442695, %v12531_v10  ;;  %vm12541_vm2 = vmor %vm4560_vm1, %vm4561_vm0 }
 0x4fd   : > { %v4557_v53 = vsub.f32 1.0, %v4556_v35  ;;  %v4548_v25 = vsel %vm4547_vm14, %v8132_v15, %v4544_v21  ;;  %v12535_v40 = vadd.f32 1.0, %v8138_v31  ;;  %v4581_v21 = vand.u32 2147483648, %v4428_v42 }
 0x4fe   : > { %v4538_v46 = vsel %vm4535_vm12, %v4537_v12, %v4533_v48  ;;  %v4553_v4 = vsel %vm4550_vm15, %v4552_v2, %v4548_v25  ;;  %v8140_v48 = vpop.eup %8139  ;;  %8141 = vpow2.f32 %v7546_v60  ;;  %v4579_v25 = vand.u32 2147483647, %v4428_v42 }
 0x4ff   : > { %v4681_v47 = vmul.f32 %v4538_v46, %v12443_v24  ;;  %v4682_v52 = vmul.f32 %v4553_v4, %v12463_v37  ;;  %v4558_v26 = vmul.f32 %v8136_v51, %v4557_v53  ;;  %8143 = vrcp.f32 %v12535_v40 }
 0x500   : > { %v4571_v24 = vmul.f32 %v8140_v48, %v4428_v42  ;;  %v4566_v37 = vand.u32 2147483648, %v12512_v0  ;;  %vm4576_vm3 = vweird.f32 %v8140_v48  ;;  %vm4580_vm7 = vcmp.eq.f32.partialorder %v4579_v25, 8.507059e+37 }
 0x501   : > { %v4694_v32 = vpack.c.bf16 %v4682_v52, %v4681_v47  ;;  %v4559_v15 = vadd.f32 %v8136_v51, %v4558_v26  ;;  %v4361_v23 = vpop.f32.mrf.mxu2  ;;  %vm4577_vm6 = vmor %vm4575_vm5, %vm4576_vm3  ;;  %vm4590_vm9 = vweird.f32 %v12535_v40 }
 0x502   : > { %v12546_v18 = vadd.f32 %v12353_v13, %v4361_v23  ;;  %v4572_v12 = vsub.f32 1.0, %v4571_v24  ;;  %v4567_v3 = vor.u32 1.1754944e-38, %v4566_v37 }
 0x503   : > { %v4563_v35 = vsel %vm12541_vm2, %v8136_v51, %v4559_v15  ;;  %v4582_v51 = vor.u32 1.1754944e-38, %v4581_v21  ;;  %v4594_v21 = vand.u32 2147483647, %v12535_v40 }
 0x504   : > { %v8142_v46 = vpop.eup %8141  ;;  %v7547_v2 = vmul.f32 -1.442695, %v12546_v18  ;;  %v4573_v53 = vmul.f32 %v8140_v48, %v4572_v12  ;;  %v4568_v26 = vsel %vm4565_vm4, %v4567_v3, %v4563_v35 }
 0x505   : > { %v8144_v0 = vpop.eup %8143  ;;  %v4430_v4 = vadd.f32 1.0, %v8142_v46  ;;  %v4683_v24 = vmul.f32 %v4568_v26, %v12488_v49  ;;  %vm4595_vm12 = vcmp.eq.f32.partialorder %v4594_v21, 8.507059e+37 }
 0x506   : > { %v4586_v47 = vmul.f32 %v8144_v0, %v12535_v40  ;;  %8145 = vpow2.f32 %v7547_v2  ;;  %v4574_v52 = vadd.f32 %v8140_v48, %v4573_v53  ;;  %vm4591_vm8 = vweird.f32 %v8144_v0 }
 0x507   : > { %8147 = vrcp.f32 %v4430_v4  ;;  %vm12564_vm10 = vmor %vm4590_vm9, %vm4591_vm8  ;;  %vm4605_vm13 = vweird.f32 %v4430_v4 }
 0x508   : > { %v4587_v31 = vsub.f32 1.0, %v4586_v47  ;;  %v4578_v60 = vsel %vm4577_vm6, %v8140_v48, %v4574_v52  ;;  %v4611_v52 = vand.u32 2147483648, %v4430_v4 }
 0x509   : > { %4790 = vmatmul.bf16.gmra.mxu3 %v4694_v32  ;;  %v4363_v32 = vpop.f32.mrf.mxu2  ;;  %v4583_v15 = vsel %vm4580_vm7, %v4582_v51, %v4578_v60  ;;  %v4609_v60 = vand.u32 2147483647, %v4430_v4 }
 0x50a   : > { %v12554_v63 = vadd.f32 %v12353_v13, %v4363_v32  ;;  %v4684_v37 = vmul.f32 %v4583_v15, %v12504_v14  ;;  %v4588_v23 = vmul.f32 %v8144_v0, %v4587_v31  ;;  %v4596_v14 = vand.u32 2147483648, %v12535_v40 }
 0x50b   : > { %vm4610_vm15 = vcmp.eq.f32.partialorder %v4609_v60, 8.507059e+37 }
 0x50c   : > { %v8146_v16 = vpop.eup %8145  ;;  %v7548_v42 = vmul.f32 -1.442695, %v12554_v63  ;;  %v4695_v12 = vpack.c.bf16 %v4684_v37, %v4683_v24  ;;  %v4589_v48 = vadd.f32 %v8144_v0, %v4588_v23  ;;  %v4597_v32 = vor.u32 1.1754944e-38, %v4596_v14 }
 0x50d   : > { %v8148_v35 = vpop.eup %8147  ;;  %v12558_v46 = vadd.f32 1.0, %v8146_v16 }
 0x50e   : > { %8149 = vpow2.f32 %v7548_v42  ;;  %v4601_v49 = vmul.f32 %v8148_v35, %v4430_v4  ;;  %v4593_v47 = vsel %vm12564_vm10, %v8144_v0, %v4589_v48  ;;  %vm4606_vm11 = vweird.f32 %v8148_v35 }
 0x50f   : > { %8151 = vrcp.f32 %v12558_v46  ;;  %v4598_v23 = vsel %vm4595_vm12, %v4597_v32, %v4593_v47  ;;  %vm4607_vm14 = vmor %vm4605_vm13, %vm4606_vm11  ;;  %v4612_v0 = vor.u32 1.1754944e-38, %v4611_v52  ;;  %vm4620_vm1 = vweird.f32 %v12558_v46 }
 0x510   : > { %v4602_v3 = vsub.f32 1.0, %v4601_v49  ;;  %v4685_v49 = vmul.f32 %v4598_v23, %v12523_v43 }
 0x512   : > { %v4603_v31 = vmul.f32 %v8148_v35, %v4602_v3 }
 0x514   : > { %v8150_v26 = vpop.eup %8149  ;;  %v4604_v37 = vadd.f32 %v8148_v35, %v4603_v31 }
 0x515   : > { %v8152_v40 = vpop.eup %8151  ;;  %v4432_v15 = vadd.f32 1.0, %v8150_v26 }
 0x516   : > { %v4366_v2 = vpop.f32.mrf.mxu2  ;;  %v4616_v24 = vmul.f32 %v8152_v40, %v12558_v46  ;;  %v4608_v42 = vsel %vm4607_vm14, %v8148_v35, %v4604_v37  ;;  %vm4621_vm0 = vweird.f32 %v8152_v40 }
 0x517   : > { %v12569_v25 = vadd.f32 %v12353_v13, %v4366_v2  ;;  %v4613_v48 = vsel %vm4610_vm15, %v4612_v0, %v4608_v42  ;;  %vm4622_vm2 = vmor %vm4620_vm1, %vm4621_vm0  ;;  %v4639_v32 = vand.u32 2147483647, %v4432_v15  ;;  %vm4635_vm5 = vweird.f32 %v4432_v15 }
 0x518   : > { %v4617_v16 = vsub.f32 1.0, %v4616_v24  ;;  %v4686_v14 = vmul.f32 %v4613_v48, %v12531_v10  ;;  %v4641_v10 = vand.u32 2147483648, %v4432_v15 }
 0x519   : > { %4795 = vmatmul.bf16.gmra.mxu3 %v4695_v12  ;;  %v7549_v51 = vmul.f32 -1.442695, %v12569_v25  ;;  %vm4640_vm7 = vcmp.eq.f32.partialorder %v4639_v32, 8.507059e+37 }
 0x51a   : > { %v4618_v2 = vmul.f32 %v8152_v40, %v4617_v16  ;;  %v4696_v3 = vpack.c.bf16 %v4686_v14, %v4685_v49 }
 0x51b   : > { %8153 = vpow2.f32 %v7549_v51  ;;  %v4626_v51 = vand.u32 2147483648, %v12558_v46 }
 0x51c   : > { %8155 = vrcp.f32 %v4432_v15  ;;  %v4619_v52 = vadd.f32 %v8152_v40, %v4618_v2 }
 0x51d   : > { %v4627_v24 = vor.u32 1.1754944e-38, %v4626_v51 }
 0x51e   : > { %v4368_v12 = vpop.f32.mrf.mxu2  ;;  %v4623_v31 = vsel %vm4622_vm2, %v8152_v40, %v4619_v52 }
 0x51f   : > { %v12577_v21 = vadd.f32 %v12353_v13, %v4368_v12  ;;  %v4624_v13 = vand.u32 2147483647, %v12558_v46  ;;  %v4642_v12 = vor.u32 1.1754944e-38, %v4641_v10 }
 0x521   : > { %v8154_v53 = vpop.eup %8153  ;;  %v7550_v4 = vmul.f32 -1.442695, %v12577_v21  ;;  %vm4625_vm4 = vcmp.eq.f32.partialorder %v4624_v13, 8.507059e+37 }
 0x522   : > { %v8156_v47 = vpop.eup %8155  ;;  %v4433_v26 = vadd.f32 1.0, %v8154_v53  ;;  %v4628_v16 = vsel %vm4625_vm4, %v4627_v24, %v4623_v31 }
 0x523   : > { %8157 = vpow2.f32 %v7550_v4  ;;  %v4631_v35 = vmul.f32 %v8156_v47, %v4432_v15  ;;  %vm4636_vm3 = vweird.f32 %v8156_v47  ;;  %v4687_v40 = vmul.f32 %v4628_v16, %v12546_v18 }
 0x524   : > { %8159 = vrcp.f32 %v4433_v26  ;;  %vm4637_vm6 = vmor %vm4635_vm5, %vm4636_vm3  ;;  %vm4650_vm9 = vweird.f32 %v4433_v26  ;;  %v4654_v51 = vand.u32 2147483647, %v4433_v26 }
 0x525   : > { %v4632_v43 = vsub.f32 1.0, %v4631_v35  ;;  %v4656_v35 = vand.u32 2147483648, %v4433_v26 }
 0x526   : > { %vm4655_vm12 = vcmp.eq.f32.partialorder %v4654_v51, 8.507059e+37 }
 0x527   : > { %v4633_v60 = vmul.f32 %v8156_v47, %v4632_v43  ;;  %v4657_v31 = vor.u32 1.1754944e-38, %v4656_v35  ;;  %v4856_v35 = vadd.f32 1.0, %v12018_v54 }
 0x529   : > { %4800 = vmatmul.bf16.gmra.mxu3 %v4696_v3  ;;  %v8158_v37 = vpop.eup %8157  ;;  %v4634_v23 = vadd.f32 %v8156_v47, %v4633_v60 }
 0x52a   : > { %v8160_v0 = vpop.eup %8159  ;;  %v4434_v42 = vadd.f32 1.0, %v8158_v37 }
 0x52b   : > { %v4646_v48 = vmul.f32 %v8160_v0, %v4433_v26  ;;  %v4638_v49 = vsel %vm4637_vm6, %v8156_v47, %v4634_v23  ;;  %vm4651_vm8 = vweird.f32 %v8160_v0 }
 0x52c   : > { %8161 = vrcp.f32 %v4434_v42  ;;  %v4643_v46 = vsel %vm4640_vm7, %v4642_v12, %v4638_v49  ;;  %vm4652_vm10 = vmor %vm4650_vm9, %vm4651_vm8  ;;  %v4671_v47 = vand.u32 2147483648, %v4434_v42  ;;  %v4669_v18 = vand.u32 2147483647, %v4434_v42 }
 0x52d   : > { %v4647_v2 = vsub.f32 1.0, %v4646_v48  ;;  %v4688_v14 = vmul.f32 %v4643_v46, %v12554_v63  ;;  %vm4665_vm13 = vweird.f32 %v4434_v42  ;;  %v4850_v12 = vadd.f32 1.0, %v11982_v27  ;;  %v8371_v46 = vld [vmem:[%s11455_s25] sm:$0xff] }
 0x52e   : > { %v4672_v32 = vor.u32 1.1754944e-38, %v4671_v47  ;;  %vm4670_vm15 = vcmp.eq.f32.partialorder %v4669_v18, 8.507059e+37 }
 0x52f   : > { %v4648_v53 = vmul.f32 %v8160_v0, %v4647_v2  ;;  %v4697_v4 = vpack.c.bf16 %v4688_v14, %v4687_v40  ;;  %v4853_v2 = vadd.f32 1.0, %v11999_v8 }
 0x531   : > { %v4649_v52 = vadd.f32 %v8160_v0, %v4648_v53  ;;  %v7776_v53 = vld [vmem:[#allocation14 + $0x78] sm:$0xff] }
 0x532   : > { %v8162_v3 = vpop.eup %8161  ;;  %5457 = vmatpush.bf16.msra.mxu2 %v7776_v53 }
 0x533   : > { %v4661_v15 = vmul.f32 %v8162_v3, %v4434_v42  ;;  %v4653_v43 = vsel %vm4652_vm10, %v8160_v0, %v4649_v52  ;;  %vm4666_vm11 = vweird.f32 %v8162_v3  ;;  %v12591_v0 = vld [vmem:[%s13852_s7] ss:$0 sm:$0xff] }
 0x534   : > { %v4658_v60 = vsel %vm4655_vm12, %v4657_v31, %v4653_v43  ;;  %vm4667_vm14 = vmor %vm4665_vm13, %vm4666_vm11  ;;  %v7775_v43 = vld [vmem:[#allocation14 + $0x70] sm:$0xff]  ;;  %v4859_v31 = vadd.f32 1.0, %v12044_v7 }
 0x535   : > { %v4662_v13 = vsub.f32 1.0, %v4661_v15  ;;  %v4689_v26 = vmul.f32 %v4658_v60, %v12569_v25  ;;  %v8374_v60 = vld [vmem:[%s11455_s25 + $0x18] sm:$0xff] }
 0x536   : > { %5458 = vmatpush.bf16.msra.mxu2 %v7775_v43 }
 0x537   : > { %v4663_v10 = vmul.f32 %v8162_v3, %v4662_v13  ;;  %v8373_v13 = vld [vmem:[%s11455_s25 + $0x10] sm:$0xff] }
 0x539   : > { %4805 = vmatmul.bf16.gmra.mxu3 %v4697_v4  ;;  %v4664_v63 = vadd.f32 %v8162_v3, %v4663_v10  ;;  %v8372_v4 = vld [vmem:[%s11455_s25 + $0x8] sm:$0xff] }
 0x53b   : > { %v4668_v24 = vsel %vm4667_vm14, %v8162_v3, %v4664_v63 }
 0x53c   : > { %v4673_v37 = vsel %vm4670_vm15, %v4672_v32, %v4668_v24 }
 0x53d   : > { %v4690_v23 = vmul.f32 %v4673_v37, %v12577_v21 }
 0x53f   : > { %v4698_v16 = vpack.c.bf16 %v4690_v23, %v4689_v26  ;;  %v4862_v26 = vadd.f32 1.0, %v12063_v28 }
 0x549   : > { %4810 = vmatmul.bf16.gmra.mxu3 %v4698_v16  ;;  %v8375_v16 = vld [vmem:[%s11455_s25 + $0x20] sm:$0xff] }
 0x551   : > { %v4776_v42 = vpop.f32.mrf.mxu3 }
 0x552   : > { %v4777_v48 = vadd.f32 %v12591_v0, %v4776_v42 }
 0x554   : > { %v4897_v49 = vmul.f32 %v4850_v12, %v4777_v48  ;;  %v7774_v12 = vld [vmem:[#allocation14 + $0x68] sm:$0xff] }
 0x555   : > { %5459 = vmatpush.bf16.msra.mxu2 %v7774_v12 }
 0x556   : > { %v12596_v40 = vadd.f32 %v8371_v46, %v4897_v49  ;;  %v4865_v46 = vadd.f32 1.0, %v12109_v22 }
 0x558   : > { %4929 = vadd.xlane.f32.xlu2 %v12596_v40  ;;  %v4961_v25 = vmul.f32 %v12596_v40, %v12596_v40 }
 0x559   : > { %v4778_v21 = vpop.f32.mrf.mxu3 }
 0x55a   : > { %v4779_v14 = vadd.f32 %v12591_v0, %v4778_v21  ;;  %4977 = vadd.xlane.f32.xlu1 %v4961_v25  ;;  %v8376_v21 = vld [vmem:[%s11455_s25 + $0x28] sm:$0xff] }
 0x55c   : > { %v4898_v27 = vmul.f32 %v4853_v2, %v4779_v14 }
 0x55e   : > { %v12604_v3 = vadd.f32 %v8372_v4, %v4898_v27  ;;  %v4868_v27 = vadd.f32 1.0, %v12144_v61 }
 0x560   : > { %4931 = vadd.xlane.f32.xlu0 %v12604_v3  ;;  %v4962_v52 = vmul.f32 %v12604_v3, %v12604_v3 }
 0x562   : > { %4979 = vadd.xlane.f32.xlu2 %v4962_v52  ;;  %v8377_v52 = vld [vmem:[%s11455_s25 + $0x30] sm:$0xff] }
 0x56a   : > { %v4781_v15 = vpop.f32.mrf.mxu3 }
 0x56b   : > { %v4782_v8 = vadd.f32 %v12591_v0, %v4781_v15 }
 0x56d   : > { %v4899_v51 = vmul.f32 %v4856_v35, %v4782_v8  ;;  %v7773_v35 = vld [vmem:[#allocation14 + $0x60] sm:$0xff] }
 0x56e   : > { %5460 = vmatpush.bf16.msra.mxu2 %v7773_v35 }
 0x56f   : > { %v12612_v47 = vadd.f32 %v8373_v13, %v4899_v51  ;;  %v4871_v13 = vadd.f32 1.0, %v12178_v34 }
 0x571   : > { %4933 = vadd.xlane.f32.xlu0 %v12612_v47  ;;  %v4963_v10 = vmul.f32 %v12612_v47, %v12612_v47 }
 0x572   : > { %v4783_v18 = vpop.f32.mrf.mxu3 }
 0x573   : > { %v4784_v63 = vadd.f32 %v12591_v0, %v4783_v18  ;;  %4981 = vadd.xlane.f32.xlu2 %v4963_v10  ;;  %v8378_v10 = vld [vmem:[%s11455_s25 + $0x38] sm:$0xff] }
 0x575   : > { %v4900_v54 = vmul.f32 %v4859_v31, %v4784_v63 }
 0x577   : > { %v12620_v32 = vadd.f32 %v8374_v60, %v4900_v54  ;;  %v4874_v54 = vadd.f32 1.0, %v12227_v36 }
 0x579   : > { %4935 = vadd.xlane.f32.xlu1 %v12620_v32  ;;  %v4964_v24 = vmul.f32 %v12620_v32, %v12620_v32 }
 0x57b   : > { %4983 = vadd.xlane.f32.xlu0 %v4964_v24  ;;  %v8379_v24 = vld [vmem:[%s11455_s25 + $0x40] sm:$0xff] }
 0x57c   : > { %v4786_v37 = vpop.f32.mrf.mxu3 }
 0x57d   : > { %v4787_v23 = vadd.f32 %v12591_v0, %v4786_v37 }
 0x57f   : > { %v4901_v7 = vmul.f32 %v4862_v26, %v4787_v23  ;;  %v7772_v26 = vld [vmem:[#allocation14 + $0x58] sm:$0xff] }
 0x580   : > { %5461 = vmatpush.bf16.msra.mxu2 %v7772_v26  ;;  %v8384_v26 = vld [vmem:[%s11455_s25 + $0x68] sm:$0xff] }
 0x581   : > { %v12628_v42 = vadd.f32 %v8375_v16, %v4901_v7  ;;  %v4877_v16 = vadd.f32 1.0, %v12255_v5 }
 0x583   : > { %4937 = vadd.xlane.f32.xlu1 %v12628_v42  ;;  %v4965_v48 = vmul.f32 %v12628_v42, %v12628_v42 }
 0x584   : > { %v4788_v49 = vpop.f32.mrf.mxu3 }
 0x585   : > { %v4789_v28 = vadd.f32 %v12591_v0, %v4788_v49  ;;  %4985 = vadd.xlane.f32.xlu0 %v4965_v48  ;;  %v8380_v48 = vld [vmem:[%s11455_s25 + $0x48] sm:$0xff] }
 0x587   : > { %v4902_v25 = vmul.f32 %v4865_v46, %v4789_v28 }
 0x589   : > { %v12636_v2 = vadd.f32 %v8376_v21, %v4902_v25  ;;  %v4880_v25 = vadd.f32 1.0, %v12284_v45 }
 0x58b   : > { %4939 = vadd.xlane.f32.xlu2 %v12636_v2  ;;  %v4966_v14 = vmul.f32 %v12636_v2, %v12636_v2 }
 0x58c   : > { %v4791_v53 = vpop.f32.mrf.mxu3 }
 0x58d   : > { %v4792_v4 = vadd.f32 %v12591_v0, %v4791_v53  ;;  %4987 = vadd.xlane.f32.xlu1 %v4966_v14  ;;  %v8381_v14 = vld [vmem:[%s11455_s25 + $0x50] sm:$0xff] }
 0x58f   : > { %v4903_v22 = vmul.f32 %v4868_v27, %v4792_v4  ;;  %v7771_v27 = vld [vmem:[#allocation14 + $0x50] sm:$0xff] }
 0x590   : > { %5462 = vmatpush.bf16.msra.mxu2 %v7771_v27 }
 0x591   : > { %v12644_v15 = vadd.f32 %v8377_v52, %v4903_v22  ;;  %v4883_v52 = vadd.f32 1.0, %v12323_v17 }
 0x593   : > { %4941 = vadd.xlane.f32.xlu2 %v12644_v15  ;;  %v4967_v8 = vmul.f32 %v12644_v15, %v12644_v15 }
 0x594   : > { %v4793_v51 = vpop.f32.mrf.mxu3 }
 0x595   : > { %v4794_v61 = vadd.f32 %v12591_v0, %v4793_v51  ;;  %4989 = vadd.xlane.f32.xlu1 %v4967_v8  ;;  %v8382_v8 = vld [vmem:[%s11455_s25 + $0x58] sm:$0xff] }
 0x597   : > { %v4904_v43 = vmul.f32 %v4871_v13, %v4794_v61 }
 0x599   : > { %v12652_v18 = vadd.f32 %v8378_v10, %v4904_v43  ;;  %v4886_v43 = vadd.f32 1.0, %v12334_v9 }
 0x59b   : > { %4943 = vadd.xlane.f32.xlu0 %v12652_v18  ;;  %v4968_v31 = vmul.f32 %v12652_v18, %v12652_v18 }
 0x59c   : > { %v4796_v63 = vpop.f32.mrf.mxu3 }
 0x59d   : > { %v4797_v60 = vadd.f32 %v12591_v0, %v4796_v63  ;;  %4991 = vadd.xlane.f32.xlu2 %v4968_v31  ;;  %v8383_v31 = vld [vmem:[%s11455_s25 + $0x60] sm:$0xff] }
 0x59f   : > { %v4905_v34 = vmul.f32 %v4874_v54, %v4797_v60 }
 0x5a1   : > { %v12660_v37 = vadd.f32 %v8379_v24, %v4905_v34  ;;  %v4889_v34 = vadd.f32 1.0, %v12346_v33 }
 0x5a3   : > { %4945 = vadd.xlane.f32.xlu0 %v12660_v37  ;;  %v4969_v23 = vmul.f32 %v12660_v37, %v12660_v37 }
 0x5a4   : > { %v4798_v7 = vpop.f32.mrf.mxu3 }
 0x5a5   : > { %v4799_v36 = vadd.f32 %v12591_v0, %v4798_v7  ;;  %4993 = vadd.xlane.f32.xlu2 %v4969_v23 }
 0x5a7   : > { %v4906_v12 = vmul.f32 %v4877_v16, %v4799_v36  ;;  %v7770_v16 = vld [vmem:[#allocation14 + $0x48] sm:$0xff] }
 0x5a8   : > { %5463 = vmatpush.bf16.msra.mxu2 %v7770_v16 }
 0x5a9   : > { %v12668_v49 = vadd.f32 %v8380_v48, %v4906_v12  ;;  %v4892_v12 = vadd.f32 1.0, %v12358_v30 }
 0x5ab   : > { %4947 = vadd.xlane.f32.xlu1 %v12668_v49  ;;  %v4970_v46 = vmul.f32 %v12668_v49, %v12668_v49 }
 0x5ac   : > { %v4801_v28 = vpop.f32.mrf.mxu3 }
 0x5ad   : > { %v4802_v21 = vadd.f32 %v12591_v0, %v4801_v28  ;;  %4995 = vadd.xlane.f32.xlu0 %v4970_v46  ;;  %v8385_v46 = vld [vmem:[%s11455_s25 + $0x70] sm:$0xff] }
 0x5af   : > { %v4907_v5 = vmul.f32 %v4880_v25, %v4802_v21 }
 0x5b1   : > { %v12676_v53 = vadd.f32 %v8381_v14, %v4907_v5 }
 0x5b3   : > { %4949 = vadd.xlane.f32.xlu1 %v12676_v53  ;;  %v4971_v4 = vmul.f32 %v12676_v53, %v12676_v53 }
 0x5b4   : > { %v4803_v22 = vpop.f32.mrf.mxu3 }
 0x5b5   : > { %v4804_v45 = vadd.f32 %v12591_v0, %v4803_v22  ;;  %4997 = vadd.xlane.f32.xlu0 %v4971_v4  ;;  %v4895_v22 = vadd.f32 1.0, %v12369_v6 }
 0x5b7   : > { %v4908_v35 = vmul.f32 %v4883_v52, %v4804_v45 }
 0x5b9   : > { %v12684_v51 = vadd.f32 %v8382_v8, %v4908_v35 }
 0x5bb   : > { %4951 = vadd.xlane.f32.xlu2 %v12684_v51  ;;  %v4972_v13 = vmul.f32 %v12684_v51, %v12684_v51 }
 0x5bc   : > { %v4806_v61 = vpop.f32.mrf.mxu3 }
 0x5bd   : > { %v4807_v10 = vadd.f32 %v12591_v0, %v4806_v61  ;;  %4999 = vadd.xlane.f32.xlu1 %v4972_v13  ;;  %v8386_v13 = vld [vmem:[%s11455_s25 + $0x78] sm:$0xff] }
 0x5bf   : > { %v4909_v17 = vmul.f32 %v4886_v43, %v4807_v10 }
 0x5c1   : > { %v12692_v63 = vadd.f32 %v8383_v31, %v4909_v17 }
 0x5c3   : > { %4953 = vadd.xlane.f32.xlu2 %v12692_v63  ;;  %v4973_v54 = vmul.f32 %v12692_v63, %v12692_v63 }
 0x5c4   : > { %v4808_v60 = vpop.f32.mrf.mxu3 }
 0x5c5   : > { %v4809_v24 = vadd.f32 %v12591_v0, %v4808_v60  ;;  %5001 = vadd.xlane.f32.xlu1 %v4973_v54 }
 0x5c7   : > { %v4910_v9 = vmul.f32 %v4889_v34, %v4809_v24 }
 0x5c9   : > { %v12700_v23 = vadd.f32 %v8384_v26, %v4910_v9 }
 0x5cb   : > { %4955 = vadd.xlane.f32.xlu0 %v12700_v23  ;;  %v4974_v7 = vmul.f32 %v12700_v23, %v12700_v23  ;;  %v4930_v25 = vpop.xlane.xlu2 %4929 }
 0x5cc   : > { %v4811_v36 = vpop.f32.mrf.mxu3  ;;  %v12710_v21 = vmul.f32 0.0625, %v4930_v25 }
 0x5cd   : > { %v4812_v48 = vadd.f32 %v12591_v0, %v4811_v36  ;;  %5003 = vadd.xlane.f32.xlu2 %v4974_v7  ;;  %v4978_v14 = vpop.xlane.xlu1 %4977 }
 0x5ce   : > { %v5041_v30 = vmul.f32 %v12710_v21, %v12710_v21  ;;  %v5025_v4 = vmul.f32 0.0625, %v4978_v14 }
 0x5cf   : > { %v4911_v33 = vmul.f32 %v4892_v12, %v4812_v48 }
 0x5d0   : > { %v5057_v45 = vsub.f32 %v5025_v4, %v5041_v30 }
 0x5d1   : > { %v12708_v28 = vadd.f32 %v8385_v46, %v4911_v33 }
 0x5d2   : > { %v5089_v8 = vadd.f32 1e-05, %v5057_v45 }
 0x5d3   : > { %4957 = vadd.xlane.f32.xlu0 %v12708_v28  ;;  %v4975_v5 = vmul.f32 %v12708_v28, %v12708_v28  ;;  %v4932_v43 = vpop.xlane.xlu0 %4931 }
 0x5d4   : > { %v4813_v27 = vpop.f32.mrf.mxu3  ;;  %8163 = vrsqrt.f32 %v5089_v8  ;;  %v5010_v10 = vmul.f32 0.0625, %v4932_v43  ;;  %vm5111_vm1 = vweird.f32 %v5089_v8 }
 0x5d5   : > { %v4814_v52 = vadd.f32 %v12591_v0, %v4813_v27  ;;  %5005 = vadd.xlane.f32.xlu2 %v4975_v5  ;;  %v4980_v31 = vpop.xlane.xlu2 %4979  ;;  %v7769_v0 = vld [vmem:[#allocation14 + $0x40] sm:$0xff] }
 0x5d6   : > { %v5042_v54 = vmul.f32 %v5010_v10, %v5010_v10  ;;  %v5026_v6 = vmul.f32 0.0625, %v4980_v31  ;;  %5464 = vmatpush.bf16.msra.mxu2 %v7769_v0  ;;  %v5074_v0 = vsub.f32 %v12604_v3, %v5010_v10 }
 0x5d7   : > { %v4912_v35 = vmul.f32 %v4895_v22, %v4814_v52 }
 0x5d8   : > { %v5058_v60 = vsub.f32 %v5026_v6, %v5042_v54 }
 0x5d9   : > { %v12720_v61 = vadd.f32 %v8386_v13, %v4912_v35 }
 0x5da   : > { %v8164_v34 = vpop.eup %8163  ;;  %v5090_v24 = vadd.f32 1e-05, %v5058_v60 }
 0x5db   : > { %4959 = vadd.xlane.f32.xlu1 %v12720_v61  ;;  %v4976_v17 = vmul.f32 %v12720_v61, %v12720_v61  ;;  %v5106_v9 = vmul.f32 %v8164_v34, %v5089_v8  ;;  %vm5112_vm0 = vweird.f32 %v8164_v34 }
 0x5dc   : > { %8165 = vrsqrt.f32 %v5090_v24  ;;  %vm12729_vm2 = vmor %vm5111_vm1, %vm5112_vm0  ;;  %vm5121_vm4 = vweird.f32 %v5090_v24 }
 0x5dd   : > { %5007 = vadd.xlane.f32.xlu0 %v4976_v17  ;;  %v5107_v26 = vmul.f32 %v8164_v34, %v5106_v9  ;;  %v5073_v17 = vsub.f32 %v12596_v40, %v12710_v21 }
 0x5df   : > { %v5108_v7 = vmul.f32 0.5, %v5107_v26  ;;  %v5316_v26 = vadd.f32 1.0, %v12373_v57 }
 0x5e1   : > { %v5109_v36 = vsub.f32 1.5, %v5108_v7  ;;  %v5319_v7 = vadd.f32 1.0, %v12379_v56 }
 0x5e2   : > { %v8166_v48 = vpop.eup %8165 }
 0x5e3   : > { %v5116_v46 = vmul.f32 %v8166_v48, %v5090_v24  ;;  %v5110_v14 = vmul.f32 %v8164_v34, %v5109_v36  ;;  %vm5122_vm3 = vweird.f32 %v8166_v48 }
 0x5e4   : > { %v4934_v16 = vpop.xlane.xlu0 %4933  ;;  %vm5123_vm5 = vmor %vm5121_vm4, %vm5122_vm3 }
 0x5e5   : > { %v12725_v12 = vmul.f32 0.0625, %v4934_v16  ;;  %v5117_v27 = vmul.f32 %v8166_v48, %v5116_v46  ;;  %v5114_v35 = vsel %vm12729_vm2, %v8164_v34, %v5110_v14 }
 0x5e6   : > { %v4982_v33 = vpop.xlane.xlu2 %4981  ;;  %v5265_v60 = vmul.f32 %v5114_v35, %v5073_v17 }
 0x5e7   : > { %v5043_v25 = vmul.f32 %v12725_v12, %v12725_v12  ;;  %v5027_v5 = vmul.f32 0.0625, %v4982_v33  ;;  %v5118_v4 = vmul.f32 0.5, %v5117_v27 }
 0x5e8   : > { %v5363_v46 = vmul.f32 %v5316_v26, %v5265_v60 }
 0x5e9   : > { %v5059_v30 = vsub.f32 %v5027_v5, %v5043_v25  ;;  %v5119_v13 = vsub.f32 1.5, %v5118_v4 }
 0x5eb   : > { %v5091_v52 = vadd.f32 1e-05, %v5059_v30  ;;  %v5120_v8 = vmul.f32 %v8166_v48, %v5119_v13 }
 0x5ec   : > { %v4936_v45 = vpop.xlane.xlu1 %4935 }
 0x5ed   : > { %v12735_v43 = vmul.f32 0.0625, %v4936_v45  ;;  %8167 = vrsqrt.f32 %v5091_v52  ;;  %v5124_v34 = vsel %vm5123_vm5, %v8166_v48, %v5120_v8  ;;  %vm5131_vm7 = vweird.f32 %v5091_v52 }
 0x5ee   : > { %v4984_v31 = vpop.xlane.xlu0 %4983  ;;  %v5266_v16 = vmul.f32 %v5124_v34, %v5074_v0 }
 0x5ef   : > { %v5044_v54 = vmul.f32 %v12735_v43, %v12735_v43  ;;  %v5028_v6 = vmul.f32 0.0625, %v4984_v31 }
 0x5f0   : > { %v5364_v24 = vmul.f32 %v5319_v7, %v5266_v16  ;;  %v5075_v7 = vsub.f32 %v12612_v47, %v12725_v12  ;;  %v5325_v12 = vadd.f32 1.0, %v12410_v41 }
 0x5f1   : > { %v5060_v9 = vsub.f32 %v5028_v6, %v5044_v54 }
 0x5f2   : > { %v5379_v10 = vpack.c.bf16 %v5364_v24, %v5363_v46 }
 0x5f3   : > { %v5092_v21 = vadd.f32 1e-05, %v5060_v9  ;;  %v8168_v36 = vpop.eup %8167 }
 0x5f4   : > { %v5126_v25 = vmul.f32 %v8168_v36, %v5091_v52  ;;  %5465 = vmatmul.bf16.vlgmr.msra.gmra.mxu2 %v5379_v10  ;;  %vm5132_vm6 = vweird.f32 %v8168_v36  ;;  %v5322_v10 = vadd.f32 1.0, %v12389_v20 }
 0x5f5   : > { %8169 = vrsqrt.f32 %v5092_v21  ;;  %vm5133_vm8 = vmor %vm5131_vm7, %vm5132_vm6  ;;  %vm5141_vm10 = vweird.f32 %v5092_v21 }
 0x5f6   : > { %v4938_v33 = vpop.xlane.xlu1 %4937  ;;  %v5127_v27 = vmul.f32 %v8168_v36, %v5126_v25  ;;  %v5076_v25 = vsub.f32 %v12620_v32, %v12735_v43 }
 0x5f7   : > { %v12744_v5 = vmul.f32 0.0625, %v4938_v33 }
 0x5f8   : > { %v4986_v14 = vpop.xlane.xlu0 %4985  ;;  %v5128_v57 = vmul.f32 0.5, %v5127_v27 }
 0x5f9   : > { %v5029_v30 = vmul.f32 0.0625, %v4986_v14  ;;  %v5045_v48 = vmul.f32 %v12744_v5, %v12744_v5 }
 0x5fa   : > { %v5129_v22 = vsub.f32 1.5, %v5128_v57 }
 0x5fb   : > { %v5061_v56 = vsub.f32 %v5029_v30, %v5045_v48  ;;  %v8170_v4 = vpop.eup %8169 }
 0x5fc   : > { %v5136_v45 = vmul.f32 %v8170_v4, %v5092_v21  ;;  %v5130_v54 = vmul.f32 %v8168_v36, %v5129_v22  ;;  %vm5142_vm9 = vweird.f32 %v8170_v4 }
 0x5fd   : > { %v5093_v35 = vadd.f32 1e-05, %v5061_v56  ;;  %vm5143_vm11 = vmor %vm5141_vm10, %vm5142_vm9 }
 0x5fe   : > { %v4940_v13 = vpop.xlane.xlu2 %4939  ;;  %v5137_v31 = vmul.f32 %v8170_v4, %v5136_v45  ;;  %v5134_v26 = vsel %vm5133_vm8, %v8168_v36, %v5130_v54 }
 0x5ff   : > { %v12748_v17 = vmul.f32 0.0625, %v4940_v13  ;;  %8171 = vrsqrt.f32 %v5093_v35  ;;  %v5267_v52 = vmul.f32 %v5134_v26, %v5075_v7  ;;  %vm5151_vm13 = vweird.f32 %v5093_v35 }
 0x600   : > { %v4988_v8 = vpop.xlane.xlu1 %4987  ;;  %v5138_v60 = vmul.f32 0.5, %v5137_v31 }
 0x601   : > { %v5046_v6 = vmul.f32 %v12748_v17, %v12748_v17  ;;  %v5030_v0 = vmul.f32 0.0625, %v4988_v8  ;;  %v5365_v43 = vmul.f32 %v5322_v10, %v5267_v52 }
 0x602   : > { %v5139_v9 = vsub.f32 1.5, %v5138_v60 }
 0x603   : > { %v5062_v34 = vsub.f32 %v5030_v0, %v5046_v6 }
 0x604   : > { %v5140_v24 = vmul.f32 %v8170_v4, %v5139_v9 }
 0x605   : > { %v5094_v16 = vadd.f32 1e-05, %v5062_v34  ;;  %v8172_v33 = vpop.eup %8171 }
 0x606   : > { %v4942_v46 = vpop.xlane.xlu2 %4941  ;;  %v5146_v14 = vmul.f32 %v8172_v33, %v5093_v35  ;;  %v5144_v30 = vsel %vm5143_vm11, %v8170_v4, %v5140_v24  ;;  %vm5152_vm12 = vweird.f32 %v8172_v33 }
 0x607   : > { %8173 = vrsqrt.f32 %v5094_v16  ;;  %v12757_v27 = vmul.f32 0.0625, %v4942_v46  ;;  %v5268_v21 = vmul.f32 %v5144_v30, %v5076_v25  ;;  %vm5153_vm14 = vmor %vm5151_vm13, %vm5152_vm12  ;;  %vm5161_vm0 = vweird.f32 %v5094_v16 }
 0x608   : > { %v4990_v36 = vpop.xlane.xlu1 %4989  ;;  %v5147_v48 = vmul.f32 %v8172_v33, %v5146_v14  ;;  %v5077_v14 = vsub.f32 %v12628_v42, %v12744_v5  ;;  %v5331_v5 = vadd.f32 1.0, %v12454_v50  ;;  %v7784_v50 = vld [vmem:[#allocation16 + $0x78] sm:$0xff] }
 0x609   : > { %v5031_v57 = vmul.f32 0.0625, %v4990_v36  ;;  %v5047_v56 = vmul.f32 %v12757_v27, %v12757_v27  ;;  %v5366_v45 = vmul.f32 %v5325_v12, %v5268_v21  ;;  %v5078_v12 = vsub.f32 %v12636_v2, %v12748_v17  ;;  %5904 = vmatpush.bf16.msra.mxu3 %v7784_v50 }
 0x60a   : > { %v5148_v22 = vmul.f32 0.5, %v5147_v48 }
 0x60b   : > { %v5063_v13 = vsub.f32 %v5031_v57, %v5047_v56  ;;  %v5380_v54 = vpack.c.bf16 %v5366_v45, %v5365_v43  ;;  %v5328_v57 = vadd.f32 1.0, %v12427_v11 }
 0x60c   : > { %v5149_v8 = vsub.f32 1.5, %v5148_v22 }
 0x60d   : > { %v8174_v31 = vpop.eup %8173  ;;  %v5095_v6 = vadd.f32 1e-05, %v5063_v13  ;;  %5470 = vmatmul.bf16.gmra.mxu2 %v5380_v54 }
 0x60e   : > { %v5156_v20 = vmul.f32 %v8174_v31, %v5094_v16  ;;  %v4944_v0 = vpop.xlane.xlu0 %4943  ;;  %v5150_v41 = vmul.f32 %v8172_v33, %v5149_v8  ;;  %vm5162_vm15 = vweird.f32 %v8174_v31 }
 0x60f   : > { %v12762_v60 = vmul.f32 0.0625, %v4944_v0  ;;  %8175 = vrsqrt.f32 %v5095_v6  ;;  %vm5163_vm1 = vmor %vm5161_vm0, %vm5162_vm15  ;;  %vm5171_vm3 = vweird.f32 %v5095_v6 }
 0x610   : > { %v5157_v4 = vmul.f32 %v8174_v31, %v5156_v20  ;;  %v4992_v34 = vpop.xlane.xlu2 %4991  ;;  %v5154_v25 = vsel %vm5153_vm14, %v8172_v33, %v5150_v41 }
 0x611   : > { %v5048_v9 = vmul.f32 %v12762_v60, %v12762_v60  ;;  %v5032_v26 = vmul.f32 0.0625, %v4992_v34  ;;  %v5269_v35 = vmul.f32 %v5154_v25, %v5077_v14 }
 0x612   : > { %v5158_v7 = vmul.f32 0.5, %v5157_v4 }
 0x613   : > { %v5064_v46 = vsub.f32 %v5032_v26, %v5048_v9  ;;  %v5367_v17 = vmul.f32 %v5328_v57, %v5269_v35  ;;  %v12780_v9 = vpop.f32.mrf.mxu1 }
 0x614   : > { %v5159_v24 = vsub.f32 1.5, %v5158_v7 }
 0x615   : > { %v5096_v52 = vadd.f32 1e-05, %v5064_v46  ;;  %v8176_v10 = vpop.eup %8175 }
 0x616   : > { %v5160_v36 = vmul.f32 %v8174_v31, %v5159_v24  ;;  %v4946_v30 = vpop.xlane.xlu0 %4945  ;;  %v5166_v48 = vmul.f32 %v8176_v10, %v5095_v6  ;;  %vm5172_vm2 = vweird.f32 %v8176_v10 }
 0x617   : > { %8177 = vrsqrt.f32 %v5096_v52  ;;  %v12771_v21 = vmul.f32 0.0625, %v4946_v30  ;;  %vm5173_vm4 = vmor %vm5171_vm3, %vm5172_vm2  ;;  %vm5181_vm6 = vweird.f32 %v5096_v52 }
 0x618   : > { %v4994_v33 = vpop.xlane.xlu2 %4993  ;;  %v5164_v56 = vsel %vm5163_vm1, %v8174_v31, %v5160_v36  ;;  %v5167_v22 = vmul.f32 %v8176_v10, %v5166_v48  ;;  %v5079_v48 = vsub.f32 %v12644_v15, %v12757_v27  ;;  %v5337_v27 = vadd.f32 1.0, %v12501_v55  ;;  %v7783_v55 = vld [vmem:[#allocation16 + $0x70] sm:$0xff] }
 0x619   : > { %v5033_v43 = vmul.f32 0.0625, %v4994_v33  ;;  %v5270_v45 = vmul.f32 %v5164_v56, %v5078_v12  ;;  %v5049_v16 = vmul.f32 %v12771_v21, %v12771_v21  ;;  %5905 = vmatpush.bf16.msra.mxu3 %v7783_v55 }
 0x61a   : > { %v5168_v13 = vmul.f32 0.5, %v5167_v22 }
 0x61b   : > { %v5368_v8 = vmul.f32 %v5331_v5, %v5270_v45  ;;  %v5065_v54 = vsub.f32 %v5033_v43, %v5049_v16  ;;  %v5080_v5 = vsub.f32 %v12652_v18, %v12762_v60  ;;  %v5334_v43 = vadd.f32 1.0, %v12475_v38 }
 0x61c   : > { %v5169_v0 = vsub.f32 1.5, %v5168_v13 }
 0x61d   : > { %v8178_v20 = vpop.eup %8177  ;;  %v5381_v41 = vpack.c.bf16 %v5368_v8, %v5367_v17  ;;  %v12776_v4 = vadd.f32 1e-05, %v5065_v54  ;;  %v5342_v8 = vpop.f32.mrf.mxu1 }
 0x61e   : > { %v5176_v11 = vmul.f32 %v8178_v20, %v5096_v52  ;;  %v4948_v34 = vpop.xlane.xlu1 %4947  ;;  %v5170_v26 = vmul.f32 %v8176_v10, %v5169_v0  ;;  %vm5182_vm5 = vweird.f32 %v8178_v20 }
 0x61f   : > { %v12778_v31 = vmul.f32 0.0625, %v4948_v34  ;;  %5475 = vmatmul.bf16.gmra.mxu2 %v5381_v41  ;;  %8179 = vrsqrt.f32 %v12776_v4  ;;  %vm5183_vm7 = vmor %vm5181_vm6, %vm5182_vm5  ;;  %vm5191_vm9 = vweird.f32 %v12776_v4 }
 0x620   : > { %v5177_v7 = vmul.f32 %v8178_v20, %v5176_v11  ;;  %v4996_v46 = vpop.xlane.xlu0 %4995  ;;  %v5174_v12 = vsel %vm5173_vm4, %v8176_v10, %v5170_v26 }
 0x621   : > { %v5050_v24 = vmul.f32 %v12778_v31, %v12778_v31  ;;  %v5034_v25 = vmul.f32 0.0625, %v4996_v46  ;;  %v5271_v22 = vmul.f32 %v5174_v12, %v5079_v48 }
 0x622   : > { %v5178_v14 = vmul.f32 0.5, %v5177_v7 }
 0x623   : > { %v5066_v36 = vsub.f32 %v5034_v25, %v5050_v24  ;;  %v5369_v0 = vmul.f32 %v5334_v43, %v5271_v22  ;;  %v5081_v22 = vsub.f32 %v12660_v37, %v12771_v21  ;;  %v5343_v21 = vadd.f32 1.0, %v5342_v8  ;;  %v7782_v8 = vld [vmem:[#allocation16 + $0x68] sm:$0xff] }
 0x624   : > { %v5179_v30 = vsub.f32 1.5, %v5178_v14  ;;  %5906 = vmatpush.bf16.msra.mxu3 %v7782_v8 }
 0x625   : > { %v5098_v35 = vadd.f32 1e-05, %v5066_v36  ;;  %v8180_v57 = vpop.eup %8179 }
 0x626   : > { %v5180_v33 = vmul.f32 %v8178_v20, %v5179_v30  ;;  %v4950_v56 = vpop.xlane.xlu1 %4949  ;;  %v5186_v6 = vmul.f32 %v8180_v57, %v12776_v4  ;;  %vm5192_vm8 = vweird.f32 %v8180_v57 }
 0x627   : > { %8181 = vrsqrt.f32 %v5098_v35  ;;  %v12791_v45 = vmul.f32 0.0625, %v4950_v56  ;;  %vm12804_vm10 = vmor %vm5191_vm9, %vm5192_vm8  ;;  %v12808_v56 = vpop.f32.mrf.mxu1  ;;  %vm5201_vm12 = vweird.f32 %v5098_v35 }
 0x628   : > { %v4998_v10 = vpop.xlane.xlu0 %4997  ;;  %v5184_v16 = vsel %vm5183_vm7, %v8178_v20, %v5180_v33  ;;  %v5187_v13 = vmul.f32 %v8180_v57, %v5186_v6 }
 0x629   : > { %v5035_v17 = vmul.f32 0.0625, %v4998_v10  ;;  %v5272_v52 = vmul.f32 %v5184_v16, %v5080_v5  ;;  %v5051_v60 = vmul.f32 %v12791_v45, %v12791_v45 }
 0x62a   : > { %v5188_v54 = vmul.f32 0.5, %v5187_v13 }
 0x62b   : > { %v5370_v41 = vmul.f32 %v5337_v27, %v5272_v52  ;;  %v5067_v11 = vsub.f32 %v5035_v17, %v5051_v60  ;;  %v5082_v27 = vsub.f32 %v12668_v49, %v12778_v31  ;;  %v5340_v52 = vadd.f32 1.0, %v12780_v9 }
 0x62c   : > { %v5189_v50 = vsub.f32 1.5, %v5188_v54 }
 0x62d   : > { %v8182_v34 = vpop.eup %8181  ;;  %v5382_v38 = vpack.c.bf16 %v5370_v41, %v5369_v0  ;;  %v12796_v7 = vadd.f32 1e-05, %v5067_v11 }
 0x62e   : > { %v5196_v26 = vmul.f32 %v8182_v34, %v5098_v35  ;;  %v4952_v20 = vpop.xlane.xlu2 %4951  ;;  %v5190_v24 = vmul.f32 %v8180_v57, %v5189_v50  ;;  %vm5202_vm11 = vweird.f32 %v8182_v34 }
 0x62f   : > { %v12798_v46 = vmul.f32 0.0625, %v4952_v20  ;;  %5480 = vmatmul.bf16.gmra.mxu2 %v5382_v38  ;;  %8183 = vrsqrt.f32 %v12796_v7  ;;  %vm5203_vm13 = vmor %vm5201_vm12, %vm5202_vm11  ;;  %vm5211_vm15 = vweird.f32 %v12796_v7 }
 0x630   : > { %v5197_v25 = vmul.f32 %v8182_v34, %v5196_v26  ;;  %v5000_v14 = vpop.xlane.xlu1 %4999  ;;  %v5194_v6 = vsel %vm12804_vm10, %v8180_v57, %v5190_v24 }
 0x631   : > { %v5052_v36 = vmul.f32 %v12798_v46, %v12798_v46  ;;  %v5036_v30 = vmul.f32 0.0625, %v5000_v14  ;;  %v5273_v17 = vmul.f32 %v5194_v6, %v5081_v22 }
 0x632   : > { %v5198_v12 = vmul.f32 0.5, %v5197_v25  ;;  %v5348_v25 = vpop.f32.mrf.mxu1 }
 0x633   : > { %v5068_v33 = vsub.f32 %v5036_v30, %v5052_v36  ;;  %v5371_v31 = vmul.f32 %v5340_v52, %v5273_v17 }
 0x634   : > { %v5199_v5 = vsub.f32 1.5, %v5198_v12 }
 0x635   : > { %v5100_v43 = vadd.f32 1e-05, %v5068_v33  ;;  %v8184_v10 = vpop.eup %8183 }
 0x636   : > { %v5200_v16 = vmul.f32 %v8182_v34, %v5199_v5  ;;  %v4954_v4 = vpop.xlane.xlu2 %4953  ;;  %v5206_v13 = vmul.f32 %v8184_v10, %v12796_v7  ;;  %vm5212_vm14 = vweird.f32 %v8184_v10  ;;  %v7781_v7 = vld [vmem:[#allocation16 + $0x60] sm:$0xff] }
 0x637   : > { %8185 = vrsqrt.f32 %v5100_v43  ;;  %v12818_v60 = vmul.f32 0.0625, %v4954_v4  ;;  %vm12830_vm0 = vmor %vm5211_vm15, %vm5212_vm14  ;;  %vm5221_vm2 = vweird.f32 %v5100_v43  ;;  %5907 = vmatpush.bf16.msra.mxu3 %v7781_v7 }
 0x638   : > { %v5002_v57 = vpop.xlane.xlu1 %5001  ;;  %v5204_v54 = vsel %vm5203_vm13, %v8182_v34, %v5200_v16  ;;  %v5207_v0 = vmul.f32 %v8184_v10, %v5206_v13  ;;  %v5083_v13 = vsub.f32 %v12676_v53, %v12791_v45 }
 0x639   : > { %v5037_v41 = vmul.f32 0.0625, %v5002_v57  ;;  %v5274_v11 = vmul.f32 %v5204_v54, %v5082_v27  ;;  %v5053_v35 = vmul.f32 %v12818_v60, %v12818_v60 }
 0x63a   : > { %v5208_v50 = vmul.f32 0.5, %v5207_v0 }
 0x63b   : > { %v5372_v38 = vmul.f32 %v5343_v21, %v5274_v11  ;;  %v5069_v26 = vsub.f32 %v5037_v41, %v5053_v35  ;;  %v5084_v21 = vsub.f32 %v12684_v51, %v12798_v46  ;;  %v5346_v11 = vadd.f32 1.0, %v12808_v56 }
 0x63c   : > { %v5209_v55 = vsub.f32 1.5, %v5208_v50 }
 0x63d   : > { %v8186_v20 = vpop.eup %8185  ;;  %v5383_v24 = vpack.c.bf16 %v5372_v38, %v5371_v31  ;;  %v12822_v14 = vadd.f32 1e-05, %v5069_v26  ;;  %v7780_v31 = vld [vmem:[#allocation16 + $0x58] sm:$0xff] }
 0x63e   : > { %v5216_v9 = vmul.f32 %v8186_v20, %v5100_v43  ;;  %v4956_v36 = vpop.xlane.xlu0 %4955  ;;  %v5210_v30 = vmul.f32 %v8184_v10, %v5209_v55  ;;  %vm5222_vm1 = vweird.f32 %v8186_v20  ;;  %v5349_v43 = vadd.f32 1.0, %v5348_v25  ;;  %5908 = vmatpush.bf16.msra.mxu3 %v7780_v31  ;;  %v7779_v25 = vld [vmem:[#allocation16 + $0x50] sm:$0xff] }
 0x63f   : > { %v12824_v34 = vmul.f32 0.0625, %v4956_v36  ;;  %5485 = vmatmul.bf16.gmra.mxu2 %v5383_v24  ;;  %8187 = vrsqrt.f32 %v12822_v14  ;;  %vm5223_vm3 = vmor %vm5221_vm2, %vm5222_vm1  ;;  %vm5231_vm5 = vweird.f32 %v12822_v14 }
 0x640   : > { %v5217_v12 = vmul.f32 %v8186_v20, %v5216_v9  ;;  %v5004_v48 = vpop.xlane.xlu2 %5003  ;;  %v5214_v27 = vsel %vm12830_vm0, %v8184_v10, %v5210_v30  ;;  %v5351_v10 = vpop.f32.mrf.mxu1 }
 0x641   : > { %v5054_v33 = vmul.f32 %v12824_v34, %v12824_v34  ;;  %v5038_v5 = vmul.f32 0.0625, %v5004_v48  ;;  %v5275_v41 = vmul.f32 %v5214_v27, %v5083_v13 }
 0x642   : > { %v5218_v6 = vmul.f32 0.5, %v5217_v12  ;;  %5909 = vmatpush.bf16.msra.mxu3 %v7779_v25 }
 0x643   : > { %v5070_v16 = vsub.f32 %v5038_v5, %v5054_v33  ;;  %v5373_v9 = vmul.f32 %v5346_v11, %v5275_v41 }
 0x644   : > { %v5219_v4 = vsub.f32 1.5, %v5218_v6 }
 0x645   : > { %v5102_v17 = vadd.f32 1e-05, %v5070_v16  ;;  %v8188_v52 = vpop.eup %8187 }
 0x646   : > { %v5220_v57 = vmul.f32 %v8186_v20, %v5219_v4  ;;  %v4958_v54 = vpop.xlane.xlu0 %4957  ;;  %v5226_v0 = vmul.f32 %v8188_v52, %v12822_v14  ;;  %vm5232_vm4 = vweird.f32 %v8188_v52 }
 0x647   : > { %8189 = vrsqrt.f32 %v5102_v17  ;;  %v12842_v35 = vmul.f32 0.0625, %v4958_v54  ;;  %vm5233_vm6 = vmor %vm5231_vm5, %vm5232_vm4  ;;  %vm5241_vm8 = vweird.f32 %v5102_v17 }
 0x648   : > { %v5006_v45 = vpop.xlane.xlu2 %5005  ;;  %v5224_v50 = vsel %vm5223_vm3, %v8186_v20, %v5220_v57  ;;  %v5227_v38 = vmul.f32 %v8188_v52, %v5226_v0  ;;  %v5354_v13 = vpop.f32.mrf.mxu1  ;;  %v5085_v0 = vsub.f32 %v12692_v63, %v12818_v60 }
 0x649   : > { %v5039_v26 = vmul.f32 0.0625, %v5006_v45  ;;  %v5276_v55 = vmul.f32 %v5224_v50, %v5084_v21  ;;  %v5055_v46 = vmul.f32 %v12842_v35, %v12842_v35  ;;  %v5086_v50 = vsub.f32 %v12700_v23, %v12824_v34 }
 0x64a   : > { %v5228_v24 = vmul.f32 0.5, %v5227_v38  ;;  %v5352_v38 = vadd.f32 1.0, %v5351_v10 }
 0x64b   : > { %v5374_v36 = vmul.f32 %v5349_v43, %v5276_v55  ;;  %v5071_v8 = vsub.f32 %v5039_v26, %v5055_v46  ;;  %v5355_v26 = vadd.f32 1.0, %v5354_v13 }
 0x64c   : > { %v5229_v30 = vsub.f32 1.5, %v5228_v24 }
 0x64d   : > { %v8190_v56 = vpop.eup %8189  ;;  %v5384_v12 = vpack.c.bf16 %v5374_v36, %v5373_v9  ;;  %v5103_v33 = vadd.f32 1e-05, %v5071_v8 }
 0x64e   : > { %v5236_v48 = vmul.f32 %v8190_v56, %v5102_v17  ;;  %v4960_v20 = vpop.xlane.xlu1 %4959  ;;  %v5230_v6 = vmul.f32 %v8188_v52, %v5229_v30  ;;  %vm5242_vm7 = vweird.f32 %v8190_v56 }
 0x64f   : > { %v12846_v5 = vmul.f32 0.0625, %v4960_v20  ;;  %5490 = vmatmul.bf16.gmra.mxu2 %v5384_v12  ;;  %8191 = vrsqrt.f32 %v5103_v33  ;;  %vm5243_vm9 = vmor %vm5241_vm8, %vm5242_vm7  ;;  %vm5251_vm11 = vweird.f32 %v5103_v33  ;;  %v5087_v20 = vsub.f32 %v12708_v28, %v12842_v35  ;;  %v12862_v35 = vld [vmem:[%s13591_s11 + $0x1] ss:$0 sm:$0xff] }
 0x650   : > { %v5237_v22 = vmul.f32 %v8190_v56, %v5236_v48  ;;  %v5008_v16 = vpop.xlane.xlu0 %5007  ;;  %v5234_v21 = vsel %vm5233_vm6, %v8188_v52, %v5230_v6  ;;  %v5357_v60 = vpop.f32.mrf.mxu1 }
 0x651   : > { %v5056_v4 = vmul.f32 %v12846_v5, %v12846_v5  ;;  %v5040_v27 = vmul.f32 0.0625, %v5008_v16  ;;  %v5277_v14 = vmul.f32 %v5234_v21, %v5085_v0 }
 0x652   : > { %v5238_v57 = vmul.f32 0.5, %v5237_v22  ;;  %v5088_v22 = vsub.f32 %v12720_v61, %v12846_v5 }
 0x653   : > { %v5072_v54 = vsub.f32 %v5040_v27, %v5056_v4  ;;  %v5375_v24 = vmul.f32 %v5352_v38, %v5277_v14  ;;  %v5358_v27 = vadd.f32 1.0, %v5357_v60 }
 0x654   : > { %v5239_v7 = vsub.f32 1.5, %v5238_v57 }
 0x655   : > { %v5104_v41 = vadd.f32 1e-05, %v5072_v54  ;;  %v8192_v11 = vpop.eup %8191 }
 0x656   : > { %v5240_v45 = vmul.f32 %v8190_v56, %v5239_v7  ;;  %v5246_v31 = vmul.f32 %v8192_v11, %v5103_v33  ;;  %vm5252_vm10 = vweird.f32 %v8192_v11 }
 0x657   : > { %8193 = vrsqrt.f32 %v5104_v41  ;;  %vm5253_vm12 = vmor %vm5251_vm11, %vm5252_vm10  ;;  %vm5261_vm14 = vweird.f32 %v5104_v41 }
 0x658   : > { %v5244_v43 = vsel %vm5243_vm9, %v8190_v56, %v5240_v45  ;;  %v5247_v55 = vmul.f32 %v8192_v11, %v5246_v31  ;;  %v5360_v25 = vpop.f32.mrf.mxu1  ;;  %v7778_v45 = vld [vmem:[#allocation16 + $0x48] sm:$0xff] }
 0x659   : > { %v5278_v46 = vmul.f32 %v5244_v43, %v5086_v50  ;;  %v5361_v13 = vadd.f32 1.0, %v5360_v25  ;;  %5910 = vmatpush.bf16.msra.mxu3 %v7778_v45 }
 0x65a   : > { %v5248_v52 = vmul.f32 0.5, %v5247_v55 }
 0x65b   : > { %v5376_v9 = vmul.f32 %v5355_v26, %v5278_v46 }
 0x65c   : > { %v5249_v8 = vsub.f32 1.5, %v5248_v52  ;;  %v7777_v52 = vld [vmem:[#allocation16 + $0x40] sm:$0xff] }
 0x65d   : > { %v8194_v36 = vpop.eup %8193  ;;  %v5385_v30 = vpack.c.bf16 %v5376_v9, %v5375_v24  ;;  %5911 = vmatpush.bf16.msra.mxu3 %v7777_v52 }
 0x65e   : > { %v5256_v17 = vmul.f32 %v8194_v36, %v5104_v41  ;;  %v5250_v12 = vmul.f32 %v8192_v11, %v5249_v8  ;;  %vm5262_vm13 = vweird.f32 %v8194_v36 }
 0x65f   : > { %5495 = vmatmul.bf16.gmra.mxu2 %v5385_v30  ;;  %vm5263_vm15 = vmor %vm5261_vm14, %vm5262_vm13 }
 0x660   : > { %v5257_v34 = vmul.f32 %v8194_v36, %v5256_v17  ;;  %v5254_v10 = vsel %vm5253_vm12, %v8192_v11, %v5250_v12 }
 0x661   : > { %v5279_v16 = vmul.f32 %v5254_v10, %v5087_v20 }
 0x662   : > { %v5258_v48 = vmul.f32 0.5, %v5257_v34 }
 0x663   : > { %v5377_v57 = vmul.f32 %v5358_v27, %v5279_v16 }
 0x664   : > { %v5259_v56 = vsub.f32 1.5, %v5258_v48 }
 0x666   : > { %v5260_v6 = vmul.f32 %v8194_v36, %v5259_v56 }
 0x668   : > { %v5264_v4 = vsel %vm5263_vm15, %v8194_v36, %v5260_v6 }
 0x669   : > { %v5280_v33 = vmul.f32 %v5264_v4, %v5088_v22 }
 0x66b   : > { %v5378_v54 = vmul.f32 %v5361_v13, %v5280_v33 }
 0x66d   : > { %v5386_v7 = vpack.c.bf16 %v5378_v54, %v5377_v57 }
 0x66f   : > { %5500 = vmatmul.bf16.gmra.mxu2 %v5386_v7 }
 0x677   : > { %v5466_v21 = vpop.f32.mrf.mxu2 }
 0x678   : > { %v5467_v0 = vadd.f32 %v12862_v35, %v5466_v21 }
 0x67a   : > { %v7616_v41 = vmul.f32 -1.442695, %v5467_v0 }
 0x67c   : > { %8195 = vpow2.f32 %v7616_v41 }
 0x67f   : > { %v5468_v5 = vpop.f32.mrf.mxu2 }
 0x680   : > { %v5469_v11 = vadd.f32 %v12862_v35, %v5468_v5 }
 0x682   : > { %v8196_v50 = vpop.eup %8195  ;;  %v7617_v31 = vmul.f32 -1.442695, %v5469_v11 }
 0x683   : > { %v5554_v14 = vadd.f32 1.0, %v8196_v50 }
 0x684   : > { %8197 = vpow2.f32 %v7617_v31 }
 0x685   : > { %8199 = vrcp.f32 %v5554_v14  ;;  %v5581_v34 = vand.u32 2147483648, %v5554_v14  ;;  %vm5575_vm1 = vweird.f32 %v5554_v14  ;;  %v5579_v56 = vand.u32 2147483647, %v5554_v14 }
 0x687   : > { %v5582_v4 = vor.u32 1.1754944e-38, %v5581_v34  ;;  %vm5580_vm4 = vcmp.eq.f32.partialorder %v5579_v56, 8.507059e+37 }
 0x68a   : > { %v8198_v43 = vpop.eup %8197 }
 0x68b   : > { %v8200_v38 = vpop.eup %8199  ;;  %v5555_v26 = vadd.f32 1.0, %v8198_v43 }
 0x68c   : > { %v5571_v55 = vmul.f32 %v8200_v38, %v5554_v14  ;;  %vm5576_vm0 = vweird.f32 %v8200_v38 }
 0x68d   : > { %8201 = vrcp.f32 %v5555_v26  ;;  %vm5577_vm2 = vmor %vm5575_vm1, %vm5576_vm0  ;;  %v5596_v20 = vand.u32 2147483648, %v5555_v26  ;;  %v5594_v16 = vand.u32 2147483647, %v5555_v26  ;;  %vm5590_vm5 = vweird.f32 %v5555_v26 }
 0x68e   : > { %v5572_v24 = vsub.f32 1.0, %v5571_v55 }
 0x68f   : > { %v5597_v57 = vor.u32 1.1754944e-38, %v5596_v20  ;;  %vm5595_vm7 = vcmp.eq.f32.partialorder %v5594_v16, 8.507059e+37 }
 0x690   : > { %v5471_v46 = vpop.f32.mrf.mxu2  ;;  %v5573_v60 = vmul.f32 %v8200_v38, %v5572_v24 }
 0x691   : > { %v12867_v9 = vadd.f32 %v12862_v35, %v5471_v46 }
 0x692   : > { %v5574_v30 = vadd.f32 %v8200_v38, %v5573_v60 }
 0x693   : > { %v7618_v36 = vmul.f32 -1.442695, %v12867_v9  ;;  %v8202_v8 = vpop.eup %8201 }
 0x694   : > { %v5586_v17 = vmul.f32 %v8202_v8, %v5555_v26  ;;  %v5578_v6 = vsel %vm5577_vm2, %v8200_v38, %v5574_v30  ;;  %vm5591_vm3 = vweird.f32 %v8202_v8 }
 0x695   : > { %8203 = vpow2.f32 %v7618_v36  ;;  %v5583_v33 = vsel %vm5580_vm4, %v5582_v4, %v5578_v6  ;;  %vm5592_vm6 = vmor %vm5590_vm5, %vm5591_vm3 }
 0x696   : > { %v5587_v10 = vsub.f32 1.0, %v5586_v17  ;;  %v5810_v45 = vmul.f32 %v5583_v33, %v5467_v0 }
 0x698   : > { %v5473_v12 = vpop.f32.mrf.mxu2  ;;  %v5588_v22 = vmul.f32 %v8202_v8, %v5587_v10 }
 0x699   : > { %v12871_v48 = vadd.f32 %v12862_v35, %v5473_v12 }
 0x69a   : > { %v5589_v13 = vadd.f32 %v8202_v8, %v5588_v22 }
 0x69b   : > { %v8204_v25 = vpop.eup %8203  ;;  %v7619_v27 = vmul.f32 -1.442695, %v12871_v48 }
 0x69c   : > { %v5556_v54 = vadd.f32 1.0, %v8204_v25  ;;  %v5593_v7 = vsel %vm5592_vm6, %v8202_v8, %v5589_v13 }
 0x69d   : > { %v5598_v41 = vsel %vm5595_vm7, %v5597_v57, %v5593_v7  ;;  %8205 = vpow2.f32 %v7619_v27 }
 0x69e   : > { %v5811_v50 = vmul.f32 %v5598_v41, %v5469_v11  ;;  %8207 = vrcp.f32 %v5556_v54  ;;  %vm5605_vm9 = vweird.f32 %v5556_v54  ;;  %v5609_v4 = vand.u32 2147483647, %v5556_v54 }
 0x69f   : > { %v5611_v27 = vand.u32 2147483648, %v5556_v54 }
 0x6a0   : > { %v5826_v14 = vpack.c.bf16 %v5811_v50, %v5810_v45  ;;  %vm5610_vm12 = vcmp.eq.f32.partialorder %v5609_v4, 8.507059e+37 }
 0x6a2   : > { %v5476_v21 = vpop.f32.mrf.mxu2  ;;  %5912 = vmatmul.bf16.vlgmr.msra.gmra.mxu3 %v5826_v14  ;;  %v5612_v14 = vor.u32 1.1754944e-38, %v5611_v27 }
 0x6a3   : > { %v12875_v5 = vadd.f32 %v12862_v35, %v5476_v21  ;;  %v8206_v43 = vpop.eup %8205 }
 0x6a4   : > { %v8208_v26 = vpop.eup %8207  ;;  %v5557_v46 = vadd.f32 1.0, %v8206_v43 }
 0x6a5   : > { %v7620_v31 = vmul.f32 -1.442695, %v12875_v5  ;;  %v5601_v60 = vmul.f32 %v8208_v26, %v5556_v54  ;;  %vm5606_vm8 = vweird.f32 %v8208_v26 }
 0x6a6   : > { %vm12897_vm10 = vmor %vm5605_vm9, %vm5606_vm8  ;;  %v5626_v50 = vand.u32 2147483648, %v5557_v46  ;;  %v5624_v54 = vand.u32 2147483647, %v5557_v46  ;;  %vm5620_vm13 = vweird.f32 %v5557_v46 }
 0x6a7   : > { %8209 = vpow2.f32 %v7620_v31  ;;  %v5602_v11 = vsub.f32 1.0, %v5601_v60 }
 0x6a8   : > { %vm5625_vm15 = vcmp.eq.f32.partialorder %v5624_v54, 8.507059e+37 }
 0x6a9   : > { %v5603_v34 = vmul.f32 %v8208_v26, %v5602_v11  ;;  %v5627_v11 = vor.u32 1.1754944e-38, %v5626_v50 }
 0x6aa   : > { %v5478_v38 = vpop.f32.mrf.mxu2 }
 0x6ab   : > { %v12879_v55 = vadd.f32 %v12862_v35, %v5478_v38  ;;  %v5604_v25 = vadd.f32 %v8208_v26, %v5603_v34 }
 0x6ad   : > { %v8210_v52 = vpop.eup %8209  ;;  %v7621_v24 = vmul.f32 -1.442695, %v12879_v55  ;;  %v5608_v45 = vsel %vm12897_vm10, %v8208_v26, %v5604_v25 }
 0x6ae   : > { %v12882_v0 = vadd.f32 1.0, %v8210_v52  ;;  %v5613_v60 = vsel %vm5610_vm12, %v5612_v14, %v5608_v45 }
 0x6af   : > { %8211 = vpow2.f32 %v7621_v24  ;;  %v5812_v25 = vmul.f32 %v5613_v60, %v12867_v9 }
 0x6b0   : > { %8213 = vrcp.f32 %v5557_v46  ;;  %vm5635_vm4 = vweird.f32 %v12882_v0 }
 0x6b1   : > { %8215 = vrcp.f32 %v12882_v0 }
 0x6b2   : > { %v5481_v36 = vpop.f32.mrf.mxu2 }
 0x6b3   : > { %v12885_v8 = vadd.f32 %v12862_v35, %v5481_v36 }
 0x6b5   : > { %v8212_v30 = vpop.eup %8211  ;;  %v7622_v17 = vmul.f32 -1.442695, %v12885_v8 }
 0x6b6   : > { %v8214_v12 = vpop.eup %8213  ;;  %v12889_v56 = vadd.f32 1.0, %v8212_v30 }
 0x6b7   : > { %8217 = vpow2.f32 %v7622_v17  ;;  %v5616_v10 = vmul.f32 %v8214_v12, %v5557_v46  ;;  %v12892_v20 = vpop.eup %8215  ;;  %vm5621_vm11 = vweird.f32 %v8214_v12 }
 0x6b8   : > { %8219 = vrcp.f32 %v12889_v56  ;;  %v5631_v57 = vmul.f32 %v12892_v20, %v12882_v0  ;;  %vm5622_vm14 = vmor %vm5620_vm13, %vm5621_vm11  ;;  %vm5636_vm1 = vweird.f32 %v12892_v20  ;;  %vm5650_vm2 = vweird.f32 %v12889_v56 }
 0x6b9   : > { %v5617_v16 = vsub.f32 1.0, %v5616_v10  ;;  %v5654_v9 = vand.u32 2147483647, %v12889_v56  ;;  %vm5637_vm5 = vmor %vm5635_vm4, %vm5636_vm1 }
 0x6ba   : > { %v5483_v6 = vpop.f32.mrf.mxu2  ;;  %v5632_v38 = vsub.f32 1.0, %v5631_v57  ;;  %v5641_v57 = vand.u32 2147483648, %v12882_v0 }
 0x6bb   : > { %v12895_v22 = vadd.f32 %v12862_v35, %v5483_v6  ;;  %v5618_v21 = vmul.f32 %v8214_v12, %v5617_v16  ;;  %vm5655_vm6 = vcmp.eq.f32.partialorder %v5654_v9, 8.507059e+37 }
 0x6bc   : > { %v5633_v6 = vmul.f32 %v12892_v20, %v5632_v38 }
 0x6bd   : > { %v8218_v13 = vpop.eup %8217  ;;  %v7623_v7 = vmul.f32 -1.442695, %v12895_v22  ;;  %v5619_v24 = vadd.f32 %v8214_v12, %v5618_v21  ;;  %v5639_v21 = vand.u32 2147483647, %v12882_v0 }
 0x6be   : > { %v8220_v41 = vpop.eup %8219  ;;  %v12907_v43 = vadd.f32 1.0, %v8218_v13  ;;  %v5656_v13 = vand.u32 2147483648, %v12889_v56  ;;  %v5634_v33 = vadd.f32 %v12892_v20, %v5633_v6 }
 0x6bf   : > { %v5646_v31 = vmul.f32 %v8220_v41, %v12889_v56  ;;  %8221 = vpow2.f32 %v7623_v7  ;;  %v5623_v26 = vsel %vm5622_vm14, %v8214_v12, %v5619_v24  ;;  %vm5651_vm0 = vweird.f32 %v8220_v41 }
 0x6c0   : > { %8223 = vrcp.f32 %v12907_v43  ;;  %v5628_v34 = vsel %vm5625_vm15, %v5627_v11, %v5623_v26  ;;  %vm5652_vm3 = vmor %vm5650_vm2, %vm5651_vm0  ;;  %v5657_v56 = vor.u32 1.1754944e-38, %v5656_v13  ;;  %vm5640_vm7 = vcmp.eq.f32.partialorder %v5639_v21, 8.507059e+37 }
 0x6c1   : > { %v5647_v52 = vsub.f32 1.0, %v5646_v31  ;;  %v5813_v46 = vmul.f32 %v5628_v34, %v12871_v48  ;;  %v5638_v31 = vsel %vm5637_vm5, %v12892_v20, %v5634_v33  ;;  %vm5665_vm12 = vweird.f32 %v12907_v43 }
 0x6c2   : > { %v5486_v36 = vpop.f32.mrf.mxu2 }
 0x6c3   : > { %v5648_v30 = vmul.f32 %v8220_v41, %v5647_v52  ;;  %v12910_v17 = vadd.f32 %v12862_v35, %v5486_v36  ;;  %v5827_v12 = vpack.c.bf16 %v5813_v46, %v5812_v25  ;;  %v5642_v52 = vor.u32 1.1754944e-38, %v5641_v57 }
 0x6c4   : > { %v5671_v57 = vand.u32 2147483648, %v12907_v43 }
 0x6c5   : > { %v8222_v10 = vpop.eup %8221  ;;  %v7624_v16 = vmul.f32 -1.442695, %v12910_v17  ;;  %v5649_v27 = vadd.f32 %v8220_v41, %v5648_v30  ;;  %5917 = vmatmul.bf16.gmra.mxu3 %v5827_v12  ;;  %v5643_v60 = vsel %vm5640_vm7, %v5642_v52, %v5638_v31 }
 0x6c6   : > { %v12917_v4 = vadd.f32 1.0, %v8222_v10  ;;  %v12925_v48 = vpop.eup %8223  ;;  %v5814_v34 = vmul.f32 %v5643_v60, %v12875_v5 }
 0x6c7   : > { %v5653_v45 = vsel %vm5652_vm3, %v8220_v41, %v5649_v27  ;;  %v5661_v54 = vmul.f32 %v12925_v48, %v12907_v43  ;;  %vm5666_vm9 = vweird.f32 %v12925_v48 }
 0x6c8   : > { %8225 = vrcp.f32 %v12917_v4  ;;  %v5658_v24 = vsel %vm5655_vm6, %v5657_v56, %v5653_v45  ;;  %v5686_v13 = vand.u32 2147483648, %v12917_v4  ;;  %vm5680_vm10 = vweird.f32 %v12917_v4  ;;  %vm5667_vm13 = vmor %vm5665_vm12, %vm5666_vm9 }
 0x6c9   : > { %8227 = vpow2.f32 %v7624_v16  ;;  %v5815_v36 = vmul.f32 %v5658_v24, %v12879_v55  ;;  %v5662_v20 = vsub.f32 1.0, %v5661_v54  ;;  %v5684_v33 = vand.u32 2147483647, %v12917_v4 }
 0x6ca   : > { %v5488_v7 = vpop.f32.mrf.mxu2  ;;  %v5669_v45 = vand.u32 2147483647, %v12907_v43 }
 0x6cb   : > { %v12931_v50 = vadd.f32 %v12862_v35, %v5488_v7  ;;  %v5663_v46 = vmul.f32 %v12925_v48, %v5662_v20  ;;  %v5828_v16 = vpack.c.bf16 %v5815_v36, %v5814_v34  ;;  %vm5685_vm14 = vcmp.eq.f32.partialorder %v5684_v33, 8.507059e+37 }
 0x6cc   : > { %vm5670_vm15 = vcmp.eq.f32.partialorder %v5669_v45, 8.507059e+37 }
 0x6cd   : > { %v7625_v14 = vmul.f32 -1.442695, %v12931_v50  ;;  %v5664_v5 = vadd.f32 %v12925_v48, %v5663_v46 }
 0x6ce   : > { %v8226_v38 = vpop.eup %8225 }
 0x6cf   : > { %v8228_v0 = vpop.eup %8227  ;;  %v5676_v41 = vmul.f32 %v8226_v38, %v12917_v4  ;;  %8229 = vpow2.f32 %v7625_v14  ;;  %vm5681_vm8 = vweird.f32 %v8226_v38  ;;  %v5687_v4 = vor.u32 1.1754944e-38, %v5686_v13 }
 0x6d0   : > { %v12940_v11 = vadd.f32 1.0, %v8228_v0  ;;  %vm12961_vm11 = vmor %vm5680_vm10, %vm5681_vm8  ;;  %v5668_v14 = vsel %vm5667_vm13, %v12925_v48, %v5664_v5 }
 0x6d1   : > { %v5677_v30 = vsub.f32 1.0, %v5676_v41  ;;  %v5672_v41 = vor.u32 1.1754944e-38, %v5671_v57 }
 0x6d2   : > { %v5491_v26 = vpop.f32.mrf.mxu2  ;;  %8231 = vrcp.f32 %v12940_v11  ;;  %v5701_v7 = vand.u32 2147483648, %v12940_v11  ;;  %vm5695_vm4 = vweird.f32 %v12940_v11 }
 0x6d3   : > { %v5678_v10 = vmul.f32 %v8226_v38, %v5677_v30  ;;  %v12945_v25 = vadd.f32 %v12862_v35, %v5491_v26  ;;  %v5673_v60 = vsel %vm5670_vm15, %v5672_v41, %v5668_v14 }
 0x6d4   : > { %v5816_v34 = vmul.f32 %v5673_v60, %v12885_v8 }
 0x6d5   : > { %v8230_v6 = vpop.eup %8229  ;;  %v7626_v27 = vmul.f32 -1.442695, %v12945_v25  ;;  %v5679_v55 = vadd.f32 %v8226_v38, %v5678_v10  ;;  %5922 = vmatmul.bf16.gmra.mxu3 %v5828_v16 }
 0x6d6   : > { %v12950_v12 = vadd.f32 1.0, %v8230_v6 }
 0x6d7   : > { %8233 = vpow2.f32 %v7626_v27  ;;  %v5683_v56 = vsel %vm12961_vm11, %v8226_v38, %v5679_v55 }
 0x6d8   : > { %8235 = vrcp.f32 %v12950_v12  ;;  %v12958_v9 = vpop.eup %8231  ;;  %v5688_v43 = vsel %vm5685_vm14, %v5687_v4, %v5683_v56  ;;  %v5716_v5 = vand.u32 2147483648, %v12950_v12  ;;  %vm5710_vm2 = vweird.f32 %v12950_v12 }
 0x6d9   : > { %v5691_v52 = vmul.f32 %v12958_v9, %v12940_v11  ;;  %v5817_v20 = vmul.f32 %v5688_v43, %v12895_v22  ;;  %vm5696_vm1 = vweird.f32 %v12958_v9  ;;  %v5714_v33 = vand.u32 2147483647, %v12950_v12 }
 0x6da   : > { %v5493_v21 = vpop.f32.mrf.mxu2  ;;  %v5699_v56 = vand.u32 2147483647, %v12940_v11  ;;  %vm5697_vm5 = vmor %vm5695_vm4, %vm5696_vm1 }
 0x6db   : > { %v12970_v31 = vadd.f32 %v12862_v35, %v5493_v21  ;;  %v5692_v30 = vsub.f32 1.0, %v5691_v52  ;;  %v5829_v27 = vpack.c.bf16 %v5817_v20, %v5816_v34  ;;  %vm5715_vm6 = vcmp.eq.f32.partialorder %v5714_v33, 8.507059e+37 }
 0x6dc   : > { %vm5700_vm7 = vcmp.eq.f32.partialorder %v5699_v56, 8.507059e+37 }
 0x6dd   : > { %v8234_v54 = vpop.eup %8233  ;;  %v7627_v24 = vmul.f32 -1.442695, %v12970_v31  ;;  %v5693_v16 = vmul.f32 %v12958_v9, %v5692_v30 }
 0x6de   : > { %v8236_v0 = vpop.eup %8235  ;;  %v12977_v36 = vadd.f32 1.0, %v8234_v54 }
 0x6df   : > { %v5706_v38 = vmul.f32 %v8236_v0, %v12950_v12  ;;  %8237 = vpow2.f32 %v7627_v24  ;;  %vm5711_vm0 = vweird.f32 %v8236_v0  ;;  %v5694_v8 = vadd.f32 %v12958_v9, %v5693_v16 }
 0x6e0   : > { %8239 = vrcp.f32 %v12977_v36  ;;  %vm12998_vm3 = vmor %vm5710_vm2, %vm5711_vm0  ;;  %v5717_v12 = vor.u32 1.1754944e-38, %v5716_v5  ;;  %v5731_v21 = vand.u32 2147483648, %v12977_v36  ;;  %vm5725_vm12 = vweird.f32 %v12977_v36 }
 0x6e1   : > { %v5707_v48 = vsub.f32 1.0, %v5706_v38  ;;  %v5698_v52 = vsel %vm5697_vm5, %v12958_v9, %v5694_v8  ;;  %v5702_v38 = vor.u32 1.1754944e-38, %v5701_v7 }
 0x6e2   : > { %v5496_v26 = vpop.f32.mrf.mxu2 }
 0x6e3   : > { %v5708_v10 = vmul.f32 %v8236_v0, %v5707_v48  ;;  %v12982_v6 = vadd.f32 %v12862_v35, %v5496_v26  ;;  %v5703_v60 = vsel %vm5700_vm7, %v5702_v38, %v5698_v52 }
 0x6e4   : > { %v5818_v34 = vmul.f32 %v5703_v60, %v12910_v17 }
 0x6e5   : > { %v8238_v46 = vpop.eup %8237  ;;  %v7628_v55 = vmul.f32 -1.442695, %v12982_v6  ;;  %v5709_v22 = vadd.f32 %v8236_v0, %v5708_v10  ;;  %5927 = vmatmul.bf16.gmra.mxu3 %v5829_v27 }
 0x6e6   : > { %v12987_v13 = vadd.f32 1.0, %v8238_v46  ;;  %v12995_v57 = vpop.eup %8239 }
 0x6e7   : > { %8241 = vpow2.f32 %v7628_v55  ;;  %v5713_v4 = vsel %vm12998_vm3, %v8236_v0, %v5709_v22  ;;  %v5721_v24 = vmul.f32 %v12995_v57, %v12977_v36  ;;  %vm5726_vm9 = vweird.f32 %v12995_v57 }
 0x6e8   : > { %8243 = vrcp.f32 %v12987_v13  ;;  %v5718_v11 = vsel %vm5715_vm6, %v5717_v12, %v5713_v4  ;;  %v5746_v8 = vand.u32 2147483648, %v12987_v13  ;;  %vm5740_vm10 = vweird.f32 %v12987_v13  ;;  %vm5727_vm13 = vmor %vm5725_vm12, %vm5726_vm9 }
 0x6e9   : > { %v5819_v30 = vmul.f32 %v5718_v11, %v12931_v50  ;;  %v5722_v48 = vsub.f32 1.0, %v5721_v24  ;;  %v5744_v33 = vand.u32 2147483647, %v12987_v13  ;;  %v5729_v4 = vand.u32 2147483647, %v12977_v36 }
 0x6ea   : > { %v5498_v45 = vpop.f32.mrf.mxu2 }
 0x6eb   : > { %v13007_v54 = vadd.f32 %v12862_v35, %v5498_v45  ;;  %v5723_v27 = vmul.f32 %v12995_v57, %v5722_v48  ;;  %v5830_v55 = vpack.c.bf16 %v5819_v30, %v5818_v34  ;;  %vm5745_vm14 = vcmp.eq.f32.partialorder %v5744_v33, 8.507059e+37 }
 0x6ec   : > { %vm5730_vm15 = vcmp.eq.f32.partialorder %v5729_v4, 8.507059e+37 }
 0x6ed   : > { %v8242_v14 = vpop.eup %8241  ;;  %v7629_v41 = vmul.f32 -1.442695, %v13007_v54  ;;  %v5724_v17 = vadd.f32 %v12995_v57, %v5723_v27 }
 0x6ee   : > { %v8244_v43 = vpop.eup %8243  ;;  %v13014_v20 = vadd.f32 1.0, %v8242_v14 }
 0x6ef   : > { %v5736_v0 = vmul.f32 %v8244_v43, %v12987_v13  ;;  %8245 = vpow2.f32 %v7629_v41  ;;  %vm5741_vm8 = vweird.f32 %v8244_v43  ;;  %v5747_v13 = vor.u32 1.1754944e-38, %v5746_v8 }
 0x6f0   : > { %8247 = vrcp.f32 %v13014_v20  ;;  %vm13033_vm11 = vmor %vm5740_vm10, %vm5741_vm8  ;;  %v5728_v24 = vsel %vm5727_vm13, %v12995_v57, %v5724_v17  ;;  %v5761_v8 = vand.u32 2147483648, %v13014_v20  ;;  %vm5755_vm4 = vweird.f32 %v13014_v20 }
 0x6f1   : > { %v5737_v9 = vsub.f32 1.0, %v5736_v0  ;;  %v5732_v0 = vor.u32 1.1754944e-38, %v5731_v21  ;;  %v5759_v17 = vand.u32 2147483647, %v13014_v20 }
 0x6f2   : > { %v5501_v26 = vpop.f32.mrf.mxu2 }
 0x6f3   : > { %v5738_v10 = vmul.f32 %v8244_v43, %v5737_v9  ;;  %v13019_v46 = vadd.f32 %v12862_v35, %v5501_v26  ;;  %vm5760_vm7 = vcmp.eq.f32.partialorder %v5759_v17, 8.507059e+37  ;;  %v5991_v17 = vadd.f32 1.0, %v12381_v39 }
 0x6f5   : > { %v8246_v16 = vpop.eup %8245  ;;  %v7630_v22 = vmul.f32 -1.442695, %v13019_v46  ;;  %v5739_v50 = vadd.f32 %v8244_v43, %v5738_v10  ;;  %5932 = vmatmul.bf16.gmra.mxu3 %v5830_v55 }
 0x6f6   : > { %v13024_v5 = vadd.f32 1.0, %v8246_v16  ;;  %v8248_v7 = vpop.eup %8247 }
 0x6f7   : > { %8249 = vpow2.f32 %v7630_v22  ;;  %v5743_v12 = vsel %vm13033_vm11, %v8244_v43, %v5739_v50  ;;  %v5751_v41 = vmul.f32 %v8248_v7, %v13014_v20  ;;  %v5733_v43 = vsel %vm5730_vm15, %v5732_v0, %v5728_v24 }
 0x6f8   : > { %8251 = vrcp.f32 %v13024_v5  ;;  %v5748_v60 = vsel %vm5745_vm14, %v5747_v13, %v5743_v12  ;;  %v5820_v57 = vmul.f32 %v5733_v43, %v12945_v25  ;;  %v5776_v22 = vand.u32 2147483648, %v13024_v5 }
 0x6f9   : > { %v5821_v30 = vmul.f32 %v5748_v60, %v12970_v31  ;;  %v5752_v48 = vsub.f32 1.0, %v5751_v41  ;;  %vm5756_vm1 = vweird.f32 %v8248_v7  ;;  %vm5770_vm2 = vweird.f32 %v13024_v5 }
 0x6fa   : > { %v5503_v56 = vpop.f32.mrf.mxu2  ;;  %v5774_v31 = vand.u32 2147483647, %v13024_v5  ;;  %vm5757_vm5 = vmor %vm5755_vm4, %vm5756_vm1  ;;  %v5777_v21 = vor.u32 1.1754944e-38, %v5776_v22  ;;  %v5762_v12 = vor.u32 1.1754944e-38, %v5761_v8  ;;  %v13070_v22 = vld [vmem:[%s13852_s7 + $0x1] ss:$0 sm:$0xff] }
 0x6fb   : > { %v13042_v14 = vadd.f32 %v12862_v35, %v5503_v56  ;;  %v5753_v10 = vmul.f32 %v8248_v7, %v5752_v48  ;;  %v5831_v16 = vpack.c.bf16 %v5821_v30, %v5820_v57 }
 0x6fc   : > { %vm5775_vm6 = vcmp.eq.f32.partialorder %v5774_v31, 8.507059e+37 }
 0x6fd   : > { %v8250_v52 = vpop.eup %8249  ;;  %v7631_v38 = vmul.f32 -1.442695, %v13042_v14  ;;  %v5754_v50 = vadd.f32 %v8248_v7, %v5753_v10 }
 0x6fe   : > { %v8252_v11 = vpop.eup %8251  ;;  %v13048_v35 = vadd.f32 1.0, %v8250_v52 }
 0x6ff   : > { %v5766_v36 = vmul.f32 %v8252_v11, %v13024_v5  ;;  %8253 = vpow2.f32 %v7631_v38  ;;  %vm5771_vm0 = vweird.f32 %v8252_v11  ;;  %v5758_v45 = vsel %vm5757_vm5, %v8248_v7, %v5754_v50 }
 0x700   : > { %8255 = vrcp.f32 %v13048_v35  ;;  %vm5772_vm3 = vmor %vm5770_vm2, %vm5771_vm0  ;;  %v5763_v52 = vsel %vm5760_vm7, %v5762_v12, %v5758_v45  ;;  %v5791_v48 = vand.u32 2147483648, %v13048_v35  ;;  %vm5785_vm12 = vweird.f32 %v13048_v35  ;;  %v7792_v45 = vld [vmem:[#allocation14 + $0xb8] sm:$0xff] }
 0x701   : > { %v5767_v9 = vsub.f32 1.0, %v5766_v36  ;;  %v5822_v0 = vmul.f32 %v5763_v52, %v12982_v6  ;;  %v5988_v50 = vadd.f32 1.0, %v12375_v58  ;;  %6595 = vmatpush.bf16.msrb.mxu2 %v7792_v45 }
 0x703   : > { %v5768_v26 = vmul.f32 %v8252_v11, %v5767_v9 }
 0x705   : > { %v8254_v34 = vpop.eup %8253  ;;  %v5769_v55 = vadd.f32 %v8252_v11, %v5768_v26  ;;  %5937 = vmatmul.bf16.gmra.mxu3 %v5831_v16  ;;  %v5792_v26 = vor.u32 1.1754944e-38, %v5791_v48 }
 0x706   : > { %v5569_v27 = vadd.f32 1.0, %v8254_v34  ;;  %v8256_v25 = vpop.eup %8255 }
 0x707   : > { %v5773_v33 = vsel %vm5772_vm3, %v8252_v11, %v5769_v55  ;;  %v5781_v56 = vmul.f32 %v8256_v25, %v13048_v35  ;;  %vm5786_vm9 = vweird.f32 %v8256_v25 }
 0x708   : > { %8257 = vrcp.f32 %v5569_v27  ;;  %v5778_v13 = vsel %vm5775_vm6, %v5777_v21, %v5773_v33  ;;  %v5806_v7 = vand.u32 2147483648, %v5569_v27  ;;  %vm5800_vm10 = vweird.f32 %v5569_v27  ;;  %vm5787_vm13 = vmor %vm5785_vm12, %vm5786_vm9 }
 0x709   : > { %v5823_v24 = vmul.f32 %v5778_v13, %v13007_v54  ;;  %v5782_v41 = vsub.f32 1.0, %v5781_v56  ;;  %v5804_v30 = vand.u32 2147483647, %v5569_v27  ;;  %v5789_v54 = vand.u32 2147483647, %v13048_v35 }
 0x70a   : > { %v5807_v6 = vor.u32 1.1754944e-38, %v5806_v7 }
 0x70b   : > { %v5783_v11 = vmul.f32 %v8256_v25, %v5782_v41  ;;  %v5832_v60 = vpack.c.bf16 %v5823_v24, %v5822_v0  ;;  %vm5805_vm14 = vcmp.eq.f32.partialorder %v5804_v30, 8.507059e+37  ;;  %vm5790_vm15 = vcmp.eq.f32.partialorder %v5789_v54, 8.507059e+37  ;;  %v6011_v54 = vpop.f32.mrf.mxu0 }
 0x70c   : > { %v5997_v24 = vadd.f32 1.0, %v12417_v1 }
 0x70d   : > { %v5784_v43 = vadd.f32 %v8256_v25, %v5783_v11 }
 0x70e   : > { %v8258_v4 = vpop.eup %8257 }
 0x70f   : > { %v5796_v5 = vmul.f32 %v8258_v4, %v5569_v27  ;;  %vm5801_vm8 = vweird.f32 %v8258_v4  ;;  %v5788_v57 = vsel %vm5787_vm13, %v8256_v25, %v5784_v43  ;;  %v6003_v43 = vadd.f32 1.0, %v12458_v44 }
 0x710   : > { %vm5802_vm11 = vmor %vm5800_vm10, %vm5801_vm8  ;;  %v5793_v10 = vsel %vm5790_vm15, %v5792_v26, %v5788_v57 }
 0x711   : > { %v5797_v38 = vsub.f32 1.0, %v5796_v5  ;;  %v5824_v27 = vmul.f32 %v5793_v10, %v13019_v46  ;;  %v7791_v5 = vld [vmem:[#allocation14 + $0xb0] sm:$0xff] }
 0x712   : > { %6596 = vmatpush.bf16.msrb.mxu2 %v7791_v5 }
 0x713   : > { %v5798_v20 = vmul.f32 %v8258_v4, %v5797_v38 }
 0x715   : > { %v5799_v36 = vadd.f32 %v8258_v4, %v5798_v20  ;;  %5942 = vmatmul.bf16.gmra.mxu3 %v5832_v60  ;;  %v6000_v20 = vadd.f32 1.0, %v12430_v19 }
 0x717   : > { %v5803_v9 = vsel %vm5802_vm11, %v8258_v4, %v5799_v36  ;;  %v5994_v4 = vadd.f32 1.0, %v12391_v62  ;;  %v7790_v36 = vld [vmem:[#allocation14 + $0xa8] sm:$0xff] }
 0x718   : > { %v5808_v34 = vsel %vm5805_vm14, %v5807_v6, %v5803_v9  ;;  %6597 = vmatpush.bf16.msrb.mxu2 %v7790_v36  ;;  %v6006_v6 = vadd.f32 1.0, %v12478_v29  ;;  %v6014_v29 = vpop.f32.mrf.mxu0 }
 0x719   : > { %v5825_v16 = vmul.f32 %v5808_v34, %v13042_v14  ;;  %v7789_v34 = vld [vmem:[#allocation14 + $0xa0] sm:$0xff] }
 0x71b   : > { %v5833_v55 = vpack.c.bf16 %v5825_v16, %v5824_v27  ;;  %v6009_v16 = vadd.f32 1.0, %v12508_v59 }
 0x71c   : > { %6598 = vmatpush.bf16.msrb.mxu2 %v7789_v34 }
 0x720   : > { %v6017_v59 = vpop.f32.mrf.mxu0 }
 0x725   : > { %5947 = vmatmul.bf16.gmra.mxu3 %v5833_v55  ;;  %v5913_v35 = vpop.f32.mrf.mxu3 }
 0x726   : > { %v5914_v31 = vadd.f32 %v13070_v22, %v5913_v35 }
 0x728   : > { %v6035_v25 = vmul.f32 %v5988_v50, %v5914_v31  ;;  %v6012_v31 = vadd.f32 1.0, %v6011_v54 }
 0x72a   : > { %v13075_v8 = vadd.f32 %v6035_v25, %v12596_v40 }
 0x72c   : > { %6067 = vadd.xlane.f32.xlu1 %v13075_v8  ;;  %v6099_v46 = vmul.f32 %v13075_v8, %v13075_v8 }
 0x72d   : > { %v5915_v14 = vpop.f32.mrf.mxu3 }
 0x72e   : > { %v5916_v33 = vadd.f32 %v13070_v22, %v5915_v14  ;;  %6115 = vadd.xlane.f32.xlu0 %v6099_v46 }
 0x730   : > { %v6036_v21 = vmul.f32 %v5991_v17, %v5916_v33  ;;  %v7788_v17 = vld [vmem:[#allocation14 + $0x98] sm:$0xff] }
 0x731   : > { %6599 = vmatpush.bf16.msrb.mxu2 %v7788_v17 }
 0x732   : > { %v13083_v58 = vadd.f32 %v6036_v21, %v12604_v3  ;;  %v6015_v21 = vadd.f32 1.0, %v6014_v29 }
 0x734   : > { %6069 = vadd.xlane.f32.xlu2 %v13083_v58  ;;  %v6100_v40 = vmul.f32 %v13083_v58, %v13083_v58 }
 0x736   : > { %6117 = vadd.xlane.f32.xlu1 %v6100_v40 }
 0x748   : > { %v5918_v56 = vpop.f32.mrf.mxu3 }
 0x749   : > { %v5919_v39 = vadd.f32 %v13070_v22, %v5918_v56 }
 0x74b   : > { %v6037_v12 = vmul.f32 %v5994_v4, %v5919_v39  ;;  %v6020_v4 = vpop.f32.mrf.mxu0 }
 0x74d   : > { %v13091_v13 = vadd.f32 %v6037_v12, %v12612_v47  ;;  %v6018_v12 = vadd.f32 1.0, %v6017_v59 }
 0x74f   : > { %6071 = vadd.xlane.f32.xlu2 %v13091_v13  ;;  %v6101_v3 = vmul.f32 %v13091_v13, %v13091_v13 }
 0x750   : > { %v5920_v52 = vpop.f32.mrf.mxu3 }
 0x751   : > { %v5921_v41 = vadd.f32 %v13070_v22, %v5920_v52  ;;  %6119 = vadd.xlane.f32.xlu1 %v6101_v3 }
 0x753   : > { %v6038_v62 = vmul.f32 %v5997_v24, %v5921_v41  ;;  %v7787_v24 = vld [vmem:[#allocation14 + $0x90] sm:$0xff]  ;;  %v6023_v41 = vpop.f32.mrf.mxu0 }
 0x754   : > { %6600 = vmatpush.bf16.msrb.mxu2 %v7787_v24  ;;  %v6024_v36 = vadd.f32 1.0, %v6023_v41 }
 0x755   : > { %v13099_v38 = vadd.f32 %v6038_v62, %v12620_v32 }
 0x757   : > { %6073 = vadd.xlane.f32.xlu0 %v13099_v38  ;;  %v6102_v47 = vmul.f32 %v13099_v38, %v13099_v38 }
 0x758   : > { %v5923_v0 = vpop.f32.mrf.mxu3 }
 0x759   : > { %v5924_v11 = vadd.f32 %v13070_v22, %v5923_v0  ;;  %6121 = vadd.xlane.f32.xlu2 %v6102_v47  ;;  %v6021_v47 = vadd.f32 1.0, %v6020_v4 }
 0x75b   : > { %v6039_v60 = vmul.f32 %v6000_v20, %v5924_v11 }
 0x75d   : > { %v13107_v1 = vadd.f32 %v6039_v60, %v12628_v42 }
 0x75f   : > { %6075 = vadd.xlane.f32.xlu0 %v13107_v1  ;;  %v6103_v32 = vmul.f32 %v13107_v1, %v13107_v1 }
 0x760   : > { %v5925_v7 = vpop.f32.mrf.mxu3 }
 0x761   : > { %v5926_v30 = vadd.f32 %v13070_v22, %v5925_v7  ;;  %6123 = vadd.xlane.f32.xlu2 %v6103_v32  ;;  %v6026_v7 = vpop.f32.mrf.mxu0 }
 0x762   : > { %v6027_v54 = vadd.f32 1.0, %v6026_v7 }
 0x763   : > { %v6040_v19 = vmul.f32 %v6003_v43, %v5926_v30 }
 0x765   : > { %v13115_v48 = vadd.f32 %v6040_v19, %v12636_v2  ;;  %v7786_v19 = vld [vmem:[#allocation14 + $0x88] sm:$0xff] }
 0x766   : > { %6601 = vmatpush.bf16.msrb.mxu2 %v7786_v19 }
 0x767   : > { %6077 = vadd.xlane.f32.xlu1 %v13115_v48  ;;  %v6104_v42 = vmul.f32 %v13115_v48, %v13115_v48 }
 0x768   : > { %v5928_v9 = vpop.f32.mrf.mxu3 }
 0x769   : > { %v5929_v57 = vadd.f32 %v13070_v22, %v5928_v9  ;;  %6125 = vadd.xlane.f32.xlu0 %v6104_v42 }
 0x76b   : > { %v6041_v44 = vmul.f32 %v6006_v6, %v5929_v57 }
 0x76d   : > { %v13123_v26 = vadd.f32 %v6041_v44, %v12644_v15 }
 0x76f   : > { %6079 = vadd.xlane.f32.xlu1 %v13123_v26  ;;  %v6105_v2 = vmul.f32 %v13123_v26, %v13123_v26 }
 0x770   : > { %v5930_v10 = vpop.f32.mrf.mxu3 }
 0x771   : > { %v5931_v27 = vadd.f32 %v13070_v22, %v5930_v10  ;;  %6127 = vadd.xlane.f32.xlu0 %v6105_v2  ;;  %v6029_v2 = vpop.f32.mrf.mxu0 }
 0x773   : > { %v6042_v55 = vmul.f32 %v6009_v16, %v5931_v27 }
 0x775   : > { %v13131_v35 = vadd.f32 %v6042_v55, %v12652_v18 }
 0x777   : > { %6081 = vadd.xlane.f32.xlu2 %v13131_v35  ;;  %v6106_v15 = vmul.f32 %v13131_v35, %v13131_v35 }
 0x778   : > { %v5933_v50 = vpop.f32.mrf.mxu3 }
 0x779   : > { %v5934_v25 = vadd.f32 %v13070_v22, %v5933_v50  ;;  %6129 = vadd.xlane.f32.xlu1 %v6106_v15  ;;  %v6030_v50 = vadd.f32 1.0, %v6029_v2 }
 0x77b   : > { %v6043_v46 = vmul.f32 %v6012_v31, %v5934_v25 }
 0x77d   : > { %v13138_v14 = vadd.f32 %v6043_v46, %v12660_v37 }
 0x77f   : > { %6083 = vadd.xlane.f32.xlu2 %v13138_v14  ;;  %v6107_v18 = vmul.f32 %v13138_v14, %v13138_v14 }
 0x780   : > { %v5935_v33 = vpop.f32.mrf.mxu3 }
 0x781   : > { %v5936_v40 = vadd.f32 %v13070_v22, %v5935_v33  ;;  %6131 = vadd.xlane.f32.xlu1 %v6107_v18  ;;  %v6453_v18 = vpop.f32.mrf.mxu1 }
 0x783   : > { %v6044_v45 = vmul.f32 %v6015_v21, %v5936_v40  ;;  %v6032_v40 = vpop.f32.mrf.mxu0 }
 0x785   : > { %v13145_v56 = vadd.f32 %v6044_v45, %v12668_v49 }
 0x787   : > { %6085 = vadd.xlane.f32.xlu0 %v13145_v56  ;;  %v6108_v37 = vmul.f32 %v13145_v56, %v13145_v56 }
 0x788   : > { %v5938_v39 = vpop.f32.mrf.mxu3 }
 0x789   : > { %v5939_v5 = vadd.f32 %v13070_v22, %v5938_v39  ;;  %6133 = vadd.xlane.f32.xlu2 %v6108_v37 }
 0x78b   : > { %v6045_v3 = vmul.f32 %v6018_v12, %v5939_v5  ;;  %v6033_v5 = vadd.f32 1.0, %v6032_v40 }
 0x78d   : > { %v13152_v52 = vadd.f32 %v6045_v3, %v12676_v53 }
 0x78f   : > { %6087 = vadd.xlane.f32.xlu0 %v13152_v52  ;;  %v6109_v49 = vmul.f32 %v13152_v52, %v13152_v52 }
 0x790   : > { %v5940_v62 = vpop.f32.mrf.mxu3 }
 0x791   : > { %v5941_v0 = vadd.f32 %v13070_v22, %v5940_v62  ;;  %6135 = vadd.xlane.f32.xlu2 %v6109_v49 }
 0x793   : > { %v6046_v20 = vmul.f32 %v6021_v47, %v5941_v0  ;;  %v6456_v47 = vpop.f32.mrf.mxu1 }
 0x795   : > { %v13159_v11 = vadd.f32 %v6046_v20, %v12684_v51 }
 0x797   : > { %6089 = vadd.xlane.f32.xlu1 %v13159_v11  ;;  %v6110_v53 = vmul.f32 %v13159_v11, %v13159_v11 }
 0x798   : > { %v5943_v60 = vpop.f32.mrf.mxu3 }
 0x799   : > { %v5944_v32 = vadd.f32 %v13070_v22, %v5943_v60  ;;  %6137 = vadd.xlane.f32.xlu0 %v6110_v53 }
 0x79b   : > { %v6047_v43 = vmul.f32 %v6024_v36, %v5944_v32 }
 0x79d   : > { %v13166_v30 = vadd.f32 %v6047_v43, %v12692_v63  ;;  %v13196_v43 = vpop.f32.mrf.mxu1 }
 0x79f   : > { %6091 = vadd.xlane.f32.xlu1 %v13166_v30  ;;  %v6111_v51 = vmul.f32 %v13166_v30, %v13166_v30  ;;  %v6068_v6 = vpop.xlane.xlu1 %6067 }
 0x7a0   : > { %v5945_v42 = vpop.f32.mrf.mxu3  ;;  %v13172_v57 = vmul.f32 0.0625, %v6068_v6 }
 0x7a1   : > { %v5946_v9 = vadd.f32 %v13070_v22, %v5945_v42  ;;  %6139 = vadd.xlane.f32.xlu0 %v6111_v51  ;;  %v6116_v34 = vpop.xlane.xlu0 %6115 }
 0x7a2   : > { %v6179_v63 = vmul.f32 %v13172_v57, %v13172_v57  ;;  %v6163_v10 = vmul.f32 0.0625, %v6116_v34  ;;  %v6211_v42 = vsub.f32 %v13075_v8, %v13172_v57  ;;  %v6457_v34 = vadd.f32 1.0, %v6456_v47 }
 0x7a3   : > { %v6048_v44 = vmul.f32 %v6027_v54, %v5946_v9 }
 0x7a4   : > { %v6195_v27 = vsub.f32 %v6163_v10, %v6179_v63 }
 0x7a5   : > { %v13177_v16 = vadd.f32 %v6048_v44, %v12700_v23 }
 0x7a6   : > { %v6227_v15 = vadd.f32 1e-05, %v6195_v27 }
 0x7a7   : > { %6093 = vadd.xlane.f32.xlu2 %v13177_v16  ;;  %v6112_v29 = vmul.f32 %v13177_v16, %v13177_v16  ;;  %v6070_v25 = vpop.xlane.xlu2 %6069 }
 0x7a8   : > { %v5948_v55 = vpop.f32.mrf.mxu3  ;;  %8259 = vrsqrt.f32 %v6227_v15  ;;  %v6148_v46 = vmul.f32 0.0625, %v6070_v25  ;;  %vm6249_vm1 = vweird.f32 %v6227_v15  ;;  %v6462_v25 = vpop.f32.mrf.mxu1 }
 0x7a9   : > { %v5949_v31 = vadd.f32 %v13070_v22, %v5948_v55  ;;  %6141 = vadd.xlane.f32.xlu1 %v6112_v29  ;;  %v6118_v17 = vpop.xlane.xlu1 %6117  ;;  %v6454_v55 = vadd.f32 1.0, %v6453_v18 }
 0x7aa   : > { %v6180_v23 = vmul.f32 %v6148_v46, %v6148_v46  ;;  %v6164_v33 = vmul.f32 0.0625, %v6118_v17  ;;  %v6212_v54 = vsub.f32 %v13083_v58, %v6148_v46 }
 0x7ab   : > { %v6049_v59 = vmul.f32 %v6030_v50, %v5949_v31 }
 0x7ac   : > { %v6196_v45 = vsub.f32 %v6164_v33, %v6180_v23 }
 0x7ad   : > { %v13184_v21 = vadd.f32 %v6049_v59, %v12708_v28 }
 0x7ae   : > { %v8260_v37 = vpop.eup %8259  ;;  %v6228_v12 = vadd.f32 1e-05, %v6196_v45 }
 0x7af   : > { %6095 = vadd.xlane.f32.xlu2 %v13184_v21  ;;  %v6113_v4 = vmul.f32 %v13184_v21, %v13184_v21  ;;  %v6244_v24 = vmul.f32 %v8260_v37, %v6227_v15  ;;  %vm6250_vm0 = vweird.f32 %v8260_v37 }
 0x7b0   : > { %v5950_v39 = vpop.f32.mrf.mxu3  ;;  %8261 = vrsqrt.f32 %v6228_v12  ;;  %vm6251_vm3 = vmor %vm6249_vm1, %vm6250_vm0  ;;  %vm6259_vm4 = vweird.f32 %v6228_v12 }
 0x7b1   : > { %v5951_v3 = vadd.f32 %v13070_v22, %v5950_v39  ;;  %6143 = vadd.xlane.f32.xlu1 %v6113_v4  ;;  %v6245_v41 = vmul.f32 %v8260_v37, %v6244_v24  ;;  %v7785_v22 = vld [vmem:[#allocation14 + $0x80] sm:$0xff] }
 0x7b2   : > { %6602 = vmatpush.bf16.msrb.mxu2 %v7785_v22 }
 0x7b3   : > { %v6050_v49 = vmul.f32 %v6033_v5, %v5951_v3  ;;  %v6246_v62 = vmul.f32 0.5, %v6245_v41  ;;  %v13207_v5 = vpop.f32.mrf.mxu1 }
 0x7b5   : > { %v13191_v28 = vadd.f32 %v6050_v49, %v12720_v61  ;;  %v6247_v53 = vsub.f32 1.5, %v6246_v62 }
 0x7b6   : > { %v8262_v20 = vpop.eup %8261 }
 0x7b7   : > { %6097 = vadd.xlane.f32.xlu0 %v13191_v28  ;;  %v6114_v0 = vmul.f32 %v13191_v28, %v13191_v28  ;;  %v6254_v60 = vmul.f32 %v8262_v20, %v6228_v12  ;;  %v6248_v32 = vmul.f32 %v8260_v37, %v6247_v53  ;;  %vm6260_vm2 = vweird.f32 %v8262_v20 }
 0x7b8   : > { %vm6261_vm5 = vmor %vm6259_vm4, %vm6260_vm2 }
 0x7b9   : > { %6145 = vadd.xlane.f32.xlu2 %v6114_v0  ;;  %v6255_v36 = vmul.f32 %v8262_v20, %v6254_v60  ;;  %v6252_v19 = vsel %vm6251_vm3, %v8260_v37, %v6248_v32 }
 0x7ba   : > { %v6403_v2 = vmul.f32 %v6252_v19, %v6211_v42 }
 0x7bb   : > { %v6256_v7 = vmul.f32 0.5, %v6255_v36  ;;  %v13215_v42 = vpop.f32.mrf.mxu1 }
 0x7bc   : > { %v6501_v31 = vmul.f32 %v6454_v55, %v6403_v2 }
 0x7bd   : > { %v6257_v61 = vsub.f32 1.5, %v6256_v7 }
 0x7bf   : > { %v6258_v51 = vmul.f32 %v8262_v20, %v6257_v61 }
 0x7c1   : > { %v6262_v6 = vsel %vm6261_vm5, %v8262_v20, %v6258_v51 }
 0x7c2   : > { %v6072_v9 = vpop.xlane.xlu2 %6071  ;;  %v6404_v63 = vmul.f32 %v6262_v6, %v6212_v54 }
 0x7c3   : > { %v13201_v44 = vmul.f32 0.0625, %v6072_v9 }
 0x7c4   : > { %v6120_v10 = vpop.xlane.xlu1 %6119  ;;  %v6502_v15 = vmul.f32 %v6457_v34, %v6404_v63 }
 0x7c5   : > { %v6181_v27 = vmul.f32 %v13201_v44, %v13201_v44  ;;  %v6165_v29 = vmul.f32 0.0625, %v6120_v10  ;;  %v6213_v10 = vsub.f32 %v13091_v13, %v13201_v44 }
 0x7c6   : > { %v6517_v59 = vpack.c.bf16 %v6502_v15, %v6501_v31 }
 0x7c7   : > { %v6197_v50 = vsub.f32 %v6165_v29, %v6181_v27 }
 0x7c8   : > { %6603 = vmatmul.bf16.vlgmr.msrb.gmra.mxu2 %v6517_v59 }
 0x7c9   : > { %v6229_v57 = vadd.f32 1e-05, %v6197_v50 }
 0x7ca   : > { %v6074_v46 = vpop.xlane.xlu0 %6073 }
 0x7cb   : > { %8263 = vrsqrt.f32 %v6229_v57  ;;  %v6150_v17 = vmul.f32 0.0625, %v6074_v46  ;;  %vm6269_vm7 = vweird.f32 %v6229_v57  ;;  %v6460_v46 = vadd.f32 1.0, %v13196_v43 }
 0x7cc   : > { %v6122_v23 = vpop.xlane.xlu2 %6121 }
 0x7cd   : > { %v6182_v33 = vmul.f32 %v6150_v17, %v6150_v17  ;;  %v6166_v40 = vmul.f32 0.0625, %v6122_v23  ;;  %v6214_v50 = vsub.f32 %v13099_v38, %v6150_v17 }
 0x7cf   : > { %v6198_v45 = vsub.f32 %v6166_v40, %v6182_v33  ;;  %v6463_v40 = vadd.f32 1.0, %v6462_v25 }
 0x7d1   : > { %v8264_v4 = vpop.eup %8263  ;;  %v6230_v37 = vadd.f32 1e-05, %v6198_v45 }
 0x7d2   : > { %v6264_v39 = vmul.f32 %v8264_v4, %v6229_v57  ;;  %v6076_v12 = vpop.xlane.xlu0 %6075  ;;  %vm6270_vm6 = vweird.f32 %v8264_v4 }
 0x7d3   : > { %8265 = vrsqrt.f32 %v6230_v37  ;;  %v13205_v18 = vmul.f32 0.0625, %v6076_v12  ;;  %vm13217_vm8 = vmor %vm6269_vm7, %vm6270_vm6  ;;  %vm6279_vm10 = vweird.f32 %v6230_v37 }
 0x7d4   : > { %v6265_v3 = vmul.f32 %v8264_v4, %v6264_v39  ;;  %v6124_v24 = vpop.xlane.xlu2 %6123 }
 0x7d5   : > { %v6183_v49 = vmul.f32 %v13205_v18, %v13205_v18  ;;  %v6167_v41 = vmul.f32 0.0625, %v6124_v24 }
 0x7d6   : > { %v6266_v62 = vmul.f32 0.5, %v6265_v3  ;;  %v13231_v3 = vpop.f32.mrf.mxu1 }
 0x7d7   : > { %v6199_v47 = vsub.f32 %v6167_v41, %v6183_v49 }
 0x7d8   : > { %v6267_v0 = vsub.f32 1.5, %v6266_v62 }
 0x7d9   : > { %v8266_v20 = vpop.eup %8265  ;;  %v6231_v53 = vadd.f32 1e-05, %v6199_v47 }
 0x7da   : > { %v6274_v60 = vmul.f32 %v8266_v20, %v6230_v37  ;;  %v6078_v22 = vpop.xlane.xlu1 %6077  ;;  %v6268_v32 = vmul.f32 %v8264_v4, %v6267_v0  ;;  %vm6280_vm9 = vweird.f32 %v8266_v20 }
 0x7db   : > { %8267 = vrsqrt.f32 %v6231_v53  ;;  %v13211_v36 = vmul.f32 0.0625, %v6078_v22  ;;  %vm6281_vm11 = vmor %vm6279_vm10, %vm6280_vm9  ;;  %vm6289_vm13 = vweird.f32 %v6231_v53 }
 0x7dc   : > { %v6275_v7 = vmul.f32 %v8266_v20, %v6274_v60  ;;  %v6126_v61 = vpop.xlane.xlu0 %6125  ;;  %v6272_v2 = vsel %vm13217_vm8, %v8264_v4, %v6268_v32 }
 0x7dd   : > { %v6184_v19 = vmul.f32 %v13211_v36, %v13211_v36  ;;  %v6168_v51 = vmul.f32 0.0625, %v6126_v61  ;;  %v6405_v57 = vmul.f32 %v6272_v2, %v6213_v10 }
 0x7de   : > { %v6276_v54 = vmul.f32 0.5, %v6275_v7  ;;  %v13248_v2 = vpop.f32.mrf.mxu1 }
 0x7df   : > { %v6200_v6 = vsub.f32 %v6168_v51, %v6184_v19  ;;  %v6503_v12 = vmul.f32 %v6460_v46, %v6405_v57 }
 0x7e0   : > { %v6277_v34 = vsub.f32 1.5, %v6276_v54 }
 0x7e1   : > { %v8268_v63 = vpop.eup %8267  ;;  %v6232_v27 = vadd.f32 1e-05, %v6200_v6  ;;  %v6215_v6 = vsub.f32 %v13107_v1, %v13205_v18 }
 0x7e2   : > { %v6278_v29 = vmul.f32 %v8266_v20, %v6277_v34  ;;  %v6284_v55 = vmul.f32 %v8268_v63, %v6231_v53  ;;  %v6080_v15 = vpop.xlane.xlu1 %6079  ;;  %vm6290_vm12 = vweird.f32 %v8268_v63 }
 0x7e3   : > { %8269 = vrsqrt.f32 %v6232_v27  ;;  %v13226_v31 = vmul.f32 0.0625, %v6080_v15  ;;  %vm13240_vm14 = vmor %vm6289_vm13, %vm6290_vm12  ;;  %vm6299_vm0 = vweird.f32 %v6232_v27 }
 0x7e4   : > { %v6285_v59 = vmul.f32 %v8268_v63, %v6284_v55  ;;  %v6128_v23 = vpop.xlane.xlu0 %6127  ;;  %v6282_v33 = vsel %vm6281_vm11, %v8266_v20, %v6278_v29  ;;  %v6216_v55 = vsub.f32 %v13115_v48, %v13211_v36 }
 0x7e5   : > { %v6185_v44 = vmul.f32 %v13226_v31, %v13226_v31  ;;  %v6169_v45 = vmul.f32 0.0625, %v6128_v23  ;;  %v6406_v4 = vmul.f32 %v6282_v33, %v6214_v50  ;;  %v6466_v50 = vadd.f32 1.0, %v13207_v5 }
 0x7e6   : > { %v6286_v37 = vmul.f32 0.5, %v6285_v59  ;;  %v6469_v59 = vadd.f32 1.0, %v13215_v42 }
 0x7e7   : > { %v6201_v39 = vsub.f32 %v6169_v45, %v6185_v44  ;;  %v6504_v17 = vmul.f32 %v6463_v40, %v6406_v4 }
 0x7e8   : > { %v6287_v24 = vsub.f32 1.5, %v6286_v37 }
 0x7e9   : > { %v8270_v49 = vpop.eup %8269  ;;  %v13233_v41 = vadd.f32 1e-05, %v6201_v39  ;;  %v6518_v43 = vpack.c.bf16 %v6504_v17, %v6503_v12 }
 0x7ea   : > { %v6294_v62 = vmul.f32 %v8270_v49, %v6232_v27  ;;  %v6082_v47 = vpop.xlane.xlu2 %6081  ;;  %v6288_v0 = vmul.f32 %v8268_v63, %v6287_v24  ;;  %vm6300_vm15 = vweird.f32 %v8270_v49  ;;  %v7800_v24 = vld [vmem:[#allocation16 + $0xb8] sm:$0xff] }
 0x7eb   : > { %8271 = vrsqrt.f32 %v13233_v41  ;;  %v13236_v25 = vmul.f32 0.0625, %v6082_v47  ;;  %6608 = vmatmul.bf16.gmra.mxu2 %v6518_v43  ;;  %vm6301_vm1 = vmor %vm6299_vm0, %vm6300_vm15  ;;  %7042 = vmatpush.bf16.msrb.mxu3 %v7800_v24  ;;  %vm6309_vm3 = vweird.f32 %v13233_v41 }
 0x7ec   : > { %v6295_v20 = vmul.f32 %v8270_v49, %v6294_v62  ;;  %v6130_v60 = vpop.xlane.xlu1 %6129  ;;  %v6292_v54 = vsel %vm13240_vm14, %v8268_v63, %v6288_v0 }
 0x7ed   : > { %v6186_v22 = vmul.f32 %v13236_v25, %v13236_v25  ;;  %v6170_v32 = vmul.f32 0.0625, %v6130_v60  ;;  %v6407_v63 = vmul.f32 %v6292_v54, %v6215_v6 }
 0x7ee   : > { %v6296_v7 = vmul.f32 0.5, %v6295_v20 }
 0x7ef   : > { %v6202_v19 = vsub.f32 %v6170_v32, %v6186_v22  ;;  %v6505_v36 = vmul.f32 %v6466_v50, %v6407_v63 }
 0x7f0   : > { %v6297_v51 = vsub.f32 1.5, %v6296_v7 }
 0x7f1   : > { %v8272_v9 = vpop.eup %8271  ;;  %v6234_v34 = vadd.f32 1e-05, %v6202_v19 }
 0x7f2   : > { %v6298_v10 = vmul.f32 %v8270_v49, %v6297_v51  ;;  %v6304_v53 = vmul.f32 %v8272_v9, %v13233_v41  ;;  %v6084_v29 = vpop.xlane.xlu2 %6083  ;;  %vm6310_vm2 = vweird.f32 %v8272_v9  ;;  %v6217_v51 = vsub.f32 %v13123_v26, %v13226_v31 }
 0x7f3   : > { %8273 = vrsqrt.f32 %v6234_v34  ;;  %v13253_v15 = vmul.f32 0.0625, %v6084_v29  ;;  %vm13269_vm4 = vmor %vm6309_vm3, %vm6310_vm2  ;;  %vm6319_vm6 = vweird.f32 %v6234_v34  ;;  %v6475_v31 = vadd.f32 1.0, %v13248_v2 }
 0x7f4   : > { %v6305_v57 = vmul.f32 %v8272_v9, %v6304_v53  ;;  %v6132_v18 = vpop.xlane.xlu1 %6131  ;;  %v6302_v46 = vsel %vm6301_vm1, %v8270_v49, %v6298_v10  ;;  %v13264_v49 = vpop.f32.mrf.mxu1  ;;  %v6218_v53 = vsub.f32 %v13131_v35, %v13236_v25 }
 0x7f5   : > { %v6187_v27 = vmul.f32 %v13253_v15, %v13253_v15  ;;  %v6171_v23 = vmul.f32 0.0625, %v6132_v18  ;;  %v6408_v33 = vmul.f32 %v6302_v46, %v6216_v55 }
 0x7f6   : > { %v6306_v40 = vmul.f32 0.5, %v6305_v57 }
 0x7f7   : > { %v6203_v44 = vsub.f32 %v6171_v23, %v6187_v27  ;;  %v6506_v45 = vmul.f32 %v6469_v59, %v6408_v33 }
 0x7f8   : > { %v6307_v4 = vsub.f32 1.5, %v6306_v40 }
 0x7f9   : > { %v8274_v37 = vpop.eup %8273  ;;  %v13259_v39 = vadd.f32 1e-05, %v6203_v44  ;;  %v6519_v12 = vpack.c.bf16 %v6506_v45, %v6505_v36 }
 0x7fa   : > { %v6314_v5 = vmul.f32 %v8274_v37, %v6234_v34  ;;  %v6086_v17 = vpop.xlane.xlu0 %6085  ;;  %v6308_v43 = vmul.f32 %v8272_v9, %v6307_v4  ;;  %vm6320_vm5 = vweird.f32 %v8274_v37 }
 0x7fb   : > { %8275 = vrsqrt.f32 %v13259_v39  ;;  %v13262_v42 = vmul.f32 0.0625, %v6086_v17  ;;  %6613 = vmatmul.bf16.gmra.mxu2 %v6519_v12  ;;  %vm6321_vm7 = vmor %vm6319_vm6, %vm6320_vm5  ;;  %vm6329_vm9 = vweird.f32 %v13259_v39 }
 0x7fc   : > { %v6315_v62 = vmul.f32 %v8274_v37, %v6314_v5  ;;  %v6134_v47 = vpop.xlane.xlu2 %6133  ;;  %v6312_v61 = vsel %vm13269_vm4, %v8272_v9, %v6308_v43  ;;  %v6472_v9 = vadd.f32 1.0, %v13231_v3  ;;  %v6480_v59 = vpop.f32.mrf.mxu1 }
 0x7fd   : > { %v6188_v0 = vmul.f32 %v13262_v42, %v13262_v42  ;;  %v6172_v20 = vmul.f32 0.0625, %v6134_v47  ;;  %v6409_v55 = vmul.f32 %v6312_v61, %v6217_v51 }
 0x7fe   : > { %v6316_v60 = vmul.f32 0.5, %v6315_v62 }
 0x7ff   : > { %v6204_v32 = vsub.f32 %v6172_v20, %v6188_v0  ;;  %v6507_v23 = vmul.f32 %v6472_v9, %v6409_v55 }
 0x800   : > { %v6317_v7 = vsub.f32 1.5, %v6316_v60 }
 0x801   : > { %v8276_v19 = vpop.eup %8275  ;;  %v6236_v54 = vadd.f32 1e-05, %v6204_v32 }
 0x802   : > { %v6318_v6 = vmul.f32 %v8274_v37, %v6317_v7  ;;  %v6324_v41 = vmul.f32 %v8276_v19, %v13259_v39  ;;  %v6088_v10 = vpop.xlane.xlu0 %6087  ;;  %vm6330_vm8 = vweird.f32 %v8276_v19  ;;  %v6219_v7 = vsub.f32 %v13138_v14, %v13253_v15 }
 0x803   : > { %8277 = vrsqrt.f32 %v6236_v54  ;;  %v13280_v29 = vmul.f32 0.0625, %v6088_v10  ;;  %vm13294_vm10 = vmor %vm6329_vm9, %vm6330_vm8  ;;  %vm6339_vm12 = vweird.f32 %v6236_v54  ;;  %v6481_v15 = vadd.f32 1.0, %v6480_v59 }
 0x804   : > { %v6325_v63 = vmul.f32 %v8276_v19, %v6324_v41  ;;  %v6136_v50 = vpop.xlane.xlu2 %6135  ;;  %v6322_v57 = vsel %vm6321_vm7, %v8274_v37, %v6318_v6  ;;  %v7799_v37 = vld [vmem:[#allocation16 + $0xb0] sm:$0xff]  ;;  %v13298_v20 = vpop.f32.mrf.mxu1  ;;  %v6220_v41 = vsub.f32 %v13145_v56, %v13262_v42 }
 0x805   : > { %v6189_v34 = vmul.f32 %v13280_v29, %v13280_v29  ;;  %v6173_v18 = vmul.f32 0.0625, %v6136_v50  ;;  %v6410_v46 = vmul.f32 %v6322_v57, %v6218_v53  ;;  %7043 = vmatpush.bf16.msrb.mxu3 %v7799_v37 }
 0x806   : > { %v6326_v27 = vmul.f32 0.5, %v6325_v63 }
 0x807   : > { %v6205_v25 = vsub.f32 %v6173_v18, %v6189_v34  ;;  %v6508_v33 = vmul.f32 %v6475_v31, %v6410_v46 }
 0x808   : > { %v6327_v40 = vsub.f32 1.5, %v6326_v27 }
 0x809   : > { %v8278_v44 = vpop.eup %8277  ;;  %v13286_v36 = vadd.f32 1e-05, %v6205_v25  ;;  %v6520_v3 = vpack.c.bf16 %v6508_v33, %v6507_v23 }
 0x80a   : > { %v6334_v45 = vmul.f32 %v8278_v44, %v6236_v54  ;;  %v6090_v4 = vpop.xlane.xlu1 %6089  ;;  %v6328_v12 = vmul.f32 %v8276_v19, %v6327_v40  ;;  %vm6340_vm11 = vweird.f32 %v8278_v44 }
 0x80b   : > { %8279 = vrsqrt.f32 %v13286_v36  ;;  %v13289_v2 = vmul.f32 0.0625, %v6090_v4  ;;  %6618 = vmatmul.bf16.gmra.mxu2 %v6520_v3  ;;  %vm6341_vm13 = vmor %vm6339_vm12, %vm6340_vm11  ;;  %v7798_v3 = vld [vmem:[#allocation16 + $0xa8] sm:$0xff]  ;;  %vm6349_vm15 = vweird.f32 %v13286_v36 }
 0x80c   : > { %v6335_v5 = vmul.f32 %v8278_v44, %v6334_v45  ;;  %v6138_v17 = vpop.xlane.xlu0 %6137  ;;  %v6332_v22 = vsel %vm13294_vm10, %v8276_v19, %v6328_v12  ;;  %v6478_v19 = vadd.f32 1.0, %v13264_v49  ;;  %v6486_v33 = vpop.f32.mrf.mxu1  ;;  %7044 = vmatpush.bf16.msrb.mxu3 %v7798_v3 }
 0x80d   : > { %v6190_v24 = vmul.f32 %v13289_v2, %v13289_v2  ;;  %v6174_v43 = vmul.f32 0.0625, %v6138_v17  ;;  %v6411_v53 = vmul.f32 %v6332_v22, %v6219_v7 }
 0x80e   : > { %v6336_v62 = vmul.f32 0.5, %v6335_v5 }
 0x80f   : > { %v6206_v0 = vsub.f32 %v6174_v43, %v6190_v24  ;;  %v6509_v18 = vmul.f32 %v6478_v19, %v6411_v53 }
 0x810   : > { %v6337_v60 = vsub.f32 1.5, %v6336_v62 }
 0x811   : > { %v8280_v32 = vpop.eup %8279  ;;  %v6238_v61 = vadd.f32 1e-05, %v6206_v0  ;;  %v6221_v0 = vsub.f32 %v13152_v52, %v13280_v29 }
 0x812   : > { %v6338_v51 = vmul.f32 %v8278_v44, %v6337_v60  ;;  %v6344_v39 = vmul.f32 %v8280_v32, %v13286_v36  ;;  %v6092_v6 = vpop.xlane.xlu1 %6091  ;;  %vm6350_vm14 = vweird.f32 %v8280_v32 }
 0x813   : > { %8281 = vrsqrt.f32 %v6238_v61  ;;  %v13307_v10 = vmul.f32 0.0625, %v6092_v6  ;;  %vm13320_vm0 = vmor %vm6349_vm15, %vm6350_vm14  ;;  %vm6359_vm2 = vweird.f32 %v6238_v61 }
 0x814   : > { %v6345_v55 = vmul.f32 %v8280_v32, %v6344_v39  ;;  %v6140_v9 = vpop.xlane.xlu0 %6139  ;;  %v6342_v63 = vsel %vm6341_vm13, %v8278_v44, %v6338_v51  ;;  %v7797_v51 = vld [vmem:[#allocation16 + $0xa0] sm:$0xff]  ;;  %v6222_v39 = vsub.f32 %v13159_v11, %v13289_v2  ;;  %v6489_v53 = vpop.f32.mrf.mxu1 }
 0x815   : > { %v6191_v54 = vmul.f32 %v13307_v10, %v13307_v10  ;;  %v6175_v50 = vmul.f32 0.0625, %v6140_v9  ;;  %v6412_v57 = vmul.f32 %v6342_v63, %v6220_v41  ;;  %v6484_v41 = vadd.f32 1.0, %v13298_v20  ;;  %7045 = vmatpush.bf16.msrb.mxu3 %v7797_v51 }
 0x816   : > { %v6346_v31 = vmul.f32 0.5, %v6345_v55  ;;  %v7796_v55 = vld [vmem:[#allocation16 + $0x98] sm:$0xff]  ;;  %v6487_v9 = vadd.f32 1.0, %v6486_v33  ;;  %v7795_v33 = vld [vmem:[#allocation16 + $0x90] sm:$0xff] }
 0x817   : > { %v6207_v34 = vsub.f32 %v6175_v50, %v6191_v54  ;;  %v6510_v42 = vmul.f32 %v6481_v15, %v6412_v57 }
 0x818   : > { %v6347_v46 = vsub.f32 1.5, %v6346_v31 }
 0x819   : > { %v8282_v27 = vpop.eup %8281  ;;  %v13312_v25 = vadd.f32 1e-05, %v6207_v34  ;;  %v6521_v23 = vpack.c.bf16 %v6510_v42, %v6509_v18  ;;  %7046 = vmatpush.bf16.msrb.mxu3 %v7796_v55 }
 0x81a   : > { %v6354_v49 = vmul.f32 %v8282_v27, %v6238_v61  ;;  %v6094_v40 = vpop.xlane.xlu2 %6093  ;;  %v6348_v44 = vmul.f32 %v8280_v32, %v6347_v46  ;;  %vm6360_vm1 = vweird.f32 %v8282_v27 }
 0x81b   : > { %8283 = vrsqrt.f32 %v13312_v25  ;;  %v13315_v59 = vmul.f32 0.0625, %v6094_v40  ;;  %6623 = vmatmul.bf16.gmra.mxu2 %v6521_v23  ;;  %vm6361_vm3 = vmor %vm6359_vm2, %vm6360_vm1  ;;  %vm6369_vm5 = vweird.f32 %v13312_v25 }
 0x81c   : > { %v6355_v45 = vmul.f32 %v8282_v27, %v6354_v49  ;;  %v6142_v4 = vpop.xlane.xlu1 %6141  ;;  %v6352_v62 = vsel %vm13320_vm0, %v8280_v32, %v6348_v44 }
 0x81d   : > { %v6192_v37 = vmul.f32 %v13315_v59, %v13315_v59  ;;  %v6176_v12 = vmul.f32 0.0625, %v6142_v4  ;;  %v6413_v32 = vmul.f32 %v6352_v62, %v6221_v0  ;;  %7047 = vmatpush.bf16.msrb.mxu3 %v7795_v33  ;;  %v6492_v4 = vpop.f32.mrf.mxu1 }
 0x81e   : > { %v6356_v5 = vmul.f32 0.5, %v6355_v45 }
 0x81f   : > { %v6208_v24 = vsub.f32 %v6176_v12, %v6192_v37  ;;  %v6511_v57 = vmul.f32 %v6484_v41, %v6413_v32  ;;  %v6493_v32 = vadd.f32 1.0, %v6492_v4  ;;  %v7794_v4 = vld [vmem:[#allocation16 + $0x88] sm:$0xff] }
 0x820   : > { %v6357_v43 = vsub.f32 1.5, %v6356_v5 }
 0x821   : > { %v13326_v47 = vpop.eup %8283  ;;  %v6240_v60 = vadd.f32 1e-05, %v6208_v24  ;;  %7048 = vmatpush.bf16.msrb.mxu3 %v7794_v4 }
 0x822   : > { %v6358_v22 = vmul.f32 %v8282_v27, %v6357_v43  ;;  %v6364_v36 = vmul.f32 %v13326_v47, %v13312_v25  ;;  %v6096_v7 = vpop.xlane.xlu2 %6095  ;;  %vm6370_vm4 = vweird.f32 %v13326_v47  ;;  %v6223_v43 = vsub.f32 %v13166_v30, %v13307_v10 }
 0x823   : > { %8285 = vrsqrt.f32 %v6240_v60  ;;  %v13334_v6 = vmul.f32 0.0625, %v6096_v7  ;;  %vm6371_vm6 = vmor %vm6369_vm5, %vm6370_vm4  ;;  %vm6379_vm8 = vweird.f32 %v6240_v60 }
 0x824   : > { %v6365_v29 = vmul.f32 %v13326_v47, %v6364_v36  ;;  %v6144_v19 = vpop.xlane.xlu1 %6143  ;;  %v6362_v61 = vsel %vm6361_vm3, %v8282_v27, %v6358_v22  ;;  %v6224_v36 = vsub.f32 %v13177_v16, %v13315_v59 }
 0x825   : > { %v6193_v63 = vmul.f32 %v13334_v6, %v13334_v6  ;;  %v6177_v15 = vmul.f32 0.0625, %v6144_v19  ;;  %v6414_v2 = vmul.f32 %v6362_v61, %v6222_v39  ;;  %v6490_v39 = vadd.f32 1.0, %v6489_v53  ;;  %v6495_v61 = vpop.f32.mrf.mxu1 }
 0x826   : > { %v6366_v54 = vmul.f32 0.5, %v6365_v29 }
 0x827   : > { %v6209_v50 = vsub.f32 %v6177_v15, %v6193_v63  ;;  %v6512_v31 = vmul.f32 %v6487_v9, %v6414_v2 }
 0x828   : > { %v6367_v34 = vsub.f32 1.5, %v6366_v54  ;;  %v6225_v54 = vsub.f32 %v13184_v21, %v13334_v6 }
 0x829   : > { %v8286_v20 = vpop.eup %8285  ;;  %v6241_v18 = vadd.f32 1e-05, %v6209_v50  ;;  %v6522_v42 = vpack.c.bf16 %v6512_v31, %v6511_v57 }
 0x82a   : > { %v6374_v46 = vmul.f32 %v8286_v20, %v6240_v60  ;;  %v6098_v23 = vpop.xlane.xlu0 %6097  ;;  %v6368_v49 = vmul.f32 %v13326_v47, %v6367_v34  ;;  %vm6380_vm7 = vweird.f32 %v8286_v20 }
 0x82b   : > { %8287 = vrsqrt.f32 %v6241_v18  ;;  %v6162_v27 = vmul.f32 0.0625, %v6098_v23  ;;  %6628 = vmatmul.bf16.gmra.mxu2 %v6522_v42  ;;  %vm6381_vm9 = vmor %vm6379_vm8, %vm6380_vm7  ;;  %vm6389_vm11 = vweird.f32 %v6241_v18  ;;  %v6496_v42 = vadd.f32 1.0, %v6495_v61 }
 0x82c   : > { %v6375_v40 = vmul.f32 %v8286_v20, %v6374_v46  ;;  %v6146_v3 = vpop.xlane.xlu2 %6145  ;;  %v6372_v17 = vsel %vm6371_vm6, %v13326_v47, %v6368_v49 }
 0x82d   : > { %v6194_v44 = vmul.f32 %v6162_v27, %v6162_v27  ;;  %v6178_v45 = vmul.f32 0.0625, %v6146_v3  ;;  %v6415_v25 = vmul.f32 %v6372_v17, %v6223_v43  ;;  %v6498_v50 = vpop.f32.mrf.mxu1  ;;  %v6226_v31 = vsub.f32 %v13191_v28, %v6162_v27 }
 0x82e   : > { %v6376_v37 = vmul.f32 0.5, %v6375_v40  ;;  %v6499_v46 = vadd.f32 1.0, %v6498_v50  ;;  %v13354_v40 = vld [vmem:[%s13591_s11 + $0x2] ss:$0 sm:$0xff] }
 0x82f   : > { %v6210_v12 = vsub.f32 %v6178_v45, %v6194_v44  ;;  %v6513_v29 = vmul.f32 %v6490_v39, %v6415_v25 }
 0x830   : > { %v6377_v5 = vsub.f32 1.5, %v6376_v37 }
 0x831   : > { %v8288_v24 = vpop.eup %8287  ;;  %v6242_v62 = vadd.f32 1e-05, %v6210_v12 }
 0x832   : > { %v6378_v0 = vmul.f32 %v8286_v20, %v6377_v5  ;;  %v6384_v22 = vmul.f32 %v8288_v24, %v6241_v18  ;;  %vm6390_vm10 = vweird.f32 %v8288_v24 }
 0x833   : > { %8289 = vrsqrt.f32 %v6242_v62  ;;  %vm6391_vm12 = vmor %vm6389_vm11, %vm6390_vm10  ;;  %vm6399_vm14 = vweird.f32 %v6242_v62 }
 0x834   : > { %v6385_v7 = vmul.f32 %v8288_v24, %v6384_v22  ;;  %v6382_v51 = vsel %vm6381_vm9, %v8286_v20, %v6378_v0 }
 0x835   : > { %v6416_v41 = vmul.f32 %v6382_v51, %v6224_v36 }
 0x836   : > { %v6386_v47 = vmul.f32 0.5, %v6385_v7 }
 0x837   : > { %v6514_v19 = vmul.f32 %v6493_v32, %v6416_v41 }
 0x838   : > { %v6387_v10 = vsub.f32 1.5, %v6386_v47 }
 0x839   : > { %v8290_v55 = vpop.eup %8289  ;;  %v6523_v9 = vpack.c.bf16 %v6514_v19, %v6513_v29 }
 0x83a   : > { %v6394_v60 = vmul.f32 %v8290_v55, %v6242_v62  ;;  %v6388_v63 = vmul.f32 %v8288_v24, %v6387_v10  ;;  %vm6400_vm13 = vweird.f32 %v8290_v55 }
 0x83b   : > { %6633 = vmatmul.bf16.gmra.mxu2 %v6523_v9  ;;  %vm6401_vm15 = vmor %vm6399_vm14, %vm6400_vm13 }
 0x83c   : > { %v6395_v59 = vmul.f32 %v8290_v55, %v6394_v60  ;;  %v6392_v53 = vsel %vm6391_vm12, %v8288_v24, %v6388_v63 }
 0x83d   : > { %v6417_v34 = vmul.f32 %v6392_v53, %v6225_v54  ;;  %v7793_v53 = vld [vmem:[#allocation16 + $0x80] sm:$0xff] }
 0x83e   : > { %v6396_v15 = vmul.f32 0.5, %v6395_v59  ;;  %7049 = vmatpush.bf16.msrb.mxu3 %v7793_v53 }
 0x83f   : > { %v6515_v18 = vmul.f32 %v6496_v42, %v6417_v34 }
 0x840   : > { %v6397_v2 = vsub.f32 1.5, %v6396_v15 }
 0x842   : > { %v6398_v57 = vmul.f32 %v8290_v55, %v6397_v2 }
 0x844   : > { %v6402_v20 = vsel %vm6401_vm15, %v8290_v55, %v6398_v57 }
 0x845   : > { %v6418_v23 = vmul.f32 %v6402_v20, %v6226_v31 }
 0x847   : > { %v6516_v33 = vmul.f32 %v6499_v46, %v6418_v23 }
 0x849   : > { %v6524_v49 = vpack.c.bf16 %v6516_v33, %v6515_v18 }
 0x84b   : > { %6638 = vmatmul.bf16.gmra.mxu2 %v6524_v49  ;;  %v6604_v6 = vpop.f32.mrf.mxu2 }
 0x84c   : > { %v6605_v3 = vadd.f32 %v13354_v40, %v6604_v6 }
 0x84e   : > { %v7698_v44 = vmul.f32 -1.442695, %v6605_v3 }
 0x850   : > { %8291 = vpow2.f32 %v7698_v44 }
 0x853   : > { %v6606_v27 = vpop.f32.mrf.mxu2 }
 0x854   : > { %v6607_v45 = vadd.f32 %v13354_v40, %v6606_v27 }
 0x856   : > { %v8292_v37 = vpop.eup %8291  ;;  %v7699_v12 = vmul.f32 -1.442695, %v6607_v45 }
 0x857   : > { %v6692_v5 = vadd.f32 1.0, %v8292_v37 }
 0x858   : > { %8293 = vpow2.f32 %v7699_v12 }
 0x859   : > { %8295 = vrcp.f32 %v6692_v5  ;;  %v6719_v51 = vand.u32 2147483648, %v6692_v5  ;;  %vm6713_vm1 = vweird.f32 %v6692_v5  ;;  %v6717_v39 = vand.u32 2147483647, %v6692_v5 }
 0x85b   : > { %v6720_v55 = vor.u32 1.1754944e-38, %v6719_v51  ;;  %vm6718_vm4 = vcmp.eq.f32.partialorder %v6717_v39, 8.507059e+37 }
 0x85e   : > { %v8294_v17 = vpop.eup %8293 }
 0x85f   : > { %v8296_v24 = vpop.eup %8295  ;;  %v6693_v43 = vadd.f32 1.0, %v8294_v17 }
 0x860   : > { %v6709_v62 = vmul.f32 %v8296_v24, %v6692_v5  ;;  %vm6714_vm0 = vweird.f32 %v8296_v24 }
 0x861   : > { %8297 = vrcp.f32 %v6693_v43  ;;  %vm6715_vm2 = vmor %vm6713_vm1, %vm6714_vm0  ;;  %v6734_v47 = vand.u32 2147483648, %v6693_v43  ;;  %v6732_v10 = vand.u32 2147483647, %v6693_v43  ;;  %vm6728_vm5 = vweird.f32 %v6693_v43 }
 0x862   : > { %v6710_v0 = vsub.f32 1.0, %v6709_v62 }
 0x863   : > { %v6735_v59 = vor.u32 1.1754944e-38, %v6734_v47  ;;  %vm6733_vm7 = vcmp.eq.f32.partialorder %v6732_v10, 8.507059e+37 }
 0x864   : > { %v6711_v22 = vmul.f32 %v8296_v24, %v6710_v0 }
 0x866   : > { %v6712_v25 = vadd.f32 %v8296_v24, %v6711_v22 }
 0x867   : > { %v8298_v36 = vpop.eup %8297 }
 0x868   : > { %v6724_v7 = vmul.f32 %v8298_v36, %v6693_v43  ;;  %v6716_v19 = vsel %vm6715_vm2, %v8296_v24, %v6712_v25  ;;  %vm6729_vm3 = vweird.f32 %v8298_v36 }
 0x869   : > { %v6721_v63 = vsel %vm6718_vm4, %v6720_v55, %v6716_v19  ;;  %vm6730_vm6 = vmor %vm6728_vm5, %vm6729_vm3 }
 0x86a   : > { %v6725_v32 = vsub.f32 1.0, %v6724_v7  ;;  %v6948_v54 = vmul.f32 %v6721_v63, %v6605_v3 }
 0x86c   : > { %v6726_v61 = vmul.f32 %v8298_v36, %v6725_v32 }
 0x86e   : > { %v6609_v41 = vpop.f32.mrf.mxu2  ;;  %v6727_v60 = vadd.f32 %v8298_v36, %v6726_v61 }
 0x86f   : > { %v13359_v29 = vadd.f32 %v13354_v40, %v6609_v41 }
 0x870   : > { %v6731_v15 = vsel %vm6730_vm6, %v8298_v36, %v6727_v60 }
 0x871   : > { %v7700_v9 = vmul.f32 -1.442695, %v13359_v29  ;;  %v6736_v2 = vsel %vm6733_vm7, %v6735_v59, %v6731_v15 }
 0x872   : > { %v6949_v50 = vmul.f32 %v6736_v2, %v6607_v45 }
 0x873   : > { %8299 = vpow2.f32 %v7700_v9 }
 0x874   : > { %v6964_v34 = vpack.c.bf16 %v6949_v50, %v6948_v54 }
 0x876   : > { %v6611_v57 = vpop.f32.mrf.mxu2  ;;  %7050 = vmatmul.bf16.vlgmr.msrb.gmra.mxu3 %v6964_v34 }
 0x877   : > { %v6612_v31 = vadd.f32 %v13354_v40, %v6611_v57 }
 0x879   : > { %v8300_v20 = vpop.eup %8299  ;;  %v7701_v42 = vmul.f32 -1.442695, %v6612_v31 }
 0x87a   : > { %v6694_v46 = vadd.f32 1.0, %v8300_v20 }
 0x87b   : > { %8301 = vpow2.f32 %v7701_v42 }
 0x87c   : > { %8303 = vrcp.f32 %v6694_v46  ;;  %v6749_v0 = vand.u32 2147483648, %v6694_v46  ;;  %vm6743_vm9 = vweird.f32 %v6694_v46  ;;  %v6747_v22 = vand.u32 2147483647, %v6694_v46 }
 0x87e   : > { %v6614_v23 = vpop.f32.mrf.mxu2  ;;  %v6750_v19 = vor.u32 1.1754944e-38, %v6749_v0  ;;  %vm6748_vm12 = vcmp.eq.f32.partialorder %v6747_v22, 8.507059e+37 }
 0x87f   : > { %v13364_v18 = vadd.f32 %v13354_v40, %v6614_v23 }
 0x881   : > { %v8302_v33 = vpop.eup %8301  ;;  %v7702_v49 = vmul.f32 -1.442695, %v13364_v18 }
 0x882   : > { %v8304_v6 = vpop.eup %8303  ;;  %v6695_v3 = vadd.f32 1.0, %v8302_v33 }
 0x883   : > { %v6739_v44 = vmul.f32 %v8304_v6, %v6694_v46  ;;  %8305 = vpow2.f32 %v7702_v49  ;;  %vm6744_vm8 = vweird.f32 %v8304_v6 }
 0x884   : > { %8307 = vrcp.f32 %v6695_v3  ;;  %vm13374_vm10 = vmor %vm6743_vm9, %vm6744_vm8  ;;  %v6762_v7 = vand.u32 2147483647, %v6695_v3  ;;  %v6764_v51 = vand.u32 2147483648, %v6695_v3  ;;  %vm6758_vm13 = vweird.f32 %v6695_v3 }
 0x885   : > { %v6740_v27 = vsub.f32 1.0, %v6739_v44 }
 0x886   : > { %v6616_v45 = vpop.f32.mrf.mxu2  ;;  %v6765_v63 = vor.u32 1.1754944e-38, %v6764_v51  ;;  %vm6763_vm15 = vcmp.eq.f32.partialorder %v6762_v7, 8.507059e+37 }
 0x887   : > { %v6741_v4 = vmul.f32 %v8304_v6, %v6740_v27  ;;  %v13368_v37 = vadd.f32 %v13354_v40, %v6616_v45 }
 0x889   : > { %v8306_v12 = vpop.eup %8305  ;;  %v7703_v5 = vmul.f32 -1.442695, %v13368_v37  ;;  %v6742_v43 = vadd.f32 %v8304_v6, %v6741_v4 }
 0x88a   : > { %v8308_v17 = vpop.eup %8307  ;;  %v13371_v24 = vadd.f32 1.0, %v8306_v12 }
 0x88b   : > { %v6754_v62 = vmul.f32 %v8308_v17, %v6695_v3  ;;  %8309 = vpow2.f32 %v7703_v5  ;;  %v6746_v32 = vsel %vm13374_vm10, %v8304_v6, %v6742_v43  ;;  %vm6759_vm11 = vweird.f32 %v8308_v17 }
 0x88c   : > { %8311 = vrcp.f32 %v13371_v24  ;;  %v6751_v60 = vsel %vm6748_vm12, %v6750_v19, %v6746_v32  ;;  %vm6760_vm14 = vmor %vm6758_vm13, %vm6759_vm11  ;;  %vm6773_vm1 = vweird.f32 %v13371_v24 }
 0x88d   : > { %v6755_v36 = vsub.f32 1.0, %v6754_v62  ;;  %v6950_v54 = vmul.f32 %v6751_v60, %v13359_v29  ;;  %v6779_v29 = vand.u32 2147483648, %v13371_v24 }
 0x88e   : > { %v6619_v39 = vpop.f32.mrf.mxu2 }
 0x88f   : > { %v6756_v41 = vmul.f32 %v8308_v17, %v6755_v36  ;;  %v13381_v47 = vadd.f32 %v13354_v40, %v6619_v39  ;;  %v6780_v0 = vor.u32 1.1754944e-38, %v6779_v29 }
 0x891   : > { %v8310_v61 = vpop.eup %8309  ;;  %v6757_v10 = vadd.f32 %v8308_v17, %v6756_v41  ;;  %v7704_v55 = vmul.f32 -1.442695, %v13381_v47 }
 0x892   : > { %v8312_v9 = vpop.eup %8311  ;;  %v6697_v59 = vadd.f32 1.0, %v8310_v61 }
 0x893   : > { %v6761_v15 = vsel %vm6760_vm14, %v8308_v17, %v6757_v10  ;;  %v6769_v2 = vmul.f32 %v8312_v9, %v13371_v24  ;;  %8313 = vpow2.f32 %v7704_v55  ;;  %vm6774_vm0 = vweird.f32 %v8312_v9 }
 0x894   : > { %v6766_v53 = vsel %vm6763_vm15, %v6765_v63, %v6761_v15  ;;  %8315 = vrcp.f32 %v6697_v59  ;;  %vm13396_vm2 = vmor %vm6773_vm1, %vm6774_vm0  ;;  %v6792_v4 = vand.u32 2147483647, %v6697_v59  ;;  %v6794_v12 = vand.u32 2147483648, %v6697_v59 }
 0x895   : > { %v6951_v50 = vmul.f32 %v6766_v53, %v6612_v31  ;;  %v6770_v57 = vsub.f32 1.0, %v6769_v2  ;;  %v6777_v31 = vand.u32 2147483647, %v13371_v24  ;;  %vm6788_vm5 = vweird.f32 %v6697_v59 }
 0x896   : > { %v6621_v34 = vpop.f32.mrf.mxu2  ;;  %v6795_v51 = vor.u32 1.1754944e-38, %v6794_v12  ;;  %vm6793_vm7 = vcmp.eq.f32.partialorder %v6792_v4, 8.507059e+37 }
 0x897   : > { %v6771_v20 = vmul.f32 %v8312_v9, %v6770_v57  ;;  %v13387_v42 = vadd.f32 %v13354_v40, %v6621_v34  ;;  %v6965_v46 = vpack.c.bf16 %v6951_v50, %v6950_v54  ;;  %vm6778_vm4 = vcmp.eq.f32.partialorder %v6777_v31, 8.507059e+37 }
 0x899   : > { %v8314_v23 = vpop.eup %8313  ;;  %v7705_v33 = vmul.f32 -1.442695, %v13387_v42  ;;  %7055 = vmatmul.bf16.gmra.mxu3 %v6965_v46  ;;  %v6772_v3 = vadd.f32 %v8312_v9, %v6771_v20 }
 0x89a   : > { %v8316_v49 = vpop.eup %8315  ;;  %v13390_v6 = vadd.f32 1.0, %v8314_v23 }
 0x89b   : > { %v6784_v44 = vmul.f32 %v8316_v49, %v6697_v59  ;;  %8317 = vpow2.f32 %v7705_v33  ;;  %v6776_v17 = vsel %vm13396_vm2, %v8312_v9, %v6772_v3  ;;  %vm6789_vm3 = vweird.f32 %v8316_v49 }
 0x89c   : > { %8319 = vrcp.f32 %v13390_v6  ;;  %v6781_v7 = vsel %vm6778_vm4, %v6780_v0, %v6776_v17  ;;  %vm6790_vm6 = vmor %vm6788_vm5, %vm6789_vm3  ;;  %vm6803_vm9 = vweird.f32 %v13390_v6 }
 0x89d   : > { %v6785_v27 = vsub.f32 1.0, %v6784_v44  ;;  %v6952_v61 = vmul.f32 %v6781_v7, %v13364_v18  ;;  %v6809_v18 = vand.u32 2147483648, %v13390_v6 }
 0x89e   : > { %v6624_v5 = vpop.f32.mrf.mxu2 }
 0x89f   : > { %v6786_v43 = vmul.f32 %v8316_v49, %v6785_v27  ;;  %v13403_v62 = vadd.f32 %v13354_v40, %v6624_v5  ;;  %v6810_v29 = vor.u32 1.1754944e-38, %v6809_v18 }
 0x8a1   : > { %v8318_v22 = vpop.eup %8317  ;;  %v6787_v24 = vadd.f32 %v8316_v49, %v6786_v43  ;;  %v7706_v36 = vmul.f32 -1.442695, %v13403_v62 }
 0x8a2   : > { %v8320_v25 = vpop.eup %8319  ;;  %v6699_v39 = vadd.f32 1.0, %v8318_v22 }
 0x8a3   : > { %v6791_v32 = vsel %vm6790_vm6, %v8316_v49, %v6787_v24  ;;  %v6799_v41 = vmul.f32 %v8320_v25, %v13390_v6  ;;  %8321 = vpow2.f32 %v7706_v36  ;;  %vm6804_vm8 = vweird.f32 %v8320_v25 }
 0x8a4   : > { %v6796_v19 = vsel %vm6793_vm7, %v6795_v51, %v6791_v32  ;;  %8323 = vrcp.f32 %v6699_v39  ;;  %vm13419_vm10 = vmor %vm6803_vm9, %vm6804_vm8  ;;  %v6822_v46 = vand.u32 2147483647, %v6699_v39  ;;  %v6824_v23 = vand.u32 2147483648, %v6699_v39 }
 0x8a5   : > { %v6953_v10 = vmul.f32 %v6796_v19, %v13368_v37  ;;  %v6800_v55 = vsub.f32 1.0, %v6799_v41  ;;  %v6807_v37 = vand.u32 2147483647, %v13390_v6  ;;  %vm6818_vm13 = vweird.f32 %v6699_v39 }
 0x8a6   : > { %v6626_v9 = vpop.f32.mrf.mxu2  ;;  %v6825_v12 = vor.u32 1.1754944e-38, %v6824_v23  ;;  %vm6823_vm15 = vcmp.eq.f32.partialorder %v6822_v46, 8.507059e+37 }
 0x8a7   : > { %v6801_v60 = vmul.f32 %v8320_v25, %v6800_v55  ;;  %v13410_v63 = vadd.f32 %v13354_v40, %v6626_v9  ;;  %v6966_v59 = vpack.c.bf16 %v6953_v10, %v6952_v61  ;;  %vm6808_vm12 = vcmp.eq.f32.partialorder %v6807_v37, 8.507059e+37 }
 0x8a9   : > { %v8322_v15 = vpop.eup %8321  ;;  %v7707_v2 = vmul.f32 -1.442695, %v13410_v63  ;;  %7060 = vmatmul.bf16.gmra.mxu3 %v6966_v59  ;;  %v6802_v50 = vadd.f32 %v8320_v25, %v6801_v60 }
 0x8aa   : > { %v8324_v53 = vpop.eup %8323  ;;  %v13413_v54 = vadd.f32 1.0, %v8322_v15 }
 0x8ab   : > { %v6814_v57 = vmul.f32 %v8324_v53, %v6699_v39  ;;  %8325 = vpow2.f32 %v7707_v2  ;;  %v6806_v49 = vsel %vm13419_vm10, %v8320_v25, %v6802_v50  ;;  %vm6819_vm11 = vweird.f32 %v8324_v53 }
 0x8ac   : > { %8327 = vrcp.f32 %v13413_v54  ;;  %v6811_v4 = vsel %vm6808_vm12, %v6810_v29, %v6806_v49  ;;  %vm6820_vm14 = vmor %vm6818_vm13, %vm6819_vm11  ;;  %vm6833_vm1 = vweird.f32 %v13413_v54 }
 0x8ad   : > { %v6815_v34 = vsub.f32 1.0, %v6814_v57  ;;  %v6954_v22 = vmul.f32 %v6811_v4, %v13381_v47  ;;  %v6839_v47 = vand.u32 2147483648, %v13413_v54 }
 0x8ae   : > { %v6629_v33 = vpop.f32.mrf.mxu2 }
 0x8af   : > { %v6816_v3 = vmul.f32 %v8324_v53, %v6815_v34  ;;  %v13426_v44 = vadd.f32 %v13354_v40, %v6629_v33  ;;  %v6840_v18 = vor.u32 1.1754944e-38, %v6839_v47 }
 0x8b1   : > { %v8326_v31 = vpop.eup %8325  ;;  %v6817_v6 = vadd.f32 %v8324_v53, %v6816_v3  ;;  %v7708_v27 = vmul.f32 -1.442695, %v13426_v44 }
 0x8b2   : > { %v8328_v45 = vpop.eup %8327  ;;  %v6701_v5 = vadd.f32 1.0, %v8326_v31 }
 0x8b3   : > { %v6821_v17 = vsel %vm6820_vm14, %v8324_v53, %v6817_v6  ;;  %v6829_v43 = vmul.f32 %v8328_v45, %v13413_v54  ;;  %8329 = vpow2.f32 %v7708_v27  ;;  %vm6834_vm0 = vweird.f32 %v8328_v45 }
 0x8b4   : > { %v6826_v0 = vsel %vm6823_vm15, %v6825_v12, %v6821_v17  ;;  %8331 = vrcp.f32 %v6701_v5  ;;  %vm13442_vm2 = vmor %vm6833_vm1, %vm6834_vm0  ;;  %v6852_v59 = vand.u32 2147483647, %v6701_v5  ;;  %v6854_v15 = vand.u32 2147483648, %v6701_v5 }
 0x8b5   : > { %v6955_v24 = vmul.f32 %v6826_v0, %v13387_v42  ;;  %v6830_v36 = vsub.f32 1.0, %v6829_v43  ;;  %v6837_v42 = vand.u32 2147483647, %v13413_v54  ;;  %vm6848_vm5 = vweird.f32 %v6701_v5 }
 0x8b6   : > { %v6631_v25 = vpop.f32.mrf.mxu2  ;;  %v6855_v23 = vor.u32 1.1754944e-38, %v6854_v15  ;;  %vm6853_vm7 = vcmp.eq.f32.partialorder %v6852_v59, 8.507059e+37 }
 0x8b7   : > { %v6831_v7 = vmul.f32 %v8328_v45, %v6830_v36  ;;  %v13433_v51 = vadd.f32 %v13354_v40, %v6631_v25  ;;  %v6967_v39 = vpack.c.bf16 %v6955_v24, %v6954_v22  ;;  %vm6838_vm4 = vcmp.eq.f32.partialorder %v6837_v42, 8.507059e+37 }
 0x8b9   : > { %v8330_v32 = vpop.eup %8329  ;;  %v7709_v41 = vmul.f32 -1.442695, %v13433_v51  ;;  %7065 = vmatmul.bf16.gmra.mxu3 %v6967_v39  ;;  %v6832_v10 = vadd.f32 %v8328_v45, %v6831_v7 }
 0x8ba   : > { %v8332_v19 = vpop.eup %8331  ;;  %v13436_v61 = vadd.f32 1.0, %v8330_v32 }
 0x8bb   : > { %v6844_v55 = vmul.f32 %v8332_v19, %v6701_v5  ;;  %8333 = vpow2.f32 %v7709_v41  ;;  %v6836_v53 = vsel %vm13442_vm2, %v8328_v45, %v6832_v10  ;;  %vm6849_vm3 = vweird.f32 %v8332_v19 }
 0x8bc   : > { %8335 = vrcp.f32 %v13436_v61  ;;  %v6841_v46 = vsel %vm6838_vm4, %v6840_v18, %v6836_v53  ;;  %vm6850_vm6 = vmor %vm6848_vm5, %vm6849_vm3  ;;  %vm6863_vm9 = vweird.f32 %v13436_v61 }
 0x8bd   : > { %v6845_v9 = vsub.f32 1.0, %v6844_v55  ;;  %v6956_v31 = vmul.f32 %v6841_v46, %v13403_v62  ;;  %v6869_v62 = vand.u32 2147483648, %v13436_v61 }
 0x8be   : > { %v6634_v2 = vpop.f32.mrf.mxu2 }
 0x8bf   : > { %v6846_v50 = vmul.f32 %v8332_v19, %v6845_v9  ;;  %v13449_v57 = vadd.f32 %v13354_v40, %v6634_v2  ;;  %v6870_v47 = vor.u32 1.1754944e-38, %v6869_v62 }
 0x8c1   : > { %v8334_v37 = vpop.eup %8333  ;;  %v6847_v54 = vadd.f32 %v8332_v19, %v6846_v50  ;;  %v7710_v34 = vmul.f32 -1.442695, %v13449_v57 }
 0x8c2   : > { %v8336_v20 = vpop.eup %8335  ;;  %v6703_v33 = vadd.f32 1.0, %v8334_v37 }
 0x8c3   : > { %v6851_v49 = vsel %vm6850_vm6, %v8332_v19, %v6847_v54  ;;  %v6859_v3 = vmul.f32 %v8336_v20, %v13436_v61  ;;  %8337 = vpow2.f32 %v7710_v34  ;;  %vm6864_vm8 = vweird.f32 %v8336_v20 }
 0x8c4   : > { %v6856_v29 = vsel %vm6853_vm7, %v6855_v23, %v6851_v49  ;;  %8339 = vrcp.f32 %v6703_v33  ;;  %vm13465_vm10 = vmor %vm6863_vm9, %vm6864_vm8  ;;  %v6882_v39 = vand.u32 2147483647, %v6703_v33  ;;  %v6884_v32 = vand.u32 2147483648, %v6703_v33 }
 0x8c5   : > { %v6957_v6 = vmul.f32 %v6856_v29, %v13410_v63  ;;  %v6860_v27 = vsub.f32 1.0, %v6859_v3  ;;  %v6867_v63 = vand.u32 2147483647, %v13436_v61  ;;  %vm6878_vm13 = vweird.f32 %v6703_v33 }
 0x8c6   : > { %v6636_v45 = vpop.f32.mrf.mxu2  ;;  %v6885_v15 = vor.u32 1.1754944e-38, %v6884_v32  ;;  %vm6883_vm15 = vcmp.eq.f32.partialorder %v6882_v39, 8.507059e+37 }
 0x8c7   : > { %v6861_v4 = vmul.f32 %v8336_v20, %v6860_v27  ;;  %v13456_v12 = vadd.f32 %v13354_v40, %v6636_v45  ;;  %v6968_v5 = vpack.c.bf16 %v6957_v6, %v6956_v31  ;;  %vm6868_vm12 = vcmp.eq.f32.partialorder %v6867_v63, 8.507059e+37 }
 0x8c9   : > { %v8338_v17 = vpop.eup %8337  ;;  %v7711_v43 = vmul.f32 -1.442695, %v13456_v12  ;;  %7070 = vmatmul.bf16.gmra.mxu3 %v6968_v5  ;;  %v6862_v24 = vadd.f32 %v8336_v20, %v6861_v4 }
 0x8ca   : > { %v8340_v0 = vpop.eup %8339  ;;  %v13459_v22 = vadd.f32 1.0, %v8338_v17 }
 0x8cb   : > { %v6874_v36 = vmul.f32 %v8340_v0, %v6703_v33  ;;  %8341 = vpow2.f32 %v7711_v43  ;;  %v6866_v19 = vsel %vm13465_vm10, %v8336_v20, %v6862_v24  ;;  %vm6879_vm11 = vweird.f32 %v8340_v0 }
 0x8cc   : > { %8343 = vrcp.f32 %v13459_v22  ;;  %v6871_v59 = vsel %vm6868_vm12, %v6870_v47, %v6866_v19  ;;  %vm6880_vm14 = vmor %vm6878_vm13, %vm6879_vm11  ;;  %vm6893_vm1 = vweird.f32 %v13459_v22 }
 0x8cd   : > { %v6875_v25 = vsub.f32 1.0, %v6874_v36  ;;  %v6958_v37 = vmul.f32 %v6871_v59, %v13426_v44  ;;  %v6899_v44 = vand.u32 2147483648, %v13459_v22 }
 0x8ce   : > { %v6639_v41 = vpop.f32.mrf.mxu2 }
 0x8cf   : > { %v6876_v10 = vmul.f32 %v8340_v0, %v6875_v25  ;;  %v13472_v55 = vadd.f32 %v13354_v40, %v6639_v41  ;;  %v6900_v43 = vor.u32 1.1754944e-38, %v6899_v44 }
 0x8d1   : > { %v8342_v42 = vpop.eup %8341  ;;  %v6877_v61 = vadd.f32 %v8340_v0, %v6876_v10  ;;  %v7712_v9 = vmul.f32 -1.442695, %v13472_v55 }
 0x8d2   : > { %v8344_v60 = vpop.eup %8343  ;;  %v6705_v2 = vadd.f32 1.0, %v8342_v42 }
 0x8d3   : > { %v6881_v53 = vsel %vm6880_vm14, %v8340_v0, %v6877_v61  ;;  %v6889_v50 = vmul.f32 %v8344_v60, %v13459_v22  ;;  %8345 = vpow2.f32 %v7712_v9  ;;  %vm6894_vm0 = vweird.f32 %v8344_v60 }
 0x8d4   : > { %v6886_v18 = vsel %vm6883_vm15, %v6885_v15, %v6881_v53  ;;  %8347 = vrcp.f32 %v6705_v2  ;;  %vm6895_vm2 = vmor %vm6893_vm1, %vm6894_vm0  ;;  %v6914_v45 = vand.u32 2147483648, %v6705_v2  ;;  %v6912_v17 = vand.u32 2147483647, %v6705_v2 }
 0x8d5   : > { %v6959_v54 = vmul.f32 %v6886_v18, %v13433_v51  ;;  %v6890_v34 = vsub.f32 1.0, %v6889_v50  ;;  %v6897_v51 = vand.u32 2147483647, %v13459_v22  ;;  %vm6908_vm5 = vweird.f32 %v6705_v2 }
 0x8d6   : > { %v6641_v20 = vpop.f32.mrf.mxu2  ;;  %v6915_v63 = vor.u32 1.1754944e-38, %v6914_v45  ;;  %vm6913_vm7 = vcmp.eq.f32.partialorder %v6912_v17, 8.507059e+37 }
 0x8d7   : > { %v6891_v46 = vmul.f32 %v8344_v60, %v6890_v34  ;;  %v13479_v23 = vadd.f32 %v13354_v40, %v6641_v20  ;;  %v6969_v33 = vpack.c.bf16 %v6959_v54, %v6958_v37  ;;  %vm6898_vm4 = vcmp.eq.f32.partialorder %v6897_v51, 8.507059e+37 }
 0x8d9   : > { %v8346_v49 = vpop.eup %8345  ;;  %v7713_v3 = vmul.f32 -1.442695, %v13479_v23  ;;  %7075 = vmatmul.bf16.gmra.mxu3 %v6969_v33  ;;  %v6892_v6 = vadd.f32 %v8344_v60, %v6891_v46 }
 0x8da   : > { %v8348_v29 = vpop.eup %8347  ;;  %v6706_v31 = vadd.f32 1.0, %v8346_v49 }
 0x8db   : > { %v6904_v27 = vmul.f32 %v8348_v29, %v6705_v2  ;;  %8349 = vpow2.f32 %v7713_v3  ;;  %v6896_v4 = vsel %vm6895_vm2, %v8344_v60, %v6892_v6  ;;  %vm6909_vm3 = vweird.f32 %v8348_v29  ;;  %v7125_v60 = vpop.f32.mrf.mxu0 }
 0x8dc   : > { %8351 = vrcp.f32 %v6706_v31  ;;  %v6901_v62 = vsel %vm6898_vm4, %v6900_v43, %v6896_v4  ;;  %vm6910_vm6 = vmor %vm6908_vm5, %vm6909_vm3  ;;  %v6929_v59 = vand.u32 2147483648, %v6706_v31  ;;  %vm6923_vm9 = vweird.f32 %v6706_v31 }
 0x8dd   : > { %v6905_v40 = vsub.f32 1.0, %v6904_v27  ;;  %v6960_v32 = vmul.f32 %v6901_v62, %v13449_v57  ;;  %v6927_v15 = vand.u32 2147483647, %v6706_v31  ;;  %v7126_v27 = vadd.f32 1.0, %v7125_v60 }
 0x8df   : > { %v6906_v5 = vmul.f32 %v8348_v29, %v6905_v40  ;;  %vm6928_vm12 = vcmp.eq.f32.partialorder %v6927_v15, 8.507059e+37 }
 0x8e1   : > { %v8350_v0 = vpop.eup %8349  ;;  %v6907_v24 = vadd.f32 %v8348_v29, %v6906_v5 }
 0x8e2   : > { %v8352_v36 = vpop.eup %8351  ;;  %v6707_v25 = vadd.f32 1.0, %v8350_v0 }
 0x8e3   : > { %v6911_v7 = vsel %vm6910_vm6, %v8348_v29, %v6907_v24  ;;  %v6919_v22 = vmul.f32 %v8352_v36, %v6706_v31  ;;  %vm6924_vm8 = vweird.f32 %v8352_v36  ;;  %v7128_v3 = vpop.f32.mrf.mxu0  ;;  %v13492_v31 = vld [vmem:[%s13852_s7 + $0x2] ss:$0 sm:$0xff] }
 0x8e4   : > { %v6916_v39 = vsel %vm6913_vm7, %v6915_v63, %v6911_v7  ;;  %8353 = vrcp.f32 %v6707_v25  ;;  %vm6925_vm10 = vmor %vm6923_vm9, %vm6924_vm8  ;;  %v6944_v53 = vand.u32 2147483648, %v6707_v25  ;;  %v6942_v57 = vand.u32 2147483647, %v6707_v25 }
 0x8e5   : > { %v6961_v41 = vmul.f32 %v6916_v39, %v13456_v12  ;;  %v6920_v19 = vsub.f32 1.0, %v6919_v22  ;;  %v6930_v12 = vor.u32 1.1754944e-38, %v6929_v59  ;;  %vm6938_vm13 = vweird.f32 %v6707_v25 }
 0x8e6   : > { %v6945_v34 = vor.u32 1.1754944e-38, %v6944_v53  ;;  %vm6943_vm15 = vcmp.eq.f32.partialorder %v6942_v57, 8.507059e+37 }
 0x8e7   : > { %v6921_v10 = vmul.f32 %v8352_v36, %v6920_v19  ;;  %v6970_v47 = vpack.c.bf16 %v6961_v41, %v6960_v32 }
 0x8e9   : > { %7080 = vmatmul.bf16.gmra.mxu3 %v6970_v47  ;;  %v6922_v61 = vadd.f32 %v8352_v36, %v6921_v10 }
 0x8ea   : > { %v8354_v42 = vpop.eup %8353 }
 0x8eb   : > { %v6934_v9 = vmul.f32 %v8354_v42, %v6707_v25  ;;  %v6926_v50 = vsel %vm6925_vm10, %v8352_v36, %v6922_v61  ;;  %vm6939_vm11 = vweird.f32 %v8354_v42  ;;  %v7131_v51 = vpop.f32.mrf.mxu0 }
 0x8ec   : > { %v6931_v54 = vsel %vm6928_vm12, %v6930_v12, %v6926_v50  ;;  %vm6940_vm14 = vmor %vm6938_vm13, %vm6939_vm11 }
 0x8ed   : > { %v6935_v2 = vsub.f32 1.0, %v6934_v9  ;;  %v6962_v33 = vmul.f32 %v6931_v54, %v13472_v55 }
 0x8ef   : > { %v6936_v18 = vmul.f32 %v8354_v42, %v6935_v2 }
 0x8f1   : > { %v6937_v37 = vadd.f32 %v8354_v42, %v6936_v18 }
 0x8f3   : > { %v6941_v20 = vsel %vm6940_vm14, %v8354_v42, %v6937_v37  ;;  %v7134_v17 = vpop.f32.mrf.mxu0 }
 0x8f4   : > { %v6946_v46 = vsel %vm6943_vm15, %v6945_v34, %v6941_v20  ;;  %v7135_v22 = vadd.f32 1.0, %v7134_v17 }
 0x8f5   : > { %v6963_v49 = vmul.f32 %v6946_v46, %v13479_v23  ;;  %v7129_v23 = vadd.f32 1.0, %v7128_v3 }
 0x8f7   : > { %v6971_v29 = vpack.c.bf16 %v6963_v49, %v6962_v33 }
 0x8f9   : > { %7085 = vmatmul.bf16.gmra.mxu3 %v6971_v29  ;;  %v7051_v6 = vpop.f32.mrf.mxu3 }
 0x8fa   : > { %v7052_v44 = vadd.f32 %v13492_v31, %v7051_v6 }
 0x8fb   : > { %v7137_v0 = vpop.f32.mrf.mxu0 }
 0x8fc   : > { %v7173_v40 = vmul.f32 %v7126_v27, %v7052_v44  ;;  %v7138_v10 = vadd.f32 1.0, %v7137_v0 }
 0x8fe   : > { %v7189_v45 = vadd.f32 %v7173_v40, %v13075_v8  ;;  %v7132_v8 = vadd.f32 1.0, %v7131_v51 }
 0x900   : > { %7205 = vst [vmem:[%s13498_s14] sm:$0xff] %v7189_v45 }
 0x901   : > { %v7053_v55 = vpop.f32.mrf.mxu3 }
 0x902   : > { %v7054_v4 = vadd.f32 %v13492_v31, %v7053_v55 }
 0x903   : > { %v7140_v62 = vpop.f32.mrf.mxu0 }
 0x904   : > { %v7174_v5 = vmul.f32 %v7129_v23, %v7054_v4  ;;  %v7141_v60 = vadd.f32 1.0, %v7140_v62 }
 0x906   : > { %v7190_v43 = vadd.f32 %v7174_v5, %v13083_v58 }
 0x908   : > { %7206 = vst [vmem:[%s13498_s14 + $0x8] sm:$0xff] %v7190_v43 }
 0x90b   : > { %v7143_v58 = vpop.f32.mrf.mxu0 }
 0x90c   : > { %v7144_v50 = vadd.f32 1.0, %v7143_v58 }
 0x91c   : > { %v7056_v24 = vpop.f32.mrf.mxu3 }
 0x91d   : > { %v7057_v36 = vadd.f32 %v13492_v31, %v7056_v24 }
 0x91f   : > { %v7175_v63 = vmul.f32 %v7132_v8, %v7057_v36 }
 0x921   : > { %v7191_v25 = vadd.f32 %v7175_v63, %v13091_v13  ;;  %v7146_v13 = vpop.f32.mrf.mxu0 }
 0x922   : > { %v7147_v37 = vadd.f32 1.0, %v7146_v13 }
 0x923   : > { %7207 = vst [vmem:[%s13498_s14 + $0x10] sm:$0xff] %v7191_v25 }
 0x924   : > { %v7058_v7 = vpop.f32.mrf.mxu3 }
 0x925   : > { %v7059_v39 = vadd.f32 %v13492_v31, %v7058_v7 }
 0x927   : > { %v7176_v32 = vmul.f32 %v7135_v22, %v7059_v39 }
 0x929   : > { %v7192_v41 = vadd.f32 %v7176_v32, %v13099_v38  ;;  %v7149_v38 = vpop.f32.mrf.mxu0 }
 0x92a   : > { %v7150_v33 = vadd.f32 1.0, %v7149_v38 }
 0x92b   : > { %7208 = vst [vmem:[%s13498_s14 + $0x18] sm:$0xff] %v7192_v41 }
 0x92c   : > { %v7061_v19 = vpop.f32.mrf.mxu3 }
 0x92d   : > { %v7062_v47 = vadd.f32 %v13492_v31, %v7061_v19 }
 0x92f   : > { %v7177_v42 = vmul.f32 %v7138_v10, %v7062_v47 }
 0x931   : > { %v7193_v61 = vadd.f32 %v7177_v42, %v13107_v1  ;;  %v7152_v34 = vpop.f32.mrf.mxu0 }
 0x932   : > { %v7153_v27 = vadd.f32 1.0, %v7152_v34 }
 0x933   : > { %7209 = vst [vmem:[%s13498_s14 + $0x20] sm:$0xff] %v7193_v61 }
 0x934   : > { %v7063_v9 = vpop.f32.mrf.mxu3 }
 0x935   : > { %v7064_v59 = vadd.f32 %v13492_v31, %v7063_v9 }
 0x937   : > { %v7178_v15 = vmul.f32 %v7141_v60, %v7064_v59 }
 0x939   : > { %v7194_v2 = vadd.f32 %v7178_v15, %v13115_v48  ;;  %v7155_v29 = vpop.f32.mrf.mxu0 }
 0x93a   : > { %v7156_v55 = vadd.f32 1.0, %v7155_v29 }
 0x93b   : > { %7210 = vst [vmem:[%s13498_s14 + $0x28] sm:$0xff] %v7194_v2 }
 0x93c   : > { %v7066_v53 = vpop.f32.mrf.mxu3 }
 0x93d   : > { %v7067_v18 = vadd.f32 %v13492_v31, %v7066_v53 }
 0x93f   : > { %v7179_v57 = vmul.f32 %v7144_v50, %v7067_v18 }
 0x941   : > { %v7195_v1 = vadd.f32 %v7179_v57, %v13123_v26 }
 0x943   : > { %7211 = vst [vmem:[%s13498_s14 + $0x30] sm:$0xff] %v7195_v1 }
 0x944   : > { %v7068_v12 = vpop.f32.mrf.mxu3 }
 0x945   : > { %v7069_v54 = vadd.f32 %v13492_v31, %v7068_v12 }
 0x947   : > { %v7180_v20 = vmul.f32 %v7147_v37, %v7069_v54 }
 0x949   : > { %v7196_v48 = vadd.f32 %v7180_v20, %v13131_v35  ;;  %v7158_v35 = vpop.f32.mrf.mxu0 }
 0x94a   : > { %v7159_v43 = vadd.f32 1.0, %v7158_v35 }
 0x94b   : > { %7212 = vst [vmem:[%s13498_s14 + $0x38] sm:$0xff] %v7196_v48 }
 0x94c   : > { %v7071_v46 = vpop.f32.mrf.mxu3 }
 0x94d   : > { %v7072_v49 = vadd.f32 %v13492_v31, %v7071_v46 }
 0x94f   : > { %v7181_v3 = vmul.f32 %v7150_v33, %v7072_v49 }
 0x951   : > { %v7197_v26 = vadd.f32 %v7181_v3, %v13138_v14  ;;  %v7161_v14 = vpop.f32.mrf.mxu0 }
 0x952   : > { %v7162_v36 = vadd.f32 1.0, %v7161_v14 }
 0x953   : > { %7213 = vst [vmem:[%s13498_s14 + $0x40] sm:$0xff] %v7197_v26 }
 0x954   : > { %v7073_v6 = vpop.f32.mrf.mxu3 }
 0x955   : > { %v7074_v44 = vadd.f32 %v13492_v31, %v7073_v6 }
 0x957   : > { %v7182_v51 = vmul.f32 %v7153_v27, %v7074_v44 }
 0x959   : > { %v7198_v40 = vadd.f32 %v7182_v51, %v13145_v56  ;;  %v7164_v63 = vpop.f32.mrf.mxu0 }
 0x95a   : > { %v7165_v22 = vadd.f32 1.0, %v7164_v63 }
 0x95b   : > { %7214 = vst [vmem:[%s13498_s14 + $0x48] sm:$0xff] %v7198_v40 }
 0x95c   : > { %v7076_v45 = vpop.f32.mrf.mxu3 }
 0x95d   : > { %v7077_v23 = vadd.f32 %v13492_v31, %v7076_v45 }
 0x95f   : > { %v7183_v4 = vmul.f32 %v7156_v55, %v7077_v23 }
 0x961   : > { %v7199_v5 = vadd.f32 %v7183_v4, %v13152_v52  ;;  %v7167_v58 = vpop.f32.mrf.mxu0 }
 0x962   : > { %v7168_v19 = vadd.f32 1.0, %v7167_v58 }
 0x963   : > { %7215 = vst [vmem:[%s13498_s14 + $0x50] sm:$0xff] %v7199_v5 }
 0x964   : > { %v7078_v17 = vpop.f32.mrf.mxu3 }
 0x965   : > { %v7079_v0 = vadd.f32 %v13492_v31, %v7078_v17 }
 0x967   : > { %v7184_v24 = vmul.f32 %v7159_v43, %v7079_v0 }
 0x969   : > { %v7200_v56 = vadd.f32 %v7184_v24, %v13159_v11  ;;  %v7170_v42 = vpop.f32.mrf.mxu0 }
 0x96b   : > { %7216 = vst [vmem:[%s13498_s14 + $0x58] sm:$0xff] %v7200_v56 }
 0x96c   : > { %v7081_v8 = vpop.f32.mrf.mxu3 }
 0x96d   : > { %v7082_v62 = vadd.f32 %v13492_v31, %v7081_v8 }
 0x96f   : > { %v7185_v25 = vmul.f32 %v7162_v36, %v7082_v62 }
 0x971   : > { %v7201_v52 = vadd.f32 %v7185_v25, %v13166_v30 }
 0x973   : > { %7217 = vst [vmem:[%s13498_s14 + $0x60] sm:$0xff] %v7201_v52 }
 0x974   : > { %v7083_v7 = vpop.f32.mrf.mxu3 }
 0x975   : > { %v7084_v39 = vadd.f32 %v13492_v31, %v7083_v7 }
 0x977   : > { %v7186_v32 = vmul.f32 %v7165_v22, %v7084_v39 }
 0x979   : > { %v7202_v11 = vadd.f32 %v7186_v32, %v13177_v16  ;;  %v7171_v16 = vadd.f32 1.0, %v7170_v42 }
 0x97b   : > { %7218 = vst [vmem:[%s13498_s14 + $0x68] sm:$0xff] %v7202_v11 }
 0x97c   : > { %v7086_v41 = vpop.f32.mrf.mxu3 }
 0x97d   : > { %v7087_v10 = vadd.f32 %v13492_v31, %v7086_v41 }
 0x97f   : > { %v7187_v47 = vmul.f32 %v7168_v19, %v7087_v10 }
 0x981   : > { %v7203_v30 = vadd.f32 %v7187_v47, %v13184_v21 }
 0x983   : > { %7219 = vst [vmem:[%s13498_s14 + $0x70] sm:$0xff] %v7203_v30 }
 0x984   : > { %v7088_v61 = vpop.f32.mrf.mxu3 }
 0x985   : > { %v7089_v13 = vadd.f32 %v13492_v31, %v7088_v61 }
 0x987   : > { %v7188_v9 = vmul.f32 %v7171_v16, %v7089_v13 }
 0x989   : > { %v7204_v60 = vadd.f32 %v7188_v9, %v13191_v28 }
 0x98b   : > { %7220 = vst [vmem:[%s13498_s14 + $0x78] sm:$0xff] %v7204_v60 }
 0x98c   : > { %8684 = shalt.err (!%p8681_p10)
}
 0x98d   : > { %s8760_s26 = smov 128   ;;  %s8761_s14 = smov 8  }
 0x98e   : > { %7884 = dma.vmem_to_hbm [thread:$0]  (%p8953_p5), %s7235_s5, 2048, %s7237_s21, %s7222_s20, %s8760_s26, %s8760_s26, %s8761_s14  }
 0x98f PF: > { %s7251_s9 = sand.u32 1, %s8727_s29   ;;  %p13888_p13 = scmp.ge.s32.totalorder %s8739_s16, 2 }
 0x990   : > { %s7252_s25 = scalar_lea.sflag [#allocation4], %s7251_s9 }
 0x991   : > { %p7916_p11 = pnand %p13888_p13, %p8957_p6 }
 0x993   : > { %p7917_p0 = pneg %p7916_p11 }
 0x995   : > { %8722 = dma.done.wait (%p7917_p0), %s7252_s25, 2048  }
 0x996   : > { %8724 = vsyncadd (%p7917_p0), %s7252_s25, 4294965248  ;;  %p31_p2 = scmp.ge.s32.totalorder %s8927_s19, 4   ;;  %s13889_s29 = smov %s8731_s30 }
 0x997   : > { %s13890_s30 = smov %s8735_s15  ;;  %s13891_s15 = smov %s8938_s6 }
 0x998   : > { %s13892_s16 = smov %s8927_s19  ;;  %33 = sbr.rel (!%p31_p2) target bundleno = 20 (0x14), region = 171 }
 0x99d   :  { %7258 = vsyncpa [#allocation3], 1 }
 0x99e   :  { %7260 = vsyncpa [#allocation3 + $0x1], 1 }
 0x99f   :  { %7261 = vsyncpa [#allocation6], 1 }
 0x9a0   :  { %7262 = vsyncpa [#allocation9], 1 }
 0x9a1   :  { %7263 = vsyncpa [#allocation12], 1 }
 0x9a2   :  { %7264 = vsyncpa [#allocation15], 1 }
 0x9a3   :  { %7265 = vsyncpa [#allocation4], 1 }
 0x9a4   :  { %7267 = vsyncpa [#allocation4 + $0x1], 1 }

</bundles_post_ra>
